<compile_context>
chip_gen: v6e
topology: v6e:2x2x1
jax: 0.10.0
libtpu: 0.0.40
codegen_flags: <defaults>
</compile_context>

<pallas_src>
import jax
import jax.numpy as jnp
from jax.experimental import pallas as pl
from jax.experimental.pallas import tpu as pltpu

KSIZE = 5   # conv kernel size
PAD = 2     # conv spatial padding (PyTorch padding=2)


# ---------------------------------------------------------------------------
# Fused forward kernel
# ---------------------------------------------------------------------------
def _net_kernel(x_ref,
                wd1, bt1, re1, ro1, cs1,
                wd2, bt2, re2, ro2, cs2,
                wd3, bt3, re3, ro3, cs3,
                w1r, b1, w2p, b2p,
                o_ref,
                a1, a2, a3, a4):
    BT = x_ref.shape[0]
    bf16 = jnp.bfloat16

    # ---- layer-1 input slab: NCHW -> rows (H + 2*PAD) x lanes (Cin*W), K padded to 128.
    a1[...] = jnp.zeros_like(a1)                       # zero borders + K-pad lanes
    for c in range(3):
        a1[:, PAD:PAD + 32, c * 32:(c + 1) * 32] = x_ref[:, c, :, :]

    def conv_pool(src, H, wd, bt, re, ro, cs, dst):
        """5x5 'same' conv + bias + 2x2/stride-2 max-pool (+ zero row re-pad).

        src : (BT, H + 4, Cin*W) f32 value (rows zero-padded, lanes = ci*W + w)
        wd  : (5, K, Cout*W)     banded-Toeplitz conv weights (bf16)
        bt  : (1, Cout*W)        bias tiled along W (f32)
        re/ro: (Hp_next, H)      0/1 even/odd pooled-row selectors (+ zero border rows)
        cs  : (Cout*W, Cout*W/2) 0/1 even-column down-select
        dst : (BT, Hp_next, Cout*W/2) f32 scratch ref (next layer's padded input)
        """
        K = src.shape[-1]
        N = wd.shape[-1]
        acc = jnp.zeros((BT * H, N), jnp.float32)
        for di in range(KSIZE):
            # NOTE: slice the row tap BEFORE flattening batch into the M dimension.
            xs = src[:, di:di + H, :].reshape(BT * H, K).astype(bf16)
            acc = acc + jnp.dot(xs, wd[di], preferred_element_type=jnp.float32)
        acc = acc + bt[...]

        # Column half of the pool: pairwise lane max via XLU roll (shift N-1 == -1),
        # valid at even lane positions (the only ones cs keeps).  f32 max (v5e-safe).
        cmax = jnp.maximum(acc, pltpu.roll(acc, shift=N - 1, axis=1)).astype(bf16)

        # Row half + re-pad (per image; B_TILE is small) and column down-select.
        for b in range(BT):
            cb = cmax[b * H:(b + 1) * H, :]
            rows = jnp.maximum(
                jnp.dot(re[...], cb, preferred_element_type=jnp.float32),
                jnp.dot(ro[...], cb, preferred_element_type=jnp.float32))
            dst[b] = jnp.dot(rows.astype(bf16), cs[...],
                             preferred_element_type=jnp.float32)

    conv_pool(a1[...], 32, wd1, bt1, re1, ro1, cs1, a2)   # (BT, 20, 512)
    conv_pool(a2[...], 16, wd2, bt2, re2, ro2, cs2, a3)   # (BT, 12, 256)
    conv_pool(a3[...],  8, wd3, bt3, re3, ro3, cs3, a4)   # (BT,  4, 256)

    # ---- Flatten + Linear(1024,64) + Linear(64,10->128 padded); CHW flatten order is
    #      folded into w1r's row blocks so no activation reshape across sublanes.
    h = jnp.zeros((BT, 64), jnp.float32)
    for r in range(4):
        h = h + jnp.dot(a4[:, r, :].astype(bf16), w1r[r],
                        preferred_element_type=jnp.float32)
    h = h + b1[...]
    out = jnp.dot(h.astype(bf16), w2p[...],
                  preferred_element_type=jnp.float32) + b2p[...]
    o_ref[0] = out


# ---------------------------------------------------------------------------
# pallas_call wrapper
# ---------------------------------------------------------------------------
def _pick_btile(B):
    if B < 4:
        return 1
    for d in (8, 4, 2):
        if B % d == 0 and B // d >= 2:
            return d
    return 1


def net_pallas(prep, x_nchw):
    assert len(prep) == 19
    B = x_nchw.shape[0]
    btile = _pick_btile(B)
    assert B % btile == 0
    nt = B // btile
    vmem = pl.BlockSpec(memory_space=pltpu.MemorySpace.VMEM)   # whole-array resident weights
    out = pl.pallas_call(
        _net_kernel,
        out_shape=jax.ShapeDtypeStruct((nt, btile, 128), jnp.float32),
        grid=(nt,),
        in_specs=[pl.BlockSpec((btile, 3, 32, 32), lambda i: (i, 0, 0, 0))] + [vmem] * 19,
        out_specs=pl.BlockSpec((1, btile, 128), lambda i: (i, 0, 0)),
        scratch_shapes=[
            pltpu.VMEM((btile, 36, 128), jnp.float32),   # conv1 padded input slab
            pltpu.VMEM((btile, 20, 512), jnp.float32),   # conv2 padded input
            pltpu.VMEM((btile, 12, 256), jnp.float32),   # conv3 padded input
            pltpu.VMEM((btile, 4, 256), jnp.float32),    # conv3 pooled output (flatten src)
        ],
        compiler_params=pltpu.CompilerParams(
            dimension_semantics=("parallel",),
            vmem_limit_bytes=32 * 1024 * 1024,
        ),
    )(x_nchw, *prep)
    return out.reshape(B, 128)[:, :10]


net_forward = jax.jit(net_pallas)


# ---------------------------------------------------------------------------
# One-time parameter preprocessing (all layout work hoisted out of the forward)
# ---------------------------------------------------------------------------
def _toeplitz_conv_weight(w_oihw, W, k_pad_to):
    """(O, I, 5, 5) -> (5, I*W [padded to k_pad_to], O*W) banded-Toeplitz GEMM slabs.

    Input/output lane layout is c*W + w; the w-direction zero padding is implicit
    (out-of-band entries are zero), so activations never carry padded columns."""
    O, I, K, _ = w_oihw.shape
    wi = jnp.arange(W)[:, None]
    wo = jnp.arange(W)[None, :]
    dj = wi - wo + PAD
    valid = (dj >= 0) & (dj < K)
    djc = jnp.clip(dj, 0, K - 1)
    wt = jnp.transpose(w_oihw, (2, 1, 3, 0))                  # (di, ci, dj, co)
    slab = wt[:, :, djc, :]                                   # (di, ci, wi, wo, co)
    slab = slab * valid[None, None, :, :, None].astype(slab.dtype)
    slab = jnp.transpose(slab, (0, 1, 2, 4, 3))               # (di, ci, wi, co, wo)
    slab = slab.reshape(K, I * W, O * W)
    if k_pad_to > I * W:
        slab = jnp.pad(slab, ((0, 0), (0, k_pad_to - I * W), (0, 0)))
    return slab


def _row_selectors(H, pad_next):
    """0/1 matrices picking even/odd pooled rows and inserting zero border rows."""
    Ho = H // 2
    Hp = Ho + 2 * pad_next
    i = jnp.arange(Hp)[:, None]
    j = jnp.arange(H)[None, :]
    valid = (i >= pad_next) & (i < pad_next + Ho)
    re = ((j == 2 * (i - pad_next)) & valid).astype(jnp.float32)
    ro = ((j == 2 * (i - pad_next) + 1) & valid).astype(jnp.float32)
    return re, ro


def _col_selector(N):
    """0/1 matrix selecting even lanes (pool down-select in the c*W + w layout)."""
    p = jnp.arange(N)[:, None]
    q = jnp.arange(N // 2)[None, :]
    return (p == 2 * q).astype(jnp.float32)


def prepare_params(params):
    bf16 = jnp.bfloat16

    def conv_layer(w, b, Wsp, pad_next, k_pad_to):
        O = w.shape[0]
        wd = _toeplitz_conv_weight(w, Wsp, k_pad_to).astype(bf16)
        bt = jnp.repeat(b, Wsp).reshape(1, O * Wsp)            # f32 bias tile
        re, ro = _row_selectors(Wsp, pad_next)
        cs = _col_selector(O * Wsp)
        return [wd, bt, re.astype(bf16), ro.astype(bf16), cs.astype(bf16)]

    c1 = conv_layer(params["c1_w"], params["c1_b"], 32, PAD, 128)   # K 96 -> 128 aligned
    c2 = conv_layer(params["c2_w"], params["c2_b"], 16, PAD, 512)
    c3 = conv_layer(params["c3_w"], params["c3_b"], 8, 0, 256)

    # nn.Flatten on NCHW flattens in (C, H, W) order; fold that permutation into fc1 and
    # split it into 4 per-row blocks so the kernel never reshapes activations.
    w1r = jnp.transpose(params["l1_w"].reshape(64, 64, 4, 4),
                        (2, 1, 3, 0)).reshape(4, 256, 64).astype(bf16)
    b1 = params["l1_b"].reshape(1, 64)
    w2p = jnp.pad(params["l2_w"].T, ((0, 0), (0, 118))).astype(bf16)   # 10 -> 128 lanes
    b2p = jnp.pad(params["l2_b"], (0, 118)).reshape(1, 128)

    return c1 + c2 + c3 + [w1r, b1, w2p, b2p]


# ---------------------------------------------------------------------------
# Parameters (deterministic synthetic init; shapes follow the PyTorch module)
# ---------------------------------------------------------------------------
def init_params(key):
    ks = jax.random.split(key, 10)

    def conv_w(k, o, i):
        return jax.random.normal(k, (o, i, 5, 5), jnp.float32) * (1.0 / (i * 25) ** 0.5)

    def lin_w(k, o, i):
        return jax.random.normal(k, (o, i), jnp.float32) * (1.0 / i ** 0.5)

    return {
        "c1_w": conv_w(ks[0], 32, 3),   "c1_b": 0.01 * jax.random.normal(ks[1], (32,), jnp.float32),
        "c2_w": conv_w(ks[2], 32, 32),  "c2_b": 0.01 * jax.random.normal(ks[3], (32,), jnp.float32),
        "c3_w": conv_w(ks[4], 64, 32),  "c3_b": 0.01 * jax.random.normal(ks[5], (64,), jnp.float32),
        "l1_w": lin_w(ks[6], 64, 1024), "l1_b": 0.01 * jax.random.normal(ks[7], (64,), jnp.float32),
        "l2_w": lin_w(ks[8], 10, 64),   "l2_b": 0.01 * jax.random.normal(ks[9], (10,), jnp.float32),
    }


# ---------------------------------------------------------------------------
# Pure-JAX reference (sanity check only)
# ---------------------------------------------------------------------------
def reference_forward(params, x_nchw):
    hi = jax.lax.Precision.HIGHEST

    def conv(y, w, b):
        out = jax.lax.conv_general_dilated(
            y, w, window_strides=(1, 1), padding=((PAD, PAD), (PAD, PAD)),
            dimension_numbers=("NCHW", "OIHW", "NCHW"), precision=hi)
        return out + b[None, :, None, None]

    def pool(y):
        B, C, H, W = y.shape
        return y.reshape(B, C, H // 2, 2, W // 2, 2).max(axis=(3, 5))

    y = pool(conv(x_nchw, params["c1_w"], params["c1_b"]))
    y = pool(conv(y, params["c2_w"], params["c2_b"]))
    y = pool(conv(y, params["c3_w"], params["c3_b"]))
    y = y.reshape(y.shape[0], -1)
    y = jnp.dot(y, params["l1_w"].T, precision=hi) + params["l1_b"]
    y = jnp.dot(y, params["l2_w"].T, precision=hi) + params["l2_b"]
    return y


if __name__ == "__main__":
    key = jax.random.PRNGKey(0)
    pkey, xkey = jax.random.split(key)
    params = init_params(pkey)
    prep = prepare_params(params)          # one-time weight/layout preprocessing (bf16)

    # Input 3x32x32 is implied by Flatten -> Linear(1024, 64) (= 64 ch * 4 * 4).
    x = jax.random.normal(xkey, (2, 3, 32, 32), jnp.float32)

    out = jax.block_until_ready(net_forward(prep, x))
    assert out.shape == (2, 10), out.shape
    assert out.dtype == jnp.float32

    ref = jax.block_until_ready(reference_forward(params, x))
    rel_err = float(jnp.max(jnp.abs(out - ref)) / (jnp.max(jnp.abs(ref)) + 1e-6))
    # Tolerance covers the bf16 matmul-operand cast (accumulation is f32 throughout).
    assert rel_err < 5e-2, f"mismatch vs reference: rel_err={rel_err}"

    print("KERNEL_OK")
</pallas_src>

<mosaic_0001>
module attributes {stable_mosaic.version = 11 : i64} {
  func.func @_net_kernel(%arg0: i32, %arg1: memref<1x3x32x32xf32, #tpu.memory_space<vmem>>, %arg2: memref<5x128x1024xbf16, #tpu.memory_space<vmem>>, %arg3: memref<1x1024xf32, #tpu.memory_space<vmem>>, %arg4: memref<20x32xbf16, #tpu.memory_space<vmem>>, %arg5: memref<20x32xbf16, #tpu.memory_space<vmem>>, %arg6: memref<1024x512xbf16, #tpu.memory_space<vmem>>, %arg7: memref<5x512x512xbf16, #tpu.memory_space<vmem>>, %arg8: memref<1x512xf32, #tpu.memory_space<vmem>>, %arg9: memref<12x16xbf16, #tpu.memory_space<vmem>>, %arg10: memref<12x16xbf16, #tpu.memory_space<vmem>>, %arg11: memref<512x256xbf16, #tpu.memory_space<vmem>>, %arg12: memref<5x256x512xbf16, #tpu.memory_space<vmem>>, %arg13: memref<1x512xf32, #tpu.memory_space<vmem>>, %arg14: memref<4x8xbf16, #tpu.memory_space<vmem>>, %arg15: memref<4x8xbf16, #tpu.memory_space<vmem>>, %arg16: memref<512x256xbf16, #tpu.memory_space<vmem>>, %arg17: memref<4x256x64xbf16, #tpu.memory_space<vmem>>, %arg18: memref<1x64xf32, #tpu.memory_space<vmem>>, %arg19: memref<64x128xbf16, #tpu.memory_space<vmem>>, %arg20: memref<1x128xf32, #tpu.memory_space<vmem>>, %arg21: memref<1x1x128xf32, #tpu.memory_space<vmem>>, %arg22: memref<1x36x128xf32, #tpu.memory_space<vmem>>, %arg23: memref<1x20x512xf32, #tpu.memory_space<vmem>>, %arg24: memref<1x12x256xf32, #tpu.memory_space<vmem>>, %arg25: memref<1x4x256xf32, #tpu.memory_space<vmem>>) attributes {dimension_semantics = [#tpu.dimension_semantics<parallel>], iteration_bounds = array<i64: 2>, scalar_prefetch = 0 : i64, scratch_operands = 4 : i64, tpu.core_type = #tpu.core_type<tc>, window_params = [{transform_indices = @transform_0, window_bounds = array<i64: 1, 3, 32, 32>}, {pipeline_mode = #tpu.pipeline_mode<synchronous>, transform_indices = @transform_1, window_bounds = array<i64: 5, 128, 1024>}, {pipeline_mode = #tpu.pipeline_mode<synchronous>, transform_indices = @transform_2, window_bounds = array<i64: 1, 1024>}, {pipeline_mode = #tpu.pipeline_mode<synchronous>, transform_indices = @transform_3, window_bounds = array<i64: 20, 32>}, {pipeline_mode = #tpu.pipeline_mode<synchronous>, transform_indices = @transform_4, window_bounds = array<i64: 20, 32>}, {pipeline_mode = #tpu.pipeline_mode<synchronous>, transform_indices = @transform_5, window_bounds = array<i64: 1024, 512>}, {pipeline_mode = #tpu.pipeline_mode<synchronous>, transform_indices = @transform_6, window_bounds = array<i64: 5, 512, 512>}, {pipeline_mode = #tpu.pipeline_mode<synchronous>, transform_indices = @transform_7, window_bounds = array<i64: 1, 512>}, {pipeline_mode = #tpu.pipeline_mode<synchronous>, transform_indices = @transform_8, window_bounds = array<i64: 12, 16>}, {pipeline_mode = #tpu.pipeline_mode<synchronous>, transform_indices = @transform_9, window_bounds = array<i64: 12, 16>}, {pipeline_mode = #tpu.pipeline_mode<synchronous>, transform_indices = @transform_10, window_bounds = array<i64: 512, 256>}, {pipeline_mode = #tpu.pipeline_mode<synchronous>, transform_indices = @transform_11, window_bounds = array<i64: 5, 256, 512>}, {pipeline_mode = #tpu.pipeline_mode<synchronous>, transform_indices = @transform_12, window_bounds = array<i64: 1, 512>}, {pipeline_mode = #tpu.pipeline_mode<synchronous>, transform_indices = @transform_13, window_bounds = array<i64: 4, 8>}, {pipeline_mode = #tpu.pipeline_mode<synchronous>, transform_indices = @transform_14, window_bounds = array<i64: 4, 8>}, {pipeline_mode = #tpu.pipeline_mode<synchronous>, transform_indices = @transform_15, window_bounds = array<i64: 512, 256>}, {pipeline_mode = #tpu.pipeline_mode<synchronous>, transform_indices = @transform_16, window_bounds = array<i64: 4, 256, 64>}, {pipeline_mode = #tpu.pipeline_mode<synchronous>, transform_indices = @transform_17, window_bounds = array<i64: 1, 64>}, {pipeline_mode = #tpu.pipeline_mode<synchronous>, transform_indices = @transform_18, window_bounds = array<i64: 64, 128>}, {pipeline_mode = #tpu.pipeline_mode<synchronous>, transform_indices = @transform_19, window_bounds = array<i64: 1, 128>}, {transform_indices = @transform_20, window_bounds = array<i64: 1, 1, 128>}]} {
    %cst = arith.constant 0.000000e+00 : f32
    %0 = vector.broadcast %cst : f32 to vector<1x36x128xf32>
    %c0 = arith.constant 0 : index
    %c0_0 = arith.constant 0 : index
    %c0_1 = arith.constant 0 : index
    %1 = vector.load %arg22[%c0, %c0_0, %c0_1] : memref<1x36x128xf32, #tpu.memory_space<vmem>>, vector<1x36x128xf32>
    tpu.vector_store %arg22[%c0, %c0_0, %c0_1], %0 {strides = array<i32>} : memref<1x36x128xf32, #tpu.memory_space<vmem>>, vector<1x36x128xf32>,
    %c0_2 = arith.constant 0 : index
    %c0_3 = arith.constant 0 : index
    %c0_4 = arith.constant 0 : index
    %c0_5 = arith.constant 0 : index
    %2 = vector.load %arg1[%c0_2, %c0_3, %c0_4, %c0_5] : memref<1x3x32x32xf32, #tpu.memory_space<vmem>>, vector<1x1x32x32xf32>
    %3 = vector.shape_cast %2 : vector<1x1x32x32xf32> to vector<1x32x32xf32>
    %c0_6 = arith.constant 0 : index
    %c2 = arith.constant 2 : index
    %c0_7 = arith.constant 0 : index
    %4 = vector.load %arg22[%c0_6, %c2, %c0_7] : memref<1x36x128xf32, #tpu.memory_space<vmem>>, vector<1x32x32xf32>
    tpu.vector_store %arg22[%c0_6, %c2, %c0_7], %3 {strides = array<i32>} : memref<1x36x128xf32, #tpu.memory_space<vmem>>, vector<1x32x32xf32>,
    %c0_8 = arith.constant 0 : index
    %c1 = arith.constant 1 : index
    %c0_9 = arith.constant 0 : index
    %c0_10 = arith.constant 0 : index
    %5 = vector.load %arg1[%c0_8, %c1, %c0_9, %c0_10] : memref<1x3x32x32xf32, #tpu.memory_space<vmem>>, vector<1x1x32x32xf32>
    %6 = vector.shape_cast %5 : vector<1x1x32x32xf32> to vector<1x32x32xf32>
    %c0_11 = arith.constant 0 : index
    %c2_12 = arith.constant 2 : index
    %c32 = arith.constant 32 : index
    %7 = vector.load %arg22[%c0_11, %c2_12, %c32] : memref<1x36x128xf32, #tpu.memory_space<vmem>>, vector<1x32x32xf32>
    tpu.vector_store %arg22[%c0_11, %c2_12, %c32], %6 {strides = array<i32>} : memref<1x36x128xf32, #tpu.memory_space<vmem>>, vector<1x32x32xf32>,
    %c0_13 = arith.constant 0 : index
    %c2_14 = arith.constant 2 : index
    %c0_15 = arith.constant 0 : index
    %c0_16 = arith.constant 0 : index
    %8 = vector.load %arg1[%c0_13, %c2_14, %c0_15, %c0_16] : memref<1x3x32x32xf32, #tpu.memory_space<vmem>>, vector<1x1x32x32xf32>
    %9 = vector.shape_cast %8 : vector<1x1x32x32xf32> to vector<1x32x32xf32>
    %c0_17 = arith.constant 0 : index
    %c2_18 = arith.constant 2 : index
    %c64 = arith.constant 64 : index
    %10 = vector.load %arg22[%c0_17, %c2_18, %c64] : memref<1x36x128xf32, #tpu.memory_space<vmem>>, vector<1x32x32xf32>
    tpu.vector_store %arg22[%c0_17, %c2_18, %c64], %9 {strides = array<i32>} : memref<1x36x128xf32, #tpu.memory_space<vmem>>, vector<1x32x32xf32>,
    %c0_19 = arith.constant 0 : index
    %c0_20 = arith.constant 0 : index
    %c0_21 = arith.constant 0 : index
    %11 = vector.load %arg22[%c0_19, %c0_20, %c0_21] : memref<1x36x128xf32, #tpu.memory_space<vmem>>, vector<1x36x128xf32>
    %cst_22 = arith.constant 0.000000e+00 : f32
    %12 = vector.broadcast %cst_22 : f32 to vector<32x1024xf32>
    %13 = vector.extract_strided_slice %11 {offsets = [0, 0, 0], sizes = [1, 32, 128], strides = [1, 1, 1]} : vector<1x36x128xf32> to vector<1x32x128xf32>
    %14 = vector.shape_cast %13 : vector<1x32x128xf32> to vector<32x128xf32>
    %15 = arith.truncf %14 : vector<32x128xf32> to vector<32x128xbf16>
    %c0_23 = arith.constant 0 : index
    %c0_24 = arith.constant 0 : index
    %c0_25 = arith.constant 0 : index
    %16 = vector.load %arg2[%c0_23, %c0_24, %c0_25] : memref<5x128x1024xbf16, #tpu.memory_space<vmem>>, vector<1x128x1024xbf16>
    %17 = vector.shape_cast %16 : vector<1x128x1024xbf16> to vector<128x1024xbf16>
    %cst_26 = arith.constant dense<0.000000e+00> : vector<32x1024xf32>
    %18 = tpu.matmul %15, %17, %cst_26 {dimension_numbers = #tpu.dot_dimension_numbers<[1], [0], [0], [1], [0, 0, 1, 1], [], []>} : vector<32x128xbf16>, vector<128x1024xbf16>, vector<32x1024xf32> -> vector<32x1024xf32>
    %19 = arith.addf %12, %18 : vector<32x1024xf32>
    %20 = vector.extract_strided_slice %11 {offsets = [0, 1, 0], sizes = [1, 32, 128], strides = [1, 1, 1]} : vector<1x36x128xf32> to vector<1x32x128xf32>
    %21 = vector.shape_cast %20 : vector<1x32x128xf32> to vector<32x128xf32>
    %22 = arith.truncf %21 : vector<32x128xf32> to vector<32x128xbf16>
    %c1_27 = arith.constant 1 : index
    %c0_28 = arith.constant 0 : index
    %c0_29 = arith.constant 0 : index
    %23 = vector.load %arg2[%c1_27, %c0_28, %c0_29] : memref<5x128x1024xbf16, #tpu.memory_space<vmem>>, vector<1x128x1024xbf16>
    %24 = vector.shape_cast %23 : vector<1x128x1024xbf16> to vector<128x1024xbf16>
    %cst_30 = arith.constant dense<0.000000e+00> : vector<32x1024xf32>
    %25 = tpu.matmul %22, %24, %cst_30 {dimension_numbers = #tpu.dot_dimension_numbers<[1], [0], [0], [1], [0, 0, 1, 1], [], []>} : vector<32x128xbf16>, vector<128x1024xbf16>, vector<32x1024xf32> -> vector<32x1024xf32>
    %26 = arith.addf %19, %25 : vector<32x1024xf32>
    %27 = vector.extract_strided_slice %11 {offsets = [0, 2, 0], sizes = [1, 32, 128], strides = [1, 1, 1]} : vector<1x36x128xf32> to vector<1x32x128xf32>
    %28 = vector.shape_cast %27 : vector<1x32x128xf32> to vector<32x128xf32>
    %29 = arith.truncf %28 : vector<32x128xf32> to vector<32x128xbf16>
    %c2_31 = arith.constant 2 : index
    %c0_32 = arith.constant 0 : index
    %c0_33 = arith.constant 0 : index
    %30 = vector.load %arg2[%c2_31, %c0_32, %c0_33] : memref<5x128x1024xbf16, #tpu.memory_space<vmem>>, vector<1x128x1024xbf16>
    %31 = vector.shape_cast %30 : vector<1x128x1024xbf16> to vector<128x1024xbf16>
    %cst_34 = arith.constant dense<0.000000e+00> : vector<32x1024xf32>
    %32 = tpu.matmul %29, %31, %cst_34 {dimension_numbers = #tpu.dot_dimension_numbers<[1], [0], [0], [1], [0, 0, 1, 1], [], []>} : vector<32x128xbf16>, vector<128x1024xbf16>, vector<32x1024xf32> -> vector<32x1024xf32>
    %33 = arith.addf %26, %32 : vector<32x1024xf32>
    %34 = vector.extract_strided_slice %11 {offsets = [0, 3, 0], sizes = [1, 32, 128], strides = [1, 1, 1]} : vector<1x36x128xf32> to vector<1x32x128xf32>
    %35 = vector.shape_cast %34 : vector<1x32x128xf32> to vector<32x128xf32>
    %36 = arith.truncf %35 : vector<32x128xf32> to vector<32x128xbf16>
    %c3 = arith.constant 3 : index
    %c0_35 = arith.constant 0 : index
    %c0_36 = arith.constant 0 : index
    %37 = vector.load %arg2[%c3, %c0_35, %c0_36] : memref<5x128x1024xbf16, #tpu.memory_space<vmem>>, vector<1x128x1024xbf16>
    %38 = vector.shape_cast %37 : vector<1x128x1024xbf16> to vector<128x1024xbf16>
    %cst_37 = arith.constant dense<0.000000e+00> : vector<32x1024xf32>
    %39 = tpu.matmul %36, %38, %cst_37 {dimension_numbers = #tpu.dot_dimension_numbers<[1], [0], [0], [1], [0, 0, 1, 1], [], []>} : vector<32x128xbf16>, vector<128x1024xbf16>, vector<32x1024xf32> -> vector<32x1024xf32>
    %40 = arith.addf %33, %39 : vector<32x1024xf32>
    %41 = vector.extract_strided_slice %11 {offsets = [0, 4, 0], sizes = [1, 32, 128], strides = [1, 1, 1]} : vector<1x36x128xf32> to vector<1x32x128xf32>
    %42 = vector.shape_cast %41 : vector<1x32x128xf32> to vector<32x128xf32>
    %43 = arith.truncf %42 : vector<32x128xf32> to vector<32x128xbf16>
    %c4 = arith.constant 4 : index
    %c0_38 = arith.constant 0 : index
    %c0_39 = arith.constant 0 : index
    %44 = vector.load %arg2[%c4, %c0_38, %c0_39] : memref<5x128x1024xbf16, #tpu.memory_space<vmem>>, vector<1x128x1024xbf16>
    %45 = vector.shape_cast %44 : vector<1x128x1024xbf16> to vector<128x1024xbf16>
    %cst_40 = arith.constant dense<0.000000e+00> : vector<32x1024xf32>
    %46 = tpu.matmul %43, %45, %cst_40 {dimension_numbers = #tpu.dot_dimension_numbers<[1], [0], [0], [1], [0, 0, 1, 1], [], []>} : vector<32x128xbf16>, vector<128x1024xbf16>, vector<32x1024xf32> -> vector<32x1024xf32>
    %47 = arith.addf %40, %46 : vector<32x1024xf32>
    %c0_41 = arith.constant 0 : index
    %c0_42 = arith.constant 0 : index
    %48 = vector.load %arg3[%c0_41, %c0_42] : memref<1x1024xf32, #tpu.memory_space<vmem>>, vector<1x1024xf32>
    %49 = vector.broadcast %48 : vector<1x1024xf32> to vector<32x1024xf32>
    %50 = arith.addf %47, %49 : vector<32x1024xf32>
    %c1023_i32 = arith.constant 1023 : i32
    %51 = tpu.dynamic_rotate %50 by %c1023_i32 dim 1 : vector<32x1024xf32>, i32 -> vector<32x1024xf32>
    %52 = arith.maximumf %50, %51 : vector<32x1024xf32>
    %53 = arith.truncf %52 : vector<32x1024xf32> to vector<32x1024xbf16>
    %c0_43 = arith.constant 0 : index
    %c0_44 = arith.constant 0 : index
    %54 = vector.load %arg4[%c0_43, %c0_44] : memref<20x32xbf16, #tpu.memory_space<vmem>>, vector<20x32xbf16>
    %cst_45 = arith.constant dense<0.000000e+00> : vector<20x1024xf32>
    %55 = tpu.matmul %54, %53, %cst_45 {dimension_numbers = #tpu.dot_dimension_numbers<[1], [0], [0], [1], [0, 0, 1, 1], [], []>} : vector<20x32xbf16>, vector<32x1024xbf16>, vector<20x1024xf32> -> vector<20x1024xf32>
    %c0_46 = arith.constant 0 : index
    %c0_47 = arith.constant 0 : index
    %56 = vector.load %arg5[%c0_46, %c0_47] : memref<20x32xbf16, #tpu.memory_space<vmem>>, vector<20x32xbf16>
    %cst_48 = arith.constant dense<0.000000e+00> : vector<20x1024xf32>
    %57 = tpu.matmul %56, %53, %cst_48 {dimension_numbers = #tpu.dot_dimension_numbers<[1], [0], [0], [1], [0, 0, 1, 1], [], []>} : vector<20x32xbf16>, vector<32x1024xbf16>, vector<20x1024xf32> -> vector<20x1024xf32>
    %58 = arith.maximumf %55, %57 : vector<20x1024xf32>
    %59 = arith.truncf %58 : vector<20x1024xf32> to vector<20x1024xbf16>
    %c0_49 = arith.constant 0 : index
    %c0_50 = arith.constant 0 : index
    %60 = vector.load %arg6[%c0_49, %c0_50] : memref<1024x512xbf16, #tpu.memory_space<vmem>>, vector<1024x512xbf16>
    %cst_51 = arith.constant dense<0.000000e+00> : vector<20x512xf32>
    %61 = tpu.matmul %59, %60, %cst_51 {dimension_numbers = #tpu.dot_dimension_numbers<[1], [0], [0], [1], [0, 0, 1, 1], [], []>} : vector<20x1024xbf16>, vector<1024x512xbf16>, vector<20x512xf32> -> vector<20x512xf32>
    %c0_52 = arith.constant 0 : index
    %c0_53 = arith.constant 0 : index
    %c0_54 = arith.constant 0 : index
    %62 = vector.load %arg23[%c0_52, %c0_53, %c0_54] : memref<1x20x512xf32, #tpu.memory_space<vmem>>, vector<1x20x512xf32>
    %63 = vector.shape_cast %62 : vector<1x20x512xf32> to vector<20x512xf32>
    %64 = vector.shape_cast %61 : vector<20x512xf32> to vector<1x20x512xf32>
    tpu.vector_store %arg23[%c0_52, %c0_53, %c0_54], %64 {strides = array<i32>} : memref<1x20x512xf32, #tpu.memory_space<vmem>>, vector<1x20x512xf32>,
    %c0_55 = arith.constant 0 : index
    %c0_56 = arith.constant 0 : index
    %c0_57 = arith.constant 0 : index
    %65 = vector.load %arg23[%c0_55, %c0_56, %c0_57] : memref<1x20x512xf32, #tpu.memory_space<vmem>>, vector<1x20x512xf32>
    %cst_58 = arith.constant 0.000000e+00 : f32
    %66 = vector.broadcast %cst_58 : f32 to vector<16x512xf32>
    %67 = vector.extract_strided_slice %65 {offsets = [0, 0, 0], sizes = [1, 16, 512], strides = [1, 1, 1]} : vector<1x20x512xf32> to vector<1x16x512xf32>
    %68 = vector.shape_cast %67 : vector<1x16x512xf32> to vector<16x512xf32>
    %69 = arith.truncf %68 : vector<16x512xf32> to vector<16x512xbf16>
    %c0_59 = arith.constant 0 : index
    %c0_60 = arith.constant 0 : index
    %c0_61 = arith.constant 0 : index
    %70 = vector.load %arg7[%c0_59, %c0_60, %c0_61] : memref<5x512x512xbf16, #tpu.memory_space<vmem>>, vector<1x512x512xbf16>
    %71 = vector.shape_cast %70 : vector<1x512x512xbf16> to vector<512x512xbf16>
    %cst_62 = arith.constant dense<0.000000e+00> : vector<16x512xf32>
    %72 = tpu.matmul %69, %71, %cst_62 {dimension_numbers = #tpu.dot_dimension_numbers<[1], [0], [0], [1], [0, 0, 1, 1], [], []>} : vector<16x512xbf16>, vector<512x512xbf16>, vector<16x512xf32> -> vector<16x512xf32>
    %73 = arith.addf %66, %72 : vector<16x512xf32>
    %74 = vector.extract_strided_slice %65 {offsets = [0, 1, 0], sizes = [1, 16, 512], strides = [1, 1, 1]} : vector<1x20x512xf32> to vector<1x16x512xf32>
    %75 = vector.shape_cast %74 : vector<1x16x512xf32> to vector<16x512xf32>
    %76 = arith.truncf %75 : vector<16x512xf32> to vector<16x512xbf16>
    %c1_63 = arith.constant 1 : index
    %c0_64 = arith.constant 0 : index
    %c0_65 = arith.constant 0 : index
    %77 = vector.load %arg7[%c1_63, %c0_64, %c0_65] : memref<5x512x512xbf16, #tpu.memory_space<vmem>>, vector<1x512x512xbf16>
    %78 = vector.shape_cast %77 : vector<1x512x512xbf16> to vector<512x512xbf16>
    %cst_66 = arith.constant dense<0.000000e+00> : vector<16x512xf32>
    %79 = tpu.matmul %76, %78, %cst_66 {dimension_numbers = #tpu.dot_dimension_numbers<[1], [0], [0], [1], [0, 0, 1, 1], [], []>} : vector<16x512xbf16>, vector<512x512xbf16>, vector<16x512xf32> -> vector<16x512xf32>
    %80 = arith.addf %73, %79 : vector<16x512xf32>
    %81 = vector.extract_strided_slice %65 {offsets = [0, 2, 0], sizes = [1, 16, 512], strides = [1, 1, 1]} : vector<1x20x512xf32> to vector<1x16x512xf32>
    %82 = vector.shape_cast %81 : vector<1x16x512xf32> to vector<16x512xf32>
    %83 = arith.truncf %82 : vector<16x512xf32> to vector<16x512xbf16>
    %c2_67 = arith.constant 2 : index
    %c0_68 = arith.constant 0 : index
    %c0_69 = arith.constant 0 : index
    %84 = vector.load %arg7[%c2_67, %c0_68, %c0_69] : memref<5x512x512xbf16, #tpu.memory_space<vmem>>, vector<1x512x512xbf16>
    %85 = vector.shape_cast %84 : vector<1x512x512xbf16> to vector<512x512xbf16>
    %cst_70 = arith.constant dense<0.000000e+00> : vector<16x512xf32>
    %86 = tpu.matmul %83, %85, %cst_70 {dimension_numbers = #tpu.dot_dimension_numbers<[1], [0], [0], [1], [0, 0, 1, 1], [], []>} : vector<16x512xbf16>, vector<512x512xbf16>, vector<16x512xf32> -> vector<16x512xf32>
    %87 = arith.addf %80, %86 : vector<16x512xf32>
    %88 = vector.extract_strided_slice %65 {offsets = [0, 3, 0], sizes = [1, 16, 512], strides = [1, 1, 1]} : vector<1x20x512xf32> to vector<1x16x512xf32>
    %89 = vector.shape_cast %88 : vector<1x16x512xf32> to vector<16x512xf32>
    %90 = arith.truncf %89 : vector<16x512xf32> to vector<16x512xbf16>
    %c3_71 = arith.constant 3 : index
    %c0_72 = arith.constant 0 : index
    %c0_73 = arith.constant 0 : index
    %91 = vector.load %arg7[%c3_71, %c0_72, %c0_73] : memref<5x512x512xbf16, #tpu.memory_space<vmem>>, vector<1x512x512xbf16>
    %92 = vector.shape_cast %91 : vector<1x512x512xbf16> to vector<512x512xbf16>
    %cst_74 = arith.constant dense<0.000000e+00> : vector<16x512xf32>
    %93 = tpu.matmul %90, %92, %cst_74 {dimension_numbers = #tpu.dot_dimension_numbers<[1], [0], [0], [1], [0, 0, 1, 1], [], []>} : vector<16x512xbf16>, vector<512x512xbf16>, vector<16x512xf32> -> vector<16x512xf32>
    %94 = arith.addf %87, %93 : vector<16x512xf32>
    %95 = vector.extract_strided_slice %65 {offsets = [0, 4, 0], sizes = [1, 16, 512], strides = [1, 1, 1]} : vector<1x20x512xf32> to vector<1x16x512xf32>
    %96 = vector.shape_cast %95 : vector<1x16x512xf32> to vector<16x512xf32>
    %97 = arith.truncf %96 : vector<16x512xf32> to vector<16x512xbf16>
    %c4_75 = arith.constant 4 : index
    %c0_76 = arith.constant 0 : index
    %c0_77 = arith.constant 0 : index
    %98 = vector.load %arg7[%c4_75, %c0_76, %c0_77] : memref<5x512x512xbf16, #tpu.memory_space<vmem>>, vector<1x512x512xbf16>
    %99 = vector.shape_cast %98 : vector<1x512x512xbf16> to vector<512x512xbf16>
    %cst_78 = arith.constant dense<0.000000e+00> : vector<16x512xf32>
    %100 = tpu.matmul %97, %99, %cst_78 {dimension_numbers = #tpu.dot_dimension_numbers<[1], [0], [0], [1], [0, 0, 1, 1], [], []>} : vector<16x512xbf16>, vector<512x512xbf16>, vector<16x512xf32> -> vector<16x512xf32>
    %101 = arith.addf %94, %100 : vector<16x512xf32>
    %c0_79 = arith.constant 0 : index
    %c0_80 = arith.constant 0 : index
    %102 = vector.load %arg8[%c0_79, %c0_80] : memref<1x512xf32, #tpu.memory_space<vmem>>, vector<1x512xf32>
    %103 = vector.broadcast %102 : vector<1x512xf32> to vector<16x512xf32>
    %104 = arith.addf %101, %103 : vector<16x512xf32>
    %c511_i32 = arith.constant 511 : i32
    %105 = tpu.dynamic_rotate %104 by %c511_i32 dim 1 : vector<16x512xf32>, i32 -> vector<16x512xf32>
    %106 = arith.maximumf %104, %105 : vector<16x512xf32>
    %107 = arith.truncf %106 : vector<16x512xf32> to vector<16x512xbf16>
    %c0_81 = arith.constant 0 : index
    %c0_82 = arith.constant 0 : index
    %108 = vector.load %arg9[%c0_81, %c0_82] : memref<12x16xbf16, #tpu.memory_space<vmem>>, vector<12x16xbf16>
    %cst_83 = arith.constant dense<0.000000e+00> : vector<12x512xf32>
    %109 = tpu.matmul %108, %107, %cst_83 {dimension_numbers = #tpu.dot_dimension_numbers<[1], [0], [0], [1], [0, 0, 1, 1], [], []>} : vector<12x16xbf16>, vector<16x512xbf16>, vector<12x512xf32> -> vector<12x512xf32>
    %c0_84 = arith.constant 0 : index
    %c0_85 = arith.constant 0 : index
    %110 = vector.load %arg10[%c0_84, %c0_85] : memref<12x16xbf16, #tpu.memory_space<vmem>>, vector<12x16xbf16>
    %cst_86 = arith.constant dense<0.000000e+00> : vector<12x512xf32>
    %111 = tpu.matmul %110, %107, %cst_86 {dimension_numbers = #tpu.dot_dimension_numbers<[1], [0], [0], [1], [0, 0, 1, 1], [], []>} : vector<12x16xbf16>, vector<16x512xbf16>, vector<12x512xf32> -> vector<12x512xf32>
    %112 = arith.maximumf %109, %111 : vector<12x512xf32>
    %113 = arith.truncf %112 : vector<12x512xf32> to vector<12x512xbf16>
    %c0_87 = arith.constant 0 : index
    %c0_88 = arith.constant 0 : index
    %114 = vector.load %arg11[%c0_87, %c0_88] : memref<512x256xbf16, #tpu.memory_space<vmem>>, vector<512x256xbf16>
    %cst_89 = arith.constant dense<0.000000e+00> : vector<12x256xf32>
    %115 = tpu.matmul %113, %114, %cst_89 {dimension_numbers = #tpu.dot_dimension_numbers<[1], [0], [0], [1], [0, 0, 1, 1], [], []>} : vector<12x512xbf16>, vector<512x256xbf16>, vector<12x256xf32> -> vector<12x256xf32>
    %c0_90 = arith.constant 0 : index
    %c0_91 = arith.constant 0 : index
    %c0_92 = arith.constant 0 : index
    %116 = vector.load %arg24[%c0_90, %c0_91, %c0_92] : memref<1x12x256xf32, #tpu.memory_space<vmem>>, vector<1x12x256xf32>
    %117 = vector.shape_cast %116 : vector<1x12x256xf32> to vector<12x256xf32>
    %118 = vector.shape_cast %115 : vector<12x256xf32> to vector<1x12x256xf32>
    tpu.vector_store %arg24[%c0_90, %c0_91, %c0_92], %118 {strides = array<i32>} : memref<1x12x256xf32, #tpu.memory_space<vmem>>, vector<1x12x256xf32>,
    %c0_93 = arith.constant 0 : index
    %c0_94 = arith.constant 0 : index
    %c0_95 = arith.constant 0 : index
    %119 = vector.load %arg24[%c0_93, %c0_94, %c0_95] : memref<1x12x256xf32, #tpu.memory_space<vmem>>, vector<1x12x256xf32>
    %cst_96 = arith.constant 0.000000e+00 : f32
    %120 = vector.broadcast %cst_96 : f32 to vector<8x512xf32>
    %121 = vector.extract_strided_slice %119 {offsets = [0, 0, 0], sizes = [1, 8, 256], strides = [1, 1, 1]} : vector<1x12x256xf32> to vector<1x8x256xf32>
    %122 = vector.shape_cast %121 : vector<1x8x256xf32> to vector<8x256xf32>
    %123 = arith.truncf %122 : vector<8x256xf32> to vector<8x256xbf16>
    %c0_97 = arith.constant 0 : index
    %c0_98 = arith.constant 0 : index
    %c0_99 = arith.constant 0 : index
    %124 = vector.load %arg12[%c0_97, %c0_98, %c0_99] : memref<5x256x512xbf16, #tpu.memory_space<vmem>>, vector<1x256x512xbf16>
    %125 = vector.shape_cast %124 : vector<1x256x512xbf16> to vector<256x512xbf16>
    %cst_100 = arith.constant dense<0.000000e+00> : vector<8x512xf32>
    %126 = tpu.matmul %123, %125, %cst_100 {dimension_numbers = #tpu.dot_dimension_numbers<[1], [0], [0], [1], [0, 0, 1, 1], [], []>} : vector<8x256xbf16>, vector<256x512xbf16>, vector<8x512xf32> -> vector<8x512xf32>
    %127 = arith.addf %120, %126 : vector<8x512xf32>
    %128 = vector.extract_strided_slice %119 {offsets = [0, 1, 0], sizes = [1, 8, 256], strides = [1, 1, 1]} : vector<1x12x256xf32> to vector<1x8x256xf32>
    %129 = vector.shape_cast %128 : vector<1x8x256xf32> to vector<8x256xf32>
    %130 = arith.truncf %129 : vector<8x256xf32> to vector<8x256xbf16>
    %c1_101 = arith.constant 1 : index
    %c0_102 = arith.constant 0 : index
    %c0_103 = arith.constant 0 : index
    %131 = vector.load %arg12[%c1_101, %c0_102, %c0_103] : memref<5x256x512xbf16, #tpu.memory_space<vmem>>, vector<1x256x512xbf16>
    %132 = vector.shape_cast %131 : vector<1x256x512xbf16> to vector<256x512xbf16>
    %cst_104 = arith.constant dense<0.000000e+00> : vector<8x512xf32>
    %133 = tpu.matmul %130, %132, %cst_104 {dimension_numbers = #tpu.dot_dimension_numbers<[1], [0], [0], [1], [0, 0, 1, 1], [], []>} : vector<8x256xbf16>, vector<256x512xbf16>, vector<8x512xf32> -> vector<8x512xf32>
    %134 = arith.addf %127, %133 : vector<8x512xf32>
    %135 = vector.extract_strided_slice %119 {offsets = [0, 2, 0], sizes = [1, 8, 256], strides = [1, 1, 1]} : vector<1x12x256xf32> to vector<1x8x256xf32>
    %136 = vector.shape_cast %135 : vector<1x8x256xf32> to vector<8x256xf32>
    %137 = arith.truncf %136 : vector<8x256xf32> to vector<8x256xbf16>
    %c2_105 = arith.constant 2 : index
    %c0_106 = arith.constant 0 : index
    %c0_107 = arith.constant 0 : index
    %138 = vector.load %arg12[%c2_105, %c0_106, %c0_107] : memref<5x256x512xbf16, #tpu.memory_space<vmem>>, vector<1x256x512xbf16>
    %139 = vector.shape_cast %138 : vector<1x256x512xbf16> to vector<256x512xbf16>
    %cst_108 = arith.constant dense<0.000000e+00> : vector<8x512xf32>
    %140 = tpu.matmul %137, %139, %cst_108 {dimension_numbers = #tpu.dot_dimension_numbers<[1], [0], [0], [1], [0, 0, 1, 1], [], []>} : vector<8x256xbf16>, vector<256x512xbf16>, vector<8x512xf32> -> vector<8x512xf32>
    %141 = arith.addf %134, %140 : vector<8x512xf32>
    %142 = vector.extract_strided_slice %119 {offsets = [0, 3, 0], sizes = [1, 8, 256], strides = [1, 1, 1]} : vector<1x12x256xf32> to vector<1x8x256xf32>
    %143 = vector.shape_cast %142 : vector<1x8x256xf32> to vector<8x256xf32>
    %144 = arith.truncf %143 : vector<8x256xf32> to vector<8x256xbf16>
    %c3_109 = arith.constant 3 : index
    %c0_110 = arith.constant 0 : index
    %c0_111 = arith.constant 0 : index
    %145 = vector.load %arg12[%c3_109, %c0_110, %c0_111] : memref<5x256x512xbf16, #tpu.memory_space<vmem>>, vector<1x256x512xbf16>
    %146 = vector.shape_cast %145 : vector<1x256x512xbf16> to vector<256x512xbf16>
    %cst_112 = arith.constant dense<0.000000e+00> : vector<8x512xf32>
    %147 = tpu.matmul %144, %146, %cst_112 {dimension_numbers = #tpu.dot_dimension_numbers<[1], [0], [0], [1], [0, 0, 1, 1], [], []>} : vector<8x256xbf16>, vector<256x512xbf16>, vector<8x512xf32> -> vector<8x512xf32>
    %148 = arith.addf %141, %147 : vector<8x512xf32>
    %149 = vector.extract_strided_slice %119 {offsets = [0, 4, 0], sizes = [1, 8, 256], strides = [1, 1, 1]} : vector<1x12x256xf32> to vector<1x8x256xf32>
    %150 = vector.shape_cast %149 : vector<1x8x256xf32> to vector<8x256xf32>
    %151 = arith.truncf %150 : vector<8x256xf32> to vector<8x256xbf16>
    %c4_113 = arith.constant 4 : index
    %c0_114 = arith.constant 0 : index
    %c0_115 = arith.constant 0 : index
    %152 = vector.load %arg12[%c4_113, %c0_114, %c0_115] : memref<5x256x512xbf16, #tpu.memory_space<vmem>>, vector<1x256x512xbf16>
    %153 = vector.shape_cast %152 : vector<1x256x512xbf16> to vector<256x512xbf16>
    %cst_116 = arith.constant dense<0.000000e+00> : vector<8x512xf32>
    %154 = tpu.matmul %151, %153, %cst_116 {dimension_numbers = #tpu.dot_dimension_numbers<[1], [0], [0], [1], [0, 0, 1, 1], [], []>} : vector<8x256xbf16>, vector<256x512xbf16>, vector<8x512xf32> -> vector<8x512xf32>
    %155 = arith.addf %148, %154 : vector<8x512xf32>
    %c0_117 = arith.constant 0 : index
    %c0_118 = arith.constant 0 : index
    %156 = vector.load %arg13[%c0_117, %c0_118] : memref<1x512xf32, #tpu.memory_space<vmem>>, vector<1x512xf32>
    %157 = vector.broadcast %156 : vector<1x512xf32> to vector<8x512xf32>
    %158 = arith.addf %155, %157 : vector<8x512xf32>
    %c511_i32_119 = arith.constant 511 : i32
    %159 = tpu.dynamic_rotate %158 by %c511_i32_119 dim 1 : vector<8x512xf32>, i32 -> vector<8x512xf32>
    %160 = arith.maximumf %158, %159 : vector<8x512xf32>
    %161 = arith.truncf %160 : vector<8x512xf32> to vector<8x512xbf16>
    %c0_120 = arith.constant 0 : index
    %c0_121 = arith.constant 0 : index
    %162 = vector.load %arg14[%c0_120, %c0_121] : memref<4x8xbf16, #tpu.memory_space<vmem>>, vector<4x8xbf16>
    %cst_122 = arith.constant dense<0.000000e+00> : vector<4x512xf32>
    %163 = tpu.matmul %162, %161, %cst_122 {dimension_numbers = #tpu.dot_dimension_numbers<[1], [0], [0], [1], [0, 0, 1, 1], [], []>} : vector<4x8xbf16>, vector<8x512xbf16>, vector<4x512xf32> -> vector<4x512xf32>
    %c0_123 = arith.constant 0 : index
    %c0_124 = arith.constant 0 : index
    %164 = vector.load %arg15[%c0_123, %c0_124] : memref<4x8xbf16, #tpu.memory_space<vmem>>, vector<4x8xbf16>
    %cst_125 = arith.constant dense<0.000000e+00> : vector<4x512xf32>
    %165 = tpu.matmul %164, %161, %cst_125 {dimension_numbers = #tpu.dot_dimension_numbers<[1], [0], [0], [1], [0, 0, 1, 1], [], []>} : vector<4x8xbf16>, vector<8x512xbf16>, vector<4x512xf32> -> vector<4x512xf32>
    %166 = arith.maximumf %163, %165 : vector<4x512xf32>
    %167 = arith.truncf %166 : vector<4x512xf32> to vector<4x512xbf16>
    %c0_126 = arith.constant 0 : index
    %c0_127 = arith.constant 0 : index
    %168 = vector.load %arg16[%c0_126, %c0_127] : memref<512x256xbf16, #tpu.memory_space<vmem>>, vector<512x256xbf16>
    %cst_128 = arith.constant dense<0.000000e+00> : vector<4x256xf32>
    %169 = tpu.matmul %167, %168, %cst_128 {dimension_numbers = #tpu.dot_dimension_numbers<[1], [0], [0], [1], [0, 0, 1, 1], [], []>} : vector<4x512xbf16>, vector<512x256xbf16>, vector<4x256xf32> -> vector<4x256xf32>
    %c0_129 = arith.constant 0 : index
    %c0_130 = arith.constant 0 : index
    %c0_131 = arith.constant 0 : index
    %170 = vector.load %arg25[%c0_129, %c0_130, %c0_131] : memref<1x4x256xf32, #tpu.memory_space<vmem>>, vector<1x4x256xf32>
    %171 = vector.shape_cast %170 : vector<1x4x256xf32> to vector<4x256xf32>
    %172 = vector.shape_cast %169 : vector<4x256xf32> to vector<1x4x256xf32>
    tpu.vector_store %arg25[%c0_129, %c0_130, %c0_131], %172 {strides = array<i32>} : memref<1x4x256xf32, #tpu.memory_space<vmem>>, vector<1x4x256xf32>,
    %cst_132 = arith.constant 0.000000e+00 : f32
    %173 = vector.broadcast %cst_132 : f32 to vector<1x64xf32>
    %c0_133 = arith.constant 0 : index
    %c0_134 = arith.constant 0 : index
    %c0_135 = arith.constant 0 : index
    %174 = vector.load %arg25[%c0_133, %c0_134, %c0_135] : memref<1x4x256xf32, #tpu.memory_space<vmem>>, vector<1x1x256xf32>
    %175 = vector.shape_cast %174 : vector<1x1x256xf32> to vector<1x256xf32>
    %176 = arith.truncf %175 : vector<1x256xf32> to vector<1x256xbf16>
    %c0_136 = arith.constant 0 : index
    %c0_137 = arith.constant 0 : index
    %c0_138 = arith.constant 0 : index
    %177 = vector.load %arg17[%c0_136, %c0_137, %c0_138] : memref<4x256x64xbf16, #tpu.memory_space<vmem>>, vector<1x256x64xbf16>
    %178 = vector.shape_cast %177 : vector<1x256x64xbf16> to vector<256x64xbf16>
    %cst_139 = arith.constant dense<0.000000e+00> : vector<1x64xf32>
    %179 = tpu.matmul %176, %178, %cst_139 {dimension_numbers = #tpu.dot_dimension_numbers<[1], [0], [0], [1], [0, 0, 1, 1], [], []>} : vector<1x256xbf16>, vector<256x64xbf16>, vector<1x64xf32> -> vector<1x64xf32>
    %180 = arith.addf %173, %179 : vector<1x64xf32>
    %c0_140 = arith.constant 0 : index
    %c1_141 = arith.constant 1 : index
    %c0_142 = arith.constant 0 : index
    %181 = vector.load %arg25[%c0_140, %c1_141, %c0_142] : memref<1x4x256xf32, #tpu.memory_space<vmem>>, vector<1x1x256xf32>
    %182 = vector.shape_cast %181 : vector<1x1x256xf32> to vector<1x256xf32>
    %183 = arith.truncf %182 : vector<1x256xf32> to vector<1x256xbf16>
    %c1_143 = arith.constant 1 : index
    %c0_144 = arith.constant 0 : index
    %c0_145 = arith.constant 0 : index
    %184 = vector.load %arg17[%c1_143, %c0_144, %c0_145] : memref<4x256x64xbf16, #tpu.memory_space<vmem>>, vector<1x256x64xbf16>
    %185 = vector.shape_cast %184 : vector<1x256x64xbf16> to vector<256x64xbf16>
    %cst_146 = arith.constant dense<0.000000e+00> : vector<1x64xf32>
    %186 = tpu.matmul %183, %185, %cst_146 {dimension_numbers = #tpu.dot_dimension_numbers<[1], [0], [0], [1], [0, 0, 1, 1], [], []>} : vector<1x256xbf16>, vector<256x64xbf16>, vector<1x64xf32> -> vector<1x64xf32>
    %187 = arith.addf %180, %186 : vector<1x64xf32>
    %c0_147 = arith.constant 0 : index
    %c2_148 = arith.constant 2 : index
    %c0_149 = arith.constant 0 : index
    %188 = vector.load %arg25[%c0_147, %c2_148, %c0_149] : memref<1x4x256xf32, #tpu.memory_space<vmem>>, vector<1x1x256xf32>
    %189 = vector.shape_cast %188 : vector<1x1x256xf32> to vector<1x256xf32>
    %190 = arith.truncf %189 : vector<1x256xf32> to vector<1x256xbf16>
    %c2_150 = arith.constant 2 : index
    %c0_151 = arith.constant 0 : index
    %c0_152 = arith.constant 0 : index
    %191 = vector.load %arg17[%c2_150, %c0_151, %c0_152] : memref<4x256x64xbf16, #tpu.memory_space<vmem>>, vector<1x256x64xbf16>
    %192 = vector.shape_cast %191 : vector<1x256x64xbf16> to vector<256x64xbf16>
    %cst_153 = arith.constant dense<0.000000e+00> : vector<1x64xf32>
    %193 = tpu.matmul %190, %192, %cst_153 {dimension_numbers = #tpu.dot_dimension_numbers<[1], [0], [0], [1], [0, 0, 1, 1], [], []>} : vector<1x256xbf16>, vector<256x64xbf16>, vector<1x64xf32> -> vector<1x64xf32>
    %194 = arith.addf %187, %193 : vector<1x64xf32>
    %c0_154 = arith.constant 0 : index
    %c3_155 = arith.constant 3 : index
    %c0_156 = arith.constant 0 : index
    %195 = vector.load %arg25[%c0_154, %c3_155, %c0_156] : memref<1x4x256xf32, #tpu.memory_space<vmem>>, vector<1x1x256xf32>
    %196 = vector.shape_cast %195 : vector<1x1x256xf32> to vector<1x256xf32>
    %197 = arith.truncf %196 : vector<1x256xf32> to vector<1x256xbf16>
    %c3_157 = arith.constant 3 : index
    %c0_158 = arith.constant 0 : index
    %c0_159 = arith.constant 0 : index
    %198 = vector.load %arg17[%c3_157, %c0_158, %c0_159] : memref<4x256x64xbf16, #tpu.memory_space<vmem>>, vector<1x256x64xbf16>
    %199 = vector.shape_cast %198 : vector<1x256x64xbf16> to vector<256x64xbf16>
    %cst_160 = arith.constant dense<0.000000e+00> : vector<1x64xf32>
    %200 = tpu.matmul %197, %199, %cst_160 {dimension_numbers = #tpu.dot_dimension_numbers<[1], [0], [0], [1], [0, 0, 1, 1], [], []>} : vector<1x256xbf16>, vector<256x64xbf16>, vector<1x64xf32> -> vector<1x64xf32>
    %201 = arith.addf %194, %200 : vector<1x64xf32>
    %c0_161 = arith.constant 0 : index
    %c0_162 = arith.constant 0 : index
    %202 = vector.load %arg18[%c0_161, %c0_162] : memref<1x64xf32, #tpu.memory_space<vmem>>, vector<1x64xf32>
    %203 = arith.addf %201, %202 : vector<1x64xf32>
    %204 = arith.truncf %203 : vector<1x64xf32> to vector<1x64xbf16>
    %c0_163 = arith.constant 0 : index
    %c0_164 = arith.constant 0 : index
    %205 = vector.load %arg19[%c0_163, %c0_164] : memref<64x128xbf16, #tpu.memory_space<vmem>>, vector<64x128xbf16>
    %cst_165 = arith.constant dense<0.000000e+00> : vector<1x128xf32>
    %206 = tpu.matmul %204, %205, %cst_165 {dimension_numbers = #tpu.dot_dimension_numbers<[1], [0], [0], [1], [0, 0, 1, 1], [], []>} : vector<1x64xbf16>, vector<64x128xbf16>, vector<1x128xf32> -> vector<1x128xf32>
    %c0_166 = arith.constant 0 : index
    %c0_167 = arith.constant 0 : index
    %207 = vector.load %arg20[%c0_166, %c0_167] : memref<1x128xf32, #tpu.memory_space<vmem>>, vector<1x128xf32>
    %208 = arith.addf %206, %207 : vector<1x128xf32>
    %c0_168 = arith.constant 0 : index
    %c0_169 = arith.constant 0 : index
    %c0_170 = arith.constant 0 : index
    %209 = vector.load %arg21[%c0_168, %c0_169, %c0_170] : memref<1x1x128xf32, #tpu.memory_space<vmem>>, vector<1x1x128xf32>
    %210 = vector.shape_cast %209 : vector<1x1x128xf32> to vector<1x128xf32>
    %211 = vector.shape_cast %208 : vector<1x128xf32> to vector<1x1x128xf32>
    tpu.vector_store %arg21[%c0_168, %c0_169, %c0_170], %211 {strides = array<i32>} : memref<1x1x128xf32, #tpu.memory_space<vmem>>, vector<1x1x128xf32>,
    return
  }
  func.func @transform_0(%arg0: i32) -> (i32, i32, i32, i32) {
    %c0_i32 = arith.constant 0 : i32
    %c0_i32_0 = arith.constant 0 : i32
    %c0_i32_1 = arith.constant 0 : i32
    %c0_i32_2 = arith.constant 0 : i32
    return %arg0, %c0_i32, %c0_i32_0, %c0_i32_1 : i32, i32, i32, i32
  }
  func.func @transform_1(%arg0: i32) -> (i32, i32, i32) {
    %c0_i32 = arith.constant 0 : i32
    %c0_i32_0 = arith.constant 0 : i32
    %c0_i32_1 = arith.constant 0 : i32
    %c0_i32_2 = arith.constant 0 : i32
    return %c0_i32, %c0_i32_0, %c0_i32_1 : i32, i32, i32
  }
  func.func @transform_2(%arg0: i32) -> (i32, i32) {
    %c0_i32 = arith.constant 0 : i32
    %c0_i32_0 = arith.constant 0 : i32
    %c0_i32_1 = arith.constant 0 : i32
    return %c0_i32, %c0_i32_0 : i32, i32
  }
  func.func @transform_3(%arg0: i32) -> (i32, i32) {
    %c0_i32 = arith.constant 0 : i32
    %c0_i32_0 = arith.constant 0 : i32
    %c0_i32_1 = arith.constant 0 : i32
    return %c0_i32, %c0_i32_0 : i32, i32
  }
  func.func @transform_4(%arg0: i32) -> (i32, i32) {
    %c0_i32 = arith.constant 0 : i32
    %c0_i32_0 = arith.constant 0 : i32
    %c0_i32_1 = arith.constant 0 : i32
    return %c0_i32, %c0_i32_0 : i32, i32
  }
  func.func @transform_5(%arg0: i32) -> (i32, i32) {
    %c0_i32 = arith.constant 0 : i32
    %c0_i32_0 = arith.constant 0 : i32
    %c0_i32_1 = arith.constant 0 : i32
    return %c0_i32, %c0_i32_0 : i32, i32
  }
  func.func @transform_6(%arg0: i32) -> (i32, i32, i32) {
    %c0_i32 = arith.constant 0 : i32
    %c0_i32_0 = arith.constant 0 : i32
    %c0_i32_1 = arith.constant 0 : i32
    %c0_i32_2 = arith.constant 0 : i32
    return %c0_i32, %c0_i32_0, %c0_i32_1 : i32, i32, i32
  }
  func.func @transform_7(%arg0: i32) -> (i32, i32) {
    %c0_i32 = arith.constant 0 : i32
    %c0_i32_0 = arith.constant 0 : i32
    %c0_i32_1 = arith.constant 0 : i32
    return %c0_i32, %c0_i32_0 : i32, i32
  }
  func.func @transform_8(%arg0: i32) -> (i32, i32) {
    %c0_i32 = arith.constant 0 : i32
    %c0_i32_0 = arith.constant 0 : i32
    %c0_i32_1 = arith.constant 0 : i32
    return %c0_i32, %c0_i32_0 : i32, i32
  }
  func.func @transform_9(%arg0: i32) -> (i32, i32) {
    %c0_i32 = arith.constant 0 : i32
    %c0_i32_0 = arith.constant 0 : i32
    %c0_i32_1 = arith.constant 0 : i32
    return %c0_i32, %c0_i32_0 : i32, i32
  }
  func.func @transform_10(%arg0: i32) -> (i32, i32) {
    %c0_i32 = arith.constant 0 : i32
    %c0_i32_0 = arith.constant 0 : i32
    %c0_i32_1 = arith.constant 0 : i32
    return %c0_i32, %c0_i32_0 : i32, i32
  }
  func.func @transform_11(%arg0: i32) -> (i32, i32, i32) {
    %c0_i32 = arith.constant 0 : i32
    %c0_i32_0 = arith.constant 0 : i32
    %c0_i32_1 = arith.constant 0 : i32
    %c0_i32_2 = arith.constant 0 : i32
    return %c0_i32, %c0_i32_0, %c0_i32_1 : i32, i32, i32
  }
  func.func @transform_12(%arg0: i32) -> (i32, i32) {
    %c0_i32 = arith.constant 0 : i32
    %c0_i32_0 = arith.constant 0 : i32
    %c0_i32_1 = arith.constant 0 : i32
    return %c0_i32, %c0_i32_0 : i32, i32
  }
  func.func @transform_13(%arg0: i32) -> (i32, i32) {
    %c0_i32 = arith.constant 0 : i32
    %c0_i32_0 = arith.constant 0 : i32
    %c0_i32_1 = arith.constant 0 : i32
    return %c0_i32, %c0_i32_0 : i32, i32
  }
  func.func @transform_14(%arg0: i32) -> (i32, i32) {
    %c0_i32 = arith.constant 0 : i32
    %c0_i32_0 = arith.constant 0 : i32
    %c0_i32_1 = arith.constant 0 : i32
    return %c0_i32, %c0_i32_0 : i32, i32
  }
  func.func @transform_15(%arg0: i32) -> (i32, i32) {
    %c0_i32 = arith.constant 0 : i32
    %c0_i32_0 = arith.constant 0 : i32
    %c0_i32_1 = arith.constant 0 : i32
    return %c0_i32, %c0_i32_0 : i32, i32
  }
  func.func @transform_16(%arg0: i32) -> (i32, i32, i32) {
    %c0_i32 = arith.constant 0 : i32
    %c0_i32_0 = arith.constant 0 : i32
    %c0_i32_1 = arith.constant 0 : i32
    %c0_i32_2 = arith.constant 0 : i32
    return %c0_i32, %c0_i32_0, %c0_i32_1 : i32, i32, i32
  }
  func.func @transform_17(%arg0: i32) -> (i32, i32) {
    %c0_i32 = arith.constant 0 : i32
    %c0_i32_0 = arith.constant 0 : i32
    %c0_i32_1 = arith.constant 0 : i32
    return %c0_i32, %c0_i32_0 : i32, i32
  }
  func.func @transform_18(%arg0: i32) -> (i32, i32) {
    %c0_i32 = arith.constant 0 : i32
    %c0_i32_0 = arith.constant 0 : i32
    %c0_i32_1 = arith.constant 0 : i32
    return %c0_i32, %c0_i32_0 : i32, i32
  }
  func.func @transform_19(%arg0: i32) -> (i32, i32) {
    %c0_i32 = arith.constant 0 : i32
    %c0_i32_0 = arith.constant 0 : i32
    %c0_i32_1 = arith.constant 0 : i32
    return %c0_i32, %c0_i32_0 : i32, i32
  }
  func.func @transform_20(%arg0: i32) -> (i32, i32, i32) {
    %c0_i32 = arith.constant 0 : i32
    %c0_i32_0 = arith.constant 0 : i32
    %c0_i32_1 = arith.constant 0 : i32
    return %arg0, %c0_i32, %c0_i32_0 : i32, i32, i32
  }
}

</mosaic_0001>

<bundles_post_ra>
// kernel: net_pallas.1
= control target key start
LH: loop header
LB: loop body
LE: loop exit
PB: predicated region body
PF: predicated region fallthrough
CT: control target
= control target key end

     0   :  { %s23779_s0 = inlined_call_operand.hbm [shape: f32[2,3,32,32], index: 0, kind: input, shape index: {}]   ;;  %s23780_s1 = inlined_call_operand.hbm [shape: bf16[5,128,1024], index: 1, kind: input, shape index: {}]   ;;  %s23781_s2 = inlined_call_operand.hbm [shape: f32[1,1024], index: 2, kind: input, shape index: {}]   ;;  %s23782_s3 = inlined_call_operand.hbm [shape: bf16[20,32], index: 3, kind: input, shape index: {}]   ;;  %s23783_s4 = inlined_call_operand.hbm [shape: bf16[20,32], index: 4, kind: input, shape index: {}]   ;;  %s23784_s5 = inlined_call_operand.hbm [shape: bf16[1024,512], index: 5, kind: input, shape index: {}]   ;;  %s23785_s6 = inlined_call_operand.hbm [shape: bf16[5,512,512], index: 6, kind: input, shape index: {}]   ;;  %s23786_s7 = inlined_call_operand.hbm [shape: f32[1,512], index: 7, kind: input, shape index: {}]   ;;  %s23787_s8 = inlined_call_operand.hbm [shape: bf16[12,16], index: 8, kind: input, shape index: {}]   ;;  %s23788_s9 = inlined_call_operand.hbm [shape: bf16[12,16], index: 9, kind: input, shape index: {}]   ;;  %s23789_s10 = inlined_call_operand.hbm [shape: bf16[512,256], index: 10, kind: input, shape index: {}]   ;;  %s23790_s11 = inlined_call_operand.hbm [shape: bf16[5,256,512], index: 11, kind: input, shape index: {}]   ;;  %s23791_s12 = inlined_call_operand.hbm [shape: f32[1,512], index: 12, kind: input, shape index: {}]   ;;  %s23792_s13 = inlined_call_operand.hbm [shape: bf16[4,8], index: 13, kind: input, shape index: {}]   ;;  %s23793_s14 = inlined_call_operand.hbm [shape: bf16[4,8], index: 14, kind: input, shape index: {}]   ;;  %s23794_s15 = inlined_call_operand.hbm [shape: bf16[512,256], index: 15, kind: input, shape index: {}]   ;;  %s23795_s16 = inlined_call_operand.vmem [shape: bf16[4,256,64], index: 16, kind: input, shape index: {}]   ;;  %s23796_s17 = inlined_call_operand.hbm [shape: f32[1,64], index: 17, kind: input, shape index: {}]   ;;  %s23797_s18 = inlined_call_operand.hbm [shape: bf16[64,128], index: 18, kind: input, shape index: {}]   ;;  %s23798_s19 = inlined_call_operand.hbm [shape: f32[1,128], index: 19, kind: input, shape index: {}]   ;;  %s23799_s20 = inlined_call_operand.hbm [shape: f32[2,1,128], index: 20, kind: output, shape index: {}]  }
   0x1   :  { %23828 = sst [smem:[#allocation85_spill]] %s23779_s0 }
   0x2   :  { %23829 = sst [smem:[#allocation86_spill]] %s23780_s1 }
   0x3   :  { %23830 = sst [smem:[#allocation87_spill]] %s23781_s2 }
   0x4   :  { %23831 = sst [smem:[#allocation88_spill]] %s23782_s3 }
   0x5   :  { %23832 = sst [smem:[#allocation89_spill]] %s23783_s4 }
   0x6   :  { %23833 = sst [smem:[#allocation90_spill]] %s23784_s5 }
   0x7   :  { %23834 = sst [smem:[#allocation91_spill]] %s23785_s6 }
   0x8   :  { %23835 = sst [smem:[#allocation92_spill]] %s23786_s7 }
   0x9   :  { %23836 = sst [smem:[#allocation93_spill]] %s23787_s8 }
   0xa   :  { %23837 = sst [smem:[#allocation94_spill]] %s23788_s9 }
   0xb   :  { %23838 = sst [smem:[#allocation95_spill]] %s23789_s10 }
   0xc   :  { %23839 = sst [smem:[#allocation96_spill]] %s23790_s11 }
   0xd   :  { %23840 = sst [smem:[#allocation97_spill]] %s23791_s12 }
   0xe   :  { %23841 = sst [smem:[#allocation98_spill]] %s23795_s16 }
   0xf   :  { %23842 = sst [smem:[#allocation99_spill]] %s23799_s20 }
  0x10   :  { %25 = vsyncpa [#allocation7], 0 }
  0x11   :  { %27 = vsyncpa [#allocation7 + $0x1], 0 }
  0x12   :  { %28 = vsyncpa [#allocation10], 0 }
  0x13   :  { %29 = vsyncpa [#allocation13], 0 }
  0x14   :  { %30 = vsyncpa [#allocation16], 0 }
  0x15   :  { %31 = vsyncpa [#allocation19], 0 }
  0x16   :  { %32 = vsyncpa [#allocation22], 0 }
  0x17   :  { %33 = vsyncpa [#allocation25], 0 }
  0x18   :  { %34 = vsyncpa [#allocation28], 0 }
  0x19   :  { %35 = vsyncpa [#allocation31], 0 }
  0x1a   :  { %36 = vsyncpa [#allocation34], 0 }
  0x1b   :  { %37 = vsyncpa [#allocation8], 0 }
  0x1c   :  { %39 = vsyncpa [#allocation8 + $0x1], 0  ;;  %s21762_s1 = smov 0   ;;  %s21764_s22 = smov 0  }
  0x1d   :  { %s21766_s23 = smov 0   ;;  %s21768_s24 = smov 0  }
  0x1e LB: > { %s21623_s2 = smov [#allocation9]   ;;  %s21783_s3 = sadd.s32 4294967295, %s21621_s24   ;;  %s21621_s24 = sphi %s21768_s24, %s23975_s24   ;;  %s21617_s23 = sphi %s21766_s23, %s23974_s23   ;;  %s21613_s22 = sphi %s21764_s22, %s23973_s22   ;;  %s21609_s1 = sphi %s21762_s1, %s23972_s1  }
  0x1f   : > { %s513_s25 = sshll.u32 %s21623_s2, 4  ;;  %23843 = sst [smem:[#allocation48_spill]] %s21783_s3  ;;  %s514_s25 = int_to_ptr.vmem [resolvable:$true] %s513_s25 }
  0x20   : > { %p16558_p0 = scmp.ge.s32.totalorder %s21621_s24, 1  ;;  %p23811_p1 = scmp.eq.s32.totalorder %s21783_s3, 0 }
  0x21   : > { %p501_p2 = scmp.lt.s32.totalorder %s21621_s24, 3  ;;  %s21624_s27 = smov [#allocation12]  }
  0x22   : > { %s537_s28 = sshll.u32 %s21624_s27, 4  ;;  %s21625_s29 = smov [#allocation15]   ;;  %s21801_s28 = int_to_ptr.vmem [resolvable:$true] %s537_s28 }
  0x23   : > { %p21788_p3 = pnand %p16558_p0, %p501_p2  ;;  %s21803_s30 = sshll.u32 %s21625_s29, 4  ;;  %s564_s30 = int_to_ptr.vmem [resolvable:$true] %s21803_s30 }
  0x24   : > { %s21036_s21 = scalar_lea.vmem %s514_s25, 40960  ;;  %p21044_p11 = scmp.lt.s32.totalorder %s514_s25, %s514_s25 }
  0x25   : > { %s23844_s26 = scalar_select %p21788_p3, 1, 0 }
  0x26   : > { %p18660_p5 = pneg %p21788_p3  ;;  %p21037_p8 = scmp.ne.s32.totalorder %s514_s25, %s21036_s21 }
  0x27   : > { %23845 = sst [smem:[#allocation49_spill]] %s23844_s26  ;;  %p21045_p12 = scmp.lt.s32.totalorder %s21036_s21, %s21036_s21 }
  0x28   : > { %p21797_p6 = pnand %p18660_p5, %p23811_p1 }
  0x29   : > { %p21046_p13 = por %p21045_p12, %p21044_p11 }
  0x2a   : > { %p21807_p7 = pneg %p21797_p6 }
  0x2c   : > { %p21039_p9 = pnand %p21037_p8, %p21807_p7 }
  0x2e   : > { %p21040_p10 = pneg %p21039_p9 }
  0x30   : > { %p21047_p0 = pnand %p21046_p13, %p21040_p10 }
  0x32   : > { %21050 = shalt.err (!%p21047_p0)
}
  0x33   : > { %s21626_s2 = smov 512   ;;  %s21627_s27 = smov 32  }
  0x34   : > { %s23848_s16 = sld [smem:[#allocation86_spill]]  ;;  %s21062_s26 = scalar_lea.vmem %s21801_s28, 192 }
  0x35   : > { %p21063_p2 = scmp.ne.s32.totalorder %s21801_s28, %s21062_s26  ;;  %p21070_p9 = scmp.lt.s32.totalorder %s21801_s28, %s21801_s28 }
  0x36   : > { %p21071_p10 = scmp.lt.s32.totalorder %s21062_s26, %s21062_s26 }
  0x37   : > { %p21065_p5 = pnand %p21063_p2, %p21807_p7 }
  0x38   : > { %p21072_p11 = por %p21071_p10, %p21070_p9 }
  0x39   : > { %p21066_p8 = pneg %p21065_p5 }
  0x3a   : > { %18663 = dma.hbm_to_vmem [thread:$0]  (!%p21797_p6), %s23848_s16, 40960, %s514_s25, [#allocation10], %s21626_s2, %s21626_s2, %s21627_s27  }
  0x3b   : > { %p21073_p12 = pnand %p21072_p11, %p21066_p8 }
  0x3d   : > { %21076 = shalt.err (!%p21073_p12)
}
  0x3e   : > { %s23807_s21 = smov 64   ;;  %s23809_s3 = smov 4  }
  0x3f   : > { %s23849_s25 = sld [smem:[#allocation88_spill]]  ;;  %s21088_s2 = scalar_lea.vmem %s564_s30, 32768 }
  0x40   : > { %p21089_p13 = scmp.ne.s32.totalorder %s564_s30, %s21088_s2  ;;  %p21096_p5 = scmp.lt.s32.totalorder %s564_s30, %s564_s30 }
  0x41   : > { %p21097_p8 = scmp.lt.s32.totalorder %s21088_s2, %s21088_s2 }
  0x42   : > { %p21091_p0 = pnand %p21089_p13, %p21807_p7 }
  0x43   : > { %p21098_p9 = por %p21097_p8, %p21096_p5 }
  0x44   : > { %p21092_p2 = pneg %p21091_p0 }
  0x45   : > { %18669 = dma.hbm_to_vmem [thread:$0]  (!%p21797_p6), %s23849_s25, 192, %s21801_s28, [#allocation13], %s23807_s21, %s23807_s21, %s23809_s3  }
  0x46   : > { %p21099_p10 = pnand %p21098_p9, %p21092_p2 }
  0x48   : > { %21102 = shalt.err (!%p21099_p10)
}
  0x49   : > { %s23813_s26 = smov 256   ;;  %s23815_s27 = smov 16  }
  0x4a   : > { %s23850_s5 = sld [smem:[#allocation90_spill]]  ;;  %s21632_s16 = smov [#allocation18]  }
  0x4b   : > { %s590_s20 = sshll.u32 %s21632_s16, 4  ;;  %s21633_s25 = smov [#allocation21]   ;;  %s591_s20 = int_to_ptr.vmem [resolvable:$true] %s590_s20 }
  0x4c   : > { %s613_s2 = sshll.u32 %s21633_s25, 4  ;;  %s21114_s21 = scalar_lea.vmem %s591_s20, 64  ;;  %s614_s2 = int_to_ptr.vmem [resolvable:$true] %s613_s2 }
  0x4d   : > { %p21115_p11 = scmp.ne.s32.totalorder %s591_s20, %s21114_s21  ;;  %p21122_p0 = scmp.lt.s32.totalorder %s591_s20, %s591_s20 }
  0x4e   : > { %p21123_p2 = scmp.lt.s32.totalorder %s21114_s21, %s21114_s21 }
  0x4f   : > { %p21117_p12 = pnand %p21115_p11, %p21807_p7 }
  0x50   : > { %18675 = dma.hbm_to_vmem [thread:$0]  (!%p21797_p6), %s23850_s5, 32768, %s564_s30, [#allocation16], %s23813_s26, %s23813_s26, %s23815_s27  }
  0x51   : > { %p21118_p13 = pneg %p21117_p12  ;;  %p21124_p5 = por %p21123_p2, %p21122_p0 }
  0x53   : > { %p21125_p8 = pnand %p21124_p5, %p21118_p13 }
  0x55   : > { %21128 = shalt.err (!%p21125_p8)
}
  0x56   : > { %s23851_s7 = sld [smem:[#allocation92_spill]]  ;;  %s21140_s30 = scalar_lea.vmem %s614_s2, 128 }
  0x57   : > { %p21141_p9 = scmp.ne.s32.totalorder %s614_s2, %s21140_s30  ;;  %p21148_p11 = scmp.lt.s32.totalorder %s614_s2, %s614_s2 }
  0x58   : > { %p21149_p12 = scmp.lt.s32.totalorder %s21140_s30, %s21140_s30 }
  0x59   : > { %p21143_p10 = pnand %p21141_p9, %p21807_p7 }
  0x5a   : > { %p21150_p1 = por %p21149_p12, %p21148_p11 }
  0x5b   : > { %p21144_p4 = pneg %p21143_p10 }
  0x5c   : > { %18681 = dma.hbm_to_vmem [thread:$0]  (!%p21797_p6), %s23851_s7, 64, %s591_s20, [#allocation19]  }
  0x5d   : > { %p21151_p3 = pnand %p21150_p1, %p21144_p4 }
  0x5f   : > { %21154 = shalt.err (!%p21151_p3)
}
  0x60   : > { %s23852_s21 = smov 4   ;;  %s23853_s29 = smov 64  }
  0x61   : > { %s23854_s9 = sld [smem:[#allocation94_spill]]  ;;  %s21634_s20 = smov [#allocation24]  }
  0x62   : > { %s639_s25 = sshll.u32 %s21634_s20, 4  ;;  %s21635_s28 = smov [#allocation27]   ;;  %s640_s25 = int_to_ptr.vmem [resolvable:$true] %s639_s25 }
  0x63   : > { %s664_s26 = sshll.u32 %s21635_s28, 4  ;;  %s21166_s27 = scalar_lea.vmem %s640_s25, 40960  ;;  %s665_s26 = int_to_ptr.vmem [resolvable:$true] %s664_s26 }
  0x64   : > { %p21167_p13 = scmp.ne.s32.totalorder %s640_s25, %s21166_s27  ;;  %p21174_p4 = scmp.lt.s32.totalorder %s640_s25, %s640_s25 }
  0x65   : > { %p21175_p0 = scmp.lt.s32.totalorder %s21166_s27, %s21166_s27 }
  0x66   : > { %p21169_p1 = pnand %p21167_p13, %p21807_p7 }
  0x67   : > { %18687 = dma.hbm_to_vmem [thread:$0]  (!%p21797_p6), %s23854_s9, 128, %s614_s2, [#allocation22], %s23853_s29, %s23853_s29, %s23852_s21  }
  0x68   : > { %p21170_p3 = pneg %p21169_p1  ;;  %p21176_p2 = por %p21175_p0, %p21174_p4 }
  0x6a   : > { %p21177_p5 = pnand %p21176_p2, %p21170_p3 }
  0x6c   : > { %21180 = shalt.err (!%p21177_p5)
}
  0x6d   : > { %s23855_s30 = smov 16   ;;  %s23856_s16 = smov 256  }
  0x6e   : > { %s23857_s11 = sld [smem:[#allocation96_spill]]  ;;  %s21192_s20 = scalar_lea.vmem %s665_s26, 32 }
  0x6f   : > { %p21193_p8 = scmp.ne.s32.totalorder %s665_s26, %s21192_s20  ;;  %p21200_p11 = scmp.lt.s32.totalorder %s665_s26, %s665_s26 }
  0x70   : > { %p21201_p12 = scmp.lt.s32.totalorder %s21192_s20, %s21192_s20 }
  0x71   : > { %p21195_p9 = pnand %p21193_p8, %p21807_p7 }
  0x72   : > { %p21202_p13 = por %p21201_p12, %p21200_p11 }
  0x73   : > { %p21196_p10 = pneg %p21195_p9 }
  0x74   : > { %18693 = dma.hbm_to_vmem [thread:$0]  (!%p21797_p6), %s23857_s11, 40960, %s640_s25, [#allocation25], %s23856_s16, %s23856_s16, %s23855_s30  }
  0x75   : > { %p21203_p1 = pnand %p21202_p13, %p21196_p10 }
  0x77   : > { %21206 = shalt.err (!%p21203_p1)
}
  0x78   : > { %18699 = dma.hbm_to_vmem [thread:$0]  (!%p21797_p6), %s23792_s13, 32, %s665_s26, [#allocation28]  }
  0x79   : > { %s21636_s2 = smov [#allocation30]   ;;  %s21637_s3 = smov [#allocation33]  }
  0x7a   : > { %s685_s25 = sshll.u32 %s21636_s2, 4  ;;  %s712_s5 = sshll.u32 %s21637_s3, 4  ;;  %s686_s25 = int_to_ptr.vmem [resolvable:$true] %s685_s25  ;;  %s713_s5 = int_to_ptr.vmem [resolvable:$true] %s712_s5 }
  0x7b   : > { %s21218_s7 = scalar_lea.vmem %s686_s25, 8192  ;;  %p21226_p2 = scmp.lt.s32.totalorder %s686_s25, %s686_s25 }
  0x7c   : > { %p21219_p3 = scmp.ne.s32.totalorder %s686_s25, %s21218_s7  ;;  %p21227_p5 = scmp.lt.s32.totalorder %s21218_s7, %s21218_s7 }
  0x7e   : > { %p21221_p4 = pnand %p21219_p3, %p21807_p7  ;;  %p21228_p8 = por %p21227_p5, %p21226_p2 }
  0x80   : > { %p21222_p0 = pneg %p21221_p4 }
  0x82   : > { %p21229_p9 = pnand %p21228_p8, %p21222_p0 }
  0x84   : > { %21232 = shalt.err (!%p21229_p9)
}
  0x85   : > { %s23817_s20 = smov 128   ;;  %s23819_s27 = smov 8  }
  0x86   : > { %18705 = dma.hbm_to_vmem [thread:$0]  (!%p21797_p6), %s23794_s15, 8192, %s686_s25, [#allocation31], %s23817_s20, %s23817_s20, %s23819_s27  }
  0x87   : > { %s21244_s2 = scalar_lea.vmem %s713_s5, 512  ;;  %p21252_p13 = scmp.lt.s32.totalorder %s713_s5, %s713_s5 }
  0x88   : > { %p21245_p10 = scmp.ne.s32.totalorder %s713_s5, %s21244_s2  ;;  %p21253_p1 = scmp.lt.s32.totalorder %s21244_s2, %s21244_s2 }
  0x8a   : > { %p21247_p11 = pnand %p21245_p10, %p21807_p7  ;;  %p21254_p3 = por %p21253_p1, %p21252_p13 }
  0x8c   : > { %p21248_p12 = pneg %p21247_p11 }
  0x8e   : > { %p21255_p4 = pnand %p21254_p3, %p21248_p12 }
  0x90   : > { %21258 = shalt.err (!%p21255_p4)
}
  0x91   : > { %18711 = dma.hbm_to_vmem [thread:$0]  (!%p21797_p6), %s23797_s18, 512, %s713_s5, [#allocation34], %s23853_s29, %s23853_s29, %s23852_s21  }
  0x92   : > { %s21640_s25 = smov [#allocation11]   ;;  %s21641_s28 = smov [#allocation14]  }
  0x93   : > { %s527_s26 = sshll.u32 %s21640_s25, 4  ;;  %s550_s20 = sshll.u32 %s21641_s28, 4  ;;  %s528_s26 = int_to_ptr.vmem [resolvable:$true] %s527_s26  ;;  %s551_s20 = int_to_ptr.vmem [resolvable:$true] %s550_s20 }
  0x94   : > { %s21270_s27 = scalar_lea.vmem %s528_s26, 128  ;;  %p21278_p8 = scmp.lt.s32.totalorder %s528_s26, %s528_s26 }
  0x95   : > { %p21271_p0 = scmp.ne.s32.totalorder %s528_s26, %s21270_s27  ;;  %p21279_p9 = scmp.lt.s32.totalorder %s21270_s27, %s21270_s27 }
  0x97   : > { %p21273_p2 = pnand %p21271_p0, %p21807_p7  ;;  %p21280_p10 = por %p21279_p9, %p21278_p8 }
  0x99   : > { %p21274_p5 = pneg %p21273_p2 }
  0x9b   : > { %p21281_p11 = pnand %p21280_p10, %p21274_p5 }
  0x9d   : > { %21284 = shalt.err (!%p21281_p11)
}
  0x9e   : > { %s23858_s5 = sld [smem:[#allocation87_spill]]  ;;  %s21296_s3 = scalar_lea.vmem %s551_s20, 192 }
  0x9f   : > { %p21297_p12 = scmp.ne.s32.totalorder %s551_s20, %s21296_s3  ;;  %p21304_p3 = scmp.lt.s32.totalorder %s551_s20, %s551_s20 }
  0xa0   : > { %p21305_p4 = scmp.lt.s32.totalorder %s21296_s3, %s21296_s3 }
  0xa1   : > { %p21299_p13 = pnand %p21297_p12, %p21807_p7 }
  0xa2   : > { %p21306_p0 = por %p21305_p4, %p21304_p3 }
  0xa3   : > { %p21300_p1 = pneg %p21299_p13 }
  0xa4   : > { %18666 = dma.hbm_to_vmem [thread:$0]  (!%p21797_p6), %s23858_s5, 128, %s528_s26, [#allocation10]  }
  0xa5   : > { %p21307_p2 = pnand %p21306_p0, %p21300_p1 }
  0xa7   : > { %21310 = shalt.err (!%p21307_p2)
}
  0xa8   : > { %s23859_s28 = sld [smem:[#allocation89_spill]]  ;;  %s21642_s26 = smov [#allocation17]  }
  0xa9   : > { %s576_s2 = sshll.u32 %s21642_s26, 4  ;;  %s21643_s7 = smov [#allocation20]   ;;  %s577_s2 = int_to_ptr.vmem [resolvable:$true] %s576_s2 }
  0xaa   : > { %s600_s5 = sshll.u32 %s21643_s7, 4  ;;  %s21322_s9 = scalar_lea.vmem %s577_s2, 81920  ;;  %s601_s5 = int_to_ptr.vmem [resolvable:$true] %s600_s5 }
  0xab   : > { %p21323_p5 = scmp.ne.s32.totalorder %s577_s2, %s21322_s9  ;;  %p21330_p10 = scmp.lt.s32.totalorder %s577_s2, %s577_s2 }
  0xac   : > { %p21331_p11 = scmp.lt.s32.totalorder %s21322_s9, %s21322_s9 }
  0xad   : > { %p21325_p8 = pnand %p21323_p5, %p21807_p7 }
  0xae   : > { %18672 = dma.hbm_to_vmem [thread:$0]  (!%p21797_p6), %s23859_s28, 192, %s551_s20, [#allocation13], %s23853_s29, %s23853_s29, %s23852_s21  }
  0xaf   : > { %p21326_p9 = pneg %p21325_p8  ;;  %p21332_p12 = por %p21331_p11, %p21330_p10 }
  0xb1   : > { %p21333_p13 = pnand %p21332_p12, %p21326_p9 }
  0xb3   : > { %21336 = shalt.err (!%p21333_p13)
}
  0xb4   : > { %s23860_s6 = sld [smem:[#allocation91_spill]]  ;;  %s21348_s27 = scalar_lea.vmem %s601_s5, 128 }
  0xb5   : > { %p21349_p1 = scmp.ne.s32.totalorder %s601_s5, %s21348_s27  ;;  %p21356_p0 = scmp.lt.s32.totalorder %s601_s5, %s601_s5 }
  0xb6   : > { %p21357_p2 = scmp.lt.s32.totalorder %s21348_s27, %s21348_s27 }
  0xb7   : > { %p21351_p3 = pnand %p21349_p1, %p21807_p7 }
  0xb8   : > { %p21358_p5 = por %p21357_p2, %p21356_p0 }
  0xb9   : > { %p21352_p4 = pneg %p21351_p3 }
  0xba   : > { %18678 = dma.hbm_to_vmem [thread:$0]  (!%p21797_p6), %s23860_s6, 81920, %s577_s2, [#allocation16], %s23856_s16, %s23856_s16, %s23855_s30  }
  0xbb   : > { %p21359_p8 = pnand %p21358_p5, %p21352_p4 }
  0xbd   : > { %21362 = shalt.err (!%p21359_p8)
}
  0xbe   : > { %s23861_s8 = sld [smem:[#allocation93_spill]]  ;;  %s21644_s30 = smov [#allocation23]  }
  0xbf   : > { %s626_s16 = sshll.u32 %s21644_s30, 4  ;;  %s21645_s28 = smov [#allocation26]   ;;  %s627_s16 = int_to_ptr.vmem [resolvable:$true] %s626_s16 }
  0xc0   : > { %s653_s26 = sshll.u32 %s21645_s28, 4  ;;  %s21374_s2 = scalar_lea.vmem %s627_s16, 8192  ;;  %s654_s26 = int_to_ptr.vmem [resolvable:$true] %s653_s26 }
  0xc1   : > { %p21375_p9 = scmp.ne.s32.totalorder %s627_s16, %s21374_s2  ;;  %p21382_p12 = scmp.lt.s32.totalorder %s627_s16, %s627_s16 }
  0xc2   : > { %p21383_p13 = scmp.lt.s32.totalorder %s21374_s2, %s21374_s2 }
  0xc3   : > { %p21377_p10 = pnand %p21375_p9, %p21807_p7 }
  0xc4   : > { %18684 = dma.hbm_to_vmem [thread:$0]  (!%p21797_p6), %s23861_s8, 128, %s601_s5, [#allocation19], %s23853_s29, %s23853_s29, %s23852_s21  }
  0xc5   : > { %p21378_p11 = pneg %p21377_p10  ;;  %p21384_p1 = por %p21383_p13, %p21382_p12 }
  0xc7   : > { %p21385_p3 = pnand %p21384_p1, %p21378_p11 }
  0xc9   : > { %21388 = shalt.err (!%p21385_p3)
}
  0xca   : > { %s23862_s7 = smov 8   ;;  %s23863_s20 = smov 128  }
  0xcb   : > { %s23864_s10 = sld [smem:[#allocation95_spill]]  ;;  %s21400_s5 = scalar_lea.vmem %s654_s26, 64 }
  0xcc   : > { %p21401_p4 = scmp.ne.s32.totalorder %s654_s26, %s21400_s5  ;;  %p21408_p5 = scmp.lt.s32.totalorder %s654_s26, %s654_s26 }
  0xcd   : > { %p21409_p8 = scmp.lt.s32.totalorder %s21400_s5, %s21400_s5 }
  0xce   : > { %p21403_p0 = pnand %p21401_p4, %p21807_p7 }
  0xcf   : > { %p21410_p9 = por %p21409_p8, %p21408_p5 }
  0xd0   : > { %p21404_p2 = pneg %p21403_p0 }
  0xd1   : > { %18690 = dma.hbm_to_vmem [thread:$0]  (!%p21797_p6), %s23864_s10, 8192, %s627_s16, [#allocation22], %s23863_s20, %s23863_s20, %s23862_s7  }
  0xd2   : > { %p21411_p10 = pnand %p21410_p9, %p21404_p2 }
  0xd4   : > { %21414 = shalt.err (!%p21411_p10)
}
  0xd5   : > { %s23865_s12 = sld [smem:[#allocation97_spill]]  ;;  %s21646_s9 = smov [#allocation29]  }
  0xd6   : > { %s675_s25 = sshll.u32 %s21646_s9, 4  ;;  %s21647_s30 = smov [#allocation32]   ;;  %s676_s25 = int_to_ptr.vmem [resolvable:$true] %s675_s25 }
  0xd7   : > { %s702_s16 = sshll.u32 %s21647_s30, 4  ;;  %s21426_s28 = scalar_lea.vmem %s676_s25, 32  ;;  %s703_s16 = int_to_ptr.vmem [resolvable:$true] %s702_s16 }
  0xd8   : > { %p21427_p11 = scmp.ne.s32.totalorder %s676_s25, %s21426_s28  ;;  %p21434_p1 = scmp.lt.s32.totalorder %s676_s25, %s676_s25 }
  0xd9   : > { %p21435_p3 = scmp.lt.s32.totalorder %s21426_s28, %s21426_s28 }
  0xda   : > { %p21429_p12 = pnand %p21427_p11, %p21807_p7 }
  0xdb   : > { %18696 = dma.hbm_to_vmem [thread:$0]  (!%p21797_p6), %s23865_s12, 64, %s654_s26, [#allocation25]  }
  0xdc   : > { %p21430_p13 = pneg %p21429_p12  ;;  %p21436_p4 = por %p21435_p3, %p21434_p1 }
  0xde   : > { %p21437_p0 = pnand %p21436_p4, %p21430_p13 }
  0xe0   : > { %21440 = shalt.err (!%p21437_p0)
}
  0xe1   : > { %18702 = dma.hbm_to_vmem [thread:$0]  (!%p21797_p6), %s23793_s14, 32, %s676_s25, [#allocation28]  }
  0xe2   : > { %s21452_s26 = scalar_lea.vmem %s703_s16, 16  ;;  %s21459_s29 = scalar_lea.vmem %s703_s16, 32 }
  0xe3   : > { %p21453_p2 = scmp.ne.s32.totalorder %s703_s16, %s21452_s26  ;;  %p21460_p9 = scmp.lt.s32.totalorder %s703_s16, %s703_s16 }
  0xe4   : > { %p21461_p10 = scmp.lt.s32.totalorder %s21459_s29, %s21452_s26 }
  0xe5   : > { %p21455_p5 = pnand %p21453_p2, %p21807_p7 }
  0xe6   : > { %p21462_p11 = por %p21461_p10, %p21460_p9 }
  0xe7   : > { %p21456_p8 = pneg %p21455_p5 }
  0xe9   : > { %p21463_p12 = pnand %p21462_p11, %p21456_p8 }
  0xeb   : > { %21466 = shalt.err (!%p21463_p12)
}
  0xec   : > { %18708 = dma.hbm_to_vmem [thread:$0]  (!%p21797_p6), %s23796_s17, 16, %s703_s16, [#allocation31]  }
  0xed   : > { %s21648_s27 = smov [#allocation35]  }
  0xee   : > { %s726_s9 = sshll.u32 %s21648_s27, 4  ;;  %s727_s9 = int_to_ptr.vmem [resolvable:$true] %s726_s9 }
  0xef   : > { %s21478_s25 = scalar_lea.vmem %s727_s9, 16  ;;  %s21485_s30 = scalar_lea.vmem %s727_s9, 32 }
  0xf0   : > { %p21479_p13 = scmp.ne.s32.totalorder %s727_s9, %s21478_s25  ;;  %p21486_p4 = scmp.lt.s32.totalorder %s727_s9, %s727_s9 }
  0xf1   : > { %p21487_p0 = scmp.lt.s32.totalorder %s21485_s30, %s21478_s25 }
  0xf2   : > { %p21481_p1 = pnand %p21479_p13, %p21807_p7 }
  0xf3   : > { %p21488_p2 = por %p21487_p0, %p21486_p4 }
  0xf4   : > { %p21482_p3 = pneg %p21481_p1 }
  0xf6   : > { %p21489_p5 = pnand %p21488_p2, %p21482_p3 }
  0xf8   : > { %21492 = shalt.err (!%p21489_p5)
}
  0xf9   : > { %s23866_s0 = sld [smem:[#allocation48_spill]]  ;;  %s16557_s16 = sadd.s32 4294967294, %s21621_s24  }
  0xfa   : > { %18714 = dma.hbm_to_vmem [thread:$0]  (!%p21797_p6), %s23798_s19, 16, %s727_s9, [#allocation34]  }
  0xfb   : > { %s21975_s4 = sadd.s32 1, %s21621_s24   ;;  %s52_s26 = sadd.s32 1, %s21617_s23 }
  0xfc   : > { %s49_s21 = ssub.s32 %s21621_s24, %s21975_s4  ;;  %p59_p8 = scmp.ne.s32.totalorder %s21617_s23, %s21613_s22 }
  0xfd   : > { %p50_p7 = scmp.eq.s32.totalorder %s49_s21, 0  ;;  %p60_p9 = scmp.eq.s32.totalorder %s21621_s24, 0 }
  0xfe   : > { %p65_p10 = scmp.ne.s32.totalorder %s21613_s22, %s21609_s1  ;;  %p494_p1 = scmp.eq.s32.totalorder %s16557_s16, 1 }
  0xff   : > { %s21986_s29 = scalar_select %p50_p7, %s21617_s23, %s52_s26  }
 0x100   : > { %p61_p11 = por %p60_p9, %p59_p8  ;;  %p23867_p12 = scmp.eq.s32.totalorder %s23866_s0, 0 }
 0x101   : > { %p488_p6 = scmp.eq.s32.totalorder %s23866_s0, 1  ;;  %p18741_p3 = scmp.lt.s32.totalorder %s21621_s24, 2 }
 0x102   : > { %p21990_p13 = por %p23867_p12, %p65_p10  ;;  %s737_s3 = sand.u32 1, %s21617_s23  }
 0x103   : > { %p21997_p4 = por %p488_p6, %p59_p8  ;;  %p22001_p0 = por %p494_p1, %p65_p10 }
 0x104   : > { %s23868_s5 = scalar_select %p21990_p13, 1, 0 }
 0x105   : > { %s23869_s27 = scalar_select %p21997_p4, 1, 0 }
 0x106   : > { %s23870_s9 = scalar_select %p22001_p0, 1, 0 }
 0x107   : > { %s18581_s25 = smul.u32 96, %s737_s3  ;;  %p22006_p2 = pnand %p18741_p3, %p61_p11 }
 0x108   : > { %s18582_s30 = smul.u32 1536, %s21621_s24  ;;  %s23872_s0 = sld [smem:[#allocation85_spill]] }
 0x109   : > { %s741_s26 = scalar_lea.vmem [#allocation6], %s18581_s25  ;;  %s22017_s8 = scalar_lea.sflag [#allocation7], %s737_s3 }
 0x10a   : > { %s748_s6 = sshll.u32 %s741_s26, 4  ;;  %p21495_p7 = pneg %p22006_p2  ;;  %s22015_s6 = int_to_ptr.vmem [resolvable:$true] %s748_s6 }
 0x10e   : > { %s22013_s16 = scalar_lea.hbm %s23872_s0, %s18582_s30  ;;  %s21498_s30 = scalar_lea.hbm %s23872_s0, 3072 }
 0x10f   : > { %s21493_s10 = scalar_lea.hbm %s22013_s16, 1536  ;;  %p21499_p10 = scmp.lt.s32.totalorder %s22013_s16, %s23872_s0 }
 0x110   : > { %p21494_p5 = scmp.ne.s32.totalorder %s22013_s16, %s21493_s10  ;;  %p21500_p11 = scmp.lt.s32.totalorder %s21498_s30, %s21493_s10 }
 0x112   : > { %p21496_p8 = pnand %p21495_p7, %p21494_p5  ;;  %p21501_p12 = por %p21500_p11, %p21499_p10 }
 0x114   : > { %p21497_p9 = pneg %p21496_p8 }
 0x116   : > { %p21502_p6 = pnand %p21501_p12, %p21497_p9 }
 0x118   : > { %21505 = shalt.err (!%p21502_p6)
}
 0x119   : > { %s21506_s3 = scalar_lea.vmem %s22015_s6, 1536  ;;  %s21649_s25 = smov [#allocation6]  }
 0x11a   : > { %p21507_p1 = scmp.ne.s32.totalorder %s22015_s6, %s21506_s3  ;;  %s21511_s26 = sshll.u32 %s21649_s25, 4  ;;  %s21512_s26 = int_to_ptr.vmem [resolvable:$false] %s21511_s26 }
 0x11b   : > { %s21513_s11 = scalar_lea.vmem %s21512_s26, 3072  ;;  %p21514_p8 = scmp.lt.s32.totalorder %s22015_s6, %s21512_s26 }
 0x11c   : > { %p21509_p3 = pnand %p21507_p1, %p21495_p7  ;;  %p21515_p0 = scmp.lt.s32.totalorder %s21513_s11, %s21506_s3 }
 0x11e   : > { %p21510_p5 = pneg %p21509_p3  ;;  %p21516_p4 = por %p21515_p0, %p21514_p8 }
 0x120   : > { %p21517_p13 = pnand %p21516_p4, %p21510_p5 }
 0x122   : > { %21520 = shalt.err (!%p21517_p13)
}
 0x123   : > { %18718 = dma.hbm_to_vmem [thread:$0]  (!%p22006_p2), %s22013_s16, 1536, %s22015_s6, %s22017_s8, %s23863_s20, %s23863_s20, %s23862_s7  }
 0x124   : > { %s23873_s10 = sld [smem:[#allocation49_spill]] }
 0x12a   : > { %p23874_p7 = scmp.ne.s32.totalorder %s23873_s10, 0 }
 0x12c   : > { %760 = sbr.rel (%p23874_p7) target bundleno = 4556 (0x11cc), region = 100 }
 0x131   : > { %s22044_s12 = sand.u32 1, %s21613_s22   ;;  %p23875_p13 = scmp.ne.s32.totalorder %s23868_s5, 0 }
 0x132   : > { %s18583_s2 = smul.u32 96, %s22044_s12  ;;  %s763_s30 = scalar_lea.sflag [#allocation7], %s22044_s12 }
 0x134   : > { %s22048_s21 = scalar_lea.vmem [#allocation6], %s18583_s2 }
 0x135   : > { %21564 = dma.done.wait (%p23875_p13), %s763_s30, 1536  }
 0x136   : > { %21566 = vsyncadd (%p23875_p13), %s763_s30, 4294965760  ;;  %s23876_s28 = sld [smem:[#allocation48_spill]] }
 0x13c   : > { %p23877_p4 = scmp.eq.s32.totalorder %s23876_s28, 0 }
 0x13e   : > { %21568 = dma.done.wait (%p23877_p4), [#allocation10], 41088   ;;  %p23878_p0 = pmov %p23877_p4 }
 0x140   : > { %21570 = vsyncadd (%p23878_p0), [#allocation10], 4294926208  ;;  %p23879_p2 = pmov %p23878_p0 }
 0x141   : > { %p23880_p9 = pmov %p23878_p0 }
 0x142   : > { %21572 = dma.done.wait (%p23879_p2), [#allocation13], 384  }
 0x143   : > { %21574 = vsyncadd (%p23880_p9), [#allocation13], 4294966912  ;;  %p23881_p10 = pmov %p23878_p0 }
 0x144   : > { %p23882_p11 = pmov %p23878_p0 }
 0x145   : > { %21576 = dma.done.wait (%p23881_p10), [#allocation16], 114688  }
 0x146   : > { %21578 = vsyncadd (%p23882_p11), [#allocation16], 4294852608  ;;  %p23883_p12 = pmov %p23878_p0 }
 0x147   : > { %p23884_p6 = pmov %p23878_p0 }
 0x148   : > { %21580 = dma.done.wait (%p23883_p12), [#allocation19], 192  }
 0x149   : > { %21582 = vsyncadd (%p23884_p6), [#allocation19], 4294967104  ;;  %p23885_p1 = pmov %p23878_p0 }
 0x14a   : > { %p23886_p3 = pmov %p23878_p0 }
 0x14b   : > { %21584 = dma.done.wait (%p23885_p1), [#allocation22], 8320  }
 0x14c   : > { %21586 = vsyncadd (%p23886_p3), [#allocation22], 4294958976  ;;  %p23887_p5 = pmov %p23878_p0 }
 0x14d   : > { %p23888_p8 = pmov %p23878_p0 }
 0x14e   : > { %21588 = dma.done.wait (%p23887_p5), [#allocation25], 41024  }
 0x14f   : > { %21590 = vsyncadd (%p23888_p8), [#allocation25], 4294926272  ;;  %p23889_p7 = pmov %p23878_p0 }
 0x150   : > { %p23890_p13 = pmov %p23878_p0 }
 0x151   : > { %21592 = dma.done.wait (%p23889_p7), [#allocation28], 64  }
 0x152   : > { %21594 = vsyncadd (%p23890_p13), [#allocation28], 4294967232  ;;  %p23891_p4 = pmov %p23878_p0 }
 0x154   : > { %21596 = dma.done.wait (%p23891_p4), [#allocation31], 8208  }
 0x155   : > { %21598 = vsyncadd (%p23878_p0), [#allocation31], 4294959088  ;;  %p23892_p2 = pmov %p23878_p0 }
 0x156   : > { %p23893_p9 = pmov %p23878_p0 }
 0x157   : > { %21600 = dma.done.wait (%p23892_p2), [#allocation34], 528  }
 0x158   : > { %21602 = vsyncadd (%p23893_p9), [#allocation34], 4294966768  ;;  %v23823_v0 = vmov 0.0   ;;  %v16602_v1 = vld [vmem:[%s22048_s21 + $0x40] sm:$0xff]  ;;  %s21651_s6 = smov 64   ;;  %s21652_s8 = smov 32  }
 0x159   : > { %895 = vst [vmem:[#allocation2] sm:$0xff] %v23823_v0  ;;  %896 = vst [vmem:[#allocation2 + $0x8] sm:$0xff] %v23823_v0  ;;  %v16598_v2 = vld [vmem:[%s22048_s21 + $0x20] sm:$0xff]  ;;  %944 = vrot.lane.b32.xlu1 %v16602_v1, %s21651_s6  ;;  %v16603_v4 = vld [vmem:[%s22048_s21 + $0x48] sm:$0xff]  ;;  %vm904_vm0 = vcmask 261120   ;;  %v23825_v39 = vmov 0  }
 0x15a   : > { %897 = vst [vmem:[#allocation2 + $0x10] sm:$0xff] %v23823_v0  ;;  %898 = vst [vmem:[#allocation2 + $0x18] sm:$0xff] %v23823_v0  ;;  %918 = vrot.lane.b32.xlu0 %v16598_v2, %s21652_s8  ;;  %v1090_v3 = vld [vmem:[#allocation9 + $0x3c0] sm:$0xff]  ;;  %v16599_v5 = vld [vmem:[%s22048_s21 + $0x28] sm:$0xff]  ;;  %1473 = vmatprep.mubr.bf16.mxu0 %v23825_v39  ;;  %vm930_vm1 = vcmask 523520   ;;  %vm956_vm2 = vcmask 785920  }
 0x15b   : > { %899 = vst [vmem:[#allocation2 + $0x20] sm:$0xf] %v23823_v0  ;;  %v1094_v6 = vld [vmem:[#allocation9 + $0x3e0] sm:$0xff]  ;;  %v1091_v7 = vld [vmem:[#allocation9 + $0x3c8] sm:$0xff]  ;;  %v16601_v9 = vld [vmem:[%s22048_s21 + $0x38] sm:$0xff]  ;;  %1526 = vmatprep.mubr.bf16.mxu1 %v23825_v39  ;;  %vm2253_vm5 = vcmask 1046528  }
 0x15c   : > { %v1095_v8 = vld [vmem:[#allocation9 + $0x3e8] sm:$0xff]  ;;  %v16600_v10 = vld [vmem:[%s22048_s21 + $0x30] sm:$0xff]  ;;  %v16663_v11 = vcombine.high %v1090_v3, %v1094_v6  ;;  %v16662_v13 = vcombine.low %v1090_v3, %v1094_v6  ;;  %v1082_v15 = vld [vmem:[#allocation9 + $0x380] sm:$0xff]  ;;  %vm1098_vm3 = vsmask.f32 7424  ;;  %vm3535_vm6 = vcmask 1045504  }
 0x15d   : > { %v16665_v12 = vcombine.high %v1091_v7, %v1095_v8  ;;  %v16664_v14 = vcombine.low %v1091_v7, %v1095_v8  ;;  %v1086_v16 = vld [vmem:[#allocation9 + $0x3a0] sm:$0xff]  ;;  %v1083_v17 = vld [vmem:[#allocation9 + $0x388] sm:$0xff]  ;;  %946 = vrot.lane.b32.xlu1 %v16603_v4, %s21651_s6  ;;  %v903_v33 = vld [vmem:[%s22048_s21 + $0x18] sm:$0xff]  ;;  %vm2890_vm4 = vsmask.f32 6400  ;;  %s21654_s7 = smov 127  }
 0x15e   : > { %920 = vrot.lane.b32.xlu0 %v16599_v5, %s21652_s8  ;;  %v16655_v18 = vcombine.high %v1082_v15, %v1086_v16  ;;  %v1087_v19 = vld [vmem:[#allocation9 + $0x3a8] sm:$0xff]  ;;  %v900_v20 = vld [vmem:[%s22048_s21] sm:$0xff]  ;;  %1441 = vmatprep.subr.bf16.mxu0 %v16663_v11  ;;  %v16654_v26 = vcombine.low %v1082_v15, %v1086_v16  ;;  %908 = vst.msk [vmem:[#allocation2 + $0x1a] sm:$0xff] %vm904_vm0, %v903_v33  ;;  %v902_v36 = vld [vmem:[%s22048_s21 + $0x10] sm:$0xff]  ;;  %vm11719_vm8 = vcmask 130048   ;;  %vm14830_vm9 = vcmask 1043456  }
 0x15f   : > { %v1074_v21 = vld [vmem:[#allocation9 + $0x340] sm:$0xff]  ;;  %1494 = vmatprep.subr.bf16.mxu1 %v16665_v12  ;;  %v16657_v22 = vcombine.high %v1083_v17, %v1087_v19  ;;  %905 = vst.msk [vmem:[#allocation2 + $0x2] sm:$0xff] %vm904_vm0, %v900_v20  ;;  %v1075_v24 = vld [vmem:[#allocation9 + $0x348] sm:$0xff]  ;;  %1442 = vmatpush1.bf16.msra.mxu0 %v16662_v13  ;;  %v16656_v27 = vcombine.low %v1083_v17, %v1087_v19  ;;  %v16605_v37 = vld [vmem:[%s22048_s21 + $0x58] sm:$0xff]  ;;  %vm14826_vm10 = vcmask 64512   ;;  %s23966_s16 = sld [smem:[#allocation98_spill]] }
 0x160   : > { %v1078_v23 = vld [vmem:[#allocation9 + $0x360] sm:$0xff]  ;;  %v1079_v25 = vld [vmem:[#allocation9 + $0x368] sm:$0xff]  ;;  %1495 = vmatpush1.bf16.msra.mxu1 %v16664_v14  ;;  %1443 = vmatprep.subr.bf16.mxu0 %v16655_v18  ;;  %v16604_v38 = vld [vmem:[%s22048_s21 + $0x50] sm:$0xff]  ;;  %907 = vst.msk [vmem:[#allocation2 + $0x12] sm:$0xff] %vm904_vm0, %v902_v36  ;;  %vm21655_vm11 = vmmov 0   ;;  %vm16262_vm12 = vcmask 523264  }
 0x161   : > { %v901_v28 = vld [vmem:[%s22048_s21 + $0x8] sm:$0xff]  ;;  %1496 = vmatprep.subr.bf16.mxu1 %v16657_v22  ;;  %v16647_v29 = vcombine.high %v1074_v21, %v1078_v23  ;;  %v16649_v30 = vcombine.high %v1075_v24, %v1079_v25  ;;  %v1066_v31 = vld [vmem:[#allocation9 + $0x300] sm:$0xff]  ;;  %924 = vrot.lane.b32.xlu1 %v16601_v9, %s21652_s8  ;;  %v16646_v40 = vcombine.low %v1074_v21, %v1078_v23  ;;  %v22121_v48 = vld [vmem:[#allocation9 + $0x3d0] sm:$0xff]  ;;  %s23968_s25 = sld [smem:[#allocation99_spill]]  ;;  %s16308_s11 = scalar_lea.sflag [#allocation8], %s22044_s12 }
 0x162   : > { %906 = vst.msk [vmem:[#allocation2 + $0xa] sm:$0xff] %vm904_vm0, %v901_v28  ;;  %v1070_v32 = vld [vmem:[#allocation9 + $0x320] sm:$0xff]  ;;  %922 = vrot.lane.b32.xlu0 %v16600_v10, %s21652_s8  ;;  %v1067_v34 = vld [vmem:[#allocation9 + $0x308] sm:$0xff]  ;;  %v16648_v41 = vcombine.low %v1075_v24, %v1079_v25  ;;  %v22123_v52 = vld [vmem:[#allocation9 + $0x3f0] sm:$0xff]  ;;  %s18469_s8 = sshll.u32 %s23876_s28, 4  ;;  %p23969_p11 = scmp.ne.s32.totalorder %s23869_s27, 0 }
 0x163   : > { %v1071_v35 = vld [vmem:[#allocation9 + $0x328] sm:$0xff]  ;;  %1444 = vmatpush1.bf16.msra.mxu0 %v16654_v26  ;;  %v16639_v42 = vcombine.high %v1066_v31, %v1070_v32  ;;  %v1058_v44 = vld [vmem:[#allocation9 + $0x2c0] sm:$0xff]  ;;  %v16638_v49 = vcombine.low %v1066_v31, %v1070_v32  ;;  %v22125_v53 = vld [vmem:[#allocation9 + $0x3d8] sm:$0xff]  ;;  %v16666_v59 = vcombine.low %v22121_v48, %v22123_v52  ;;  %v16667_v21 = vcombine.high %v22121_v48, %v22123_v52  ;;  %s21656_s28 = smov [#allocation36]  }
 0x164   : > { %1497 = vmatpush1.bf16.msra.mxu1 %v16656_v27  ;;  %1445 = vmatprep.subr.bf16.mxu0 %v16647_v29  ;;  %v16641_v43 = vcombine.high %v1067_v34, %v1071_v35  ;;  %v1062_v45 = vld [vmem:[#allocation9 + $0x2e0] sm:$0xff]  ;;  %v1059_v46 = vld [vmem:[#allocation9 + $0x2c8] sm:$0xff]  ;;  %v16640_v50 = vcombine.low %v1067_v34, %v1071_v35  ;;  %v22127_v54 = vld [vmem:[#allocation9 + $0x3f8] sm:$0xff]  ;;  %s21525_s2 = sshll.u32 %s21656_s28, 4  ;;  %s21526_s2 = int_to_ptr.vmem [resolvable:$false] %s21525_s2 }
 0x165   : > { %1498 = vmatprep.subr.bf16.mxu1 %v16649_v30  ;;  %950 = vrot.lane.b32.xlu1 %v16605_v37, %s21651_s6  ;;  %v1063_v47 = vld [vmem:[#allocation9 + $0x2e8] sm:$0xff]  ;;  %v16631_v51 = vcombine.high %v1058_v44, %v1062_v45  ;;  %v1050_v56 = vld [vmem:[#allocation9 + $0x280] sm:$0xff]  ;;  %v16668_v60 = vcombine.low %v22125_v53, %v22127_v54  ;;  %v16630_v62 = vcombine.low %v1058_v44, %v1062_v45  ;;  %v1084_v44 = vld [vmem:[#allocation9 + $0x390] sm:$0xff]  ;;  %s21527_s30 = scalar_lea.vmem %s21526_s2, 32 }
 0x166   : > { %948 = vrot.lane.b32.xlu0 %v16604_v38, %s21651_s6  ;;  %v16633_v55 = vcombine.high %v1059_v46, %v1063_v47  ;;  %v1054_v57 = vld [vmem:[#allocation9 + $0x2a0] sm:$0xff]  ;;  %v1051_v58 = vld [vmem:[#allocation9 + $0x288] sm:$0xff]  ;;  %v16632_v63 = vcombine.low %v1059_v46, %v1063_v47  ;;  %v16669_v22 = vcombine.high %v22125_v53, %v22127_v54  ;;  %v1088_v45 = vld [vmem:[#allocation9 + $0x3b0] sm:$0xff] }
 0x167   : > { %1446 = vmatpush1.bf16.msra.mxu0 %v16646_v40  ;;  %v1055_v61 = vld [vmem:[#allocation9 + $0x2a8] sm:$0xff]  ;;  %v16623_v1 = vcombine.high %v1050_v56, %v1054_v57  ;;  %v1042_v3 = vld [vmem:[#allocation9 + $0x240] sm:$0xff]  ;;  %v16622_v7 = vcombine.low %v1050_v56, %v1054_v57  ;;  %v1085_v46 = vld [vmem:[#allocation9 + $0x398] sm:$0xff]  ;;  %s23736_s26 = scalar_lea.hbm %s23968_s25, %s18469_s8 }
 0x168   : > { %1499 = vmatpush1.bf16.msra.mxu1 %v16648_v41  ;;  %1447 = vmatprep.subr.bf16.mxu0 %v16639_v42  ;;  %v16625_v2 = vcombine.high %v1051_v58, %v1055_v61  ;;  %v1046_v4 = vld [vmem:[#allocation9 + $0x260] sm:$0xff]  ;;  %v1043_v5 = vld [vmem:[#allocation9 + $0x248] sm:$0xff]  ;;  %v16624_v8 = vcombine.low %v1051_v58, %v1055_v61 }
 0x169   : > { %1500 = vmatprep.subr.bf16.mxu1 %v16641_v43  ;;  %v1047_v6 = vld [vmem:[#allocation9 + $0x268] sm:$0xff]  ;;  %v16615_v9 = vcombine.high %v1042_v3, %v1046_v4  ;;  %v1034_v11 = vld [vmem:[#allocation9 + $0x200] sm:$0xff]  ;;  %v16614_v15 = vcombine.low %v1042_v3, %v1046_v4  ;;  %v16659_v3 = vcombine.high %v1084_v44, %v1088_v45 }
 0x16a   : > { %v16617_v10 = vcombine.high %v1043_v5, %v1047_v6  ;;  %v1038_v12 = vld [vmem:[#allocation9 + $0x220] sm:$0xff]  ;;  %v1035_v13 = vld [vmem:[#allocation9 + $0x208] sm:$0xff]  ;;  %v16616_v16 = vcombine.low %v1043_v5, %v1047_v6  ;;  %v1077_v5 = vld [vmem:[#allocation9 + $0x358] sm:$0xff] }
 0x16b   : > { %1448 = vmatpush1.bf16.msra.mxu0 %v16638_v49  ;;  %v1039_v14 = vld [vmem:[#allocation9 + $0x228] sm:$0xff]  ;;  %v16607_v17 = vcombine.high %v1034_v11, %v1038_v12  ;;  %v16606_v19 = vcombine.low %v1034_v11, %v1038_v12  ;;  %v1081_v6 = vld [vmem:[#allocation9 + $0x378] sm:$0xff]  ;;  %v16658_v11 = vcombine.low %v1084_v44, %v1088_v45 }
 0x16c   : > { %1501 = vmatpush1.bf16.msra.mxu1 %v16640_v50  ;;  %1449 = vmatprep.subr.bf16.mxu0 %v16631_v51  ;;  %v16609_v18 = vcombine.high %v1035_v13, %v1039_v14  ;;  %v16608_v20 = vcombine.low %v1035_v13, %v1039_v14  ;;  %v1089_v50 = vld [vmem:[#allocation9 + $0x3b8] sm:$0xff]  ;;  %v1068_v13 = vld [vmem:[#allocation9 + $0x310] sm:$0xff]  ;;  %v16652_v54 = vcombine.low %v1077_v5, %v1081_v6 }
 0x16d   : > { %1502 = vmatprep.subr.bf16.mxu1 %v16633_v55  ;;  %v16661_v4 = vcombine.high %v1085_v46, %v1089_v50  ;;  %v16660_v12 = vcombine.low %v1085_v46, %v1089_v50  ;;  %v1072_v14 = vld [vmem:[#allocation9 + $0x330] sm:$0xff]  ;;  %v1049_v45 = vld [vmem:[#allocation9 + $0x278] sm:$0xff] }
 0x16e   : > { %v1036_v50 = vld [vmem:[#allocation9 + $0x210] sm:$0xff] }
 0x16f   : > { %1450 = vmatpush1.bf16.msra.mxu0 %v16630_v62 }
 0x170   : > { %1503 = vmatpush1.bf16.msra.mxu1 %v16632_v63  ;;  %1451 = vmatprep.subr.bf16.mxu0 %v16623_v1  ;;  %v1076_v63 = vld [vmem:[#allocation9 + $0x350] sm:$0xff] }
 0x171   : > { %1504 = vmatprep.subr.bf16.mxu1 %v16625_v2  ;;  %v1080_v1 = vld [vmem:[#allocation9 + $0x370] sm:$0xff] }
 0x172   : > { %v16650_v53 = vcombine.low %v1076_v63, %v1080_v1 }
 0x173   : > { %1452 = vmatpush1.bf16.msra.mxu0 %v16622_v7 }
 0x174   : > { %1505 = vmatpush1.bf16.msra.mxu1 %v16624_v8  ;;  %1453 = vmatprep.subr.bf16.mxu0 %v16615_v9 }
 0x175   : > { %1506 = vmatprep.subr.bf16.mxu1 %v16617_v10 }
 0x177   : > { %1454 = vmatpush1.bf16.msra.mxu0 %v16614_v15  ;;  %v1069_v15 = vld [vmem:[#allocation9 + $0x318] sm:$0xff] }
 0x178   : > { %1507 = vmatpush1.bf16.msra.mxu1 %v16616_v16  ;;  %1455 = vmatprep.subr.bf16.mxu0 %v16607_v17  ;;  %v16651_v16 = vcombine.high %v1076_v63, %v1080_v1  ;;  %v16653_v17 = vcombine.high %v1077_v5, %v1081_v6  ;;  %v1024_v63 = vld [vmem:[#allocation9 + $0x1c0] sm:$0xff]  ;;  %v1029_v5 = vld [vmem:[#allocation9 + $0x1e8] sm:$0xff] }
 0x179   : > { %1508 = vmatprep.subr.bf16.mxu1 %v16609_v18  ;;  %v1073_v18 = vld [vmem:[#allocation9 + $0x338] sm:$0xff]  ;;  %v1028_v1 = vld [vmem:[#allocation9 + $0x1e0] sm:$0xff] }
 0x17b   : > { %1456 = vmatpush1.bf16.msra.mxu0 %v16606_v19 }
 0x17c   : > { %1509 = vmatpush1.bf16.msra.mxu1 %v16608_v20  ;;  %1547 = vmatprep.subr.bf16.mxu0 %v16667_v21  ;;  %v1064_v20 = vld [vmem:[#allocation9 + $0x2f0] sm:$0xff]  ;;  %v1061_v21 = vld [vmem:[#allocation9 + $0x2d8] sm:$0xff] }
 0x17d   : > { %1600 = vmatprep.subr.bf16.mxu1 %v16669_v22 }
 0x1cb   : > { %v945_v23 = vpop.permute.xlu1 %944 }
 0x1cc   : > { %v919_v24 = vpop.permute.xlu0 %918 }
 0x1cd   : > { %931 = vst.msk [vmem:[#allocation2 + $0x2] sm:$0xff] %vm930_vm1, %v919_v24  ;;  %v16645_v24 = vcombine.high %v1069_v15, %v1073_v18 }
 0x1ce   : > { %957 = vst.msk [vmem:[#allocation2 + $0x2] sm:$0xff] %vm956_vm2, %v945_v23  ;;  %v16643_v23 = vcombine.high %v1068_v13, %v1072_v14 }
 0x1cf   : > { %v947_v25 = vpop.permute.xlu1 %946 }
 0x1d0   : > { %v921_v26 = vpop.permute.xlu0 %920 }
 0x1d1   : > { %932 = vst.msk [vmem:[#allocation2 + $0xa] sm:$0xff] %vm930_vm1, %v921_v26 }
 0x1d2   : > { %958 = vst.msk [vmem:[#allocation2 + $0xa] sm:$0xff] %vm956_vm2, %v947_v25  ;;  %v1065_v25 = vld [vmem:[#allocation9 + $0x2f8] sm:$0xff] }
 0x1d3   : > { %v925_v27 = vpop.permute.xlu1 %924 }
 0x1d4   : > { %v923_v28 = vpop.permute.xlu0 %922  ;;  %934 = vst.msk [vmem:[#allocation2 + $0x1a] sm:$0xff] %vm930_vm1, %v925_v27  ;;  %v16642_v27 = vcombine.low %v1068_v13, %v1072_v14  ;;  %v1021_v14 = vld [vmem:[#allocation9 + $0x1a8] sm:$0xff] }
 0x1d5   : > { %933 = vst.msk [vmem:[#allocation2 + $0x12] sm:$0xff] %vm930_vm1, %v923_v28  ;;  %v961_v31 = vld [vmem:[#allocation2] sm:$0xff]  ;;  %v16644_v28 = vcombine.low %v1069_v15, %v1073_v18  ;;  %v16726_v15 = vcombine.low %v1024_v63, %v1028_v1  ;;  %v1012_v18 = vld [vmem:[#allocation9 + $0x160] sm:$0xff] }
 0x1d7   : > { %v951_v29 = vpop.permute.xlu1 %950 }
 0x1d8   : > { %v949_v30 = vpop.permute.xlu0 %948  ;;  %960 = vst.msk [vmem:[#allocation2 + $0x1a] sm:$0xff] %vm956_vm2, %v951_v29  ;;  %v1052_v29 = vld [vmem:[#allocation9 + $0x290] sm:$0xff] }
 0x1d9   : > { %v962_v32 = vld [vmem:[#allocation2 + $0x8] sm:$0xff]  ;;  %959 = vst.msk [vmem:[#allocation2 + $0x12] sm:$0xff] %vm956_vm2, %v949_v30  ;;  %v1056_v30 = vld [vmem:[#allocation9 + $0x2b0] sm:$0xff] }
 0x1da   : > { %v22141_v33 = vpack.c.bf16 %v962_v32, %v961_v31  ;;  %v1053_v31 = vld [vmem:[#allocation9 + $0x298] sm:$0xff]  ;;  %v16626_v46 = vcombine.low %v1052_v29, %v1056_v30 }
 0x1dc   : > { %v1100_v34 = vshrl.u32 %v22141_v33, 16  ;;  %v1102_v35 = vshll.u32 %v22141_v33, 16 }
 0x1de   : > { %v2891_v36 = vrot.slane %v1100_v34, 1  ;;  %v2892_v37 = vrot.slane %v1102_v35, 2  ;;  %v1104_v43 = vrot.slane %v1102_v35, 1  ;;  %v1057_v35 = vld [vmem:[#allocation9 + $0x2b8] sm:$0xff] }
 0x1df   : > { %v965_v41 = vld [vmem:[#allocation2 + $0x20] sm:$0xf]  ;;  %v16629_v44 = vcombine.high %v1053_v31, %v1057_v35 }
 0x1e0   : > { %v963_v38 = vld [vmem:[#allocation2 + $0x10] sm:$0xff]  ;;  %v964_v40 = vld [vmem:[#allocation2 + $0x18] sm:$0xff]  ;;  %v22147_v47 = vpack.c.bf16 %v965_v41, %v965_v41  ;;  %v2893_v49 = vor.u32 %v2892_v37, %v2891_v36  ;;  %v1105_v58 = vor.u32 %v1104_v43, %v1100_v34  ;;  %v16637_v34 = vcombine.high %v1061_v21, %v1065_v25  ;;  %v1045_v41 = vld [vmem:[#allocation9 + $0x258] sm:$0xff] }
 0x1e1   : > { %v22145_v42 = vpack.c.bf16 %v964_v40, %v963_v38  ;;  %v16636_v37 = vcombine.low %v1061_v21, %v1065_v25  ;;  %v1044_v38 = vld [vmem:[#allocation9 + $0x250] sm:$0xff]  ;;  %v16627_v43 = vcombine.high %v1052_v29, %v1056_v30  ;;  %v1004_v21 = vld [vmem:[#allocation9 + $0x120] sm:$0xff] }
 0x1e2   : > { %v1115_v56 = vshll.u32 %v22147_v47, 16  ;;  %v2898_v57 = vshrl.u32 %v22147_v47, 16  ;;  %v1048_v40 = vld [vmem:[#allocation9 + $0x270] sm:$0xff]  ;;  %v992_v29 = vld [vmem:[#allocation9 + $0xc0] sm:$0xff] }
 0x1e3   : > { %v1107_v51 = vshll.u32 %v22145_v42, 16  ;;  %v1111_v55 = vshrl.u32 %v22145_v42, 16  ;;  %v996_v30 = vld [vmem:[#allocation9 + $0xe0] sm:$0xff] }
 0x1e4   : > { %v2900_v8 = vrot.slane %v2898_v57, 1  ;;  %v2901_v10 = vrot.slane %v1115_v56, 2  ;;  %v16621_v57 = vcombine.high %v1045_v41, %v1049_v45 }
 0x1e5   : > { %v1109_v61 = vrot.slane %v1107_v51, 1  ;;  %v2895_v62 = vrot.slane %v1107_v51, 2  ;;  %v2894_v2 = vrot.slane %v1111_v55, 1  ;;  %v1040_v51 = vld [vmem:[#allocation9 + $0x230] sm:$0xff] }
 0x1e6   : > { %v2902_v52 = vor.u32 %v2901_v10, %v2900_v8  ;;  %v16610_v6 = vcombine.low %v1036_v50, %v1040_v51  ;;  %v1020_v10 = vld [vmem:[#allocation9 + $0x1a0] sm:$0xff] }
 0x1e7   : > { %v22154_v7 = vsel %vm1098_vm3, %v1105_v58, %v1109_v61  ;;  %v2896_v9 = vor.u32 %v2895_v62, %v2894_v2  ;;  %v1113_v48 = vor.u32 %v1111_v55, %v1109_v61  ;;  %v1037_v55 = vld [vmem:[#allocation9 + $0x218] sm:$0xff]  ;;  %v16618_v61 = vcombine.low %v1044_v38, %v1048_v40  ;;  %v1025_v2 = vld [vmem:[#allocation9 + $0x1c8] sm:$0xff] }
 0x1e8   : > { %1474 = vmatmul.mubr.bf16.vlgmr.msra.gmra.mxu0 %v22154_v7  ;;  %1527 = vmatmul.mubr.bf16.vlgmr.msra.gmra.mxu1 %v22154_v7  ;;  %v1041_v58 = vld [vmem:[#allocation9 + $0x238] sm:$0xff]  ;;  %v16620_v62 = vcombine.low %v1045_v41, %v1049_v45  ;;  %v16729_v13 = vcombine.high %v1025_v2, %v1029_v5  ;;  %v985_v41 = vld [vmem:[#allocation9 + $0x88] sm:$0xff] }
 0x1e9   : > { %1548 = vmatpush1.bf16.msra.mxu0 %v16666_v59  ;;  %1601 = vmatpush1.bf16.msra.mxu1 %v16668_v60  ;;  %v22165_v19 = vsel %vm2890_vm4, %v2893_v49, %v2896_v9  ;;  %v1117_v59 = vrot.slane %v1115_v56, 1  ;;  %v1060_v60 = vld [vmem:[#allocation9 + $0x2d0] sm:$0xff]  ;;  %v22170_v22 = vsel %vm2890_vm4, %v2896_v9, %v2902_v52  ;;  %v16628_v49 = vcombine.low %v1053_v31, %v1057_v35  ;;  %v1016_v9 = vld [vmem:[#allocation9 + $0x180] sm:$0xff]  ;;  %v993_v31 = vld [vmem:[#allocation9 + $0xc8] sm:$0xff] }
 0x1ea   : > { %1549 = vmatprep.subr.bf16.mxu0 %v16659_v3  ;;  %1602 = vmatprep.subr.bf16.mxu1 %v16661_v4  ;;  %v16635_v32 = vcombine.high %v1060_v60, %v1064_v20  ;;  %v16634_v36 = vcombine.low %v1060_v60, %v1064_v20  ;;  %v16619_v56 = vcombine.high %v1044_v38, %v1048_v40  ;;  %v1000_v20 = vld [vmem:[#allocation9 + $0x100] sm:$0xff]  ;;  %v997_v35 = vld [vmem:[#allocation9 + $0xe8] sm:$0xff] }
 0x1eb   : > { %1483 = vmatprep.mubr.bf16.mxu0 %v23825_v39  ;;  %1536 = vmatprep.mubr.bf16.mxu1 %v23825_v39  ;;  %v22173_v26 = vsel %vm1098_vm3, %v1113_v48, %v1117_v59  ;;  %v16611_v3 = vcombine.high %v1036_v50, %v1040_v51  ;;  %v16613_v4 = vcombine.high %v1037_v55, %v1041_v58  ;;  %v1009_v48 = vld [vmem:[#allocation9 + $0x148] sm:$0xff]  ;;  %v984_v38 = vld [vmem:[#allocation9 + $0x80] sm:$0xff] }
 0x1ec   : > { %v16612_v8 = vcombine.low %v1037_v55, %v1041_v58  ;;  %v16719_v52 = vcombine.high %v1016_v9, %v1020_v10  ;;  %v16718_v59 = vcombine.low %v1016_v9, %v1020_v10  ;;  %v988_v40 = vld [vmem:[#allocation9 + $0xa0] sm:$0xff]  ;;  %v989_v45 = vld [vmem:[#allocation9 + $0xa8] sm:$0xff]  ;;  %v1030_v9 = vld [vmem:[#allocation9 + $0x1f0] sm:$0xff] }
 0x1ed   : > { %1550 = vmatpush1.bf16.msra.mxu0 %v16658_v11  ;;  %1603 = vmatpush1.bf16.msra.mxu1 %v16660_v12  ;;  %v1017_v11 = vld [vmem:[#allocation9 + $0x188] sm:$0xff]  ;;  %v16727_v12 = vcombine.high %v1024_v63, %v1028_v1  ;;  %v980_v50 = vld [vmem:[#allocation9 + $0x60] sm:$0xff]  ;;  %v16687_v55 = vcombine.high %v984_v38, %v988_v40  ;;  %v16686_v58 = vcombine.low %v984_v38, %v988_v40  ;;  %v1027_v10 = vld [vmem:[#allocation9 + $0x1d8] sm:$0xff] }
 0x1ee   : > { %1551 = vmatprep.subr.bf16.mxu0 %v16651_v16  ;;  %1604 = vmatprep.subr.bf16.mxu1 %v16653_v17  ;;  %v16728_v16 = vcombine.low %v1025_v2, %v1029_v5  ;;  %v1008_v17 = vld [vmem:[#allocation9 + $0x140] sm:$0xff]  ;;  %v16720_v60 = vcombine.low %v1017_v11, %v1021_v14  ;;  %v977_v51 = vld [vmem:[#allocation9 + $0x48] sm:$0xff]  ;;  %v998_v38 = vld [vmem:[#allocation9 + $0xf0] sm:$0xff] }
 0x1ef   : > { %v972_v63 = vld [vmem:[#allocation9 + $0x20] sm:$0xff]  ;;  %v969_v1 = vld [vmem:[#allocation9 + $0x8] sm:$0xff]  ;;  %v995_v40 = vld [vmem:[#allocation9 + $0xd8] sm:$0xff] }
 0x1f0   : > { %1484 = vmatmul.mubr.bf16.gmra.mxu0 %v22173_v26  ;;  %1537 = vmatmul.mubr.bf16.gmra.mxu1 %v22173_v26 }
 0x1f1   : > { %1552 = vmatpush1.bf16.msra.mxu0 %v16650_v53  ;;  %1605 = vmatpush1.bf16.msra.mxu1 %v16652_v54  ;;  %v16721_v53 = vcombine.high %v1017_v11, %v1021_v14  ;;  %v1013_v54 = vld [vmem:[#allocation9 + $0x168] sm:$0xff] }
 0x1f2   : > { %1553 = vmatprep.subr.bf16.mxu0 %v16643_v23  ;;  %1606 = vmatprep.subr.bf16.mxu1 %v16645_v24  ;;  %v1001_v23 = vld [vmem:[#allocation9 + $0x108] sm:$0xff]  ;;  %v16711_v24 = vcombine.high %v1008_v17, %v1012_v18  ;;  %v16713_v25 = vcombine.high %v1009_v48, %v1013_v54 }
 0x1f3   : > { %1579 = vmatprep.mubr.bf16.mxu0 %v23825_v39  ;;  %1632 = vmatprep.mubr.bf16.mxu1 %v23825_v39 }
 0x1f5   : > { %1554 = vmatpush1.bf16.msra.mxu0 %v16642_v27  ;;  %1607 = vmatpush1.bf16.msra.mxu1 %v16644_v28  ;;  %v1005_v27 = vld [vmem:[#allocation9 + $0x128] sm:$0xff]  ;;  %v16710_v28 = vcombine.low %v1008_v17, %v1012_v18  ;;  %v1022_v17 = vld [vmem:[#allocation9 + $0x1b0] sm:$0xff]  ;;  %v1019_v18 = vld [vmem:[#allocation9 + $0x198] sm:$0xff] }
 0x1f6   : > { %1555 = vmatprep.subr.bf16.mxu0 %v16635_v32  ;;  %1608 = vmatprep.subr.bf16.mxu1 %v16637_v34  ;;  %v16703_v32 = vcombine.high %v1000_v20, %v1004_v21  ;;  %v16705_v34 = vcombine.high %v1001_v23, %v1005_v27 }
 0x1f9   : > { %1556 = vmatpush1.bf16.msra.mxu0 %v16634_v36  ;;  %1609 = vmatpush1.bf16.msra.mxu1 %v16636_v37  ;;  %v16702_v36 = vcombine.low %v1000_v20, %v1004_v21  ;;  %v16704_v37 = vcombine.low %v1001_v23, %v1005_v27  ;;  %v1014_v20 = vld [vmem:[#allocation9 + $0x170] sm:$0xff]  ;;  %v1011_v21 = vld [vmem:[#allocation9 + $0x158] sm:$0xff] }
 0x1fa   : > { %1557 = vmatprep.subr.bf16.mxu0 %v16627_v43  ;;  %1610 = vmatprep.subr.bf16.mxu1 %v16629_v44  ;;  %v16695_v43 = vcombine.high %v992_v29, %v996_v30  ;;  %v16697_v44 = vcombine.high %v993_v31, %v997_v35 }
 0x1fd   : > { %1558 = vmatpush1.bf16.msra.mxu0 %v16626_v46  ;;  %1611 = vmatpush1.bf16.msra.mxu1 %v16628_v49  ;;  %v16694_v46 = vcombine.low %v992_v29, %v996_v30  ;;  %v976_v49 = vld [vmem:[#allocation9 + $0x40] sm:$0xff]  ;;  %v1006_v29 = vld [vmem:[#allocation9 + $0x130] sm:$0xff]  ;;  %v1003_v30 = vld [vmem:[#allocation9 + $0x118] sm:$0xff] }
 0x1fe   : > { %1559 = vmatprep.subr.bf16.mxu0 %v16619_v56  ;;  %1612 = vmatprep.subr.bf16.mxu1 %v16621_v57  ;;  %v16689_v56 = vcombine.high %v985_v41, %v989_v45  ;;  %v981_v57 = vld [vmem:[#allocation9 + $0x68] sm:$0xff]  ;;  %v16679_v2 = vcombine.high %v976_v49, %v980_v50  ;;  %v16678_v5 = vcombine.low %v976_v49, %v980_v50  ;;  %v986_v50 = vld [vmem:[#allocation9 + $0x90] sm:$0xff] }
 0x201   : > { %1560 = vmatpush1.bf16.msra.mxu0 %v16618_v61  ;;  %1613 = vmatpush1.bf16.msra.mxu1 %v16620_v62  ;;  %v16688_v61 = vcombine.low %v985_v41, %v989_v45  ;;  %v968_v62 = vld [vmem:[#allocation9] sm:$0xff]  ;;  %v999_v41 = vld [vmem:[#allocation9 + $0xf8] sm:$0xff] }
 0x202   : > { %1561 = vmatprep.subr.bf16.mxu0 %v16611_v3  ;;  %1614 = vmatprep.subr.bf16.mxu1 %v16613_v4  ;;  %v16681_v3 = vcombine.high %v977_v51, %v981_v57  ;;  %v973_v4 = vld [vmem:[#allocation9 + $0x28] sm:$0xff]  ;;  %v16671_v11 = vcombine.high %v968_v62, %v972_v63  ;;  %v16670_v14 = vcombine.low %v968_v62, %v972_v63  ;;  %v978_v63 = vld [vmem:[#allocation9 + $0x50] sm:$0xff] }
 0x203   : > { %v16701_v49 = vcombine.high %v995_v40, %v999_v41 }
 0x205   : > { %1562 = vmatpush1.bf16.msra.mxu0 %v16610_v6  ;;  %1615 = vmatpush1.bf16.msra.mxu1 %v16612_v8  ;;  %v16680_v6 = vcombine.low %v977_v51, %v981_v57  ;;  %v1026_v8 = vld [vmem:[#allocation9 + $0x1d0] sm:$0xff] }
 0x206   : > { %1973 = vmatprep.subr.bf16.mxu0 %v16727_v12  ;;  %2026 = vmatprep.subr.bf16.mxu1 %v16729_v13  ;;  %v16673_v12 = vcombine.high %v969_v1, %v973_v4  ;;  %v1031_v13 = vld [vmem:[#allocation9 + $0x1f8] sm:$0xff]  ;;  %v990_v51 = vld [vmem:[#allocation9 + $0xb0] sm:$0xff] }
 0x208   : > { %1580 = vmatmul.mubr.bf16.vlgmr.msra.gmra.mxu0 %v22154_v7  ;;  %1633 = vmatmul.mubr.bf16.vlgmr.msra.gmra.mxu1 %v22154_v7  ;;  %v16712_v7 = vcombine.low %v1009_v48, %v1013_v54  ;;  %v16731_v48 = vcombine.high %v1026_v8, %v1030_v9  ;;  %v16730_v54 = vcombine.low %v1026_v8, %v1030_v9  ;;  %v974_v8 = vld [vmem:[#allocation9 + $0x30] sm:$0xff] }
 0x209   : > { %1974 = vmatpush1.bf16.msra.mxu0 %v16726_v15  ;;  %2027 = vmatpush1.bf16.msra.mxu1 %v16728_v16  ;;  %v16672_v15 = vcombine.low %v969_v1, %v973_v4  ;;  %v1018_v16 = vld [vmem:[#allocation9 + $0x190] sm:$0xff]  ;;  %v16690_v4 = vcombine.low %v986_v50, %v990_v51 }
 0x20a   : > { %1975 = vmatprep.subr.bf16.mxu0 %v16719_v52  ;;  %2028 = vmatprep.subr.bf16.mxu1 %v16721_v53  ;;  %v16733_v52 = vcombine.high %v1027_v10, %v1031_v13  ;;  %v1023_v53 = vld [vmem:[#allocation9 + $0x1b8] sm:$0xff]  ;;  %v16723_v23 = vcombine.high %v1018_v16, %v1022_v17  ;;  %v16722_v27 = vcombine.low %v1018_v16, %v1022_v17  ;;  %v982_v1 = vld [vmem:[#allocation9 + $0x70] sm:$0xff]  ;;  %v2246_v16 = vld [vmem:[#allocation9 + $0x5e0] sm:$0xff] }
 0x20b   : > { %1589 = vmatprep.mubr.bf16.mxu0 %v23825_v39  ;;  %1642 = vmatprep.mubr.bf16.mxu1 %v23825_v39  ;;  %v16683_v9 = vcombine.high %v978_v63, %v982_v1 }
 0x20d   : > { %1976 = vmatpush1.bf16.msra.mxu0 %v16718_v59  ;;  %2029 = vmatpush1.bf16.msra.mxu1 %v16720_v60  ;;  %v16732_v59 = vcombine.low %v1027_v10, %v1031_v13  ;;  %v1010_v60 = vld [vmem:[#allocation9 + $0x150] sm:$0xff]  ;;  %v16682_v13 = vcombine.low %v978_v63, %v982_v1  ;;  %v2207_v63 = vld [vmem:[#allocation9 + $0x4a8] sm:$0xff] }
 0x20e   : > { %1977 = vmatprep.subr.bf16.mxu0 %v16711_v24  ;;  %2030 = vmatprep.subr.bf16.mxu1 %v16713_v25  ;;  %v16725_v24 = vcombine.high %v1019_v18, %v1023_v53  ;;  %v1015_v25 = vld [vmem:[#allocation9 + $0x178] sm:$0xff] }
 0x210   : > { %1590 = vmatmul.mubr.bf16.gmra.mxu0 %v22173_v26  ;;  %1643 = vmatmul.mubr.bf16.gmra.mxu1 %v22173_v26  ;;  %v16696_v26 = vcombine.low %v993_v31, %v997_v35  ;;  %v16715_v31 = vcombine.high %v1010_v60, %v1014_v20  ;;  %v16714_v35 = vcombine.low %v1010_v60, %v1014_v20  ;;  %v2238_v60 = vld [vmem:[#allocation9 + $0x5a0] sm:$0xff] }
 0x211   : > { %1978 = vmatpush1.bf16.msra.mxu0 %v16710_v28  ;;  %2031 = vmatpush1.bf16.msra.mxu1 %v16712_v7  ;;  %v16724_v28 = vcombine.low %v1019_v18, %v1023_v53  ;;  %v1002_v7 = vld [vmem:[#allocation9 + $0x110] sm:$0xff] }
 0x212   : > { %1979 = vmatprep.subr.bf16.mxu0 %v16703_v32  ;;  %2032 = vmatprep.subr.bf16.mxu1 %v16705_v34  ;;  %v16717_v32 = vcombine.high %v1011_v21, %v1015_v25  ;;  %v1007_v34 = vld [vmem:[#allocation9 + $0x138] sm:$0xff]  ;;  %v16706_v45 = vcombine.low %v1002_v7, %v1006_v29 }
 0x213   : > { %2005 = vmatprep.mubr.bf16.mxu0 %v23825_v39  ;;  %2058 = vmatprep.mubr.bf16.mxu1 %v23825_v39 }
 0x215   : > { %1980 = vmatpush1.bf16.msra.mxu0 %v16702_v36  ;;  %2033 = vmatpush1.bf16.msra.mxu1 %v16704_v37  ;;  %v16716_v36 = vcombine.low %v1011_v21, %v1015_v25  ;;  %v994_v37 = vld [vmem:[#allocation9 + $0xd0] sm:$0xff] }
 0x216   : > { %1981 = vmatprep.subr.bf16.mxu0 %v16695_v43  ;;  %2034 = vmatprep.subr.bf16.mxu1 %v16697_v44  ;;  %v16707_v43 = vcombine.high %v1002_v7, %v1006_v29  ;;  %v16709_v44 = vcombine.high %v1003_v30, %v1007_v34  ;;  %v16698_v57 = vcombine.low %v994_v37, %v998_v38  ;;  %v2230_v7 = vld [vmem:[#allocation9 + $0x560] sm:$0xff]  ;;  %v2227_v29 = vld [vmem:[#allocation9 + $0x548] sm:$0xff] }
 0x219   : > { %1982 = vmatpush1.bf16.msra.mxu0 %v16694_v46  ;;  %2035 = vmatpush1.bf16.msra.mxu1 %v16696_v26  ;;  %v16708_v46 = vcombine.low %v1003_v30, %v1007_v34  ;;  %v16699_v26 = vcombine.high %v994_v37, %v998_v38  ;;  %v2231_v30 = vld [vmem:[#allocation9 + $0x568] sm:$0xff]  ;;  %v2222_v37 = vld [vmem:[#allocation9 + $0x520] sm:$0xff] }
 0x21a   : > { %1983 = vmatprep.subr.bf16.mxu0 %v16687_v55  ;;  %2036 = vmatprep.subr.bf16.mxu1 %v16689_v56  ;;  %v987_v55 = vld [vmem:[#allocation9 + $0x98] sm:$0xff]  ;;  %v2219_v38 = vld [vmem:[#allocation9 + $0x508] sm:$0xff] }
 0x21b   : > { %v991_v56 = vld [vmem:[#allocation9 + $0xb8] sm:$0xff] }
 0x21c   : > { %v16693_v62 = vcombine.high %v987_v55, %v991_v56 }
 0x21d   : > { %1984 = vmatpush1.bf16.msra.mxu0 %v16686_v58  ;;  %2037 = vmatpush1.bf16.msra.mxu1 %v16688_v61  ;;  %v16700_v58 = vcombine.low %v995_v40, %v999_v41  ;;  %v16691_v61 = vcombine.high %v986_v50, %v990_v51  ;;  %v2223_v40 = vld [vmem:[#allocation9 + $0x528] sm:$0xff] }
 0x21e   : > { %1985 = vmatprep.subr.bf16.mxu0 %v16679_v2  ;;  %2038 = vmatprep.subr.bf16.mxu1 %v16681_v3  ;;  %v979_v2 = vld [vmem:[#allocation9 + $0x58] sm:$0xff]  ;;  %v2215_v50 = vld [vmem:[#allocation9 + $0x4e8] sm:$0xff] }
 0x21f   : > { %v983_v3 = vld [vmem:[#allocation9 + $0x78] sm:$0xff] }
 0x220   : > { %v16685_v10 = vcombine.high %v979_v2, %v983_v3 }
 0x221   : > { %1986 = vmatpush1.bf16.msra.mxu0 %v16678_v5  ;;  %2039 = vmatpush1.bf16.msra.mxu1 %v16680_v6  ;;  %v16692_v5 = vcombine.low %v987_v55, %v991_v56  ;;  %v970_v6 = vld [vmem:[#allocation9 + $0x10] sm:$0xff]  ;;  %v16769_v55 = vcombine.high %v2219_v38, %v2223_v40 }
 0x222   : > { %1987 = vmatprep.subr.bf16.mxu0 %v16671_v11  ;;  %2040 = vmatprep.subr.bf16.mxu1 %v16673_v12  ;;  %v971_v11 = vld [vmem:[#allocation9 + $0x18] sm:$0xff]  ;;  %v16675_v17 = vcombine.high %v970_v6, %v974_v8  ;;  %v16674_v53 = vcombine.low %v970_v6, %v974_v8  ;;  %v2194_v8 = vld [vmem:[#allocation9 + $0x440] sm:$0xff] }
 0x223   : > { %v975_v12 = vld [vmem:[#allocation9 + $0x38] sm:$0xff] }
 0x224   : > { %v16677_v18 = vcombine.high %v971_v11, %v975_v12 }
 0x225   : > { %1988 = vmatpush1.bf16.msra.mxu0 %v16670_v14  ;;  %2041 = vmatpush1.bf16.msra.mxu1 %v16672_v15  ;;  %v16684_v14 = vcombine.low %v979_v2, %v983_v3  ;;  %v2242_v15 = vld [vmem:[#allocation9 + $0x5c0] sm:$0xff] }
 0x226   : > { %2079 = vmatprep.subr.bf16.mxu0 %v16731_v48  ;;  %2132 = vmatprep.subr.bf16.mxu1 %v16733_v52  ;;  %v2243_v48 = vld [vmem:[#allocation9 + $0x5c8] sm:$0xff]  ;;  %v16791_v20 = vcombine.high %v2242_v15, %v2246_v16  ;;  %v16790_v25 = vcombine.low %v2242_v15, %v2246_v16  ;;  %v2190_v15 = vld [vmem:[#allocation9 + $0x420] sm:$0xff] }
 0x227   : > { %v2247_v52 = vld [vmem:[#allocation9 + $0x5e8] sm:$0xff] }
 0x228   : > { %2006 = vmatmul.mubr.bf16.vlgmr.msra.gmra.mxu0 %v22141_v33  ;;  %2059 = vmatmul.mubr.bf16.vlgmr.msra.gmra.mxu1 %v22141_v33  ;;  %v16793_v21 = vcombine.high %v2243_v48, %v2247_v52 }
 0x229   : > { %2080 = vmatpush1.bf16.msra.mxu0 %v16730_v54  ;;  %2133 = vmatpush1.bf16.msra.mxu1 %v16732_v59  ;;  %v16676_v54 = vcombine.low %v971_v11, %v975_v12  ;;  %v2234_v59 = vld [vmem:[#allocation9 + $0x580] sm:$0xff]  ;;  %v2199_v11 = vld [vmem:[#allocation9 + $0x468] sm:$0xff] }
 0x22a   : > { %2081 = vmatprep.subr.bf16.mxu0 %v16723_v23  ;;  %2134 = vmatprep.subr.bf16.mxu1 %v16725_v24  ;;  %v2235_v23 = vld [vmem:[#allocation9 + $0x588] sm:$0xff]  ;;  %v16782_v34 = vcombine.low %v2234_v59, %v2238_v60 }
 0x22b   : > { %2015 = vmatprep.mubr.bf16.mxu0 %v23825_v39  ;;  %2068 = vmatprep.mubr.bf16.mxu1 %v23825_v39  ;;  %v2239_v24 = vld [vmem:[#allocation9 + $0x5a8] sm:$0xff] }
 0x22d   : > { %2082 = vmatpush1.bf16.msra.mxu0 %v16722_v27  ;;  %2135 = vmatpush1.bf16.msra.mxu1 %v16724_v28  ;;  %v16792_v27 = vcombine.low %v2243_v48, %v2247_v52  ;;  %v2226_v28 = vld [vmem:[#allocation9 + $0x540] sm:$0xff]  ;;  %v2191_v48 = vld [vmem:[#allocation9 + $0x428] sm:$0xff] }
 0x22e   : > { %2083 = vmatprep.subr.bf16.mxu0 %v16715_v31  ;;  %2136 = vmatprep.subr.bf16.mxu1 %v16717_v32  ;;  %v16783_v31 = vcombine.high %v2234_v59, %v2238_v60  ;;  %v16785_v32 = vcombine.high %v2235_v23, %v2239_v24  ;;  %v16775_v41 = vcombine.high %v2226_v28, %v2230_v7  ;;  %v2248_v59 = vld [vmem:[#allocation9 + $0x5f0] sm:$0xff] }
 0x230   : > { %2016 = vmatmul.mubr.bf16.gmra.mxu0 %v22145_v42  ;;  %2069 = vmatmul.mubr.bf16.gmra.mxu1 %v22145_v42 }
 0x231   : > { %2084 = vmatpush1.bf16.msra.mxu0 %v16714_v35  ;;  %2137 = vmatpush1.bf16.msra.mxu1 %v16716_v36  ;;  %v16784_v35 = vcombine.low %v2235_v23, %v2239_v24  ;;  %v2218_v36 = vld [vmem:[#allocation9 + $0x500] sm:$0xff]  ;;  %v2249_v23 = vld [vmem:[#allocation9 + $0x5f8] sm:$0xff] }
 0x232   : > { %2085 = vmatprep.subr.bf16.mxu0 %v16707_v43  ;;  %2138 = vmatprep.subr.bf16.mxu1 %v16709_v44  ;;  %v16777_v43 = vcombine.high %v2227_v29, %v2231_v30  ;;  %v16774_v44 = vcombine.low %v2226_v28, %v2230_v7  ;;  %v16767_v51 = vcombine.high %v2218_v36, %v2222_v37  ;;  %v2240_v28 = vld [vmem:[#allocation9 + $0x5b0] sm:$0xff] }
 0x233   : > { %2111 = vmatprep.mubr.bf16.mxu0 %v23825_v39  ;;  %2164 = vmatprep.mubr.bf16.mxu1 %v23825_v39  ;;  %v16766_v56 = vcombine.low %v2218_v36, %v2222_v37  ;;  %v2228_v37 = vld [vmem:[#allocation9 + $0x550] sm:$0xff] }
 0x235   : > { %2086 = vmatpush1.bf16.msra.mxu0 %v16706_v45  ;;  %2139 = vmatpush1.bf16.msra.mxu1 %v16708_v46  ;;  %v16776_v45 = vcombine.low %v2227_v29, %v2231_v30  ;;  %v2210_v46 = vld [vmem:[#allocation9 + $0x4c0] sm:$0xff]  ;;  %v2237_v30 = vld [vmem:[#allocation9 + $0x598] sm:$0xff] }
 0x236   : > { %2087 = vmatprep.subr.bf16.mxu0 %v16699_v26  ;;  %2140 = vmatprep.subr.bf16.mxu1 %v16701_v49  ;;  %v2214_v26 = vld [vmem:[#allocation9 + $0x4e0] sm:$0xff]  ;;  %v2211_v49 = vld [vmem:[#allocation9 + $0x4c8] sm:$0xff] }
 0x237   : > { %v16759_v1 = vcombine.high %v2210_v46, %v2214_v26  ;;  %v16761_v2 = vcombine.high %v2211_v49, %v2215_v50  ;;  %v16758_v3 = vcombine.low %v2210_v46, %v2214_v26 }
 0x239   : > { %2088 = vmatpush1.bf16.msra.mxu0 %v16698_v57  ;;  %2141 = vmatpush1.bf16.msra.mxu1 %v16700_v58  ;;  %v16768_v57 = vcombine.low %v2219_v38, %v2223_v40  ;;  %v2202_v58 = vld [vmem:[#allocation9 + $0x480] sm:$0xff]  ;;  %v2232_v38 = vld [vmem:[#allocation9 + $0x570] sm:$0xff]  ;;  %v2229_v40 = vld [vmem:[#allocation9 + $0x558] sm:$0xff] }
 0x23a   : > { %2089 = vmatprep.subr.bf16.mxu0 %v16691_v61  ;;  %2142 = vmatprep.subr.bf16.mxu1 %v16693_v62  ;;  %v2206_v61 = vld [vmem:[#allocation9 + $0x4a0] sm:$0xff]  ;;  %v2203_v62 = vld [vmem:[#allocation9 + $0x488] sm:$0xff] }
 0x23b   : > { %v16753_v6 = vcombine.high %v2203_v62, %v2207_v63  ;;  %v16750_v12 = vcombine.low %v2202_v58, %v2206_v61 }
 0x23d   : > { %2090 = vmatpush1.bf16.msra.mxu0 %v16690_v4  ;;  %2143 = vmatpush1.bf16.msra.mxu1 %v16692_v5  ;;  %v16760_v4 = vcombine.low %v2211_v49, %v2215_v50  ;;  %v16751_v5 = vcombine.high %v2202_v58, %v2206_v61  ;;  %v2220_v49 = vld [vmem:[#allocation9 + $0x510] sm:$0xff]  ;;  %v2257_v58 = vrot.slane %v22147_v47, 1  ;;  %v16778_v61 = vcombine.low %v2228_v37, %v2232_v38 }
 0x23e   : > { %2091 = vmatprep.subr.bf16.mxu0 %v16683_v9  ;;  %2144 = vmatprep.subr.bf16.mxu1 %v16685_v10  ;;  %v2198_v9 = vld [vmem:[#allocation9 + $0x460] sm:$0xff]  ;;  %v2195_v10 = vld [vmem:[#allocation9 + $0x448] sm:$0xff]  ;;  %v2224_v50 = vld [vmem:[#allocation9 + $0x530] sm:$0xff] }
 0x23f   : > { %v16743_v16 = vcombine.high %v2194_v8, %v2198_v9  ;;  %v16742_v52 = vcombine.low %v2194_v8, %v2198_v9  ;;  %v16770_v8 = vcombine.low %v2220_v49, %v2224_v50 }
 0x241   : > { %2092 = vmatpush1.bf16.msra.mxu0 %v16682_v13  ;;  %2145 = vmatpush1.bf16.msra.mxu1 %v16684_v14  ;;  %v16752_v13 = vcombine.low %v2203_v62, %v2207_v63  ;;  %v2186_v14 = vld [vmem:[#allocation9 + $0x400] sm:$0xff]  ;;  %v2212_v63 = vld [vmem:[#allocation9 + $0x4d0] sm:$0xff] }
 0x242   : > { %2093 = vmatprep.subr.bf16.mxu0 %v16675_v17  ;;  %2146 = vmatprep.subr.bf16.mxu1 %v16677_v18  ;;  %v16745_v17 = vcombine.high %v2195_v10, %v2199_v11  ;;  %v2187_v18 = vld [vmem:[#allocation9 + $0x408] sm:$0xff]  ;;  %v16735_v60 = vcombine.high %v2186_v14, %v2190_v15  ;;  %v16734_v24 = vcombine.low %v2186_v14, %v2190_v15  ;;  %v2209_v15 = vld [vmem:[#allocation9 + $0x4b8] sm:$0xff] }
 0x245   : > { %2094 = vmatpush1.bf16.msra.mxu0 %v16674_v53  ;;  %2147 = vmatpush1.bf16.msra.mxu1 %v16676_v54  ;;  %v16744_v53 = vcombine.low %v2195_v10, %v2199_v11  ;;  %v2244_v54 = vld [vmem:[#allocation9 + $0x5d0] sm:$0xff] }
 0x246   : > { %2581 = vmatprep.subr.bf16.mxu0 %v16791_v20  ;;  %2634 = vmatprep.subr.bf16.mxu1 %v16793_v21  ;;  %v16737_v20 = vcombine.high %v2187_v18, %v2191_v48  ;;  %v2245_v21 = vld [vmem:[#allocation9 + $0x5d8] sm:$0xff]  ;;  %v16795_v7 = vcombine.high %v2244_v54, %v2248_v59  ;;  %v2204_v10 = vld [vmem:[#allocation9 + $0x490] sm:$0xff] }
 0x247   : > { %v16797_v29 = vcombine.high %v2245_v21, %v2249_v23  ;;  %v16796_v36 = vcombine.low %v2245_v21, %v2249_v23  ;;  %v2208_v11 = vld [vmem:[#allocation9 + $0x4b0] sm:$0xff] }
 0x248   : > { %2112 = vmatmul.mubr.bf16.vlgmr.msra.gmra.mxu0 %v22141_v33  ;;  %2165 = vmatmul.mubr.bf16.vlgmr.msra.gmra.mxu1 %v22141_v33  ;;  %v2188_v21 = vld [vmem:[#allocation9 + $0x410] sm:$0xff] }
 0x249   : > { %2582 = vmatpush1.bf16.msra.mxu0 %v16790_v25  ;;  %2635 = vmatpush1.bf16.msra.mxu1 %v16792_v27  ;;  %v16736_v25 = vcombine.low %v2187_v18, %v2191_v48  ;;  %v2236_v27 = vld [vmem:[#allocation9 + $0x590] sm:$0xff]  ;;  %v16755_v18 = vcombine.high %v2204_v10, %v2208_v11 }
 0x24a   : > { %2583 = vmatprep.subr.bf16.mxu0 %v16783_v31  ;;  %2636 = vmatprep.subr.bf16.mxu1 %v16785_v32  ;;  %v2241_v31 = vld [vmem:[#allocation9 + $0x5b8] sm:$0xff]  ;;  %v2255_v32 = vrot.slane %v22145_v42, 1  ;;  %v16786_v46 = vcombine.low %v2236_v27, %v2240_v28  ;;  %v2192_v23 = vld [vmem:[#allocation9 + $0x430] sm:$0xff] }
 0x24b   : > { %2121 = vmatprep.mubr.bf16.mxu0 %v23825_v39  ;;  %2174 = vmatprep.mubr.bf16.mxu1 %v23825_v39  ;;  %v16788_v26 = vcombine.low %v2237_v30, %v2241_v31 }
 0x24d   : > { %2584 = vmatpush1.bf16.msra.mxu0 %v16782_v34  ;;  %2637 = vmatpush1.bf16.msra.mxu1 %v16784_v35  ;;  %v2254_v34 = vrot.slane %v22141_v33, 1  ;;  %v16794_v35 = vcombine.low %v2244_v54, %v2248_v59  ;;  %v2197_v54 = vld [vmem:[#allocation9 + $0x458] sm:$0xff] }
 0x24e   : > { %2585 = vmatprep.subr.bf16.mxu0 %v16775_v41  ;;  %2638 = vmatprep.subr.bf16.mxu1 %v16777_v43  ;;  %v2233_v41 = vld [vmem:[#allocation9 + $0x578] sm:$0xff]  ;;  %v16787_v43 = vcombine.high %v2236_v27, %v2240_v28 }
 0x24f   : > { %v16780_v62 = vcombine.low %v2229_v40, %v2233_v41  ;;  %v2201_v59 = vld [vmem:[#allocation9 + $0x478] sm:$0xff] }
 0x250   : > { %2122 = vmatmul.mubr.bf16.gmra.mxu0 %v22145_v42  ;;  %2175 = vmatmul.mubr.bf16.gmra.mxu1 %v22145_v42  ;;  %v2189_v27 = vld [vmem:[#allocation9 + $0x418] sm:$0xff] }
 0x251   : > { %2586 = vmatpush1.bf16.msra.mxu0 %v16774_v44  ;;  %2639 = vmatpush1.bf16.msra.mxu1 %v16776_v45  ;;  %v16789_v44 = vcombine.high %v2237_v30, %v2241_v31  ;;  %v22206_v45 = vsel %vm2253_vm5, %v2254_v34, %v2255_v32  ;;  %v2193_v28 = vld [vmem:[#allocation9 + $0x438] sm:$0xff]  ;;  %v2882_v30 = vld [vmem:[#allocation9 + $0x7c0] sm:$0xff] }
 0x252   : > { %2587 = vmatprep.subr.bf16.mxu0 %v16767_v51  ;;  %2640 = vmatprep.subr.bf16.mxu1 %v16769_v55  ;;  %v2221_v51 = vld [vmem:[#allocation9 + $0x518] sm:$0xff]  ;;  %v16779_v55 = vcombine.high %v2228_v37, %v2232_v38  ;;  %v2886_v31 = vld [vmem:[#allocation9 + $0x7e0] sm:$0xff]  ;;  %v16741_v34 = vcombine.high %v2189_v27, %v2193_v28  ;;  %v16738_v37 = vcombine.low %v2188_v21, %v2192_v23 }
 0x253   : > { %2613 = vmatprep.mubr.bf16.mxu0 %v23825_v39  ;;  %2666 = vmatprep.mubr.bf16.mxu1 %v23825_v39  ;;  %v16740_v38 = vcombine.low %v2189_v27, %v2193_v28 }
 0x255   : > { %2588 = vmatpush1.bf16.msra.mxu0 %v16766_v56  ;;  %2641 = vmatpush1.bf16.msra.mxu1 %v16768_v57  ;;  %v16781_v56 = vcombine.high %v2229_v40, %v2233_v41  ;;  %v2225_v57 = vld [vmem:[#allocation9 + $0x538] sm:$0xff]  ;;  %v2874_v40 = vld [vmem:[#allocation9 + $0x780] sm:$0xff] }
 0x256   : > { %2589 = vmatprep.subr.bf16.mxu0 %v16759_v1  ;;  %2642 = vmatprep.subr.bf16.mxu1 %v16761_v2  ;;  %v2216_v1 = vld [vmem:[#allocation9 + $0x4f0] sm:$0xff]  ;;  %v2213_v2 = vld [vmem:[#allocation9 + $0x4d8] sm:$0xff]  ;;  %v16772_v9 = vcombine.low %v2221_v51, %v2225_v57  ;;  %v2878_v41 = vld [vmem:[#allocation9 + $0x7a0] sm:$0xff] }
 0x259   : > { %2590 = vmatpush1.bf16.msra.mxu0 %v16758_v3  ;;  %2643 = vmatpush1.bf16.msra.mxu1 %v16760_v4  ;;  %v16771_v3 = vcombine.high %v2220_v49, %v2224_v50  ;;  %v16773_v4 = vcombine.high %v2221_v51, %v2225_v57  ;;  %v16854_v49 = vcombine.low %v2882_v30, %v2886_v31  ;;  %v2866_v51 = vld [vmem:[#allocation9 + $0x740] sm:$0xff]  ;;  %v2871_v57 = vld [vmem:[#allocation9 + $0x768] sm:$0xff] }
 0x25a   : > { %2591 = vmatprep.subr.bf16.mxu0 %v16751_v5  ;;  %2644 = vmatprep.subr.bf16.mxu1 %v16753_v6  ;;  %v2217_v5 = vld [vmem:[#allocation9 + $0x4f8] sm:$0xff]  ;;  %v22214_v6 = vsel %vm2253_vm5, %v2255_v32, %v2257_v58  ;;  %v16739_v32 = vcombine.high %v2188_v21, %v2192_v23  ;;  %v16847_v58 = vcombine.high %v2874_v40, %v2878_v41  ;;  %v2838_v21 = vld [vmem:[#allocation9 + $0x660] sm:$0xff]  ;;  %v2835_v23 = vld [vmem:[#allocation9 + $0x648] sm:$0xff] }
 0x25b   : > { %v16765_v14 = vcombine.high %v2213_v2, %v2217_v5 }
 0x25d   : > { %2592 = vmatpush1.bf16.msra.mxu0 %v16750_v12  ;;  %2645 = vmatpush1.bf16.msra.mxu1 %v16752_v13  ;;  %v2205_v12 = vld [vmem:[#allocation9 + $0x498] sm:$0xff]  ;;  %v16763_v13 = vcombine.high %v2212_v63, %v2216_v1 }
 0x25e   : > { %2593 = vmatprep.subr.bf16.mxu0 %v16743_v16  ;;  %2646 = vmatprep.subr.bf16.mxu1 %v16745_v17  ;;  %v16762_v16 = vcombine.low %v2212_v63, %v2216_v1  ;;  %v16764_v17 = vcombine.low %v2213_v2, %v2217_v5  ;;  %v16757_v48 = vcombine.high %v2205_v12, %v2209_v15  ;;  %v2858_v1 = vld [vmem:[#allocation9 + $0x700] sm:$0xff] }
 0x25f   : > { %v2862_v2 = vld [vmem:[#allocation9 + $0x720] sm:$0xff] }
 0x261   : > { %2594 = vmatpush1.bf16.msra.mxu0 %v16742_v52  ;;  %2647 = vmatpush1.bf16.msra.mxu1 %v16744_v53  ;;  %v2196_v52 = vld [vmem:[#allocation9 + $0x450] sm:$0xff] }
 0x262   : > { %2595 = vmatprep.subr.bf16.mxu0 %v16735_v60  ;;  %2648 = vmatprep.subr.bf16.mxu1 %v16737_v20  ;;  %v2200_v53 = vld [vmem:[#allocation9 + $0x470] sm:$0xff]  ;;  %v16754_v60 = vcombine.low %v2204_v10, %v2208_v11  ;;  %v16756_v20 = vcombine.low %v2205_v12, %v2209_v15  ;;  %v2850_v10 = vld [vmem:[#allocation9 + $0x6c0] sm:$0xff]  ;;  %v2851_v12 = vld [vmem:[#allocation9 + $0x6c8] sm:$0xff] }
 0x263   : > { %v2854_v11 = vld [vmem:[#allocation9 + $0x6e0] sm:$0xff] }
 0x265   : > { %2596 = vmatpush1.bf16.msra.mxu0 %v16734_v24  ;;  %2649 = vmatpush1.bf16.msra.mxu1 %v16736_v25  ;;  %v16747_v24 = vcombine.high %v2196_v52, %v2200_v53  ;;  %v16749_v25 = vcombine.high %v2197_v54, %v2201_v59 }
 0x266   : > { %2687 = vmatprep.subr.bf16.mxu0 %v16795_v7  ;;  %2740 = vmatprep.subr.bf16.mxu1 %v16797_v29  ;;  %v16746_v7 = vcombine.low %v2196_v52, %v2200_v53  ;;  %v16748_v29 = vcombine.low %v2197_v54, %v2201_v59  ;;  %v2843_v52 = vld [vmem:[#allocation9 + $0x688] sm:$0xff]  ;;  %v16823_v54 = vcombine.high %v2850_v10, %v2854_v11 }
 0x267   : > { %v2847_v53 = vld [vmem:[#allocation9 + $0x6a8] sm:$0xff] }
 0x268   : > { %2614 = vmatmul.mubr.bf16.vlgmr.msra.gmra.mxu0 %v22206_v45  ;;  %2667 = vmatmul.mubr.bf16.vlgmr.msra.gmra.mxu1 %v22206_v45  ;;  %v16817_v27 = vcombine.high %v2843_v52, %v2847_v53 }
 0x269   : > { %2688 = vmatpush1.bf16.msra.mxu0 %v16794_v35  ;;  %2741 = vmatpush1.bf16.msra.mxu1 %v16796_v36  ;;  %v2883_v35 = vld [vmem:[#allocation9 + $0x7c8] sm:$0xff] }
 0x26a   : > { %2689 = vmatprep.subr.bf16.mxu0 %v16787_v43  ;;  %2742 = vmatprep.subr.bf16.mxu1 %v16789_v44  ;;  %v2887_v36 = vld [vmem:[#allocation9 + $0x7e8] sm:$0xff]  ;;  %v16855_v43 = vcombine.high %v2882_v30, %v2886_v31  ;;  %v2830_v30 = vld [vmem:[#allocation9 + $0x620] sm:$0xff] }
 0x26b   : > { %2623 = vmatprep.mubr.bf16.mxu0 %v23825_v39  ;;  %2676 = vmatprep.mubr.bf16.mxu1 %v23825_v39  ;;  %v16857_v44 = vcombine.high %v2883_v35, %v2887_v36  ;;  %v16856_v50 = vcombine.low %v2883_v35, %v2887_v36  ;;  %v2827_v31 = vld [vmem:[#allocation9 + $0x608] sm:$0xff] }
 0x26d   : > { %2690 = vmatpush1.bf16.msra.mxu0 %v16786_v46  ;;  %2743 = vmatpush1.bf16.msra.mxu1 %v16788_v26  ;;  %v2875_v46 = vld [vmem:[#allocation9 + $0x788] sm:$0xff] }
 0x26e   : > { %2691 = vmatprep.subr.bf16.mxu0 %v16779_v55  ;;  %2744 = vmatprep.subr.bf16.mxu1 %v16781_v56  ;;  %v2879_v26 = vld [vmem:[#allocation9 + $0x7a8] sm:$0xff]  ;;  %v2870_v55 = vld [vmem:[#allocation9 + $0x760] sm:$0xff] }
 0x26f   : > { %v2867_v56 = vld [vmem:[#allocation9 + $0x748] sm:$0xff]  ;;  %v16848_v63 = vcombine.low %v2875_v46, %v2879_v26  ;;  %v16839_v5 = vcombine.high %v2866_v51, %v2870_v55 }
 0x270   : > { %2624 = vmatmul.mubr.bf16.gmra.mxu0 %v22214_v6  ;;  %2677 = vmatmul.mubr.bf16.gmra.mxu1 %v22214_v6 }
 0x271   : > { %2692 = vmatpush1.bf16.msra.mxu0 %v16778_v61  ;;  %2745 = vmatpush1.bf16.msra.mxu1 %v16780_v62  ;;  %v16849_v61 = vcombine.high %v2875_v46, %v2879_v26  ;;  %v16846_v62 = vcombine.low %v2874_v40, %v2878_v41  ;;  %v2888_v40 = vld [vmem:[#allocation9 + $0x7f0] sm:$0xff]  ;;  %v2885_v41 = vld [vmem:[#allocation9 + $0x7d8] sm:$0xff] }
 0x272   : > { %2693 = vmatprep.subr.bf16.mxu0 %v16771_v3  ;;  %2746 = vmatprep.subr.bf16.mxu1 %v16773_v4  ;;  %v2859_v3 = vld [vmem:[#allocation9 + $0x708] sm:$0xff] }
 0x273   : > { %2719 = vmatprep.mubr.bf16.mxu0 %v23825_v39  ;;  %2772 = vmatprep.mubr.bf16.mxu1 %v23825_v39  ;;  %v2863_v4 = vld [vmem:[#allocation9 + $0x728] sm:$0xff] }
 0x274   : > { %v16833_v15 = vcombine.high %v2859_v3, %v2863_v4 }
 0x275   : > { %2694 = vmatpush1.bf16.msra.mxu0 %v16770_v8  ;;  %2747 = vmatpush1.bf16.msra.mxu1 %v16772_v9  ;;  %v16841_v8 = vcombine.high %v2867_v56, %v2871_v57  ;;  %v16838_v9 = vcombine.low %v2866_v51, %v2870_v55  ;;  %v2880_v51 = vld [vmem:[#allocation9 + $0x7b0] sm:$0xff]  ;;  %v2877_v55 = vld [vmem:[#allocation9 + $0x798] sm:$0xff] }
 0x276   : > { %2695 = vmatprep.subr.bf16.mxu0 %v16763_v13  ;;  %2748 = vmatprep.subr.bf16.mxu1 %v16765_v14  ;;  %v2855_v13 = vld [vmem:[#allocation9 + $0x6e8] sm:$0xff]  ;;  %v16831_v14 = vcombine.high %v2858_v1, %v2862_v2 }
 0x277   : > { %v16825_v59 = vcombine.high %v2851_v12, %v2855_v13 }
 0x279   : > { %2696 = vmatpush1.bf16.msra.mxu0 %v16762_v16  ;;  %2749 = vmatpush1.bf16.msra.mxu1 %v16764_v17  ;;  %v16830_v16 = vcombine.low %v2858_v1, %v2862_v2  ;;  %v16832_v17 = vcombine.low %v2859_v3, %v2863_v4  ;;  %v2872_v1 = vld [vmem:[#allocation9 + $0x770] sm:$0xff]  ;;  %v2869_v2 = vld [vmem:[#allocation9 + $0x758] sm:$0xff] }
 0x27a   : > { %2697 = vmatprep.subr.bf16.mxu0 %v16755_v18  ;;  %2750 = vmatprep.subr.bf16.mxu1 %v16757_v48  ;;  %v2842_v18 = vld [vmem:[#allocation9 + $0x680] sm:$0xff]  ;;  %v2873_v3 = vld [vmem:[#allocation9 + $0x778] sm:$0xff] }
 0x27b   : > { %v2846_v48 = vld [vmem:[#allocation9 + $0x6a0] sm:$0xff] }
 0x27c   : > { %v16814_v28 = vcombine.low %v2842_v18, %v2846_v48 }
 0x27d   : > { %2698 = vmatpush1.bf16.msra.mxu0 %v16754_v60  ;;  %2751 = vmatpush1.bf16.msra.mxu1 %v16756_v20  ;;  %v16822_v60 = vcombine.low %v2850_v10, %v2854_v11  ;;  %v2834_v20 = vld [vmem:[#allocation9 + $0x640] sm:$0xff]  ;;  %v2864_v10 = vld [vmem:[#allocation9 + $0x730] sm:$0xff]  ;;  %v2861_v11 = vld [vmem:[#allocation9 + $0x718] sm:$0xff] }
 0x27e   : > { %2699 = vmatprep.subr.bf16.mxu0 %v16747_v24  ;;  %2752 = vmatprep.subr.bf16.mxu1 %v16749_v25  ;;  %v2839_v24 = vld [vmem:[#allocation9 + $0x668] sm:$0xff]  ;;  %v16815_v25 = vcombine.high %v2842_v18, %v2846_v48  ;;  %v16806_v36 = vcombine.low %v2834_v20, %v2838_v21  ;;  %v16844_v18 = vcombine.low %v2869_v2, %v2873_v3  ;;  %v2852_v48 = vld [vmem:[#allocation9 + $0x6d0] sm:$0xff] }
 0x27f   : > { %v16809_v35 = vcombine.high %v2835_v23, %v2839_v24 }
 0x281   : > { %2700 = vmatpush1.bf16.msra.mxu0 %v16746_v7  ;;  %2753 = vmatpush1.bf16.msra.mxu1 %v16748_v29  ;;  %v16816_v7 = vcombine.low %v2843_v52, %v2847_v53  ;;  %v2826_v29 = vld [vmem:[#allocation9 + $0x600] sm:$0xff]  ;;  %v2856_v52 = vld [vmem:[#allocation9 + $0x6f0] sm:$0xff]  ;;  %v2853_v53 = vld [vmem:[#allocation9 + $0x6d8] sm:$0xff] }
 0x282   : > { %2701 = vmatprep.subr.bf16.mxu0 %v16739_v32  ;;  %2754 = vmatprep.subr.bf16.mxu1 %v16741_v34  ;;  %v2831_v32 = vld [vmem:[#allocation9 + $0x628] sm:$0xff]  ;;  %v16807_v34 = vcombine.high %v2834_v20, %v2838_v21  ;;  %v16798_v26 = vcombine.low %v2826_v29, %v2830_v30 }
 0x283   : > { %v16801_v46 = vcombine.high %v2827_v31, %v2831_v32 }
 0x285   : > { %2702 = vmatpush1.bf16.msra.mxu0 %v16738_v37  ;;  %2755 = vmatpush1.bf16.msra.mxu1 %v16740_v38  ;;  %v16808_v37 = vcombine.low %v2835_v23, %v2839_v24  ;;  %v2884_v38 = vld [vmem:[#allocation9 + $0x7d0] sm:$0xff] }
 0x286   : > { %3226 = vmatprep.subr.bf16.mxu0 %v16855_v43  ;;  %3279 = vmatprep.subr.bf16.mxu1 %v16857_v44  ;;  %v2889_v43 = vld [vmem:[#allocation9 + $0x7f8] sm:$0xff]  ;;  %v16799_v44 = vcombine.high %v2826_v29, %v2830_v30  ;;  %v2844_v24 = vld [vmem:[#allocation9 + $0x690] sm:$0xff] }
 0x288   : > { %2720 = vmatmul.mubr.bf16.vlgmr.msra.gmra.mxu0 %v22206_v45  ;;  %2773 = vmatmul.mubr.bf16.vlgmr.msra.gmra.mxu1 %v22206_v45  ;;  %v16840_v45 = vcombine.low %v2867_v56, %v2871_v57  ;;  %v2881_v56 = vld [vmem:[#allocation9 + $0x7b8] sm:$0xff]  ;;  %v16859_v57 = vcombine.high %v2884_v38, %v2888_v40 }
 0x289   : > { %3227 = vmatpush1.bf16.msra.mxu0 %v16854_v49  ;;  %3280 = vmatpush1.bf16.msra.mxu1 %v16856_v50  ;;  %v16800_v49 = vcombine.low %v2827_v31, %v2831_v32  ;;  %v2876_v50 = vld [vmem:[#allocation9 + $0x790] sm:$0xff]  ;;  %v16826_v32 = vcombine.low %v2852_v48, %v2856_v52 }
 0x28a   : > { %3228 = vmatprep.subr.bf16.mxu0 %v16847_v58  ;;  %3281 = vmatprep.subr.bf16.mxu1 %v16849_v61  ;;  %v16861_v58 = vcombine.high %v2885_v41, %v2889_v43  ;;  %v16858_v61 = vcombine.low %v2884_v38, %v2888_v40  ;;  %v16851_v4 = vcombine.high %v2876_v50, %v2880_v51  ;;  %v2841_v38 = vld [vmem:[#allocation9 + $0x678] sm:$0xff] }
 0x28b   : > { %2729 = vmatprep.mubr.bf16.mxu0 %v23825_v39  ;;  %2782 = vmatprep.mubr.bf16.mxu1 %v23825_v39 }
 0x28d   : > { %3229 = vmatpush1.bf16.msra.mxu0 %v16846_v62  ;;  %3282 = vmatpush1.bf16.msra.mxu1 %v16848_v63  ;;  %v16860_v62 = vcombine.low %v2885_v41, %v2889_v43  ;;  %v2868_v63 = vld [vmem:[#allocation9 + $0x750] sm:$0xff] }
 0x28e   : > { %3230 = vmatprep.subr.bf16.mxu0 %v16839_v5  ;;  %3283 = vmatprep.subr.bf16.mxu1 %v16841_v8  ;;  %v16853_v5 = vcombine.high %v2877_v55, %v2881_v56  ;;  %v16850_v8 = vcombine.low %v2876_v50, %v2880_v51  ;;  %v2832_v50 = vld [vmem:[#allocation9 + $0x630] sm:$0xff]  ;;  %v2829_v51 = vld [vmem:[#allocation9 + $0x618] sm:$0xff] }
 0x290   : > { %2730 = vmatmul.mubr.bf16.gmra.mxu0 %v22214_v6  ;;  %2783 = vmatmul.mubr.bf16.gmra.mxu1 %v22214_v6  ;;  %v16824_v6 = vcombine.low %v2851_v12, %v2855_v13  ;;  %v2865_v12 = vld [vmem:[#allocation9 + $0x738] sm:$0xff]  ;;  %v16843_v13 = vcombine.high %v2868_v63, %v2872_v1 }
 0x291   : > { %3231 = vmatpush1.bf16.msra.mxu0 %v16838_v9  ;;  %3284 = vmatpush1.bf16.msra.mxu1 %v16840_v45  ;;  %v16852_v9 = vcombine.low %v2877_v55, %v2881_v56  ;;  %v2860_v45 = vld [vmem:[#allocation9 + $0x710] sm:$0xff]  ;;  %v16836_v23 = vcombine.low %v2861_v11, %v2865_v12  ;;  %v2833_v55 = vld [vmem:[#allocation9 + $0x638] sm:$0xff] }
 0x292   : > { %3232 = vmatprep.subr.bf16.mxu0 %v16831_v14  ;;  %3285 = vmatprep.subr.bf16.mxu1 %v16833_v15  ;;  %v16845_v14 = vcombine.high %v2869_v2, %v2873_v3  ;;  %v16834_v21 = vcombine.low %v2860_v45, %v2864_v10  ;;  %v3531_v2 = vld [vmem:[#allocation9 + $0x9e0] sm:$0xff]  ;;  %v3528_v3 = vld [vmem:[#allocation9 + $0x9c8] sm:$0xff] }
 0x293   : > { %3258 = vmatprep.mubr.bf16.mxu0 %v23825_v39  ;;  %3311 = vmatprep.mubr.bf16.mxu1 %v23825_v39 }
 0x295   : > { %3233 = vmatpush1.bf16.msra.mxu0 %v16830_v16  ;;  %3286 = vmatpush1.bf16.msra.mxu1 %v16832_v17  ;;  %v16842_v17 = vcombine.low %v2868_v63, %v2872_v1  ;;  %v3527_v1 = vld [vmem:[#allocation9 + $0x9c0] sm:$0xff] }
 0x296   : > { %3234 = vmatprep.subr.bf16.mxu0 %v16823_v54  ;;  %3287 = vmatprep.subr.bf16.mxu1 %v16825_v59  ;;  %v2857_v54 = vld [vmem:[#allocation9 + $0x6f8] sm:$0xff]  ;;  %v16835_v59 = vcombine.high %v2860_v45, %v2864_v10 }
 0x297   : > { %v16829_v29 = vcombine.high %v2853_v53, %v2857_v54 }
 0x299   : > { %3235 = vmatpush1.bf16.msra.mxu0 %v16822_v60  ;;  %3288 = vmatpush1.bf16.msra.mxu1 %v16824_v6  ;;  %v16837_v60 = vcombine.high %v2861_v11, %v2865_v12  ;;  %v16804_v11 = vcombine.low %v2829_v51, %v2833_v55  ;;  %v3519_v12 = vld [vmem:[#allocation9 + $0x980] sm:$0xff] }
 0x29a   : > { %3236 = vmatprep.subr.bf16.mxu0 %v16815_v25  ;;  %3289 = vmatprep.subr.bf16.mxu1 %v16817_v27  ;;  %v2848_v25 = vld [vmem:[#allocation9 + $0x6b0] sm:$0xff]  ;;  %v2845_v27 = vld [vmem:[#allocation9 + $0x698] sm:$0xff] }
 0x29b   : > { %v16819_v40 = vcombine.high %v2844_v24, %v2848_v25 }
 0x29d   : > { %3237 = vmatpush1.bf16.msra.mxu0 %v16814_v28  ;;  %3290 = vmatpush1.bf16.msra.mxu1 %v16816_v7  ;;  %v2849_v28 = vld [vmem:[#allocation9 + $0x6b8] sm:$0xff]  ;;  %v16827_v7 = vcombine.high %v2852_v48, %v2856_v52 }
 0x29e   : > { %3238 = vmatprep.subr.bf16.mxu0 %v16807_v34  ;;  %3291 = vmatprep.subr.bf16.mxu1 %v16809_v35  ;;  %v16828_v34 = vcombine.low %v2853_v53, %v2857_v54  ;;  %v2836_v35 = vld [vmem:[#allocation9 + $0x650] sm:$0xff]  ;;  %v16821_v41 = vcombine.high %v2845_v27, %v2849_v28  ;;  %v16918_v54 = vcombine.low %v3527_v1, %v3531_v2 }
 0x2a1   : > { %3239 = vmatpush1.bf16.msra.mxu0 %v16806_v36  ;;  %3292 = vmatpush1.bf16.msra.mxu1 %v16808_v37  ;;  %v2840_v36 = vld [vmem:[#allocation9 + $0x670] sm:$0xff]  ;;  %v2837_v37 = vld [vmem:[#allocation9 + $0x658] sm:$0xff] }
 0x2a2   : > { %3240 = vmatprep.subr.bf16.mxu0 %v16799_v44  ;;  %3293 = vmatprep.subr.bf16.mxu1 %v16801_v46  ;;  %v16818_v46 = vcombine.low %v2844_v24, %v2848_v25  ;;  %v16811_v56 = vcombine.high %v2836_v35, %v2840_v36  ;;  %v16812_v63 = vcombine.low %v2837_v37, %v2841_v38  ;;  %v3516_v24 = vld [vmem:[#allocation9 + $0x968] sm:$0xff] }
 0x2a5   : > { %3241 = vmatpush1.bf16.msra.mxu0 %v16798_v26  ;;  %3294 = vmatpush1.bf16.msra.mxu1 %v16800_v49  ;;  %v16820_v26 = vcombine.low %v2845_v27, %v2849_v28  ;;  %v2828_v49 = vld [vmem:[#allocation9 + $0x610] sm:$0xff] }
 0x2a6   : > { %3332 = vmatprep.subr.bf16.mxu0 %v16859_v57  ;;  %3385 = vmatprep.subr.bf16.mxu1 %v16861_v58  ;;  %v16813_v57 = vcombine.high %v2837_v37, %v2841_v38  ;;  %v16802_v10 = vcombine.low %v2828_v49, %v2832_v50  ;;  %v3508_v37 = vld [vmem:[#allocation9 + $0x928] sm:$0xff] }
 0x2a8   : > { %3259 = vmatmul.mubr.bf16.vlgmr.msra.gmra.mxu0 %v22165_v19  ;;  %3312 = vmatmul.mubr.bf16.vlgmr.msra.gmra.mxu1 %v22165_v19  ;;  %v22232_v15 = vpop.f32.mrf.mxu0  ;;  %v22234_v16 = vpop.f32.mrf.mxu1 }
 0x2a9   : > { %3333 = vmatpush1.bf16.msra.mxu0 %v16858_v61  ;;  %3386 = vmatpush1.bf16.msra.mxu1 %v16860_v62  ;;  %v16810_v62 = vcombine.low %v2836_v35, %v2840_v36  ;;  %v3507_v35 = vld [vmem:[#allocation9 + $0x920] sm:$0xff]  ;;  %v3504_v36 = vld [vmem:[#allocation9 + $0x908] sm:$0xff] }
 0x2aa   : > { %3334 = vmatprep.subr.bf16.mxu0 %v16851_v4  ;;  %3387 = vmatprep.subr.bf16.mxu1 %v16853_v5  ;;  %v22236_v6 = vpop.f32.mrf.mxu0  ;;  %v22238_v20 = vpop.f32.mrf.mxu1  ;;  %v3532_v4 = vld [vmem:[#allocation9 + $0x9e8] sm:$0xff]  ;;  %v16803_v5 = vcombine.high %v2828_v49, %v2832_v50  ;;  %v3495_v49 = vld [vmem:[#allocation9 + $0x8c0] sm:$0xff] }
 0x2ab   : > { %3268 = vmatprep.mubr.bf16.mxu0 %v23825_v39  ;;  %3321 = vmatprep.mubr.bf16.mxu1 %v23825_v39  ;;  %v16921_v48 = vcombine.high %v3528_v3, %v3532_v4  ;;  %v3499_v50 = vld [vmem:[#allocation9 + $0x8e0] sm:$0xff] }
 0x2ac   : > { %v22244_v30 = vpop.f32.mrf.mxu0  ;;  %v22246_v31 = vpop.f32.mrf.mxu1 }
 0x2ad   : > { %3335 = vmatpush1.bf16.msra.mxu0 %v16850_v8  ;;  %3388 = vmatpush1.bf16.msra.mxu1 %v16852_v9  ;;  %v16805_v8 = vcombine.high %v2829_v51, %v2833_v55  ;;  %v3496_v51 = vld [vmem:[#allocation9 + $0x8c8] sm:$0xff] }
 0x2ae   : > { %3336 = vmatprep.subr.bf16.mxu0 %v16843_v13  ;;  %3389 = vmatprep.subr.bf16.mxu1 %v16845_v14  ;;  %v22248_v43 = vpop.f32.mrf.mxu0  ;;  %v22250_v44 = vpop.f32.mrf.mxu1  ;;  %v3523_v13 = vld [vmem:[#allocation9 + $0x9a0] sm:$0xff]  ;;  %v3520_v14 = vld [vmem:[#allocation9 + $0x988] sm:$0xff] }
 0x2af   : > { %v16911_v25 = vcombine.high %v3519_v12, %v3523_v13  ;;  %v3500_v55 = vld [vmem:[#allocation9 + $0x8e8] sm:$0xff] }
 0x2b0   : > { %3269 = vmatmul.mubr.bf16.gmra.mxu0 %v22170_v22  ;;  %3322 = vmatmul.mubr.bf16.gmra.mxu1 %v22170_v22  ;;  %v22252_v58 = vpop.f32.mrf.mxu0  ;;  %v22254_v61 = vpop.f32.mrf.mxu1 }
 0x2b1   : > { %3337 = vmatpush1.bf16.msra.mxu0 %v16842_v17  ;;  %3390 = vmatpush1.bf16.msra.mxu1 %v16844_v18  ;;  %v3524_v17 = vld [vmem:[#allocation9 + $0x9a8] sm:$0xff]  ;;  %v16919_v18 = vcombine.high %v3527_v1, %v3531_v2  ;;  %v16896_v2 = vcombine.low %v3504_v36, %v3508_v37 }
 0x2b2   : > { %3338 = vmatprep.subr.bf16.mxu0 %v16835_v59  ;;  %3391 = vmatprep.subr.bf16.mxu1 %v16837_v60  ;;  %v22256_v9 = vpop.f32.mrf.mxu0  ;;  %v22258_v45 = vpop.f32.mrf.mxu1  ;;  %v16920_v59 = vcombine.low %v3528_v3, %v3532_v4  ;;  %v3511_v60 = vld [vmem:[#allocation9 + $0x940] sm:$0xff]  ;;  %v16913_v27 = vcombine.high %v3520_v14, %v3524_v17 }
 0x2b3   : > { %3364 = vmatprep.mubr.bf16.mxu0 %v23825_v39  ;;  %3417 = vmatprep.mubr.bf16.mxu1 %v23825_v39  ;;  %v3487_v3 = vld [vmem:[#allocation9 + $0x880] sm:$0xff] }
 0x2b4   : > { %v22260_v52 = vpop.f32.mrf.mxu0  ;;  %v22262_v53 = vpop.f32.mrf.mxu1  ;;  %v3491_v4 = vld [vmem:[#allocation9 + $0x8a0] sm:$0xff] }
 0x2b5   : > { %3339 = vmatpush1.bf16.msra.mxu0 %v16834_v21  ;;  %3392 = vmatpush1.bf16.msra.mxu1 %v16836_v23  ;;  %v3515_v21 = vld [vmem:[#allocation9 + $0x960] sm:$0xff]  ;;  %v3512_v23 = vld [vmem:[#allocation9 + $0x948] sm:$0xff] }
 0x2b6   : > { %3340 = vmatprep.subr.bf16.mxu0 %v16827_v7  ;;  %3393 = vmatprep.subr.bf16.mxu1 %v16829_v29  ;;  %v22264_v28 = vpop.f32.mrf.mxu0  ;;  %v22266_v7 = vpop.f32.mrf.mxu1  ;;  %v16910_v29 = vcombine.low %v3519_v12, %v3523_v13  ;;  %v16887_v12 = vcombine.high %v3495_v49, %v3499_v50  ;;  %v16889_v13 = vcombine.high %v3496_v51, %v3500_v55 }
 0x2b9   : > { %3341 = vmatpush1.bf16.msra.mxu0 %v16826_v32  ;;  %3394 = vmatpush1.bf16.msra.mxu1 %v16828_v34  ;;  %v16912_v32 = vcombine.low %v3520_v14, %v3524_v17  ;;  %v3503_v34 = vld [vmem:[#allocation9 + $0x900] sm:$0xff]  ;;  %v16888_v14 = vcombine.low %v3496_v51, %v3500_v55  ;;  %v3534_v51 = vld [vmem:[#allocation9 + $0x9f8] sm:$0xff] }
 0x2ba   : > { %3342 = vmatprep.subr.bf16.mxu0 %v16819_v40  ;;  %3395 = vmatprep.subr.bf16.mxu1 %v16821_v41  ;;  %v16903_v41 = vcombine.high %v3511_v60, %v3515_v21  ;;  %v16894_v1 = vcombine.low %v3503_v34, %v3507_v35  ;;  %v3479_v17 = vld [vmem:[#allocation9 + $0x840] sm:$0xff] }
 0x2bd   : > { %3343 = vmatpush1.bf16.msra.mxu0 %v16818_v46  ;;  %3396 = vmatpush1.bf16.msra.mxu1 %v16820_v26  ;;  %v16905_v46 = vcombine.high %v3512_v23, %v3516_v24  ;;  %v16904_v26 = vcombine.low %v3512_v23, %v3516_v24  ;;  %v16878_v24 = vcombine.low %v3487_v3, %v3491_v4 }
 0x2be   : > { %3344 = vmatprep.subr.bf16.mxu0 %v16811_v56  ;;  %3397 = vmatprep.subr.bf16.mxu1 %v16813_v57 }
 0x2c1   : > { %3345 = vmatpush1.bf16.msra.mxu0 %v16810_v62  ;;  %3398 = vmatpush1.bf16.msra.mxu1 %v16812_v63  ;;  %v16895_v62 = vcombine.high %v3503_v34, %v3507_v35  ;;  %v16897_v63 = vcombine.high %v3504_v36, %v3508_v37  ;;  %v3476_v34 = vld [vmem:[#allocation9 + $0x828] sm:$0xff] }
 0x2c2   : > { %3346 = vmatprep.subr.bf16.mxu0 %v16803_v5  ;;  %3399 = vmatprep.subr.bf16.mxu1 %v16805_v8  ;;  %v3488_v5 = vld [vmem:[#allocation9 + $0x888] sm:$0xff] }
 0x2c3   : > { %v3492_v8 = vld [vmem:[#allocation9 + $0x8a8] sm:$0xff] }
 0x2c4   : > { %v16881_v23 = vcombine.high %v3488_v5, %v3492_v8 }
 0x2c5   : > { %3347 = vmatpush1.bf16.msra.mxu0 %v16802_v10  ;;  %3400 = vmatpush1.bf16.msra.mxu1 %v16804_v11 }
 0x2c6   : > { %3863 = vmatprep.subr.bf16.mxu0 %v16919_v18  ;;  %3916 = vmatprep.subr.bf16.mxu1 %v16921_v48  ;;  %v3483_v18 = vld [vmem:[#allocation9 + $0x860] sm:$0xff]  ;;  %v3480_v48 = vld [vmem:[#allocation9 + $0x848] sm:$0xff] }
 0x2c7   : > { %v16871_v37 = vcombine.high %v3479_v17, %v3483_v18 }
 0x2c8   : > { %3365 = vmatmul.mubr.bf16.vlgmr.msra.gmra.mxu0 %v22165_v19  ;;  %3418 = vmatmul.mubr.bf16.vlgmr.msra.gmra.mxu1 %v22165_v19  ;;  %v22270_v38 = vpop.f32.mrf.mxu0  ;;  %v22272_v40 = vpop.f32.mrf.mxu1  ;;  %v16902_v19 = vcombine.low %v3511_v60, %v3515_v21  ;;  %v16879_v21 = vcombine.high %v3487_v3, %v3491_v4  ;;  %v3521_v4 = vld [vmem:[#allocation9 + $0x990] sm:$0xff] }
 0x2c9   : > { %3864 = vmatpush1.bf16.msra.mxu0 %v16918_v54  ;;  %3917 = vmatpush1.bf16.msra.mxu1 %v16920_v59  ;;  %v3484_v54 = vld [vmem:[#allocation9 + $0x868] sm:$0xff] }
 0x2ca   : > { %3865 = vmatprep.subr.bf16.mxu0 %v16911_v25  ;;  %3918 = vmatprep.subr.bf16.mxu1 %v16913_v27  ;;  %v22276_v56 = vpop.f32.mrf.mxu0  ;;  %v22278_v57 = vpop.f32.mrf.mxu1  ;;  %v16880_v25 = vcombine.low %v3488_v5, %v3492_v8  ;;  %v3471_v27 = vld [vmem:[#allocation9 + $0x800] sm:$0xff]  ;;  %v3525_v5 = vld [vmem:[#allocation9 + $0x9b0] sm:$0xff]  ;;  %v3522_v8 = vld [vmem:[#allocation9 + $0x998] sm:$0xff] }
 0x2cb   : > { %3374 = vmatprep.mubr.bf16.mxu0 %v23825_v39  ;;  %3427 = vmatprep.mubr.bf16.mxu1 %v23825_v39 }
 0x2cc   : > { %v22282_v10 = vpop.f32.mrf.mxu0  ;;  %v22284_v11 = vpop.f32.mrf.mxu1 }
 0x2cd   : > { %3866 = vmatpush1.bf16.msra.mxu0 %v16910_v29  ;;  %3919 = vmatpush1.bf16.msra.mxu1 %v16912_v32  ;;  %v3475_v29 = vld [vmem:[#allocation9 + $0x820] sm:$0xff]  ;;  %v3472_v32 = vld [vmem:[#allocation9 + $0x808] sm:$0xff] }
 0x2ce   : > { %3867 = vmatprep.subr.bf16.mxu0 %v16903_v41  ;;  %3920 = vmatprep.subr.bf16.mxu1 %v16905_v46  ;;  %v22288_v59 = vpop.f32.mrf.mxu0  ;;  %v22290_v60 = vpop.f32.mrf.mxu1  ;;  %v16873_v41 = vcombine.high %v3480_v48, %v3484_v54  ;;  %v16870_v46 = vcombine.low %v3479_v17, %v3483_v18  ;;  %v16864_v3 = vcombine.low %v3472_v32, %v3476_v34  ;;  %v3537_v18 = vrot.slane %v22145_v42, 2 }
 0x2cf   : > { %23894 = vst [vmem:[#allocation50_spill] sm:$0xff] %v22288_v59  ;;  %23895 = vst [vmem:[#allocation51_spill] sm:$0xff] %v22290_v60 }
 0x2d0   : > { %3375 = vmatmul.mubr.bf16.gmra.mxu0 %v22170_v22  ;;  %3428 = vmatmul.mubr.bf16.gmra.mxu1 %v22170_v22  ;;  %v16886_v22 = vcombine.low %v3495_v49, %v3499_v50  ;;  %v22292_v35 = vpop.f32.mrf.mxu0  ;;  %v22294_v36 = vpop.f32.mrf.mxu1  ;;  %v3533_v49 = vld [vmem:[#allocation9 + $0x9f0] sm:$0xff]  ;;  %v3530_v50 = vld [vmem:[#allocation9 + $0x9d8] sm:$0xff] }
 0x2d1   : > { %3868 = vmatpush1.bf16.msra.mxu0 %v16902_v19  ;;  %3921 = vmatpush1.bf16.msra.mxu1 %v16904_v26  ;;  %v16872_v19 = vcombine.low %v3480_v48, %v3484_v54  ;;  %v3529_v26 = vld [vmem:[#allocation9 + $0x9d0] sm:$0xff]  ;;  %v16925_v17 = vcombine.high %v3530_v50, %v3534_v51  ;;  %v3536_v48 = vrot.slane %v22141_v33, 2  ;;  %v16914_v33 = vcombine.low %v3521_v4, %v3525_v5 }
 0x2d2   : > { %3869 = vmatprep.subr.bf16.mxu0 %v16895_v62  ;;  %3922 = vmatprep.subr.bf16.mxu1 %v16897_v63  ;;  %v22296_v55 = vpop.f32.mrf.mxu0  ;;  %v22298_v62 = vpop.f32.mrf.mxu1  ;;  %v16863_v63 = vcombine.high %v3471_v27, %v3475_v29  ;;  %v16922_v54 = vcombine.low %v3529_v26, %v3533_v49 }
 0x2d3   : > { %3895 = vmatprep.mubr.bf16.mxu0 %v23825_v39  ;;  %3948 = vmatprep.mubr.bf16.mxu1 %v23825_v39  ;;  %v22311_v42 = vsel %vm3535_vm6, %v3536_v48, %v3537_v18 }
 0x2d5   : > { %3870 = vmatpush1.bf16.msra.mxu0 %v16894_v1  ;;  %3923 = vmatpush1.bf16.msra.mxu1 %v16896_v2  ;;  %v16865_v1 = vcombine.high %v3472_v32, %v3476_v34  ;;  %v16862_v2 = vcombine.low %v3471_v27, %v3475_v29  ;;  %v3518_v27 = vld [vmem:[#allocation9 + $0x978] sm:$0xff]  ;;  %v16915_v34 = vcombine.high %v3521_v4, %v3525_v5  ;;  %v3539_v5 = vrot.slane %v22147_v47, 2 }
 0x2d6   : > { %3871 = vmatprep.subr.bf16.mxu0 %v16887_v12  ;;  %3924 = vmatprep.subr.bf16.mxu1 %v16889_v13  ;;  %v3526_v12 = vld [vmem:[#allocation9 + $0x9b8] sm:$0xff]  ;;  %v22300_v13 = vpop.f32.mrf.mxu0 }
 0x2d8   : > { %v22306_v29 = vpop.f32.mrf.mxu0 }
 0x2d9   : > { %3872 = vmatpush1.bf16.msra.mxu0 %v16886_v22  ;;  %3925 = vmatpush1.bf16.msra.mxu1 %v16888_v14  ;;  %v22302_v22 = vpop.f32.mrf.mxu1  ;;  %v16923_v14 = vcombine.high %v3529_v26, %v3533_v49  ;;  %v16916_v49 = vcombine.low %v3522_v8, %v3526_v12 }
 0x2da   : > { %3873 = vmatprep.subr.bf16.mxu0 %v16879_v21  ;;  %3926 = vmatprep.subr.bf16.mxu1 %v16881_v23  ;;  %v16924_v21 = vcombine.low %v3530_v50, %v3534_v51  ;;  %v3513_v23 = vld [vmem:[#allocation9 + $0x950] sm:$0xff] }
 0x2db   : > { %v22308_v32 = vpop.f32.mrf.mxu1  ;;  %v22321_v50 = vld [vmem:[#allocation9 + $0x910] sm:$0xff] }
 0x2dc   : > { %23896 = vst [vmem:[#allocation52_spill] sm:$0xff] %v22308_v32  ;;  %v3509_v51 = vld [vmem:[#allocation9 + $0x930] sm:$0xff] }
 0x2dd   : > { %3874 = vmatpush1.bf16.msra.mxu0 %v16878_v24  ;;  %3927 = vmatpush1.bf16.msra.mxu1 %v16880_v25  ;;  %v3517_v24 = vld [vmem:[#allocation9 + $0x970] sm:$0xff]  ;;  %v3514_v25 = vld [vmem:[#allocation9 + $0x958] sm:$0xff]  ;;  %v16899_v47 = vcombine.high %v22321_v50, %v3509_v51 }
 0x2de   : > { %3875 = vmatprep.subr.bf16.mxu0 %v16871_v37  ;;  %3928 = vmatprep.subr.bf16.mxu1 %v16873_v41  ;;  %v16917_v37 = vcombine.high %v3522_v8, %v3526_v12  ;;  %v16909_v4 = vcombine.high %v3514_v25, %v3518_v27 }
 0x2e1   : > { %3876 = vmatpush1.bf16.msra.mxu0 %v16870_v46  ;;  %3929 = vmatpush1.bf16.msra.mxu1 %v16872_v19 }
 0x2e2   : > { %3877 = vmatprep.subr.bf16.mxu0 %v16863_v63  ;;  %3930 = vmatprep.subr.bf16.mxu1 %v16865_v1  ;;  %v3506_v63 = vld [vmem:[#allocation9 + $0x918] sm:$0xff] }
 0x2e3   : > { %v3510_v1 = vld [vmem:[#allocation9 + $0x938] sm:$0xff] }
 0x2e5   : > { %3878 = vmatpush1.bf16.msra.mxu0 %v16862_v2  ;;  %3931 = vmatpush1.bf16.msra.mxu1 %v16864_v3 }
 0x2e6   : > { %3969 = vmatprep.subr.bf16.mxu0 %v16923_v14  ;;  %4022 = vmatprep.subr.bf16.mxu1 %v16925_v17  ;;  %v16907_v14 = vcombine.high %v3513_v23, %v3517_v24  ;;  %v16906_v17 = vcombine.low %v3513_v23, %v3517_v24  ;;  %v22344_v23 = vsel %vm3535_vm6, %v3537_v18, %v3539_v5  ;;  %v3493_v18 = vld [vmem:[#allocation9 + $0x8b0] sm:$0xff] }
 0x2e8   : > { %v2007_v41 = vpop.f32.mrf.mxu0  ;;  %v2060_v46 = vpop.f32.mrf.mxu1  ;;  %3896 = vmatmul.mubr.bf16.vlgmr.msra.gmra.mxu0 %v22311_v42  ;;  %3949 = vmatmul.mubr.bf16.vlgmr.msra.gmra.mxu1 %v22311_v42 }
 0x2e9   : > { %v22316_v19 = vadd.f32 %v2007_v41, %v22232_v15  ;;  %v22319_v26 = vadd.f32 %v2060_v46, %v22234_v16  ;;  %3970 = vmatpush1.bf16.msra.mxu0 %v16922_v54  ;;  %4023 = vmatpush1.bf16.msra.mxu1 %v16924_v21  ;;  %v3501_v21 = vld [vmem:[#allocation9 + $0x8f0] sm:$0xff] }
 0x2ea   : > { %v2009_v2 = vpop.f32.mrf.mxu0  ;;  %v2062_v3 = vpop.f32.mrf.mxu1  ;;  %3971 = vmatprep.subr.bf16.mxu0 %v16915_v34  ;;  %4024 = vmatprep.subr.bf16.mxu1 %v16917_v37  ;;  %v3498_v34 = vld [vmem:[#allocation9 + $0x8d8] sm:$0xff] }
 0x2eb   : > { %v22324_v15 = vadd.f32 %v2009_v2, %v22236_v6  ;;  %v22327_v16 = vadd.f32 %v2062_v3, %v22238_v20  ;;  %3905 = vmatprep.mubr.bf16.mxu0 %v23825_v39  ;;  %3958 = vmatprep.mubr.bf16.mxu1 %v23825_v39  ;;  %v16908_v6 = vcombine.low %v3514_v25, %v3518_v27  ;;  %v3497_v20 = vld [vmem:[#allocation9 + $0x8d0] sm:$0xff]  ;;  %v3502_v37 = vld [vmem:[#allocation9 + $0x8f8] sm:$0xff] }
 0x2ec   : > { %v2011_v8 = vpop.f32.mrf.mxu0  ;;  %v2064_v12 = vpop.f32.mrf.mxu1  ;;  %v16898_v25 = vcombine.low %v22321_v50, %v3509_v51  ;;  %v3489_v2 = vld [vmem:[#allocation9 + $0x890] sm:$0xff]  ;;  %v3490_v3 = vld [vmem:[#allocation9 + $0x898] sm:$0xff] }
 0x2ed   : > { %v22333_v48 = vadd.f32 %v2011_v8, %v22244_v30  ;;  %v22336_v54 = vadd.f32 %v2064_v12, %v22246_v31  ;;  %3972 = vmatpush1.bf16.msra.mxu0 %v16914_v33  ;;  %4025 = vmatpush1.bf16.msra.mxu1 %v16916_v49  ;;  %v16901_v30 = vcombine.high %v3506_v63, %v3510_v1 }
 0x2ee   : > { %v22338_v41 = vpop.f32.mrf.mxu0  ;;  %v22340_v46 = vpop.f32.mrf.mxu1  ;;  %3973 = vmatprep.subr.bf16.mxu0 %v16907_v14  ;;  %4026 = vmatprep.subr.bf16.mxu1 %v16909_v4  ;;  %v16900_v49 = vcombine.low %v3506_v63, %v3510_v1  ;;  %v3494_v14 = vld [vmem:[#allocation9 + $0x8b8] sm:$0xff]  ;;  %v16891_v8 = vcombine.high %v3497_v20, %v3501_v21  ;;  %v16893_v12 = vcombine.high %v3498_v34, %v3502_v37 }
 0x2ef   : > { %v16890_v63 = vcombine.low %v3497_v20, %v3501_v21  ;;  %v16882_v20 = vcombine.low %v3489_v2, %v3493_v18  ;;  %v16884_v21 = vcombine.low %v3490_v3, %v3494_v14 }
 0x2f0   : > { %v2017_v31 = vpop.f32.mrf.mxu0  ;;  %v2070_v24 = vpop.f32.mrf.mxu1  ;;  %3906 = vmatmul.mubr.bf16.gmra.mxu0 %v22344_v23  ;;  %3959 = vmatmul.mubr.bf16.gmra.mxu1 %v22344_v23 }
 0x2f1   : > { %v22350_v27 = vadd.f32 %v2017_v31, %v22252_v58  ;;  %v22353_v33 = vadd.f32 %v2070_v24, %v22254_v61  ;;  %3974 = vmatpush1.bf16.msra.mxu0 %v16906_v17  ;;  %4027 = vmatpush1.bf16.msra.mxu1 %v16908_v6  ;;  %v3481_v6 = vld [vmem:[#allocation9 + $0x850] sm:$0xff]  ;;  %v16883_v31 = vcombine.high %v3489_v2, %v3493_v18 }
 0x2f2   : > { %v2019_v4 = vpop.f32.mrf.mxu0  ;;  %v2072_v5 = vpop.f32.mrf.mxu1  ;;  %3975 = vmatprep.subr.bf16.mxu0 %v16899_v47  ;;  %4028 = vmatprep.subr.bf16.mxu1 %v16901_v30  ;;  %v3485_v47 = vld [vmem:[#allocation9 + $0x870] sm:$0xff]  ;;  %v3486_v30 = vld [vmem:[#allocation9 + $0x878] sm:$0xff]  ;;  %v16885_v24 = vcombine.high %v3490_v3, %v3494_v14 }
 0x2f3   : > { %v22356_v50 = vadd.f32 %v2019_v4, %v22256_v9  ;;  %v22359_v58 = vadd.f32 %v2072_v5, %v22258_v45  ;;  %4001 = vmatprep.mubr.bf16.mxu0 %v23825_v39  ;;  %4054 = vmatprep.mubr.bf16.mxu1 %v23825_v39  ;;  %v16892_v9 = vcombine.low %v3498_v34, %v3502_v37  ;;  %v3482_v45 = vld [vmem:[#allocation9 + $0x858] sm:$0xff]  ;;  %v3477_v4 = vld [vmem:[#allocation9 + $0x830] sm:$0xff] }
 0x2f4   : > { %v2021_v61 = vpop.f32.mrf.mxu0  ;;  %v2074_v51 = vpop.f32.mrf.mxu1  ;;  %v3474_v5 = vld [vmem:[#allocation9 + $0x818] sm:$0xff]  ;;  %v16877_v34 = vcombine.high %v3482_v45, %v3486_v30  ;;  %v16874_v37 = vcombine.low %v3481_v6, %v3485_v47 }
 0x2f5   : > { %v22364_v1 = vadd.f32 %v2021_v61, %v22260_v52  ;;  %v22367_v17 = vadd.f32 %v2074_v51, %v22262_v53  ;;  %3976 = vmatpush1.bf16.msra.mxu0 %v16898_v25  ;;  %4029 = vmatpush1.bf16.msra.mxu1 %v16900_v49  ;;  %v3473_v52 = vld [vmem:[#allocation9 + $0x810] sm:$0xff]  ;;  %v3478_v53 = vld [vmem:[#allocation9 + $0x838] sm:$0xff]  ;;  %v16875_v25 = vcombine.high %v3481_v6, %v3485_v47 }
 0x2f6   : > { %3977 = vmatprep.subr.bf16.mxu0 %v16891_v8  ;;  %4030 = vmatprep.subr.bf16.mxu1 %v16893_v12  ;;  %v16876_v49 = vcombine.low %v3482_v45, %v3486_v30  ;;  %v16867_v8 = vcombine.high %v3473_v52, %v3477_v4  ;;  %v16869_v12 = vcombine.high %v3474_v5, %v3478_v53  ;;  %v22369_v3 = vpop.f32.mrf.mxu0  ;;  %v22371_v14 = vpop.f32.mrf.mxu1 }
 0x2f7   : > { %v16866_v2 = vcombine.low %v3473_v52, %v3477_v4  ;;  %v16868_v18 = vcombine.low %v3474_v5, %v3478_v53 }
 0x2f9   : > { %3978 = vmatpush1.bf16.msra.mxu0 %v16890_v63  ;;  %4031 = vmatpush1.bf16.msra.mxu1 %v16892_v9 }
 0x2fa   : > { %3979 = vmatprep.subr.bf16.mxu0 %v16883_v31  ;;  %4032 = vmatprep.subr.bf16.mxu1 %v16885_v24 }
 0x2fd   : > { %3980 = vmatpush1.bf16.msra.mxu0 %v16882_v20  ;;  %4033 = vmatpush1.bf16.msra.mxu1 %v16884_v21 }
 0x2fe   : > { %3981 = vmatprep.subr.bf16.mxu0 %v16875_v25  ;;  %4034 = vmatprep.subr.bf16.mxu1 %v16877_v34 }
 0x301   : > { %3982 = vmatpush1.bf16.msra.mxu0 %v16874_v37  ;;  %4035 = vmatpush1.bf16.msra.mxu1 %v16876_v49 }
 0x302   : > { %3983 = vmatprep.subr.bf16.mxu0 %v16867_v8  ;;  %4036 = vmatprep.subr.bf16.mxu1 %v16869_v12 }
 0x305   : > { %3984 = vmatpush1.bf16.msra.mxu0 %v16866_v2  ;;  %4037 = vmatpush1.bf16.msra.mxu1 %v16868_v18 }
 0x308   : > { %v2113_v61 = vpop.f32.mrf.mxu0  ;;  %v2166_v51 = vpop.f32.mrf.mxu1  ;;  %4002 = vmatmul.mubr.bf16.vlgmr.msra.gmra.mxu0 %v22311_v42  ;;  %4055 = vmatmul.mubr.bf16.vlgmr.msra.gmra.mxu1 %v22311_v42 }
 0x309   : > { %v2114_v63 = vadd.f32 %v2113_v61, %v22270_v38  ;;  %v2167_v9 = vadd.f32 %v2166_v51, %v22272_v40  ;;  %4011 = vmatprep.mubr.bf16.mxu0 %v23825_v39  ;;  %4064 = vmatprep.mubr.bf16.mxu1 %v23825_v39 }
 0x30a   : > { %v2115_v6 = vpop.f32.mrf.mxu0  ;;  %v2168_v47 = vpop.f32.mrf.mxu1 }
 0x30b   : > { %v2116_v45 = vadd.f32 %v2115_v6, %v22276_v56  ;;  %v2169_v30 = vadd.f32 %v2168_v47, %v22278_v57 }
 0x30c   : > { %v2117_v31 = vpop.f32.mrf.mxu0  ;;  %v2170_v24 = vpop.f32.mrf.mxu1 }
 0x30d   : > { %v2118_v20 = vadd.f32 %v2117_v31, %v22282_v10  ;;  %v2171_v42 = vadd.f32 %v2170_v24, %v22284_v11 }
 0x30e   : > { %v22383_v21 = vpop.f32.mrf.mxu0  ;;  %v22385_v38 = vpop.f32.mrf.mxu1 }
 0x30f   : > { %23897 = vst [vmem:[#allocation53_spill] sm:$0xff] %v22383_v21  ;;  %23898 = vst [vmem:[#allocation54_spill] sm:$0xff] %v22385_v38 }
 0x310   : > { %v2123_v40 = vpop.f32.mrf.mxu0  ;;  %v2176_v52 = vpop.f32.mrf.mxu1  ;;  %4012 = vmatmul.mubr.bf16.gmra.mxu0 %v22344_v23  ;;  %4065 = vmatmul.mubr.bf16.gmra.mxu1 %v22344_v23 }
 0x311   : > { %v2124_v56 = vadd.f32 %v2123_v40, %v22292_v35  ;;  %v2177_v57 = vadd.f32 %v2176_v52, %v22294_v36  ;;  %4387 = vmatprep.mubr.bf16.mxu1 %v23825_v39  ;;  %4377 = vmatprep.mubr.bf16.mxu0 %v23825_v39 }
 0x312   : > { %v2125_v10 = vpop.f32.mrf.mxu0  ;;  %v2178_v11 = vpop.f32.mrf.mxu1 }
 0x313   : > { %v2126_v4 = vadd.f32 %v2125_v10, %v22296_v55  ;;  %v2179_v5 = vadd.f32 %v2178_v11, %v22298_v62 }
 0x314   : > { %v2127_v53 = vpop.f32.mrf.mxu0  ;;  %v2180_v25 = vpop.f32.mrf.mxu1 }
 0x315   : > { %v2128_v34 = vadd.f32 %v2127_v53, %v22300_v13  ;;  %v2181_v23 = vadd.f32 %v2180_v25, %v22302_v22 }
 0x316   : > { %v22397_v37 = vpop.f32.mrf.mxu0  ;;  %v22399_v35 = vpop.f32.mrf.mxu1 }
 0x317   : > { %23899 = vst [vmem:[#allocation55_spill] sm:$0xff] %v22397_v37  ;;  %23900 = vst [vmem:[#allocation56_spill] sm:$0xff] %v22399_v35 }
 0x328   : > { %v2615_v36 = vpop.f32.mrf.mxu0  ;;  %v2668_v49 = vpop.f32.mrf.mxu1 }
 0x329   : > { %v22402_v8 = vadd.f32 %v2615_v36, %v22316_v19  ;;  %v22405_v12 = vadd.f32 %v2668_v49, %v22319_v26 }
 0x32a   : > { %v2617_v55 = vpop.f32.mrf.mxu0  ;;  %v2670_v62 = vpop.f32.mrf.mxu1 }
 0x32b   : > { %v22408_v2 = vadd.f32 %v2617_v55, %v22324_v15  ;;  %v22411_v13 = vadd.f32 %v2670_v62, %v22327_v16 }
 0x32c   : > { %v2619_v22 = vpop.f32.mrf.mxu0  ;;  %v2672_v18 = vpop.f32.mrf.mxu1 }
 0x32d   : > { %v22414_v61 = vadd.f32 %v2619_v22, %v22333_v48  ;;  %v22417_v51 = vadd.f32 %v2672_v18, %v22336_v54 }
 0x32e   : > { %v22419_v19 = vpop.f32.mrf.mxu0  ;;  %v22421_v26 = vpop.f32.mrf.mxu1 }
 0x330   : > { %v2625_v6 = vpop.f32.mrf.mxu0  ;;  %v2678_v47 = vpop.f32.mrf.mxu1 }
 0x331   : > { %v22424_v15 = vadd.f32 %v2625_v6, %v22350_v27  ;;  %v22427_v16 = vadd.f32 %v2678_v47, %v22353_v33 }
 0x332   : > { %v2627_v31 = vpop.f32.mrf.mxu0  ;;  %v2680_v24 = vpop.f32.mrf.mxu1 }
 0x333   : > { %v22430_v48 = vadd.f32 %v2627_v31, %v22356_v50  ;;  %v22433_v54 = vadd.f32 %v2680_v24, %v22359_v58 }
 0x334   : > { %v22435_v40 = vpop.f32.mrf.mxu0  ;;  %v22437_v52 = vpop.f32.mrf.mxu1 }
 0x336   : > { %v22439_v10 = vpop.f32.mrf.mxu0  ;;  %v22441_v11 = vpop.f32.mrf.mxu1 }
 0x348   : > { %v2721_v27 = vpop.f32.mrf.mxu0  ;;  %v2774_v53 = vpop.f32.mrf.mxu1 }
 0x349   : > { %v22443_v33 = vadd.f32 %v2721_v27, %v2114_v63  ;;  %v2799_v25 = vadd.f32 %v2774_v53, %v2167_v9 }
 0x34a   : > { %v2723_v36 = vpop.f32.mrf.mxu0  ;;  %v2776_v49 = vpop.f32.mrf.mxu1 }
 0x34b   : > { %23901 = vst [vmem:[#allocation57_spill] sm:$0xff] %v22443_v33  ;;  %v2798_v50 = vadd.f32 %v2723_v36, %v2116_v45  ;;  %v2800_v55 = vadd.f32 %v2776_v49, %v2169_v30 }
 0x34c   : > { %v2725_v62 = vpop.f32.mrf.mxu0  ;;  %v2778_v58 = vpop.f32.mrf.mxu1 }
 0x34d   : > { %v22445_v22 = vadd.f32 %v2725_v62, %v2118_v20  ;;  %v2807_v18 = vadd.f32 %v2778_v58, %v2171_v42 }
 0x34e   : > { %v22447_v6 = vpop.f32.mrf.mxu0  ;;  %v22449_v47 = vpop.f32.mrf.mxu1 }
 0x34f   : > { %23902 = vst [vmem:[#allocation58_spill] sm:$0xff] %v22445_v22  ;;  %23903 = vst [vmem:[#allocation59_spill] sm:$0xff] %v22447_v6 }
 0x350   : > { %23904 = vst [vmem:[#allocation60_spill] sm:$0xff] %v22449_v47  ;;  %v2731_v31 = vpop.f32.mrf.mxu0  ;;  %v2784_v24 = vpop.f32.mrf.mxu1  ;;  %v23827_v47 = vlaneseq }
 0x351   : > { %v22451_v0 = vadd.f32 %v2731_v31, %v2124_v56  ;;  %v22453_v63 = vadd.f32 %v2784_v24, %v2177_v57 }
 0x352   : > { %v2733_v9 = vpop.f32.mrf.mxu0  ;;  %v2786_v27 = vpop.f32.mrf.mxu1 }
 0x353   : > { %23905 = vst [vmem:[#allocation61_spill] sm:$0xff] %v22451_v0  ;;  %23906 = vst [vmem:[#allocation62_spill] sm:$0xff] %v22453_v63  ;;  %v22455_v53 = vadd.f32 %v2733_v9, %v2126_v4  ;;  %v22457_v45 = vadd.f32 %v2786_v27, %v2179_v5 }
 0x354   : > { %v2735_v30 = vpop.f32.mrf.mxu0  ;;  %v2788_v20 = vpop.f32.mrf.mxu1 }
 0x355   : > { %23907 = vst [vmem:[#allocation63_spill] sm:$0xff] %v22455_v53  ;;  %23908 = vst [vmem:[#allocation64_spill] sm:$0xff] %v22457_v45  ;;  %v22459_v36 = vadd.f32 %v2735_v30, %v2128_v34  ;;  %v22461_v42 = vadd.f32 %v2788_v20, %v2181_v23  ;;  %v22494_v45 = vshrl.u32 %v23827_v47, 7 }
 0x356   : > { %v22463_v49 = vpop.f32.mrf.mxu0  ;;  %v22465_v62 = vpop.f32.mrf.mxu1 }
 0x357   : > { %23909 = vst [vmem:[#allocation65_spill] sm:$0xff] %v22459_v36  ;;  %23910 = vst [vmem:[#allocation66_spill] sm:$0xff] %v22461_v42  ;;  %v22506_v0 = vsub.s32 2, %v22494_v45 }
 0x358   : > { %23911 = vst [vmem:[#allocation67_spill] sm:$0xff] %v22463_v49  ;;  %23912 = vst [vmem:[#allocation68_spill] sm:$0xff] %v22465_v62  ;;  %v22503_v49 = vsub.s32 0, %v22494_v45 }
 0x368   : > { %v22467_v56 = vpop.f32.mrf.mxu0  ;;  %v22469_v57 = vpop.f32.mrf.mxu1 }
 0x36a   : > { %v3262_v58 = vpop.f32.mrf.mxu0  ;;  %v22471_v31 = vpop.f32.mrf.mxu1 }
 0x36c   : > { %v22473_v4 = vpop.f32.mrf.mxu0  ;;  %v22475_v5 = vpop.f32.mrf.mxu1 }
 0x36e   : > { %v3266_v24 = vpop.f32.mrf.mxu0  ;;  %v22477_v34 = vpop.f32.mrf.mxu1 }
 0x370   : > { %v3270_v23 = vpop.f32.mrf.mxu0  ;;  %v3323_v9 = vpop.f32.mrf.mxu1 }
 0x372   : > { %v22479_v27 = vpop.f32.mrf.mxu0  ;;  %v22481_v30 = vpop.f32.mrf.mxu1 }
 0x374   : > { %v22483_v20 = vpop.f32.mrf.mxu0  ;;  %v22485_v39 = vpop.f32.mrf.mxu1 }
 0x376   : > { %v22487_v38 = vpop.f32.mrf.mxu0  ;;  %v22489_v60 = vpop.f32.mrf.mxu1 }
 0x388   : > { %v22491_v63 = vpop.f32.mrf.mxu0  ;;  %v3419_v42 = vpop.f32.mrf.mxu1 }
 0x389   : > { %23913 = vst [vmem:[#allocation69_spill] sm:$0xff] %v22491_v63  ;;  %v22496_v6 = vadd.f32 %v3419_v42, %v2799_v25  ;;  %v22509_v63 = vsub.s32 1, %v22494_v45  ;;  %v22514_v25 = vsub.s32 3, %v22494_v45 }
 0x38a   : > { %v3368_v33 = vpop.f32.mrf.mxu0  ;;  %v3421_v36 = vpop.f32.mrf.mxu1 }
 0x38b   : > { %23914 = vst [vmem:[#allocation70_spill] sm:$0xff] %v22496_v6  ;;  %v22498_v53 = vadd.f32 %v3368_v33, %v2798_v50  ;;  %v22500_v62 = vadd.f32 %v3421_v36, %v2800_v55 }
 0x38c   : > { %v3423_v22 = vpop.f32.mrf.mxu1  ;;  %v22516_v42 = vpop.f32.mrf.mxu0 }
 0x38d   : > { %23915 = vst [vmem:[#allocation71_spill] sm:$0xff] %v22498_v53  ;;  %23916 = vst [vmem:[#allocation72_spill] sm:$0xff] %v22500_v62  ;;  %v22511_v47 = vadd.f32 %v3423_v22, %v2807_v18 }
 0x38e   : > { %23918 = vst [vmem:[#allocation74_spill] sm:$0xff] %v22516_v42  ;;  %v22518_v33 = vpop.f32.mrf.mxu0  ;;  %v22520_v50 = vpop.f32.mrf.mxu1 }
 0x38f   : > { %23917 = vst [vmem:[#allocation73_spill] sm:$0xff] %v22511_v47  ;;  %23919 = vst [vmem:[#allocation75_spill] sm:$0xff] %v22518_v33 }
 0x390   : > { %23920 = vst [vmem:[#allocation76_spill] sm:$0xff] %v22520_v50  ;;  %v22522_v55 = vpop.f32.mrf.mxu0  ;;  %v22524_v36 = vpop.f32.mrf.mxu1  ;;  %v2014_v50 = vadd.f32 %v22338_v41, %v22248_v43  ;;  %v2024_v41 = vadd.f32 %v22369_v3, %v22264_v28 }
 0x391   : > { %23921 = vst [vmem:[#allocation77_spill] sm:$0xff] %v22522_v55  ;;  %23922 = vst [vmem:[#allocation78_spill] sm:$0xff] %v22524_v36 }
 0x392   : > { %v22526_v62 = vpop.f32.mrf.mxu0  ;;  %v22528_v53 = vpop.f32.mrf.mxu1 }
 0x393   : > { %23923 = vst [vmem:[#allocation79_spill] sm:$0xff] %v22526_v62  ;;  %23924 = vst [vmem:[#allocation80_spill] sm:$0xff] %v22528_v53  ;;  %v2802_v62 = vadd.f32 %v22419_v19, %v2014_v50  ;;  %v22545_v53 = vld [vmem:[#allocation11] sm:$0xff]  ;;  %v3454_v19 = vadd.f32 %v3270_v23, %v22424_v15  ;;  %v3456_v50 = vadd.f32 %v3323_v9, %v22427_v16 }
 0x394   : > { %v22530_v6 = vpop.f32.mrf.mxu0  ;;  %v22532_v22 = vpop.f32.mrf.mxu1  ;;  %v4112_v28 = vrot.slane %v22545_v53, %v22503_v49  ;;  %v2818_v9 = vadd.f32 %v22439_v10, %v2024_v41 }
 0x395   : > { %23925 = vst [vmem:[#allocation81_spill] sm:$0xff] %v22530_v6  ;;  %23926 = vst [vmem:[#allocation82_spill] sm:$0xff] %v22532_v22  ;;  %v3439_v6 = vadd.f32 %v3262_v58, %v22408_v2  ;;  %v2819_v58 = vadd.f32 %v22437_v52, %v22367_v17 }
 0x396   : > { %v22534_v18 = vpop.f32.mrf.mxu0  ;;  %v22536_v47 = vpop.f32.mrf.mxu1 }
 0x397   : > { %23927 = vst [vmem:[#allocation83_spill] sm:$0xff] %v22534_v18  ;;  %23928 = vst [vmem:[#allocation84_spill] sm:$0xff] %v22536_v47  ;;  %v3447_v18 = vadd.f32 %v3266_v24, %v2802_v62  ;;  %v4116_v47 = vrot.slane %v22545_v53, %v22509_v63  ;;  %v2077_v62 = vadd.f32 %v22371_v14, %v22266_v7 }
 0x398   : > { %v3446_v7 = vadd.f32 %v22473_v4, %v22414_v61  ;;  %v3464_v17 = vadd.f32 %v22485_v39, %v2819_v58  ;;  %v3438_v14 = vadd.f32 %v22467_v56, %v22402_v8  ;;  %v3463_v61 = vadd.f32 %v22487_v38, %v2818_v9 }
 0x399   : > { %v3448_v39 = vadd.f32 %v22475_v5, %v22417_v51  ;;  %v3440_v51 = vadd.f32 %v22469_v57, %v22405_v12 }
 0x3a8   : > { %v3897_v42 = vpop.f32.mrf.mxu0  ;;  %v22538_v33 = vpop.f32.mrf.mxu1 }
 0x3a9   : > { %v4075_v8 = vadd.f32 %v3897_v42, %v3438_v14 }
 0x3aa   : > { %v3899_v55 = vpop.f32.mrf.mxu0  ;;  %v22542_v36 = vpop.f32.mrf.mxu1 }
 0x3ab   : > { %v4076_v32 = vadd.f32 %v3899_v55, %v3439_v6  ;;  %v2817_v6 = vadd.f32 %v22435_v40, %v22364_v1 }
 0x3ac   : > { %v3901_v22 = vpop.f32.mrf.mxu0  ;;  %v3954_v35 = vpop.f32.mrf.mxu1 }
 0x3ad   : > { %v22566_v3 = vadd.f32 %v4116_v47, %v4076_v32  ;;  %v3462_v1 = vadd.f32 %v22483_v20, %v2817_v6  ;;  %v3455_v32 = vadd.f32 %v22479_v27, %v22430_v48  ;;  %v4083_v4 = vadd.f32 %v3901_v22, %v3446_v7 }
 0x3ae   : > { %v3903_v21 = vpop.f32.mrf.mxu0  ;;  %v22550_v59 = vpop.f32.mrf.mxu1  ;;  %v2820_v22 = vadd.f32 %v22441_v11, %v2077_v62  ;;  %v4085_v5 = vadd.f32 %v3954_v35, %v3448_v39  ;;  %v2067_v6 = vadd.f32 %v22340_v46, %v22250_v44  ;;  %v22607_v62 = vadd.f32 %v4112_v28, %v4075_v8  ;;  %v23930_v8 = vld [vmem:[#allocation50_spill] sm:$0xff] }
 0x3af   : > { %v4084_v43 = vadd.f32 %v3903_v21, %v3447_v18  ;;  %v22596_v42 = vadd.f32 %v4112_v28, %v4083_v4  ;;  %v4077_v35 = vadd.f32 %v22538_v33, %v3440_v51 }
 0x3b0   : > { %v3907_v37 = vpop.f32.mrf.mxu0  ;;  %v3960_v2 = vpop.f32.mrf.mxu1  ;;  %v3465_v58 = vadd.f32 %v22489_v60, %v2820_v22  ;;  %v2804_v57 = vadd.f32 %v22421_v26, %v2067_v6  ;;  %v23933_v22 = vld [vmem:[#allocation56_spill] sm:$0xff]  ;;  %v23936_v6 = vld [vmem:[#allocation67_spill] sm:$0xff] }
 0x3b1   : > { %v22562_v24 = vadd.f32 %v4116_v47, %v4084_v43  ;;  %v4091_v21 = vadd.f32 %v3907_v37, %v3454_v19  ;;  %v4093_v15 = vadd.f32 %v3960_v2, %v3456_v50  ;;  %v4120_v37 = vrot.slane %v22545_v53, %v22506_v0 }
 0x3b2   : > { %v3909_v16 = vpop.f32.mrf.mxu0  ;;  %v3962_v23 = vpop.f32.mrf.mxu1  ;;  %v18850_v46 = vpack.i.bf16 %v22596_v42, %v22607_v62  ;;  %v3449_v33 = vadd.f32 %v22477_v34, %v2804_v57 }
 0x3b3   : > { %v18825_v10 = vpack.i.bf16 %v22562_v24, %v22566_v3  ;;  %v22584_v56 = vadd.f32 %v4112_v28, %v4091_v21  ;;  %v22586_v48 = vadd.f32 %v4120_v37, %v4093_v15  ;;  %v4092_v18 = vadd.f32 %v3909_v16, %v3455_v32 }
 0x3b4   : > { %v3911_v40 = vpop.f32.mrf.mxu0  ;;  %v3964_v52 = vpop.f32.mrf.mxu1  ;;  %v3457_v21 = vadd.f32 %v22481_v30, %v22433_v54  ;;  %v22617_v15 = vadd.f32 %v4120_v37, %v4085_v5  ;;  %v3441_v54 = vadd.f32 %v22471_v31, %v22411_v13  ;;  %v4086_v30 = vadd.f32 %v22550_v59, %v3449_v33  ;;  %v23934_v5 = vld [vmem:[#allocation61_spill] sm:$0xff]  ;;  %v23940_v33 = vld [vmem:[#allocation63_spill] sm:$0xff] }
 0x3b5   : > { %v4099_v20 = vadd.f32 %v3911_v40, %v3462_v1  ;;  %v4101_v55 = vadd.f32 %v3964_v52, %v3464_v17  ;;  %18826 = vrot.lane.b32.xlu1 %v18825_v10, %s21654_s7  ;;  %v22610_v12 = vadd.f32 %v4116_v47, %v4092_v18  ;;  %v4127_v40 = vsub.s32 4, %v22494_v45 }
 0x3b6   : > { %v3913_v27 = vpop.f32.mrf.mxu0  ;;  %v3966_v11 = vpop.f32.mrf.mxu1  ;;  %v4094_v26 = vadd.f32 %v3962_v23, %v3457_v21  ;;  %v4078_v7 = vadd.f32 %v22542_v36, %v3441_v54  ;;  %v4135_v21 = vsub.s32 6, %v22494_v45 }
 0x3b7   : > { %v22589_v43 = vadd.f32 %v4112_v28, %v4099_v20  ;;  %v22591_v41 = vadd.f32 %v4120_v37, %v4101_v55  ;;  %v4100_v38 = vadd.f32 %v3913_v27, %v3463_v61  ;;  %v4102_v44 = vadd.f32 %v3966_v11, %v3465_v58  ;;  %v23929_v61 = vld [vmem:[#allocation55_spill] sm:$0xff]  ;;  %v23931_v27 = vld [vmem:[#allocation53_spill] sm:$0xff]  ;;  %v23937_v11 = vld [vmem:[#allocation58_spill] sm:$0xff] }
 0x3b8   : > { %v22626_v28 = vadd.f32 %v4120_v37, %v4077_v35  ;;  %v2130_v4 = vadd.f32 %v23929_v61, %v22306_v29  ;;  %v4131_v20 = vsub.s32 5, %v22494_v45  ;;  %v2120_v18 = vadd.f32 %v23931_v27, %v23930_v8  ;;  %v23938_v35 = vld [vmem:[#allocation74_spill] sm:$0xff]  ;;  %v23945_v61 = vld [vmem:[#allocation69_spill] sm:$0xff] }
 0x3b9   : > { %v22598_v19 = vadd.f32 %v4116_v47, %v4100_v38  ;;  %v18835_v50 = vpack.i.bf16 %v22589_v43, %v22584_v56  ;;  %v18830_v2 = vpack.i.bf16 %v22591_v41, %v22586_v48  ;;  %v4124_v47 = vrot.slane %v22545_v53, %v22514_v25  ;;  %v23932_v38 = vld [vmem:[#allocation52_spill] sm:$0xff] }
 0x3ba   : > { %v18845_v9 = vpack.i.bf16 %v22617_v15, %v22626_v28  ;;  %v2183_v51 = vadd.f32 %v23933_v22, %v23932_v38  ;;  %v2822_v58 = vadd.f32 %v23936_v6, %v2130_v4  ;;  %v3450_v57 = vadd.f32 %v23938_v35, %v23937_v11 }
 0x3bb   : > { %18836 = vrot.lane.b32.xlu0 %v18835_v50, %s21654_s7  ;;  %18831 = vrot.lane.b32.xlu1 %v18830_v2, %s21654_s7  ;;  %v18840_v60 = vpack.i.bf16 %v22598_v19, %v22610_v12  ;;  %v22633_v16 = vadd.f32 %v4124_v47, %v4102_v44  ;;  %v22638_v34 = vadd.f32 %v4124_v47, %v4094_v26  ;;  %v23935_v50 = vld [vmem:[#allocation77_spill] sm:$0xff]  ;;  %v23941_v26 = vld [vmem:[#allocation79_spill] sm:$0xff] }
 0x3bc   : > { %v22641_v23 = vadd.f32 %v4124_v47, %v4086_v30  ;;  %v22645_v17 = vadd.f32 %v4124_v47, %v4078_v7  ;;  %v3458_v2 = vadd.f32 %v23935_v50, %v23934_v5  ;;  %v4128_v29 = vrot.slane %v22545_v53, %v4127_v40  ;;  %v23942_v30 = vld [vmem:[#allocation65_spill] sm:$0xff]  ;;  %v23946_v5 = vld [vmem:[#allocation83_spill] sm:$0xff] }
 0x3bd   : > { %v18855_v1 = vpack.i.bf16 %v22633_v16, %v22638_v34  ;;  %v3459_v54 = vadd.f32 %v23941_v26, %v23940_v33  ;;  %v4132_v8 = vrot.slane %v22545_v53, %v4131_v20  ;;  %v4139_v40 = vsub.s32 7, %v22494_v45  ;;  %v23949_v26 = vld [vmem:[#allocation64_spill] sm:$0xff] }
 0x3be   : > { %v18860_v31 = vpack.i.bf16 %v22641_v23, %v22645_v17  ;;  %v3467_v50 = vadd.f32 %v23946_v5, %v2822_v58 }
 0x3bf   : > { %18841 = vrot.lane.b32.xlu0 %v18840_v60, %s21654_s7  ;;  %18851 = vrot.lane.b32.xlu1 %v18850_v46, %s21654_s7  ;;  %v23939_v46 = vld [vmem:[#allocation68_spill] sm:$0xff] }
 0x3c0   : > { %v2824_v47 = vadd.f32 %v23939_v46, %v2183_v51  ;;  %v23947_v51 = vld [vmem:[#allocation84_spill] sm:$0xff]  ;;  %v23948_v46 = vld [vmem:[#allocation59_spill] sm:$0xff] }
 0x3c1   : > { %v2806_v33 = vadd.f32 %v23948_v46, %v2120_v18  ;;  %v4140_v18 = vrot.slane %v22545_v53, %v4139_v40  ;;  %v4136_v40 = vrot.slane %v22545_v53, %v4135_v21  ;;  %v23962_v21 = vld [vmem:[#allocation71_spill] sm:$0xff] }
 0x3c2   : > { %v3469_v6 = vadd.f32 %v23947_v51, %v2824_v47  ;;  %v23953_v47 = vld [vmem:[#allocation62_spill] sm:$0xff] }
 0x3c3   : > { %18846 = vrot.lane.b32.xlu0 %v18845_v9, %s21654_s7  ;;  %v23943_v9 = vld [vmem:[#allocation81_spill] sm:$0xff] }
 0x3c4   : > { %v3466_v7 = vadd.f32 %v23943_v9, %v23942_v30  ;;  %v23951_v30 = vld [vmem:[#allocation66_spill] sm:$0xff] }
 0x3c5   : > { %v23952_v9 = vld [vmem:[#allocation82_spill] sm:$0xff] }
 0x3c7   : > { %18856 = vrot.lane.b32.xlu0 %v18855_v1, %s21654_s7 }
 0x3c8   : > { %v4003_v59 = vpop.f32.mrf.mxu0  ;;  %v22648_v13 = vpop.f32.mrf.mxu1 }
 0x3ca   : > { %v22652_v36 = vpop.f32.mrf.mxu0  ;;  %v22654_v14 = vpop.f32.mrf.mxu1 }
 0x3cb   : > { %18861 = vrot.lane.b32.xlu0 %v18860_v31, %s21654_s7  ;;  %v23944_v31 = vld [vmem:[#allocation57_spill] sm:$0xff] }
 0x3cc   : > { %v4007_v32 = vpop.f32.mrf.mxu0  ;;  %v4060_v37 = vpop.f32.mrf.mxu1  ;;  %v3442_v4 = vadd.f32 %v23945_v61, %v23944_v31  ;;  %v3468_v31 = vadd.f32 %v23952_v9, %v23951_v30 }
 0x3cd   : > { %v4087_v27 = vadd.f32 %v4007_v32, %v3450_v57 }
 0x3ce   : > { %v4009_v52 = vpop.f32.mrf.mxu0  ;;  %v22658_v10 = vpop.f32.mrf.mxu1  ;;  %v4079_v20 = vadd.f32 %v4003_v59, %v3442_v4  ;;  %v23955_v4 = vld [vmem:[#allocation51_spill] sm:$0xff] }
 0x3d0   : > { %v4013_v55 = vpop.f32.mrf.mxu0  ;;  %v4066_v39 = vpop.f32.mrf.mxu1 }
 0x3d1   : > { %v4095_v1 = vadd.f32 %v4013_v55, %v3458_v2  ;;  %v23950_v55 = vld [vmem:[#allocation80_spill] sm:$0xff] }
 0x3d2   : > { %v4015_v44 = vpop.f32.mrf.mxu0  ;;  %v4068_v60 = vpop.f32.mrf.mxu1  ;;  %v3461_v2 = vadd.f32 %v23950_v55, %v23949_v26  ;;  %v22708_v55 = vadd.f32 %v4128_v29, %v4079_v20 }
 0x3d3   : > { %v4096_v11 = vadd.f32 %v4015_v44, %v3459_v54  ;;  %v22690_v32 = vadd.f32 %v4128_v29, %v4095_v1  ;;  %v23954_v44 = vld [vmem:[#allocation78_spill] sm:$0xff] }
 0x3d4   : > { %v4017_v38 = vpop.f32.mrf.mxu0  ;;  %v4070_v22 = vpop.f32.mrf.mxu1  ;;  %v3460_v54 = vadd.f32 %v23954_v44, %v23953_v47 }
 0x3d5   : > { %v4103_v35 = vadd.f32 %v4017_v38, %v3466_v7  ;;  %v22697_v7 = vadd.f32 %v4128_v29, %v4087_v27  ;;  %v4098_v38 = vadd.f32 %v4068_v60, %v3461_v2  ;;  %v22699_v51 = vadd.f32 %v4132_v8, %v4096_v11  ;;  %v23958_v27 = vld [vmem:[#allocation73_spill] sm:$0xff]  ;;  %v23959_v2 = vld [vmem:[#allocation60_spill] sm:$0xff] }
 0x3d6   : > { %v4019_v61 = vpop.f32.mrf.mxu0  ;;  %v4072_v45 = vpop.f32.mrf.mxu1  ;;  %v4105_v46 = vadd.f32 %v4070_v22, %v3468_v31  ;;  %v4089_v30 = vadd.f32 %v4060_v37, %v23958_v27  ;;  %v4097_v60 = vadd.f32 %v4066_v39, %v3460_v54  ;;  %v23960_v31 = vld [vmem:[#allocation70_spill] sm:$0xff]  ;;  %v23961_v37 = vld [vmem:[#allocation76_spill] sm:$0xff] }
 0x3d7   : > { %v22692_v57 = vadd.f32 %v4128_v29, %v4103_v35  ;;  %v4104_v58 = vadd.f32 %v4019_v61, %v3467_v50  ;;  %v4106_v5 = vadd.f32 %v4072_v45, %v3469_v6  ;;  %v23956_v35 = vld [vmem:[#allocation54_spill] sm:$0xff]  ;;  %v23957_v6 = vld [vmem:[#allocation75_spill] sm:$0xff]  ;;  %v4081_v61 = vadd.f32 %v22648_v13, %v23960_v31 }
 0x3d8   : > { %v2173_v50 = vadd.f32 %v23956_v35, %v23955_v4  ;;  %v3451_v26 = vadd.f32 %v23957_v6, %v2806_v33  ;;  %v22720_v29 = vadd.f32 %v4140_v18, %v4098_v38  ;;  %v22722_v20 = vadd.f32 %v4136_v40, %v4105_v46  ;;  %v23963_v38 = vld [vmem:[#allocation72_spill] sm:$0xff] }
 0x3d9   : > { %v22701_v59 = vadd.f32 %v4132_v8, %v4104_v58  ;;  %v18865_v1 = vpack.i.bf16 %v22692_v57, %v22690_v32  ;;  %v22712_v11 = vadd.f32 %v4140_v18, %v4106_v5  ;;  %v18870_v53 = vpack.i.bf16 %v22697_v7, %v22708_v55 }
 0x3da   : > { %v2808_v9 = vadd.f32 %v23959_v2, %v2173_v50  ;;  %v4088_v33 = vadd.f32 %v4009_v52, %v3451_v26  ;;  %v4080_v45 = vadd.f32 %v22652_v36, %v23962_v21  ;;  %v22730_v58 = vadd.f32 %v4136_v40, %v4089_v30 }
 0x3db   : > { %18866 = vrot.lane.b32.xlu1 %v18865_v1, %s21654_s7  ;;  %v18885_v22 = vpack.i.bf16 %v22701_v59, %v22699_v51  ;;  %v22732_v5 = vadd.f32 %v4136_v40, %v4097_v60  ;;  %v18890_v13 = vpack.i.bf16 %v22712_v11, %v22720_v29  ;;  %v22737_v52 = vadd.f32 %v4136_v40, %v4081_v61 }
 0x3dc   : > { %v3453_v39 = vadd.f32 %v23961_v37, %v2808_v9  ;;  %v22739_v47 = vadd.f32 %v4132_v8, %v4088_v33  ;;  %v22745_v54 = vadd.f32 %v4132_v8, %v4080_v45  ;;  %v4082_v46 = vadd.f32 %v22654_v14, %v23963_v38 }
 0x3dd   : > { %18886 = vrot.lane.b32.xlu0 %v18885_v22, %s21654_s7  ;;  %v18875_v36 = vpack.i.bf16 %v22722_v20, %v22732_v5  ;;  %v18895_v1 = vpack.i.bf16 %v22730_v58, %v22737_v52  ;;  %v23964_v50 = vlaneseq }
 0x3de   : > { %v4090_v44 = vadd.f32 %v22658_v10, %v3453_v39  ;;  %v18880_v10 = vpack.i.bf16 %v22739_v47, %v22745_v54  ;;  %v22757_v35 = vadd.f32 %v4140_v18, %v4082_v46 }
 0x3df   : > { %18871 = vrot.lane.b32.xlu1 %v18870_v53, %s21654_s7  ;;  %v22764_v6 = vand.u32 127, %v23964_v50 }
 0x3e0   : > { %v22752_v4 = vadd.f32 %v4140_v18, %v4090_v44 }
 0x3e1   : > { %18891 = vrot.lane.b32.xlu0 %v18890_v13, %s21654_s7  ;;  %vm4247_vm7 = vcmp.lt.s32.totalorder %v22764_v6, 127  ;;  %v20863_v6 = vld [vmem:[#allocation30 + $0x74] ss:$8 sps:$4 sm:$0xff]  }
 0x3e2   : > { %v18900_v8 = vpack.i.bf16 %v22752_v4, %v22757_v35 }
 0x3e3   : > { %18876 = vrot.lane.b32.xlu1 %v18875_v36, %s21654_s7 }
 0x3e5   : > { %18896 = vrot.lane.b32.xlu0 %v18895_v1, %s21654_s7 }
 0x3e7   : > { %18881 = vrot.lane.b32.xlu1 %v18880_v10, %s21654_s7 }
 0x3eb   : > { %18901 = vrot.lane.b32.xlu1 %v18900_v8, %s21654_s7 }
 0x427   : > { %v18827_v14 = vpop.permute.xlu1 %18826 }
 0x428   : > { %v18829_v45 = vunpack.i.h.bf16 %v18827_v14  ;;  %v18828_v13 = vunpack.i.l.bf16 %v18827_v14 }
 0x42d   : > { %v22766_v26 = vpop.permute.xlu0 %18836  ;;  %v18832_v40 = vpop.permute.xlu1 %18831 }
 0x42e   : > { %v18839_v27 = vunpack.i.h.bf16 %v22766_v26  ;;  %v18838_v18 = vunpack.i.l.bf16 %v22766_v26  ;;  %v18834_v22 = vunpack.i.h.bf16 %v18832_v40  ;;  %v18833_v2 = vunpack.i.l.bf16 %v18832_v40 }
 0x431   : > { %v18842_v30 = vpop.permute.xlu0 %18841  ;;  %v22771_v60 = vpop.permute.xlu1 %18851 }
 0x432   : > { %v18844_v9 = vunpack.i.h.bf16 %v18842_v30  ;;  %v18843_v31 = vunpack.i.l.bf16 %v18842_v30  ;;  %v18854_v61 = vunpack.i.h.bf16 %v22771_v60  ;;  %v18853_v33 = vunpack.i.l.bf16 %v22771_v60  ;;  %v18939_v60 = vld [vmem:[#allocation15 + $0xe0] ss:$16 sps:$4 sm:$0xff]  }
 0x434   : > { %v4270_v53 = vsel %vm4247_vm7, %v18843_v31, %v18833_v2  ;;  %v4271_v37 = vsel %vm4247_vm7, %v18844_v9, %v18834_v22  ;;  %v4274_v39 = vsel %vm4247_vm7, %v18838_v18, %v18843_v31  ;;  %v4275_v21 = vsel %vm4247_vm7, %v18839_v27, %v18844_v9 }
 0x435   : > { %v4296_v44 = vmax.f32 %v22584_v56, %v4274_v39  ;;  %v4304_v36 = vmax.f32 %v22589_v43, %v4275_v21  ;;  %v18847_v38 = vpop.permute.xlu0 %18846  ;;  %v4273_v10 = vsel %vm4247_vm7, %v18854_v61, %v18829_v45  ;;  %v4272_v8 = vsel %vm4247_vm7, %v18853_v33, %v18828_v13 }
 0x436   : > { %v18849_v46 = vunpack.i.h.bf16 %v18847_v38  ;;  %v18848_v1 = vunpack.i.l.bf16 %v18847_v38  ;;  %v4297_v50 = vmax.f32 %v22610_v12, %v4270_v53  ;;  %v4305_v14 = vmax.f32 %v22598_v19, %v4271_v37 }
 0x437   : > { %v22803_v40 = vpack.c.bf16 %v4304_v36, %v4296_v44  ;;  %v4288_v39 = vmax.f32 %v22596_v42, %v4273_v10  ;;  %v4280_v12 = vmax.f32 %v22607_v62, %v4272_v8  ;;  %v22823_v42 = vld [vmem:[#allocation12] sm:$0xff]   ;;  %v23965_v53 = vmov 0  }
 0x438   : > { %v4268_v56 = vsel %vm4247_vm7, %v18828_v13, %v18848_v1  ;;  %v4269_v43 = vsel %vm4247_vm7, %v18829_v45, %v18849_v46  ;;  %v22805_v30 = vpack.c.bf16 %v4305_v14, %v4297_v50 }
 0x439   : > { %v4281_v9 = vmax.f32 %v22566_v3, %v4268_v56  ;;  %v4289_v31 = vmax.f32 %v22562_v24, %v4269_v43  ;;  %v22819_v3 = vpack.c.bf16 %v4288_v39, %v4280_v12  ;;  %v22821_v24 = vld [vmem:[#allocation12 + $0x8] ss:$0 sps:$4 sm:$0x33]   ;;  %v18857_v62 = vpop.permute.xlu0 %18856 }
 0x43a   : > { %4357 = vmatprep.subr.bf16.mxu0 %v22805_v30  ;;  %18577 = vmatprep.subr.bf16.mxu1 %v22805_v30  ;;  %v18859_v21 = vunpack.i.h.bf16 %v18857_v62  ;;  %v18858_v45 = vunpack.i.l.bf16 %v18857_v62 }
 0x43b   : > { %v22813_v19 = vpack.c.bf16 %v4289_v31, %v4281_v9  ;;  %4358 = vmatpush1.bf16.msra.mxu0 %v22803_v40  ;;  %18579 = vmatpush1.bf16.msra.mxu1 %v22803_v40 }
 0x43c   : > { %v4266_v36 = vsel %vm4247_vm7, %v18833_v2, %v18858_v45  ;;  %v4267_v38 = vsel %vm4247_vm7, %v18834_v22, %v18859_v21 }
 0x43d   : > { %4359 = vmatprep.subr.bf16.mxu0 %v22813_v19  ;;  %18578 = vmatprep.subr.bf16.mxu1 %v22813_v19  ;;  %v18862_v37 = vpop.permute.xlu0 %18861  ;;  %v4298_v43 = vmax.f32 %v22586_v48, %v4266_v36  ;;  %v4306_v9 = vmax.f32 %v22591_v41, %v4267_v38 }
 0x43e   : > { %v18864_v13 = vunpack.i.h.bf16 %v18862_v37  ;;  %v18863_v44 = vunpack.i.l.bf16 %v18862_v37 }
 0x43f   : > { %4360 = vmatpush1.bf16.msra.mxu0 %v22819_v3  ;;  %18580 = vmatpush1.bf16.msra.mxu1 %v22819_v3 }
 0x440   : > { %v4264_v8 = vsel %vm4247_vm7, %v18848_v1, %v18863_v44  ;;  %v4265_v50 = vsel %vm4247_vm7, %v18849_v46, %v18864_v13 }
 0x441   : > { %v4282_v1 = vmax.f32 %v22626_v28, %v4264_v8  ;;  %v4290_v62 = vmax.f32 %v22617_v15, %v4265_v50 }
 0x442   : > { %16929 = vmatmul.mubr.msk.bf16.vlgmr.msra.gmra.mxu1 %vm904_vm0, %v22821_v24  ;;  %16928 = vmatmul.mubr.msk.bf16.vlgmr.msra.gmra.mxu0 %vm904_vm0, %v22823_v42 }
 0x443   : > { %4428 = vmatprep.mubr.bf16.mxu1 %v23965_v53  ;;  %4479 = vmatprep.mubr.bf16.mxu0 %v23965_v53 }
 0x44d   : > { %v18867_v10 = vpop.permute.xlu1 %18866 }
 0x44e   : > { %v18869_v14 = vunpack.i.h.bf16 %v18867_v10  ;;  %v18868_v56 = vunpack.i.l.bf16 %v18867_v10 }
 0x44f   : > { %v18887_v31 = vpop.permute.xlu0 %18886 }
 0x450   : > { %v4263_v2 = vsel %vm4247_vm7, %v18859_v21, %v18869_v14  ;;  %v4262_v22 = vsel %vm4247_vm7, %v18858_v45, %v18868_v56  ;;  %v18889_v39 = vunpack.i.h.bf16 %v18887_v31  ;;  %v18888_v12 = vunpack.i.l.bf16 %v18887_v31 }
 0x451   : > { %v18872_v46 = vpop.permute.xlu1 %18871  ;;  %v4299_v37 = vmax.f32 %v22638_v34, %v4262_v22  ;;  %v4307_v48 = vmax.f32 %v22633_v16, %v4263_v2  ;;  %v22857_v31 = vpack.c.bf16 %v4306_v9, %v4298_v43  ;;  %v22867_v2 = vpack.c.bf16 %v4290_v62, %v4282_v1 }
 0x452   : > { %v4258_v41 = vsel %vm4247_vm7, %v18868_v56, %v18888_v12  ;;  %v18874_v36 = vunpack.i.h.bf16 %v18872_v46  ;;  %v18873_v38 = vunpack.i.l.bf16 %v18872_v46  ;;  %v4259_v21 = vsel %vm4247_vm7, %v18869_v14, %v18889_v39 }
 0x453   : > { %v18892_v45 = vpop.permute.xlu0 %18891  ;;  %v22855_v10 = vpack.c.bf16 %v4307_v48, %v4299_v37  ;;  %v4300_v8 = vmax.f32 %v22690_v32, %v4258_v41 }
 0x454   : > { %v4261_v15 = vsel %vm4247_vm7, %v18864_v13, %v18874_v36  ;;  %v4260_v28 = vsel %vm4247_vm7, %v18863_v44, %v18873_v38  ;;  %v18894_v16 = vunpack.i.h.bf16 %v18892_v45  ;;  %v18893_v34 = vunpack.i.l.bf16 %v18892_v45 }
 0x455   : > { %v18877_v50 = vpop.permute.xlu1 %18876  ;;  %4408 = vmatprep.subr.bf16.mxu1 %v22855_v10  ;;  %v4283_v14 = vmax.f32 %v22645_v17, %v4260_v28  ;;  %v4291_v56 = vmax.f32 %v22641_v23, %v4261_v15  ;;  %v4308_v17 = vmax.f32 %v22692_v57, %v4259_v21 }
 0x456   : > { %v4278_v13 = vsel %vm4247_vm7, %v18893_v34, %v18838_v18  ;;  %v4279_v44 = vsel %vm4247_vm7, %v18894_v16, %v18839_v27  ;;  %v18879_v32 = vunpack.i.h.bf16 %v18877_v50  ;;  %v18878_v43 = vunpack.i.l.bf16 %v18877_v50  ;;  %4409 = vmatpush1.bf16.msra.mxu1 %v22857_v31 }
 0x457   : > { %v18897_v9 = vpop.permute.xlu0 %18896  ;;  %v22879_v23 = vpack.c.bf16 %v4291_v56, %v4283_v14  ;;  %v4303_v22 = vmax.f32 %v22720_v29, %v4278_v13  ;;  %v4311_v1 = vmax.f32 %v22712_v11, %v4279_v44  ;;  %v4324_v13 = vpack.c.bf16 %v4308_v17, %v4300_v8 }
 0x458   : > { %v4251_v18 = vsel %vm4247_vm7, %v18879_v32, %v18894_v16  ;;  %v4255_v26 = vsel %vm4247_vm7, %v18889_v39, %v18879_v32  ;;  %v4250_v27 = vsel %vm4247_vm7, %v18878_v43, %v18893_v34  ;;  %v4254_v62 = vsel %vm4247_vm7, %v18888_v12, %v18878_v43 }
 0x459   : > { %v4310_v57 = vmax.f32 %v22722_v20, %v4251_v18  ;;  %v4302_v46 = vmax.f32 %v22732_v5, %v4250_v27  ;;  %v18899_v37 = vunpack.i.h.bf16 %v18897_v9  ;;  %v18898_v29 = vunpack.i.l.bf16 %v18897_v9  ;;  %v18882_v48 = vpop.permute.xlu1 %18881  ;;  %4410 = vmatprep.subr.bf16.mxu1 %v22879_v23  ;;  %v18957_v18 = vld [vmem:[#allocation15 + $0x60] ss:$16 sps:$4 sm:$0xff]  }
 0x45a   : > { %v18884_v11 = vunpack.i.h.bf16 %v18882_v48  ;;  %v18883_v41 = vunpack.i.l.bf16 %v18882_v48  ;;  %4411 = vmatpush1.bf16.msra.mxu1 %v22867_v2  ;;  %v4327_v39 = vpack.c.bf16 %v4311_v1, %v4303_v22  ;;  %v4301_v21 = vmax.f32 %v22699_v51, %v4254_v62  ;;  %v18968_v1 = vld [vmem:[#allocation15 + $0x284] ss:$16 sps:$4 sm:$0xff]   ;;  %v18966_v27 = vld [vmem:[#allocation15 + $0x280] ss:$16 sps:$4 sm:$0xff]  }
 0x45b   : > { %v4309_v45 = vmax.f32 %v22701_v59, %v4255_v26  ;;  %v22897_v15 = vpack.c.bf16 %v4310_v57, %v4302_v46  ;;  %v18965_v26 = vld [vmem:[#allocation15 + $0x44] ss:$16 sps:$4 sm:$0xff]   ;;  %v18963_v57 = vld [vmem:[#allocation15 + $0x40] ss:$16 sps:$4 sm:$0xff]  }
 0x45c   : > { %v4253_v20 = vsel %vm4247_vm7, %v18884_v11, %v18899_v37  ;;  %v4252_v5 = vsel %vm4247_vm7, %v18883_v41, %v18898_v29  ;;  %v4256_v12 = vsel %vm4247_vm7, %v18873_v38, %v18883_v41  ;;  %v4257_v28 = vsel %vm4247_vm7, %v18874_v36, %v18884_v11  ;;  %4510 = vmatprep.subr.bf16.mxu1 %v4327_v39  ;;  %v18974_v62 = vld [vmem:[#allocation15 + $0x264] ss:$16 sps:$4 sm:$0xff]   ;;  %v18969_v48 = vld [vmem:[#allocation15 + $0x20] ss:$16 sps:$4 sm:$0xff]  }
 0x45d   : > { %v4284_v16 = vmax.f32 %v22708_v55, %v4256_v12  ;;  %v4292_v51 = vmax.f32 %v22697_v7, %v4257_v28  ;;  %v18902_v59 = vpop.permute.xlu1 %18901  ;;  %16930 = vmatmul.mubr.msk.bf16.vlgmr.msra.gmra.mxu1 %vm904_vm0, %v22823_v42  ;;  %v4325_v34 = vpack.c.bf16 %v4309_v45, %v4301_v21  ;;  %v4285_v50 = vmax.f32 %v22745_v54, %v4252_v5  ;;  %v18971_v46 = vld [vmem:[#allocation15 + $0x24] ss:$16 sps:$4 sm:$0xff]   ;;  %v18978_v41 = vld [vmem:[#allocation15 + $0x240] ss:$16 sps:$4 sm:$0xff]  }
 0x45e   : > { %v18904_v14 = vunpack.i.h.bf16 %v18902_v59  ;;  %v18903_v56 = vunpack.i.l.bf16 %v18902_v59  ;;  %4511 = vmatpush1.bf16.msra.mxu1 %v22897_v15  ;;  %v4293_v38 = vmax.f32 %v22739_v47, %v4253_v20  ;;  %4438 = vmatprep.mubr.bf16.mxu1 %v23965_v53  ;;  %v18977_v11 = vld [vmem:[#allocation15 + $0x4] ss:$16 sps:$4 sm:$0xff]   ;;  %v18981_v20 = vld [vmem:[#allocation15 + $0x1e0] ss:$16 sps:$4 sm:$0xff]  }
 0x45f   : > { %4459 = vmatprep.subr.bf16.mxu0 %v4325_v34  ;;  %v4316_v55 = vpack.c.bf16 %v4292_v51, %v4284_v16  ;;  %v18986_v21 = vld [vmem:[#allocation15 + $0x224] ss:$16 sps:$4 sm:$0xff]   ;;  %v18990_v28 = vld [vmem:[#allocation15 + $0x200] ss:$16 sps:$4 sm:$0xff]  }
 0x460   : > { %v4249_v7 = vsel %vm4247_vm7, %v18899_v37, %v18904_v14  ;;  %v4248_v36 = vsel %vm4247_vm7, %v18898_v29, %v18903_v56  ;;  %v4276_v54 = vsel %vm4247_vm7, %v18903_v56, %v18853_v33  ;;  %v4277_v47 = vsel %vm4247_vm7, %v18904_v14, %v18854_v61  ;;  %4460 = vmatpush1.bf16.msra.mxu0 %v4324_v13  ;;  %v18944_v61 = vld [vmem:[#allocation15 + $0xc4] ss:$16 sps:$4 sm:$0xff]   ;;  %v18942_v33 = vld [vmem:[#allocation15 + $0xc0] ss:$16 sps:$4 sm:$0xff]  }
 0x461   : > { %v4294_v8 = vmax.f32 %v22730_v58, %v4249_v7  ;;  %v4286_v44 = vmax.f32 %v22737_v52, %v4248_v36  ;;  %v4317_v32 = vpack.c.bf16 %v4293_v38, %v4285_v50  ;;  %v4287_v43 = vmax.f32 %v22757_v35, %v4276_v54  ;;  %v18937_v58 = vld [vmem:[#allocation14] sm:$0xff]   ;;  %v18972_v37 = vld [vmem:[#allocation15 + $0x260] ss:$16 sps:$4 sm:$0xff]  }
 0x462   : > { %v4295_v17 = vmax.f32 %v22752_v4, %v4277_v47  ;;  %v18941_v52 = vld [vmem:[#allocation15 + $0xe4] ss:$16 sps:$4 sm:$0xff]   ;;  %v18938_v4 = vld [vmem:[#allocation14 + $0x8] ss:$0 sps:$4 sm:$0x33]  }
 0x463   : > { %4461 = vmatprep.subr.bf16.mxu0 %v4317_v32  ;;  %v4318_v9 = vpack.c.bf16 %v4294_v8, %v4286_v44  ;;  %v18950_v35 = vld [vmem:[#allocation15 + $0x2e4] ss:$16 sps:$4 sm:$0xff]   ;;  %v18987_v16 = vld [vmem:[#allocation15 + $0x1c0] ss:$16 sps:$4 sm:$0xff]  }
 0x464   : > { %4462 = vmatpush1.bf16.msra.mxu0 %v4316_v55  ;;  %v4319_v22 = vpack.c.bf16 %v4295_v17, %v4287_v43  ;;  %v18980_v29 = vld [vmem:[#allocation15 + $0x244] ss:$16 sps:$4 sm:$0xff]   ;;  %v18996_v59 = vld [vmem:[#allocation15 + $0x3e0] ss:$16 sps:$4 sm:$0xff]  }
 0x465   : > { %4578 = vmatprep.subr.bf16.mxu0 %v22805_v30  ;;  %16931 = vmatmul.mubr.msk.bf16.gmra.mxu1 %vm904_vm0, %v22821_v24  ;;  %v18948_v30 = vld [vmem:[#allocation15 + $0x2e0] ss:$16 sps:$4 sm:$0xff]   ;;  %v18983_v45 = vld [vmem:[#allocation15 + $0x1e4] ss:$16 sps:$4 sm:$0xff]  }
 0x466   : > { %4512 = vmatprep.subr.bf16.mxu1 %v4319_v22  ;;  %4530 = vmatprep.mubr.bf16.mxu1 %v23965_v53  ;;  %v18992_v5 = vld [vmem:[#allocation15 + $0x204] ss:$16 sps:$4 sm:$0xff]   ;;  %v18993_v50 = vld [vmem:[#allocation15 + $0x1a0] ss:$16 sps:$4 sm:$0xff]  }
 0x467   : > { %16932 = vmatmul.mubr.msk.bf16.vlgmr.msra.gmra.mxu0 %vm904_vm0, %v22823_v42  ;;  %4513 = vmatpush1.bf16.msra.mxu1 %v4318_v9  ;;  %v18989_v12 = vld [vmem:[#allocation15 + $0x1c4] ss:$16 sps:$4 sm:$0xff]   ;;  %v19002_v56 = vld [vmem:[#allocation15 + $0x3c0] ss:$16 sps:$4 sm:$0xff]  }
 0x468   : > { %4579 = vmatpush1.bf16.msra.mxu0 %v22803_v40  ;;  %4629 = vmatprep.subr.bf16.mxu1 %v22855_v10  ;;  %v18947_v40 = vld [vmem:[#allocation15 + $0xa4] ss:$16 sps:$4 sm:$0xff]   ;;  %v18999_v38 = vld [vmem:[#allocation15 + $0x180] ss:$16 sps:$4 sm:$0xff]  }
 0x469   : > { %4580 = vmatprep.subr.bf16.mxu0 %v22813_v19  ;;  %4489 = vmatprep.mubr.bf16.mxu0 %v23965_v53  ;;  %v18956_v19 = vld [vmem:[#allocation15 + $0x2c4] ss:$16 sps:$4 sm:$0xff]   ;;  %v19008_v7 = vld [vmem:[#allocation15 + $0x3a0] ss:$16 sps:$4 sm:$0xff]  }
 0x46a   : > { %v18962_v10 = vld [vmem:[#allocation15 + $0x2a4] ss:$16 sps:$4 sm:$0xff]   ;;  %v19005_v54 = vld [vmem:[#allocation15 + $0x160] ss:$16 sps:$4 sm:$0xff]  }
 0x46b   : > { %v18995_v51 = vld [vmem:[#allocation15 + $0x1a4] ss:$16 sps:$4 sm:$0xff]   ;;  %v19014_v8 = vld [vmem:[#allocation15 + $0x380] ss:$16 sps:$4 sm:$0xff]  }
 0x46c   : > { %4581 = vmatpush1.bf16.msra.mxu0 %v22819_v3  ;;  %v18945_v3 = vld [vmem:[#allocation15 + $0xa0] ss:$16 sps:$4 sm:$0xff]   ;;  %v19001_v14 = vld [vmem:[#allocation15 + $0x184] ss:$16 sps:$4 sm:$0xff]  }
 0x46d   : > { %4680 = vmatprep.subr.bf16.mxu0 %v4325_v34  ;;  %16934 = vmatmul.mubr.msk.bf16.vlgmr.msra.gmra.mxu1 %vm904_vm0, %v22823_v42  ;;  %v18954_v42 = vld [vmem:[#allocation15 + $0x2c0] ss:$16 sps:$4 sm:$0xff]   ;;  %v18998_v34 = vld [vmem:[#allocation15 + $0x3e4] ss:$16 sps:$4 sm:$0xff]  }
 0x46e   : > { %4630 = vmatpush1.bf16.msra.mxu1 %v22857_v31  ;;  %4540 = vmatprep.mubr.bf16.mxu1 %v23965_v53  ;;  %v18951_v31 = vld [vmem:[#allocation15 + $0x80] ss:$16 sps:$4 sm:$0xff]   ;;  %v19010_v36 = vld [vmem:[#allocation15 + $0x3a4] ss:$16 sps:$4 sm:$0xff]  }
 0x46f   : > { %16933 = vmatmul.mubr.msk.bf16.gmra.mxu0 %vm904_vm0, %v22821_v24  ;;  %4631 = vmatprep.subr.bf16.mxu1 %v22879_v23  ;;  %v18960_v23 = vld [vmem:[#allocation15 + $0x2a0] ss:$16 sps:$4 sm:$0xff]   ;;  %v19013_v47 = vld [vmem:[#allocation15 + $0x144] ss:$16 sps:$4 sm:$0xff]  }
 0x470   : > { %4598 = vmatprep.mubr.bf16.mxu0 %v23965_v53  ;;  %v19016_v44 = vld [vmem:[#allocation15 + $0x384] ss:$16 sps:$4 sm:$0xff]   ;;  %v19020_v17 = vld [vmem:[#allocation15 + $0x360] ss:$16 sps:$4 sm:$0xff]  }
 0x471   : > { %v19019_v43 = vld [vmem:[#allocation15 + $0x124] ss:$16 sps:$4 sm:$0xff]  }
 0x472   : > { %4632 = vmatpush1.bf16.msra.mxu1 %v22867_v2  ;;  %v18959_v2 = vld [vmem:[#allocation15 + $0x64] ss:$16 sps:$4 sm:$0xff]  }
 0x473   : > { %4731 = vmatprep.subr.bf16.mxu1 %v4327_v39  ;;  %v18975_v39 = vld [vmem:[#allocation15] ss:$16 sps:$4 sm:$0xff]  }
 0x475   : > { %16935 = vmatmul.mubr.msk.bf16.gmra.mxu1 %vm904_vm0, %v22821_v24  ;;  %v18953_v24 = vld [vmem:[#allocation15 + $0x84] ss:$16 sps:$4 sm:$0xff]  }
 0x476   : > { %4649 = vmatprep.mubr.bf16.mxu1 %v23965_v53 }
 0x477   : > { %16938 = vmatmul.mubr.msk.bf16.vlgmr.msra.gmra.mxu0 %vm904_vm0, %v18937_v58 }
 0x478   : > { %4681 = vmatpush1.bf16.msra.mxu0 %v4324_v13  ;;  %4608 = vmatprep.mubr.bf16.mxu0 %v23965_v53  ;;  %v19004_v13 = vld [vmem:[#allocation15 + $0x3c4] ss:$16 sps:$4 sm:$0xff]  }
 0x479   : > { %4682 = vmatprep.subr.bf16.mxu0 %v4317_v32  ;;  %v19011_v32 = vld [vmem:[#allocation15 + $0x140] ss:$16 sps:$4 sm:$0xff]  }
 0x47c   : > { %4683 = vmatpush1.bf16.msra.mxu0 %v4316_v55  ;;  %v19007_v55 = vld [vmem:[#allocation15 + $0x164] ss:$16 sps:$4 sm:$0xff]  }
 0x47d   : > { %16940 = vmatmul.mubr.msk.bf16.vlgmr.msra.gmra.mxu1 %vm904_vm0, %v18937_v58  ;;  %6346 = vmatprep.subr.bf16.mxu0 %v18941_v52  ;;  %v19025_v52 = vld [vmem:[#allocation15 + $0x104] ss:$16 sps:$4 sm:$0xff]  }
 0x47e   : > { %4732 = vmatpush1.bf16.msra.mxu1 %v22897_v15  ;;  %4659 = vmatprep.mubr.bf16.mxu1 %v23965_v53  ;;  %v18984_v15 = vld [vmem:[#allocation15 + $0x220] ss:$16 sps:$4 sm:$0xff]  }
 0x47f   : > { %16939 = vmatmul.mubr.msk.bf16.gmra.mxu0 %vm904_vm0, %v18938_v4  ;;  %4733 = vmatprep.subr.bf16.mxu1 %v4319_v22  ;;  %v19017_v22 = vld [vmem:[#allocation15 + $0x120] ss:$16 sps:$4 sm:$0xff]  }
 0x480   : > { %4700 = vmatprep.mubr.bf16.mxu0 %v23965_v53 }
 0x482   : > { %4734 = vmatpush1.bf16.msra.mxu1 %v4318_v9  ;;  %v19022_v9 = vld [vmem:[#allocation15 + $0x364] ss:$16 sps:$4 sm:$0xff]  }
 0x483   : > { %6397 = vmatprep.subr.bf16.mxu1 %v18950_v35  ;;  %v19028_v35 = vld [vmem:[#allocation15 + $0x344] ss:$16 sps:$4 sm:$0xff]  }
 0x485   : > { %16941 = vmatmul.mubr.msk.bf16.gmra.mxu1 %vm904_vm0, %v18938_v4 }
 0x486   : > { %4751 = vmatprep.mubr.bf16.mxu1 %v23965_v53 }
 0x487   : > { %16942 = vmatmul.mubr.msk.bf16.vlgmr.msra.gmra.mxu0 %vm904_vm0, %v18937_v58 }
 0x488   : > { %4710 = vmatprep.mubr.bf16.mxu0 %v23965_v53  ;;  %6347 = vmatpush1.bf16.msra.mxu0 %v18939_v60  ;;  %v19029_v60 = vld [vmem:[#allocation15 + $0x320] ss:$16 sps:$4 sm:$0xff]  }
 0x489   : > { %6348 = vmatprep.subr.bf16.mxu0 %v18944_v61  ;;  %v19031_v61 = vld [vmem:[#allocation15 + $0x324] ss:$16 sps:$4 sm:$0xff]  }
 0x48c   : > { %6349 = vmatpush1.bf16.msra.mxu0 %v18942_v33  ;;  %v19034_v33 = vld [vmem:[#allocation15 + $0x4e4] ss:$16 sps:$4 sm:$0xff]  }
 0x48d   : > { %16944 = vmatmul.mubr.msk.bf16.vlgmr.msra.gmra.mxu1 %vm904_vm0, %v18937_v58  ;;  %6350 = vmatprep.subr.bf16.mxu0 %v18947_v40  ;;  %v19023_v58 = vld [vmem:[#allocation15 + $0x100] ss:$16 sps:$4 sm:$0xff]   ;;  %v19037_v40 = vld [vmem:[#allocation15 + $0x304] ss:$16 sps:$4 sm:$0xff]  }
 0x48e   : > { %4761 = vmatprep.mubr.bf16.mxu1 %v23965_v53  ;;  %6398 = vmatpush1.bf16.msra.mxu1 %v18948_v30  ;;  %v19035_v30 = vld [vmem:[#allocation15 + $0x300] ss:$16 sps:$4 sm:$0xff]  }
 0x48f   : > { %16943 = vmatmul.mubr.msk.bf16.gmra.mxu0 %vm904_vm0, %v18938_v4  ;;  %6399 = vmatprep.subr.bf16.mxu1 %v18956_v19  ;;  %v19046_v19 = vld [vmem:[#allocation15 + $0x6e4] ss:$16 sps:$4 sm:$0xff]  }
 0x490   : > { %6351 = vmatpush1.bf16.msra.mxu0 %v18945_v3 }
 0x491   : > { %6352 = vmatprep.subr.bf16.mxu0 %v18953_v24 }
 0x492   : > { %6400 = vmatpush1.bf16.msra.mxu1 %v18954_v42 }
 0x493   : > { %6401 = vmatprep.subr.bf16.mxu1 %v18962_v10 }
 0x494   : > { %6353 = vmatpush1.bf16.msra.mxu0 %v18951_v31 }
 0x495   : > { %16945 = vmatmul.mubr.msk.bf16.gmra.mxu1 %vm904_vm0, %v18938_v4  ;;  %6354 = vmatprep.subr.bf16.mxu0 %v18959_v2  ;;  %v19026_v4 = vld [vmem:[#allocation15 + $0x340] ss:$16 sps:$4 sm:$0xff]  }
 0x496   : > { %6402 = vmatpush1.bf16.msra.mxu1 %v18960_v23 }
 0x497   : > { %6403 = vmatprep.subr.bf16.mxu1 %v18968_v1 }
 0x498   : > { %6355 = vmatpush1.bf16.msra.mxu0 %v18957_v18 }
 0x499   : > { %6356 = vmatprep.subr.bf16.mxu0 %v18965_v26 }
 0x49a   : > { %6404 = vmatpush1.bf16.msra.mxu1 %v18966_v27 }
 0x49b   : > { %6405 = vmatprep.subr.bf16.mxu1 %v18974_v62 }
 0x49c   : > { %6357 = vmatpush1.bf16.msra.mxu0 %v18963_v57 }
 0x49d   : > { %6358 = vmatprep.subr.bf16.mxu0 %v18971_v46 }
 0x49e   : > { %6406 = vmatpush1.bf16.msra.mxu1 %v18972_v37 }
 0x49f   : > { %6407 = vmatprep.subr.bf16.mxu1 %v18980_v29 }
 0x4a0   : > { %6359 = vmatpush1.bf16.msra.mxu0 %v18969_v48 }
 0x4a1   : > { %6360 = vmatprep.subr.bf16.mxu0 %v18977_v11 }
 0x4a2   : > { %6408 = vmatpush1.bf16.msra.mxu1 %v18978_v41 }
 0x4a3   : > { %6409 = vmatprep.subr.bf16.mxu1 %v18986_v21 }
 0x4a4   : > { %6361 = vmatpush1.bf16.msra.mxu0 %v18975_v39 }
 0x4a5   : > { %6362 = vmatprep.subr.bf16.mxu0 %v18983_v45 }
 0x4a6   : > { %6410 = vmatpush1.bf16.msra.mxu1 %v18984_v15 }
 0x4a7   : > { %6411 = vmatprep.subr.bf16.mxu1 %v18992_v5 }
 0x4a8   : > { %6363 = vmatpush2.bf16.msra.mxu0 %v18981_v20 }
 0x4a9   : > { %6364 = vmatprep.subr.bf16.mxu0 %v18989_v12 }
 0x4aa   : > { %6412 = vmatpush1.bf16.msra.mxu1 %v18990_v28 }
 0x4ab   : > { %6413 = vmatprep.subr.bf16.mxu1 %v18998_v34 }
 0x4ac   : > { %6365 = vmatpush2.bf16.msra.mxu0 %v18987_v16 }
 0x4ad   : > { %6366 = vmatprep.subr.bf16.mxu0 %v18995_v51 }
 0x4ae   : > { %6414 = vmatpush2.bf16.msra.mxu1 %v18996_v59 }
 0x4af   : > { %6415 = vmatprep.subr.bf16.mxu1 %v19004_v13 }
 0x4b0   : > { %6367 = vmatpush2.bf16.msra.mxu0 %v18993_v50 }
 0x4b1   : > { %6368 = vmatprep.subr.bf16.mxu0 %v19001_v14 }
 0x4b2   : > { %6416 = vmatpush2.bf16.msra.mxu1 %v19002_v56 }
 0x4b3   : > { %6417 = vmatprep.subr.bf16.mxu1 %v19010_v36 }
 0x4b4   : > { %6369 = vmatpush2.bf16.msra.mxu0 %v18999_v38 }
 0x4b5   : > { %6370 = vmatprep.subr.bf16.mxu0 %v19007_v55 }
 0x4b6   : > { %6418 = vmatpush2.bf16.msra.mxu1 %v19008_v7 }
 0x4b7   : > { %6419 = vmatprep.subr.bf16.mxu1 %v19016_v44 }
 0x4b8   : > { %6371 = vmatpush2.bf16.msra.mxu0 %v19005_v54 }
 0x4b9   : > { %6372 = vmatprep.subr.bf16.mxu0 %v19013_v47 }
 0x4ba   : > { %6420 = vmatpush2.bf16.msra.mxu1 %v19014_v8 }
 0x4bb   : > { %6421 = vmatprep.subr.bf16.mxu1 %v19022_v9 }
 0x4bc   : > { %6373 = vmatpush2.bf16.msra.mxu0 %v19011_v32 }
 0x4bd   : > { %6374 = vmatprep.subr.bf16.mxu0 %v19019_v43  ;;  %v19032_v43 = vld [vmem:[#allocation15 + $0x4e0] ss:$16 sps:$4 sm:$0xff]  }
 0x4be   : > { %6422 = vmatpush2.bf16.msra.mxu1 %v19020_v17 }
 0x4bf   : > { %6423 = vmatprep.subr.bf16.mxu1 %v19028_v35 }
 0x4c0   : > { %6375 = vmatpush2.bf16.msra.mxu0 %v19017_v22 }
 0x4c1   : > { %6376 = vmatprep.subr.bf16.mxu0 %v19025_v52 }
 0x4c2   : > { %6424 = vmatpush2.bf16.msra.mxu1 %v19026_v4 }
 0x4c3   : > { %6425 = vmatprep.subr.bf16.mxu1 %v19031_v61 }
 0x4c4   : > { %6377 = vmatpush2.bf16.msra.mxu0 %v19023_v58  ;;  %v19040_v58 = vld [vmem:[#allocation15 + $0x4c4] ss:$16 sps:$4 sm:$0xff]  }
 0x4c5   : > { %6448 = vmatprep.subr.bf16.mxu0 %v19034_v33 }
 0x4c6   : > { %6426 = vmatpush2.bf16.msra.mxu1 %v19029_v60 }
 0x4c7   : > { %6427 = vmatprep.subr.bf16.mxu1 %v19037_v40 }
 0x4ca   : > { %6428 = vmatpush2.bf16.msra.mxu1 %v19035_v30  ;;  %v19038_v30 = vld [vmem:[#allocation15 + $0x4c0] ss:$16 sps:$4 sm:$0xff]  }
 0x4cb   : > { %6499 = vmatprep.subr.bf16.mxu1 %v19046_v19 }
 0x502   : > { %v4389_v3 = vpop.f32.mrf.mxu1  ;;  %v4379_v31 = vpop.f32.mrf.mxu0 }
 0x504   : > { %v4391_v24 = vpop.f32.mrf.mxu1  ;;  %v4381_v2 = vpop.f32.mrf.mxu0 }
 0x506   : > { %v4393_v42 = vpop.f32.mrf.mxu1  ;;  %v4383_v18 = vpop.f32.mrf.mxu0 }
 0x508   : > { %v4394_v10 = vpop.f32.mrf.mxu1  ;;  %v4385_v27 = vpop.f32.mrf.mxu0 }
 0x51d   : > { %v22969_v23 = vpop.f32.mrf.mxu1 }
 0x51f   : > { %v4432_v1 = vpop.f32.mrf.mxu1 }
 0x521   : > { %v4434_v26 = vpop.f32.mrf.mxu1 }
 0x523   : > { %v4436_v62 = vpop.f32.mrf.mxu1 }
 0x525   : > { %v22971_v57 = vpop.f32.mrf.mxu1 }
 0x527   : > { %v22973_v46 = vpop.f32.mrf.mxu0  ;;  %v4442_v37 = vpop.f32.mrf.mxu1 }
 0x529   : > { %v22975_v29 = vpop.f32.mrf.mxu0  ;;  %v4444_v48 = vpop.f32.mrf.mxu1 }
 0x52b   : > { %v22977_v11 = vpop.f32.mrf.mxu0  ;;  %v4445_v41 = vpop.f32.mrf.mxu1 }
 0x52d   : > { %v22979_v39 = vpop.f32.mrf.mxu0  ;;  %v22981_v21 = vpop.f32.mrf.mxu1 }
 0x52f   : > { %v22983_v45 = vpop.f32.mrf.mxu0  ;;  %v22985_v15 = vpop.f32.mrf.mxu1 }
 0x531   : > { %v22987_v20 = vpop.f32.mrf.mxu0  ;;  %v22989_v5 = vpop.f32.mrf.mxu1 }
 0x533   : > { %v4495_v12 = vpop.f32.mrf.mxu0  ;;  %v22991_v28 = vpop.f32.mrf.mxu1 }
 0x535   : > { %v4496_v16 = vpop.f32.mrf.mxu0  ;;  %v22993_v51 = vpop.f32.mrf.mxu1 }
 0x536   : > { %v19049_v16 = vld [vmem:[#allocation15 + $0x484] ss:$16 sps:$4 sm:$0xff]  }
 0x537   : > { %v4600_v59 = vpop.f32.mrf.mxu0  ;;  %v22995_v34 = vpop.f32.mrf.mxu1 }
 0x538   : > { %v4770_v47 = vmax.f32 %v4379_v31, %v4600_v59 }
 0x539   : > { %v4602_v50 = vpop.f32.mrf.mxu0  ;;  %v4546_v14 = vpop.f32.mrf.mxu1 }
 0x53a   : > { %v4771_v36 = vmax.f32 %v4381_v2, %v4602_v50  ;;  %v19050_v50 = vld [vmem:[#allocation15 + $0x6c0] ss:$16 sps:$4 sm:$0xff]  }
 0x53b   : > { %v4604_v56 = vpop.f32.mrf.mxu0  ;;  %v4547_v13 = vpop.f32.mrf.mxu1 }
 0x53c   : > { %v4778_v38 = vmax.f32 %v4383_v18, %v4604_v56  ;;  %v19044_v18 = vld [vmem:[#allocation15 + $0x6e0] ss:$16 sps:$4 sm:$0xff]   ;;  %v19058_v13 = vld [vmem:[#allocation15 + $0x6a4] ss:$16 sps:$4 sm:$0xff]  }
 0x53d   : > { %v4606_v55 = vpop.f32.mrf.mxu0  ;;  %v4651_v7 = vpop.f32.mrf.mxu1 }
 0x53e   : > { %v4779_v54 = vmax.f32 %v4385_v27, %v4606_v55  ;;  %v22999_v17 = vpack.c.bf16 %v4778_v38, %v4770_v47  ;;  %v4772_v42 = vmax.f32 %v22969_v23, %v4651_v7  ;;  %v19047_v7 = vld [vmem:[#allocation15 + $0x480] ss:$16 sps:$4 sm:$0xff]   ;;  %v19055_v47 = vld [vmem:[#allocation15 + $0x464] ss:$16 sps:$4 sm:$0xff]  }
 0x53f   : > { %v4610_v8 = vpop.f32.mrf.mxu0  ;;  %v4653_v44 = vpop.f32.mrf.mxu1 }
 0x540   : > { %v22997_v32 = vpack.c.bf16 %v4779_v54, %v4771_v36  ;;  %v4773_v33 = vmax.f32 %v4432_v1, %v4653_v44  ;;  %v4786_v19 = vmax.f32 %v4389_v3, %v4610_v8  ;;  %v19052_v1 = vld [vmem:[#allocation15 + $0x6c4] ss:$16 sps:$4 sm:$0xff]   ;;  %v19041_v3 = vld [vmem:[#allocation15 + $0x4a0] ss:$16 sps:$4 sm:$0xff]  }
 0x541   : > { %v4612_v9 = vpop.f32.mrf.mxu0  ;;  %v4655_v22 = vpop.f32.mrf.mxu1 }
 0x542   : > { %v4787_v52 = vmax.f32 %v4391_v24, %v4612_v9  ;;  %6378 = vmatprep.mubr.bf16.mxu0 %v22997_v32  ;;  %v4780_v35 = vmax.f32 %v4434_v26, %v4655_v22  ;;  %v19043_v24 = vld [vmem:[#allocation15 + $0x4a4] ss:$16 sps:$4 sm:$0xff]   ;;  %v23012_v23 = vpack.c.bf16 %v4786_v19, %v4786_v19 }
 0x543   : > { %v4614_v4 = vpop.f32.mrf.mxu0  ;;  %6379 = vmatmul.mubr.bf16.vlgmr.msra.gmra.mxu0 %v22999_v17  ;;  %v4657_v60 = vpop.f32.mrf.mxu1  ;;  %v19064_v22 = vld [vmem:[#allocation15 + $0x684] ss:$16 sps:$4 sm:$0xff]  }
 0x544   : > { %v23003_v61 = vpack.c.bf16 %v4787_v52, %v4787_v52  ;;  %6449 = vmatpush1.bf16.msra.mxu0 %v19032_v43  ;;  %v4781_v40 = vmax.f32 %v4436_v62, %v4657_v60  ;;  %v23009_v26 = vpack.c.bf16 %v4780_v35, %v4772_v42  ;;  %v19056_v43 = vld [vmem:[#allocation15 + $0x6a0] ss:$16 sps:$4 sm:$0xff]  }
 0x545   : > { %v4615_v10 = vpop.f32.mrf.mxu0  ;;  %6450 = vmatprep.subr.bf16.mxu0 %v19040_v58  ;;  %v4661_v31 = vpop.f32.mrf.mxu1  ;;  %v19053_v52 = vld [vmem:[#allocation15 + $0x460] ss:$16 sps:$4 sm:$0xff]  }
 0x546   : > { %v23006_v2 = vpack.c.bf16 %v4781_v40, %v4773_v33  ;;  %6388 = vmatprep.mubr.bf16.mxu0 %v23003_v61  ;;  %v4788_v14 = vmax.f32 %v22971_v57, %v4661_v31  ;;  %v19062_v33 = vld [vmem:[#allocation15 + $0x680] ss:$16 sps:$4 sm:$0xff]  }
 0x547   : > { %v4702_v27 = vpop.f32.mrf.mxu0  ;;  %v4663_v48 = vpop.f32.mrf.mxu1 }
 0x548   : > { %6451 = vmatpush1.bf16.msra.mxu0 %v19038_v30  ;;  %v4789_v62 = vmax.f32 %v4442_v37, %v4663_v48  ;;  %6429 = vmatprep.mubr.bf16.mxu1 %v23006_v2  ;;  %v4774_v38 = vmax.f32 %v22973_v46, %v4702_v27  ;;  %v23026_v9 = vpack.c.bf16 %v4788_v14, %v4788_v14  ;;  %v19070_v30 = vld [vmem:[#allocation15 + $0x664] ss:$16 sps:$4 sm:$0xff]   ;;  %v19068_v48 = vld [vmem:[#allocation15 + $0x660] ss:$16 sps:$4 sm:$0xff]  }
 0x549   : > { %v4704_v41 = vpop.f32.mrf.mxu0  ;;  %6452 = vmatprep.subr.bf16.mxu0 %v19043_v24  ;;  %v4665_v12 = vpop.f32.mrf.mxu1  ;;  %6430 = vmatmul.mubr.bf16.vlgmr.msra.gmra.mxu1 %v23009_v26  ;;  %v19059_v24 = vld [vmem:[#allocation15 + $0x440] ss:$16 sps:$4 sm:$0xff]   ;;  %v19079_v14 = vld [vmem:[#allocation15 + $0x5e4] ss:$16 sps:$4 sm:$0xff]  }
 0x54a   : > { %v23015_v59 = vpack.c.bf16 %v4789_v62, %v4789_v62  ;;  %6500 = vmatpush1.bf16.msra.mxu1 %v19044_v18  ;;  %v4775_v57 = vmax.f32 %v22975_v29, %v4704_v41  ;;  %v19067_v18 = vld [vmem:[#allocation15 + $0x424] ss:$16 sps:$4 sm:$0xff]   ;;  %v19074_v41 = vld [vmem:[#allocation15 + $0x640] ss:$16 sps:$4 sm:$0xff]  }
 0x54b   : > { %v4706_v56 = vpop.f32.mrf.mxu0  ;;  %6389 = vmatmul.mubr.bf16.gmra.mxu0 %v23012_v23  ;;  %v4666_v37 = vpop.f32.mrf.mxu1  ;;  %6501 = vmatprep.subr.bf16.mxu1 %v19052_v1  ;;  %v19076_v62 = vld [vmem:[#allocation15 + $0x644] ss:$16 sps:$4 sm:$0xff]  }
 0x54c   : > { %v4782_v55 = vmax.f32 %v22977_v11, %v4706_v56  ;;  %6453 = vmatpush1.bf16.msra.mxu0 %v19041_v3  ;;  %6439 = vmatprep.mubr.bf16.mxu1 %v23015_v59  ;;  %v19082_v12 = vld [vmem:[#allocation15 + $0x624] ss:$16 sps:$4 sm:$0xff]   ;;  %v19080_v56 = vld [vmem:[#allocation15 + $0x620] ss:$16 sps:$4 sm:$0xff]  }
 0x54d   : > { %v4708_v36 = vpop.f32.mrf.mxu0  ;;  %6454 = vmatprep.subr.bf16.mxu0 %v19049_v16  ;;  %v4753_v54 = vpop.f32.mrf.mxu1  ;;  %v19088_v37 = vld [vmem:[#allocation15 + $0x604] ss:$16 sps:$4 sm:$0xff]  }
 0x54e   : > { %v23023_v8 = vpack.c.bf16 %v4782_v55, %v4774_v38  ;;  %v4783_v44 = vmax.f32 %v22979_v39, %v4708_v36  ;;  %6502 = vmatpush1.bf16.msra.mxu1 %v19050_v50  ;;  %v19061_v39 = vld [vmem:[#allocation15 + $0x444] ss:$16 sps:$4 sm:$0xff]   ;;  %v4776_v35 = vmax.f32 %v22981_v21, %v4753_v54  ;;  %v19071_v50 = vld [vmem:[#allocation15 + $0x400] ss:$16 sps:$4 sm:$0xff]  }
 0x54f   : > { %v23028_v46 = vpop.f32.mrf.mxu0  ;;  %v4755_v11 = vpop.f32.mrf.mxu1  ;;  %6503 = vmatprep.subr.bf16.mxu1 %v19058_v13  ;;  %v19077_v13 = vld [vmem:[#allocation15 + $0x5e0] ss:$16 sps:$4 sm:$0xff]   ;;  %v19085_v38 = vld [vmem:[#allocation15 + $0x5c4] ss:$16 sps:$4 sm:$0xff]  }
 0x550   : > { %v23030_v58 = vpack.c.bf16 %v4783_v44, %v4775_v57  ;;  %6455 = vmatpush1.bf16.msra.mxu0 %v19047_v7  ;;  %v4777_v42 = vmax.f32 %v22985_v15, %v4755_v11  ;;  %v19065_v15 = vld [vmem:[#allocation15 + $0x420] ss:$16 sps:$4 sm:$0xff]   ;;  %v19094_v7 = vld [vmem:[#allocation15 + $0x7e4] ss:$16 sps:$4 sm:$0xff]  }
 0x551   : > { %v23032_v4 = vpop.f32.mrf.mxu0  ;;  %6456 = vmatprep.subr.bf16.mxu0 %v19055_v47  ;;  %v4757_v29 = vpop.f32.mrf.mxu1  ;;  %6440 = vmatmul.mubr.bf16.gmra.mxu1 %v23026_v9  ;;  %v19086_v55 = vld [vmem:[#allocation15 + $0x600] ss:$16 sps:$4 sm:$0xff]   ;;  %v19091_v54 = vld [vmem:[#allocation15 + $0x5a4] ss:$16 sps:$4 sm:$0xff]  }
 0x552   : > { %6480 = vmatprep.mubr.bf16.mxu0 %v23030_v58  ;;  %v4784_v60 = vmax.f32 %v22989_v5, %v4757_v29  ;;  %6504 = vmatpush1.bf16.msra.mxu1 %v19056_v43  ;;  %v19083_v36 = vld [vmem:[#allocation15 + $0x5c0] ss:$16 sps:$4 sm:$0xff]   ;;  %v19100_v57 = vld [vmem:[#allocation15 + $0x7c4] ss:$16 sps:$4 sm:$0xff]  }
 0x553   : > { %v4759_v40 = vpop.f32.mrf.mxu1  ;;  %6505 = vmatprep.subr.bf16.mxu1 %v19064_v22  ;;  %v4716_v19 = vpop.f32.mrf.mxu0  ;;  %v19092_v47 = vld [vmem:[#allocation15 + $0x7e0] ss:$16 sps:$4 sm:$0xff]   ;;  %v19097_v43 = vld [vmem:[#allocation15 + $0x584] ss:$16 sps:$4 sm:$0xff]  }
 0x554   : > { %v23039_v10 = vpack.c.bf16 %v4784_v60, %v4776_v35  ;;  %6457 = vmatpush1.bf16.msra.mxu0 %v19053_v52  ;;  %v4785_v31 = vmax.f32 %v22991_v28, %v4759_v40  ;;  %v19073_v28 = vld [vmem:[#allocation15 + $0x404] ss:$16 sps:$4 sm:$0xff]   ;;  %v19089_v44 = vld [vmem:[#allocation15 + $0x5a0] ss:$16 sps:$4 sm:$0xff]  }
 0x555   : > { %6458 = vmatprep.subr.bf16.mxu0 %v19061_v39  ;;  %v23042_v21 = vpop.f32.mrf.mxu1  ;;  %v4717_v27 = vpop.f32.mrf.mxu0  ;;  %v19098_v11 = vld [vmem:[#allocation15 + $0x7c0] ss:$16 sps:$4 sm:$0xff]   ;;  %v19106_v22 = vld [vmem:[#allocation15 + $0x7a4] ss:$16 sps:$4 sm:$0xff]  }
 0x556   : > { %v23044_v5 = vpack.c.bf16 %v4785_v31, %v4777_v42  ;;  %6506 = vmatpush1.bf16.msra.mxu1 %v19062_v33  ;;  %v19095_v52 = vld [vmem:[#allocation15 + $0x580] ss:$16 sps:$4 sm:$0xff]   ;;  %v19103_v29 = vld [vmem:[#allocation15 + $0x564] ss:$16 sps:$4 sm:$0xff]  }
 0x557   : > { %v23046_v1 = vpop.f32.mrf.mxu1  ;;  %6507 = vmatprep.subr.bf16.mxu1 %v19070_v30  ;;  %v19104_v39 = vld [vmem:[#allocation15 + $0x7a0] ss:$16 sps:$4 sm:$0xff]   ;;  %v19112_v35 = vld [vmem:[#allocation15 + $0x784] ss:$16 sps:$4 sm:$0xff]  }
 0x558   : > { %6459 = vmatpush1.bf16.msra.mxu0 %v19059_v24  ;;  %6531 = vmatprep.mubr.bf16.mxu1 %v23044_v5  ;;  %v19101_v60 = vld [vmem:[#allocation15 + $0x560] ss:$16 sps:$4 sm:$0xff]   ;;  %v19109_v33 = vld [vmem:[#allocation15 + $0x544] ss:$16 sps:$4 sm:$0xff]  }
 0x559   : > { %6460 = vmatprep.subr.bf16.mxu0 %v19067_v18  ;;  %v4767_v3 = vpop.f32.mrf.mxu1  ;;  %v19110_v40 = vld [vmem:[#allocation15 + $0x780] ss:$16 sps:$4 sm:$0xff]   ;;  %v19118_v30 = vld [vmem:[#allocation15 + $0x764] ss:$16 sps:$4 sm:$0xff]  }
 0x55a   : > { %6508 = vmatpush1.bf16.msra.mxu1 %v19068_v48  ;;  %v19107_v19 = vld [vmem:[#allocation15 + $0x540] ss:$16 sps:$4 sm:$0xff]   ;;  %v19115_v42 = vld [vmem:[#allocation15 + $0x524] ss:$16 sps:$4 sm:$0xff]   ;;  %v4791_v3 = vmax.f32 %v22987_v20, %v23032_v4  ;;  %v19134_v20 = vld [vmem:[#allocation15 + $0xc8] ss:$16 sps:$4 sm:$0xff]   ;;  %v4790_v4 = vmax.f32 %v22983_v45, %v23028_v46  ;;  %v4792_v46 = vmax.f32 %v22993_v51, %v23042_v21 }
 0x55b   : > { %6509 = vmatprep.subr.bf16.mxu1 %v19076_v62  ;;  %v4768_v16 = vpop.f32.mrf.mxu1  ;;  %v19116_v31 = vld [vmem:[#allocation15 + $0x760] ss:$16 sps:$4 sm:$0xff]   ;;  %v19124_v24 = vld [vmem:[#allocation15 + $0x744] ss:$16 sps:$4 sm:$0xff]   ;;  %v19146_v45 = vld [vmem:[#allocation15 + $0x2c8] ss:$16 sps:$4 sm:$0xff]  }
 0x55c   : > { %6461 = vmatpush1.bf16.msra.mxu0 %v19065_v15  ;;  %v19113_v18 = vld [vmem:[#allocation15 + $0x520] ss:$16 sps:$4 sm:$0xff]   ;;  %v19121_v27 = vld [vmem:[#allocation15 + $0x504] ss:$16 sps:$4 sm:$0xff]   ;;  %v19128_v16 = vld [vmem:[#allocation15 + $0xe8] ss:$16 sps:$4 sm:$0xff]  }
 0x55d   : > { %6462 = vmatprep.subr.bf16.mxu0 %v19073_v28  ;;  %v19122_v48 = vld [vmem:[#allocation15 + $0x740] ss:$16 sps:$4 sm:$0xff]   ;;  %v19127_v62 = vld [vmem:[#allocation15 + $0x724] ss:$16 sps:$4 sm:$0xff]   ;;  %v19130_v28 = vld [vmem:[#allocation15 + $0xec] ss:$16 sps:$4 sm:$0xff]  }
 0x55e   : > { %6510 = vmatpush1.bf16.msra.mxu1 %v19074_v41  ;;  %v19119_v15 = vld [vmem:[#allocation15 + $0x500] ss:$16 sps:$4 sm:$0xff]   ;;  %v19157_v51 = vld [vmem:[#allocation15 + $0x4c] ss:$16 sps:$4 sm:$0xff]   ;;  %v19158_v21 = vld [vmem:[#allocation15 + $0x288] ss:$16 sps:$4 sm:$0xff]  }
 0x55f   : > { %6511 = vmatprep.subr.bf16.mxu1 %v19082_v12  ;;  %v19125_v41 = vld [vmem:[#allocation15 + $0x720] ss:$16 sps:$4 sm:$0xff]   ;;  %v19133_v12 = vld [vmem:[#allocation15 + $0x704] ss:$16 sps:$4 sm:$0xff]  }
 0x560   : > { %6463 = vmatpush1.bf16.msra.mxu0 %v19071_v50  ;;  %v19136_v50 = vld [vmem:[#allocation15 + $0xcc] ss:$16 sps:$4 sm:$0xff]  }
 0x561   : > { %6464 = vmatprep.subr.bf16.mxu0 %v19079_v14  ;;  %v23051_v14 = vpack.c.bf16 %v4791_v3, %v4791_v3  ;;  %v19188_v3 = vld [vmem:[#allocation15 + $0x3e8] ss:$16 sps:$4 sm:$0xff]  }
 0x562   : > { %6512 = vmatpush1.bf16.msra.mxu1 %v19080_v56  ;;  %v19131_v56 = vld [vmem:[#allocation15 + $0x700] ss:$16 sps:$4 sm:$0xff]  }
 0x563   : > { %6513 = vmatprep.subr.bf16.mxu1 %v19088_v37  ;;  %v19142_v37 = vld [vmem:[#allocation15 + $0x2ec] ss:$16 sps:$4 sm:$0xff]  }
 0x564   : > { %6465 = vmatpush2.bf16.msra.mxu0 %v19077_v13  ;;  %v4793_v13 = vmax.f32 %v22995_v34, %v23046_v1  ;;  %v19145_v34 = vld [vmem:[#allocation15 + $0x8c] ss:$16 sps:$4 sm:$0xff]  }
 0x565   : > { %6466 = vmatprep.subr.bf16.mxu0 %v19085_v38  ;;  %v19139_v38 = vld [vmem:[#allocation15 + $0xac] ss:$16 sps:$4 sm:$0xff]  }
 0x566   : > { %6514 = vmatpush1.bf16.msra.mxu1 %v19086_v55  ;;  %v19140_v55 = vld [vmem:[#allocation15 + $0x2e8] ss:$16 sps:$4 sm:$0xff]   ;;  %v19154_v1 = vld [vmem:[#allocation15 + $0x2ac] ss:$16 sps:$4 sm:$0xff]  }
 0x567   : > { %6515 = vmatprep.subr.bf16.mxu1 %v19094_v7  ;;  %v19148_v7 = vld [vmem:[#allocation15 + $0x2cc] ss:$16 sps:$4 sm:$0xff]  }
 0x568   : > { %6467 = vmatpush2.bf16.msra.mxu0 %v19083_v36  ;;  %v23059_v36 = vpack.c.bf16 %v4793_v13, %v4793_v13  ;;  %v19199_v13 = vld [vmem:[#allocation15 + $0x16c] ss:$16 sps:$4 sm:$0xff]  }
 0x569   : > { %6468 = vmatprep.subr.bf16.mxu0 %v19091_v54  ;;  %v19137_v54 = vld [vmem:[#allocation15 + $0xa8] ss:$16 sps:$4 sm:$0xff]  }
 0x56a   : > { %6516 = vmatpush2.bf16.msra.mxu1 %v19092_v47  ;;  %v23061_v47 = vpack.c.bf16 %v4790_v4, %v4790_v4  ;;  %v19208_v4 = vld [vmem:[#allocation15 + $0x38c] ss:$16 sps:$4 sm:$0xff]  }
 0x56b   : > { %6517 = vmatprep.subr.bf16.mxu1 %v19100_v57  ;;  %v19143_v57 = vld [vmem:[#allocation15 + $0x88] ss:$16 sps:$4 sm:$0xff]  }
 0x56c   : > { %6469 = vmatpush2.bf16.msra.mxu0 %v19089_v44  ;;  %v19151_v44 = vld [vmem:[#allocation15 + $0x6c] ss:$16 sps:$4 sm:$0xff]  }
 0x56d   : > { %6470 = vmatprep.subr.bf16.mxu0 %v19097_v43  ;;  %v19152_v43 = vld [vmem:[#allocation15 + $0x2a8] ss:$16 sps:$4 sm:$0xff]  }
 0x56e   : > { %6518 = vmatpush2.bf16.msra.mxu1 %v19098_v11  ;;  %v23069_v11 = vpack.c.bf16 %v4792_v46, %v4792_v46  ;;  %v19212_v46 = vld [vmem:[#allocation15 + $0x368] ss:$16 sps:$4 sm:$0xff]  }
 0x56f   : > { %6519 = vmatprep.subr.bf16.mxu1 %v19106_v22  ;;  %v19160_v22 = vld [vmem:[#allocation15 + $0x28c] ss:$16 sps:$4 sm:$0xff]  }
 0x570   : > { %6471 = vmatpush2.bf16.msra.mxu0 %v19095_v52  ;;  %v19149_v52 = vld [vmem:[#allocation15 + $0x68] ss:$16 sps:$4 sm:$0xff]  }
 0x571   : > { %6472 = vmatprep.subr.bf16.mxu0 %v19103_v29  ;;  %v19155_v29 = vld [vmem:[#allocation15 + $0x48] ss:$16 sps:$4 sm:$0xff]  }
 0x572   : > { %6520 = vmatpush2.bf16.msra.mxu1 %v19104_v39  ;;  %v19163_v39 = vld [vmem:[#allocation15 + $0x2c] ss:$16 sps:$4 sm:$0xff]  }
 0x573   : > { %6521 = vmatprep.subr.bf16.mxu1 %v19112_v35  ;;  %v19164_v35 = vld [vmem:[#allocation15 + $0x268] ss:$16 sps:$4 sm:$0xff]  }
 0x574   : > { %6473 = vmatpush2.bf16.msra.mxu0 %v19101_v60  ;;  %v19172_v60 = vld [vmem:[#allocation15 + $0x24c] ss:$16 sps:$4 sm:$0xff]  }
 0x575   : > { %6474 = vmatprep.subr.bf16.mxu0 %v19109_v33  ;;  %v19161_v33 = vld [vmem:[#allocation15 + $0x28] ss:$16 sps:$4 sm:$0xff]  }
 0x576   : > { %6522 = vmatpush2.bf16.msra.mxu1 %v19110_v40  ;;  %v19169_v40 = vld [vmem:[#allocation15 + $0xc] ss:$16 sps:$4 sm:$0xff]  }
 0x577   : > { %6523 = vmatprep.subr.bf16.mxu1 %v19118_v30  ;;  %v19170_v30 = vld [vmem:[#allocation15 + $0x248] ss:$16 sps:$4 sm:$0xff]  }
 0x578   : > { %6475 = vmatpush2.bf16.msra.mxu0 %v19107_v19  ;;  %v19178_v19 = vld [vmem:[#allocation15 + $0x22c] ss:$16 sps:$4 sm:$0xff]  }
 0x579   : > { %6476 = vmatprep.subr.bf16.mxu0 %v19115_v42  ;;  %v19175_v42 = vld [vmem:[#allocation15 + $0x1ec] ss:$16 sps:$4 sm:$0xff]  }
 0x57a   : > { %6524 = vmatpush2.bf16.msra.mxu1 %v19116_v31  ;;  %v19176_v31 = vld [vmem:[#allocation15 + $0x228] ss:$16 sps:$4 sm:$0xff]  }
 0x57b   : > { %6525 = vmatprep.subr.bf16.mxu1 %v19124_v24  ;;  %v19184_v24 = vld [vmem:[#allocation15 + $0x20c] ss:$16 sps:$4 sm:$0xff]  }
 0x57c   : > { %6477 = vmatpush2.bf16.msra.mxu0 %v19113_v18  ;;  %v19173_v18 = vld [vmem:[#allocation15 + $0x1e8] ss:$16 sps:$4 sm:$0xff]  }
 0x57d   : > { %6478 = vmatprep.subr.bf16.mxu0 %v19121_v27  ;;  %v19181_v27 = vld [vmem:[#allocation15 + $0x1cc] ss:$16 sps:$4 sm:$0xff]  }
 0x57e   : > { %6526 = vmatpush2.bf16.msra.mxu1 %v19122_v48  ;;  %v19182_v48 = vld [vmem:[#allocation15 + $0x208] ss:$16 sps:$4 sm:$0xff]  }
 0x57f   : > { %6527 = vmatprep.subr.bf16.mxu1 %v19127_v62  ;;  %v19190_v62 = vld [vmem:[#allocation15 + $0x3ec] ss:$16 sps:$4 sm:$0xff]  }
 0x580   : > { %6479 = vmatpush2.bf16.msra.mxu0 %v19119_v15  ;;  %v19179_v15 = vld [vmem:[#allocation15 + $0x1c8] ss:$16 sps:$4 sm:$0xff]  }
 0x581   : > { %6550 = vmatprep.subr.bf16.mxu0 %v19130_v28  ;;  %v19187_v28 = vld [vmem:[#allocation15 + $0x1ac] ss:$16 sps:$4 sm:$0xff]  }
 0x582   : > { %6528 = vmatpush2.bf16.msra.mxu1 %v19125_v41  ;;  %v19196_v41 = vld [vmem:[#allocation15 + $0x3cc] ss:$16 sps:$4 sm:$0xff]  }
 0x583   : > { %6481 = vmatmul.mubr.bf16.vlgmr.msra.gmra.mxu0 %v23023_v8  ;;  %6529 = vmatprep.subr.bf16.mxu1 %v19133_v12  ;;  %v19185_v12 = vld [vmem:[#allocation15 + $0x1a8] ss:$16 sps:$4 sm:$0xff]  }
 0x584   : > { %6490 = vmatprep.mubr.bf16.mxu0 %v23051_v14  ;;  %6551 = vmatpush1.bf16.msra.mxu0 %v19128_v16  ;;  %v19193_v16 = vld [vmem:[#allocation15 + $0x18c] ss:$16 sps:$4 sm:$0xff]  }
 0x585   : > { %6552 = vmatprep.subr.bf16.mxu0 %v19136_v50  ;;  %v19194_v50 = vld [vmem:[#allocation15 + $0x3c8] ss:$16 sps:$4 sm:$0xff]  }
 0x586   : > { %6530 = vmatpush2.bf16.msra.mxu1 %v19131_v56  ;;  %v19202_v56 = vld [vmem:[#allocation15 + $0x3ac] ss:$16 sps:$4 sm:$0xff]  }
 0x587   : > { %6601 = vmatprep.subr.bf16.mxu1 %v19142_v37  ;;  %v19191_v37 = vld [vmem:[#allocation15 + $0x188] ss:$16 sps:$4 sm:$0xff]  }
 0x588   : > { %6553 = vmatpush1.bf16.msra.mxu0 %v19134_v20  ;;  %v19200_v20 = vld [vmem:[#allocation15 + $0x3a8] ss:$16 sps:$4 sm:$0xff]  }
 0x589   : > { %6532 = vmatmul.mubr.bf16.vlgmr.msra.gmra.mxu1 %v23039_v10  ;;  %6554 = vmatprep.subr.bf16.mxu0 %v19139_v38  ;;  %v19197_v38 = vld [vmem:[#allocation15 + $0x168] ss:$16 sps:$4 sm:$0xff]  }
 0x58a   : > { %6541 = vmatprep.mubr.bf16.mxu1 %v23059_v36  ;;  %6602 = vmatpush1.bf16.msra.mxu1 %v19140_v55  ;;  %v19205_v55 = vld [vmem:[#allocation15 + $0x14c] ss:$16 sps:$4 sm:$0xff]  }
 0x58b   : > { %6491 = vmatmul.mubr.bf16.gmra.mxu0 %v23061_v47  ;;  %6603 = vmatprep.subr.bf16.mxu1 %v19148_v7  ;;  %v19206_v7 = vld [vmem:[#allocation15 + $0x388] ss:$16 sps:$4 sm:$0xff]  }
 0x58c   : > { %6555 = vmatpush1.bf16.msra.mxu0 %v19137_v54  ;;  %6582 = vmatprep.mubr.bf16.mxu0 %v22997_v32  ;;  %v19166_v32 = vld [vmem:[#allocation15 + $0x26c] ss:$16 sps:$4 sm:$0xff]  }
 0x58d   : > { %6556 = vmatprep.subr.bf16.mxu0 %v19145_v34  ;;  %v19214_v54 = vld [vmem:[#allocation15 + $0x36c] ss:$16 sps:$4 sm:$0xff]   ;;  %v19203_v34 = vld [vmem:[#allocation15 + $0x148] ss:$16 sps:$4 sm:$0xff]  }
 0x58e   : > { %6604 = vmatpush1.bf16.msra.mxu1 %v19146_v45  ;;  %v19211_v45 = vld [vmem:[#allocation15 + $0x12c] ss:$16 sps:$4 sm:$0xff]  }
 0x58f   : > { %6605 = vmatprep.subr.bf16.mxu1 %v19154_v1  ;;  %v19220_v1 = vld [vmem:[#allocation15 + $0x34c] ss:$16 sps:$4 sm:$0xff]  }
 0x590   : > { %6557 = vmatpush1.bf16.msra.mxu0 %v19143_v57  ;;  %v19209_v57 = vld [vmem:[#allocation15 + $0x128] ss:$16 sps:$4 sm:$0xff]  }
 0x591   : > { %6542 = vmatmul.mubr.bf16.gmra.mxu1 %v23069_v11  ;;  %6558 = vmatprep.subr.bf16.mxu0 %v19151_v44  ;;  %v19217_v44 = vld [vmem:[#allocation15 + $0x10c] ss:$16 sps:$4 sm:$0xff]  }
 0x592   : > { %6606 = vmatpush1.bf16.msra.mxu1 %v19152_v43  ;;  %6633 = vmatprep.mubr.bf16.mxu1 %v23006_v2  ;;  %v19167_v2 = vld [vmem:[#allocation15 + $0x8] ss:$16 sps:$4 sm:$0xff]  }
 0x593   : > { %6607 = vmatprep.subr.bf16.mxu1 %v19160_v22  ;;  %v19218_v43 = vld [vmem:[#allocation15 + $0x348] ss:$16 sps:$4 sm:$0xff]   ;;  %v19223_v22 = vld [vmem:[#allocation15 + $0x32c] ss:$16 sps:$4 sm:$0xff]  }
 0x594   : > { %6559 = vmatpush1.bf16.msra.mxu0 %v19149_v52  ;;  %v19215_v52 = vld [vmem:[#allocation15 + $0x108] ss:$16 sps:$4 sm:$0xff]  }
 0x595   : > { %6560 = vmatprep.subr.bf16.mxu0 %v19157_v51  ;;  %v19226_v51 = vld [vmem:[#allocation15 + $0x4ec] ss:$16 sps:$4 sm:$0xff]  }
 0x596   : > { %6608 = vmatpush1.bf16.msra.mxu1 %v19158_v21  ;;  %v19221_v21 = vld [vmem:[#allocation15 + $0x328] ss:$16 sps:$4 sm:$0xff]  }
 0x597   : > { %6609 = vmatprep.subr.bf16.mxu1 %v19166_v32  ;;  %v19229_v32 = vld [vmem:[#allocation15 + $0x30c] ss:$16 sps:$4 sm:$0xff]  }
 0x598   : > { %6561 = vmatpush1.bf16.msra.mxu0 %v19155_v29  ;;  %v19224_v29 = vld [vmem:[#allocation15 + $0x4e8] ss:$16 sps:$4 sm:$0xff]  }
 0x599   : > { %6562 = vmatprep.subr.bf16.mxu0 %v19163_v39  ;;  %v19232_v39 = vld [vmem:[#allocation15 + $0x4cc] ss:$16 sps:$4 sm:$0xff]  }
 0x59a   : > { %6610 = vmatpush1.bf16.msra.mxu1 %v19164_v35  ;;  %v19227_v35 = vld [vmem:[#allocation15 + $0x308] ss:$16 sps:$4 sm:$0xff]  }
 0x59b   : > { %6611 = vmatprep.subr.bf16.mxu1 %v19172_v60  ;;  %v19238_v60 = vld [vmem:[#allocation15 + $0x6ec] ss:$16 sps:$4 sm:$0xff]  }
 0x59c   : > { %6563 = vmatpush1.bf16.msra.mxu0 %v19161_v33  ;;  %v19230_v33 = vld [vmem:[#allocation15 + $0x4c8] ss:$16 sps:$4 sm:$0xff]  }
 0x59d   : > { %6564 = vmatprep.subr.bf16.mxu0 %v19169_v40  ;;  %v19235_v40 = vld [vmem:[#allocation15 + $0x4ac] ss:$16 sps:$4 sm:$0xff]  }
 0x59e   : > { %6612 = vmatpush1.bf16.msra.mxu1 %v19170_v30  ;;  %v19236_v30 = vld [vmem:[#allocation15 + $0x6e8] ss:$16 sps:$4 sm:$0xff]  }
 0x59f   : > { %6613 = vmatprep.subr.bf16.mxu1 %v19178_v19  ;;  %v19244_v19 = vld [vmem:[#allocation15 + $0x6cc] ss:$16 sps:$4 sm:$0xff]  }
 0x5a0   : > { %6565 = vmatpush1.bf16.msra.mxu0 %v19167_v2  ;;  %v19233_v2 = vld [vmem:[#allocation15 + $0x4a8] ss:$16 sps:$4 sm:$0xff]  }
 0x5a1   : > { %6566 = vmatprep.subr.bf16.mxu0 %v19175_v42  ;;  %v19241_v42 = vld [vmem:[#allocation15 + $0x48c] ss:$16 sps:$4 sm:$0xff]  }
 0x5a2   : > { %6614 = vmatpush1.bf16.msra.mxu1 %v19176_v31  ;;  %v19239_v31 = vld [vmem:[#allocation15 + $0x488] ss:$16 sps:$4 sm:$0xff]  }
 0x5a3   : > { %6615 = vmatprep.subr.bf16.mxu1 %v19184_v24  ;;  %v19247_v24 = vld [vmem:[#allocation15 + $0x46c] ss:$16 sps:$4 sm:$0xff]  }
 0x5a4   : > { %6567 = vmatpush2.bf16.msra.mxu0 %v19173_v18  ;;  %v19248_v18 = vld [vmem:[#allocation15 + $0x6a8] ss:$16 sps:$4 sm:$0xff]  }
 0x5a5   : > { %6568 = vmatprep.subr.bf16.mxu0 %v19181_v27  ;;  %v19245_v27 = vld [vmem:[#allocation15 + $0x468] ss:$16 sps:$4 sm:$0xff]  }
 0x5a6   : > { %6616 = vmatpush1.bf16.msra.mxu1 %v19182_v48  ;;  %v19262_v48 = vld [vmem:[#allocation15 + $0x66c] ss:$16 sps:$4 sm:$0xff]  }
 0x5a7   : > { %6617 = vmatprep.subr.bf16.mxu1 %v19190_v62  ;;  %v19259_v62 = vld [vmem:[#allocation15 + $0x42c] ss:$16 sps:$4 sm:$0xff]  }
 0x5a8   : > { %6569 = vmatpush2.bf16.msra.mxu0 %v19179_v15  ;;  %v19260_v15 = vld [vmem:[#allocation15 + $0x668] ss:$16 sps:$4 sm:$0xff]  }
 0x5a9   : > { %6570 = vmatprep.subr.bf16.mxu0 %v19187_v28  ;;  %v19268_v28 = vld [vmem:[#allocation15 + $0x64c] ss:$16 sps:$4 sm:$0xff]  }
 0x5aa   : > { %6618 = vmatpush2.bf16.msra.mxu1 %v19188_v3  ;;  %v19257_v3 = vld [vmem:[#allocation15 + $0x428] ss:$16 sps:$4 sm:$0xff]  }
 0x5ab   : > { %6619 = vmatprep.subr.bf16.mxu1 %v19196_v41  ;;  %v19266_v41 = vld [vmem:[#allocation15 + $0x648] ss:$16 sps:$4 sm:$0xff]  }
 0x5ac   : > { %6571 = vmatpush2.bf16.msra.mxu0 %v19185_v12  ;;  %v19274_v12 = vld [vmem:[#allocation15 + $0x62c] ss:$16 sps:$4 sm:$0xff]  }
 0x5ad   : > { %6572 = vmatprep.subr.bf16.mxu0 %v19193_v16  ;;  %v19271_v16 = vld [vmem:[#allocation15 + $0x5ec] ss:$16 sps:$4 sm:$0xff]  }
 0x5ae   : > { %6620 = vmatpush2.bf16.msra.mxu1 %v19194_v50  ;;  %v19272_v50 = vld [vmem:[#allocation15 + $0x628] ss:$16 sps:$4 sm:$0xff]  }
 0x5af   : > { %6621 = vmatprep.subr.bf16.mxu1 %v19202_v56  ;;  %v19280_v56 = vld [vmem:[#allocation15 + $0x60c] ss:$16 sps:$4 sm:$0xff]  }
 0x5b0   : > { %6573 = vmatpush2.bf16.msra.mxu0 %v19191_v37  ;;  %v19269_v37 = vld [vmem:[#allocation15 + $0x5e8] ss:$16 sps:$4 sm:$0xff]  }
 0x5b1   : > { %6574 = vmatprep.subr.bf16.mxu0 %v19199_v13  ;;  %v19277_v13 = vld [vmem:[#allocation15 + $0x5cc] ss:$16 sps:$4 sm:$0xff]  }
 0x5b2   : > { %6622 = vmatpush2.bf16.msra.mxu1 %v19200_v20  ;;  %v19278_v20 = vld [vmem:[#allocation15 + $0x608] ss:$16 sps:$4 sm:$0xff]  }
 0x5b3   : > { %6623 = vmatprep.subr.bf16.mxu1 %v19208_v4  ;;  %v19286_v4 = vld [vmem:[#allocation15 + $0x7ec] ss:$16 sps:$4 sm:$0xff]  }
 0x5b4   : > { %6575 = vmatpush2.bf16.msra.mxu0 %v19197_v38  ;;  %v19275_v38 = vld [vmem:[#allocation15 + $0x5c8] ss:$16 sps:$4 sm:$0xff]  }
 0x5b5   : > { %6576 = vmatprep.subr.bf16.mxu0 %v19205_v55  ;;  %v19283_v55 = vld [vmem:[#allocation15 + $0x5ac] ss:$16 sps:$4 sm:$0xff]  }
 0x5b6   : > { %6624 = vmatpush2.bf16.msra.mxu1 %v19206_v7  ;;  %v19284_v7 = vld [vmem:[#allocation15 + $0x7e8] ss:$16 sps:$4 sm:$0xff]  }
 0x5b7   : > { %6625 = vmatprep.subr.bf16.mxu1 %v19214_v54  ;;  %v19292_v54 = vld [vmem:[#allocation15 + $0x7cc] ss:$16 sps:$4 sm:$0xff]  }
 0x5b8   : > { %6577 = vmatpush2.bf16.msra.mxu0 %v19203_v34  ;;  %v19281_v34 = vld [vmem:[#allocation15 + $0x5a8] ss:$16 sps:$4 sm:$0xff]  }
 0x5b9   : > { %6578 = vmatprep.subr.bf16.mxu0 %v19211_v45  ;;  %v19289_v45 = vld [vmem:[#allocation15 + $0x58c] ss:$16 sps:$4 sm:$0xff]  }
 0x5ba   : > { %6626 = vmatpush2.bf16.msra.mxu1 %v19212_v46  ;;  %v19290_v46 = vld [vmem:[#allocation15 + $0x7c8] ss:$16 sps:$4 sm:$0xff]  }
 0x5bb   : > { %6627 = vmatprep.subr.bf16.mxu1 %v19220_v1  ;;  %v19298_v1 = vld [vmem:[#allocation15 + $0x7ac] ss:$16 sps:$4 sm:$0xff]  }
 0x5bc   : > { %6579 = vmatpush2.bf16.msra.mxu0 %v19209_v57  ;;  %v19287_v57 = vld [vmem:[#allocation15 + $0x588] ss:$16 sps:$4 sm:$0xff]  }
 0x5bd   : > { %6580 = vmatprep.subr.bf16.mxu0 %v19217_v44  ;;  %v19295_v44 = vld [vmem:[#allocation15 + $0x56c] ss:$16 sps:$4 sm:$0xff]  }
 0x5be   : > { %6628 = vmatpush2.bf16.msra.mxu1 %v19218_v43  ;;  %v19296_v43 = vld [vmem:[#allocation15 + $0x7a8] ss:$16 sps:$4 sm:$0xff]  }
 0x5bf   : > { %6629 = vmatprep.subr.bf16.mxu1 %v19223_v22  ;;  %v19304_v22 = vld [vmem:[#allocation15 + $0x78c] ss:$16 sps:$4 sm:$0xff]  }
 0x5c0   : > { %6581 = vmatpush2.bf16.msra.mxu0 %v19215_v52  ;;  %v19293_v52 = vld [vmem:[#allocation15 + $0x568] ss:$16 sps:$4 sm:$0xff]  }
 0x5c1   : > { %6652 = vmatprep.subr.bf16.mxu0 %v19226_v51  ;;  %v19301_v51 = vld [vmem:[#allocation15 + $0x54c] ss:$16 sps:$4 sm:$0xff]  }
 0x5c2   : > { %6630 = vmatpush2.bf16.msra.mxu1 %v19221_v21  ;;  %v19302_v21 = vld [vmem:[#allocation15 + $0x788] ss:$16 sps:$4 sm:$0xff]  }
 0x5c3   : > { %6583 = vmatmul.mubr.bf16.vlgmr.msra.gmra.mxu0 %v22999_v17  ;;  %6631 = vmatprep.subr.bf16.mxu1 %v19229_v32  ;;  %v19242_v17 = vld [vmem:[#allocation15 + $0x6c8] ss:$16 sps:$4 sm:$0xff]   ;;  %v19310_v32 = vld [vmem:[#allocation15 + $0x76c] ss:$16 sps:$4 sm:$0xff]  }
 0x5c4   : > { %6592 = vmatprep.mubr.bf16.mxu0 %v23003_v61  ;;  %6653 = vmatpush1.bf16.msra.mxu0 %v19224_v29  ;;  %v19250_v61 = vld [vmem:[#allocation15 + $0x6ac] ss:$16 sps:$4 sm:$0xff]   ;;  %v19299_v29 = vld [vmem:[#allocation15 + $0x548] ss:$16 sps:$4 sm:$0xff]  }
 0x5c5   : > { %6654 = vmatprep.subr.bf16.mxu0 %v19232_v39  ;;  %v19307_v39 = vld [vmem:[#allocation15 + $0x52c] ss:$16 sps:$4 sm:$0xff]  }
 0x5c6   : > { %6632 = vmatpush2.bf16.msra.mxu1 %v19227_v35  ;;  %v19308_v35 = vld [vmem:[#allocation15 + $0x768] ss:$16 sps:$4 sm:$0xff]  }
 0x5c7   : > { %6703 = vmatprep.subr.bf16.mxu1 %v19238_v60  ;;  %v19316_v60 = vld [vmem:[#allocation15 + $0x74c] ss:$16 sps:$4 sm:$0xff]  }
 0x5c8   : > { %6655 = vmatpush1.bf16.msra.mxu0 %v19230_v33  ;;  %v19305_v33 = vld [vmem:[#allocation15 + $0x528] ss:$16 sps:$4 sm:$0xff]  }
 0x5c9   : > { %6634 = vmatmul.mubr.bf16.vlgmr.msra.gmra.mxu1 %v23009_v26  ;;  %6656 = vmatprep.subr.bf16.mxu0 %v19235_v40  ;;  %v19256_v26 = vld [vmem:[#allocation15 + $0x68c] ss:$16 sps:$4 sm:$0xff]  }
 0x5ca   : > { %6643 = vmatprep.mubr.bf16.mxu1 %v23015_v59  ;;  %6704 = vmatpush1.bf16.msra.mxu1 %v19236_v30  ;;  %v19253_v59 = vld [vmem:[#allocation15 + $0x44c] ss:$16 sps:$4 sm:$0xff]   ;;  %v19314_v30 = vld [vmem:[#allocation15 + $0x748] ss:$16 sps:$4 sm:$0xff]  }
 0x5cb   : > { %6593 = vmatmul.mubr.bf16.gmra.mxu0 %v23012_v23  ;;  %6705 = vmatprep.subr.bf16.mxu1 %v19244_v19  ;;  %v19254_v23 = vld [vmem:[#allocation15 + $0x688] ss:$16 sps:$4 sm:$0xff]   ;;  %v19313_v40 = vld [vmem:[#allocation15 + $0x50c] ss:$16 sps:$4 sm:$0xff]  }
 0x5cc   : > { %6657 = vmatpush1.bf16.msra.mxu0 %v19233_v2  ;;  %6684 = vmatprep.mubr.bf16.mxu0 %v23030_v58  ;;  %v19251_v58 = vld [vmem:[#allocation15 + $0x448] ss:$16 sps:$4 sm:$0xff]   ;;  %v19319_v19 = vld [vmem:[#allocation15 + $0x72c] ss:$16 sps:$4 sm:$0xff]  }
 0x5cd   : > { %6658 = vmatprep.subr.bf16.mxu0 %v19241_v42  ;;  %v19311_v2 = vld [vmem:[#allocation15 + $0x508] ss:$16 sps:$4 sm:$0xff]   ;;  %v19325_v42 = vld [vmem:[#allocation17 + $0x4e4] ss:$16 sps:$4 sm:$0xff]  }
 0x5ce   : > { %6706 = vmatpush1.bf16.msra.mxu1 %v19242_v17  ;;  %v19317_v17 = vld [vmem:[#allocation15 + $0x728] ss:$16 sps:$4 sm:$0xff]  }
 0x5cf   : > { %6707 = vmatprep.subr.bf16.mxu1 %v19250_v61  ;;  %v19322_v61 = vld [vmem:[#allocation15 + $0x70c] ss:$16 sps:$4 sm:$0xff]  }
 0x5d0   : > { %6659 = vmatpush1.bf16.msra.mxu0 %v19239_v31  ;;  %v19323_v31 = vld [vmem:[#allocation17 + $0x4e0] ss:$16 sps:$4 sm:$0xff]  }
 0x5d1   : > { %6644 = vmatmul.mubr.bf16.gmra.mxu1 %v23026_v9  ;;  %6660 = vmatprep.subr.bf16.mxu0 %v19247_v24  ;;  %v19265_v9 = vld [vmem:[#allocation15 + $0x40c] ss:$16 sps:$4 sm:$0xff]   ;;  %v19328_v24 = vld [vmem:[#allocation17 + $0x4c4] ss:$16 sps:$4 sm:$0xff]  }
 0x5d2   : > { %6708 = vmatpush1.bf16.msra.mxu1 %v19248_v18  ;;  %6735 = vmatprep.mubr.bf16.mxu1 %v23044_v5  ;;  %v19263_v5 = vld [vmem:[#allocation15 + $0x408] ss:$16 sps:$4 sm:$0xff]  }
 0x5d3   : > { %6709 = vmatprep.subr.bf16.mxu1 %v19256_v26  ;;  %v19320_v18 = vld [vmem:[#allocation15 + $0x708] ss:$16 sps:$4 sm:$0xff]  }
 0x5d4   : > { %6661 = vmatpush1.bf16.msra.mxu0 %v19245_v27  ;;  %v19326_v27 = vld [vmem:[#allocation17 + $0x4c0] ss:$16 sps:$4 sm:$0xff]  }
 0x5d5   : > { %6662 = vmatprep.subr.bf16.mxu0 %v19253_v59 }
 0x5d6   : > { %6710 = vmatpush1.bf16.msra.mxu1 %v19254_v23  ;;  %v19331_v23 = vld [vmem:[#allocation17 + $0x4a4] ss:$16 sps:$4 sm:$0xff]  }
 0x5d7   : > { %6711 = vmatprep.subr.bf16.mxu1 %v19262_v48 }
 0x5d8   : > { %6663 = vmatpush1.bf16.msra.mxu0 %v19251_v58  ;;  %v19329_v58 = vld [vmem:[#allocation17 + $0x4a0] ss:$16 sps:$4 sm:$0xff]  }
 0x5d9   : > { %6664 = vmatprep.subr.bf16.mxu0 %v19259_v62 }
 0x5da   : > { %6712 = vmatpush1.bf16.msra.mxu1 %v19260_v15  ;;  %v19334_v15 = vld [vmem:[#allocation17 + $0x484] ss:$16 sps:$4 sm:$0xff]  }
 0x5db   : > { %6713 = vmatprep.subr.bf16.mxu1 %v19268_v28 }
 0x5dc   : > { %6665 = vmatpush1.bf16.msra.mxu0 %v19257_v3  ;;  %v19332_v3 = vld [vmem:[#allocation17 + $0x480] ss:$16 sps:$4 sm:$0xff]  }
 0x5dd   : > { %6666 = vmatprep.subr.bf16.mxu0 %v19265_v9 }
 0x5de   : > { %6714 = vmatpush1.bf16.msra.mxu1 %v19266_v41 }
 0x5df   : > { %6715 = vmatprep.subr.bf16.mxu1 %v19274_v12 }
 0x5e0   : > { %6667 = vmatpush1.bf16.msra.mxu0 %v19263_v5 }
 0x5e1   : > { %6668 = vmatprep.subr.bf16.mxu0 %v19271_v16  ;;  %v19335_v16 = vld [vmem:[#allocation17 + $0x460] ss:$16 sps:$4 sm:$0xff]  }
 0x5e2   : > { %6716 = vmatpush1.bf16.msra.mxu1 %v19272_v50  ;;  %v19340_v50 = vld [vmem:[#allocation17 + $0x444] ss:$16 sps:$4 sm:$0xff]  }
 0x5e3   : > { %6717 = vmatprep.subr.bf16.mxu1 %v19280_v56 }
 0x5e4   : > { %6669 = vmatpush2.bf16.msra.mxu0 %v19269_v37  ;;  %v19338_v37 = vld [vmem:[#allocation17 + $0x440] ss:$16 sps:$4 sm:$0xff]  }
 0x5e5   : > { %6670 = vmatprep.subr.bf16.mxu0 %v19277_v13 }
 0x5e6   : > { %6718 = vmatpush1.bf16.msra.mxu1 %v19278_v20  ;;  %v19343_v20 = vld [vmem:[#allocation17 + $0x424] ss:$16 sps:$4 sm:$0xff]  }
 0x5e7   : > { %6719 = vmatprep.subr.bf16.mxu1 %v19286_v4 }
 0x5e8   : > { %6671 = vmatpush2.bf16.msra.mxu0 %v19275_v38  ;;  %v19341_v38 = vld [vmem:[#allocation17 + $0x420] ss:$16 sps:$4 sm:$0xff]  }
 0x5e9   : > { %6672 = vmatprep.subr.bf16.mxu0 %v19283_v55  ;;  %v19346_v55 = vld [vmem:[#allocation17 + $0x404] ss:$16 sps:$4 sm:$0xff]  }
 0x5ea   : > { %6720 = vmatpush2.bf16.msra.mxu1 %v19284_v7  ;;  %v19344_v7 = vld [vmem:[#allocation17 + $0x400] ss:$16 sps:$4 sm:$0xff]  }
 0x5eb   : > { %6721 = vmatprep.subr.bf16.mxu1 %v19292_v54  ;;  %v19347_v54 = vld [vmem:[#allocation17 + $0x5e0] ss:$16 sps:$4 sm:$0xff]  }
 0x5ec   : > { %6673 = vmatpush2.bf16.msra.mxu0 %v19281_v34  ;;  %v19352_v34 = vld [vmem:[#allocation17 + $0x5c4] ss:$16 sps:$4 sm:$0xff]  }
 0x5ed   : > { %6674 = vmatprep.subr.bf16.mxu0 %v19289_v45  ;;  %v19419_v45 = vld [vmem:[#allocation17 + $0x6e0] ss:$16 sps:$4 sm:$0xff]  }
 0x5ee   : > { %6722 = vmatpush2.bf16.msra.mxu1 %v19290_v46  ;;  %v19421_v46 = vld [vmem:[#allocation17 + $0x6e4] ss:$16 sps:$4 sm:$0xff]  }
 0x5ef   : > { %6723 = vmatprep.subr.bf16.mxu1 %v19298_v1  ;;  %v19350_v1 = vld [vmem:[#allocation17 + $0x5c0] ss:$16 sps:$4 sm:$0xff]  }
 0x5f0   : > { %6675 = vmatpush2.bf16.msra.mxu0 %v19287_v57  ;;  %v19355_v57 = vld [vmem:[#allocation17 + $0x5a4] ss:$16 sps:$4 sm:$0xff]  }
 0x5f1   : > { %6676 = vmatprep.subr.bf16.mxu0 %v19295_v44  ;;  %v19425_v44 = vld [vmem:[#allocation17 + $0x6c0] ss:$16 sps:$4 sm:$0xff]  }
 0x5f2   : > { %6724 = vmatpush2.bf16.msra.mxu1 %v19296_v43  ;;  %v19427_v43 = vld [vmem:[#allocation17 + $0x6c4] ss:$16 sps:$4 sm:$0xff]  }
 0x5f3   : > { %6725 = vmatprep.subr.bf16.mxu1 %v19304_v22  ;;  %v19353_v22 = vld [vmem:[#allocation17 + $0x5a0] ss:$16 sps:$4 sm:$0xff]  }
 0x5f4   : > { %6677 = vmatpush2.bf16.msra.mxu0 %v19293_v52  ;;  %v19358_v52 = vld [vmem:[#allocation17 + $0x584] ss:$16 sps:$4 sm:$0xff]  }
 0x5f5   : > { %6678 = vmatprep.subr.bf16.mxu0 %v19301_v51  ;;  %v19431_v51 = vld [vmem:[#allocation17 + $0x6a0] ss:$16 sps:$4 sm:$0xff]  }
 0x5f6   : > { %6726 = vmatpush2.bf16.msra.mxu1 %v19302_v21  ;;  %v19433_v21 = vld [vmem:[#allocation17 + $0x6a4] ss:$16 sps:$4 sm:$0xff]  }
 0x5f7   : > { %6727 = vmatprep.subr.bf16.mxu1 %v19310_v32  ;;  %v19356_v32 = vld [vmem:[#allocation17 + $0x580] ss:$16 sps:$4 sm:$0xff]  }
 0x5f8   : > { %6679 = vmatpush2.bf16.msra.mxu0 %v19299_v29  ;;  %v19361_v29 = vld [vmem:[#allocation17 + $0x564] ss:$16 sps:$4 sm:$0xff]  }
 0x5f9   : > { %6680 = vmatprep.subr.bf16.mxu0 %v19307_v39  ;;  %v19437_v39 = vld [vmem:[#allocation17 + $0x680] ss:$16 sps:$4 sm:$0xff]  }
 0x5fa   : > { %6728 = vmatpush2.bf16.msra.mxu1 %v19308_v35  ;;  %v19439_v35 = vld [vmem:[#allocation17 + $0x684] ss:$16 sps:$4 sm:$0xff]  }
 0x5fb   : > { %6729 = vmatprep.subr.bf16.mxu1 %v19316_v60  ;;  %v19359_v60 = vld [vmem:[#allocation17 + $0x560] ss:$16 sps:$4 sm:$0xff]  }
 0x5fc   : > { %6681 = vmatpush2.bf16.msra.mxu0 %v19305_v33  ;;  %v19364_v33 = vld [vmem:[#allocation17 + $0x544] ss:$16 sps:$4 sm:$0xff]  }
 0x5fd   : > { %6682 = vmatprep.subr.bf16.mxu0 %v19313_v40  ;;  %v19443_v40 = vld [vmem:[#allocation17 + $0x660] ss:$16 sps:$4 sm:$0xff]  }
 0x5fe   : > { %6730 = vmatpush2.bf16.msra.mxu1 %v19314_v30  ;;  %v19445_v30 = vld [vmem:[#allocation17 + $0x664] ss:$16 sps:$4 sm:$0xff]  }
 0x5ff   : > { %6731 = vmatprep.subr.bf16.mxu1 %v19319_v19  ;;  %v19362_v19 = vld [vmem:[#allocation17 + $0x540] ss:$16 sps:$4 sm:$0xff]  }
 0x600   : > { %6683 = vmatpush2.bf16.msra.mxu0 %v19311_v2  ;;  %v19367_v2 = vld [vmem:[#allocation17 + $0x524] ss:$16 sps:$4 sm:$0xff]  }
 0x601   : > { %7735 = vmatprep.subr.bf16.mxu0 %v19325_v42  ;;  %v19449_v42 = vld [vmem:[#allocation17 + $0x640] ss:$16 sps:$4 sm:$0xff]  }
 0x602   : > { %6732 = vmatpush2.bf16.msra.mxu1 %v19317_v17  ;;  %v19451_v17 = vld [vmem:[#allocation17 + $0x644] ss:$16 sps:$4 sm:$0xff]  }
 0x603   : > { %6685 = vmatmul.mubr.bf16.vlgmr.msra.gmra.mxu0 %v23023_v8  ;;  %v23082_v26 = vpop.f32.mrf.mxu0  ;;  %6733 = vmatprep.subr.bf16.mxu1 %v19322_v61  ;;  %v19365_v61 = vld [vmem:[#allocation17 + $0x520] ss:$16 sps:$4 sm:$0xff]  }
 0x604   : > { %6694 = vmatprep.mubr.bf16.mxu0 %v23051_v14  ;;  %7736 = vmatpush1.bf16.msra.mxu0 %v19323_v31  ;;  %v19370_v31 = vld [vmem:[#allocation17 + $0x504] ss:$16 sps:$4 sm:$0xff]  }
 0x605   : > { %v23085_v59 = vpop.f32.mrf.mxu0  ;;  %7737 = vmatprep.subr.bf16.mxu0 %v19328_v24  ;;  %v19455_v24 = vld [vmem:[#allocation17 + $0x620] ss:$16 sps:$4 sm:$0xff]  }
 0x606   : > { %6734 = vmatpush2.bf16.msra.mxu1 %v19320_v18  ;;  %v19457_v18 = vld [vmem:[#allocation17 + $0x624] ss:$16 sps:$4 sm:$0xff]  }
 0x607   : > { %v23087_v48 = vpop.f32.mrf.mxu0  ;;  %7778 = vmatprep.subr.bf16.mxu1 %v19421_v46 }
 0x608   : > { %7738 = vmatpush1.bf16.msra.mxu0 %v19326_v27  ;;  %v19368_v27 = vld [vmem:[#allocation17 + $0x500] ss:$16 sps:$4 sm:$0xff]  }
 0x609   : > { %v23089_v62 = vpop.f32.mrf.mxu0  ;;  %6736 = vmatmul.mubr.bf16.vlgmr.msra.gmra.mxu1 %v23039_v10  ;;  %v23092_v8 = vpop.f32.mrf.mxu1  ;;  %7739 = vmatprep.subr.bf16.mxu0 %v19331_v23  ;;  %v19337_v10 = vld [vmem:[#allocation17 + $0x464] ss:$16 sps:$4 sm:$0xff]   ;;  %v19373_v23 = vld [vmem:[#allocation17 + $0x4ec] ss:$16 sps:$4 sm:$0xff]  }
 0x60a   : > { %6745 = vmatprep.mubr.bf16.mxu1 %v23059_v36  ;;  %7779 = vmatpush1.bf16.msra.mxu1 %v19419_v45 }
 0x60b   : > { %6695 = vmatmul.mubr.bf16.gmra.mxu0 %v23061_v47  ;;  %v23096_v14 = vpop.f32.mrf.mxu0  ;;  %v23098_v28 = vpop.f32.mrf.mxu1  ;;  %7780 = vmatprep.subr.bf16.mxu1 %v19427_v43 }
 0x60c   : > { %7740 = vmatpush1.bf16.msra.mxu0 %v19329_v58 }
 0x60d   : > { %v23100_v9 = vpop.f32.mrf.mxu0  ;;  %v23102_v41 = vpop.f32.mrf.mxu1  ;;  %7741 = vmatprep.subr.bf16.mxu0 %v19334_v15  ;;  %v19461_v15 = vld [vmem:[#allocation17 + $0x600] ss:$16 sps:$4 sm:$0xff]  }
 0x60e   : > { %7781 = vmatpush1.bf16.msra.mxu1 %v19425_v44 }
 0x60f   : > { %v6394_v12 = vpop.f32.mrf.mxu0  ;;  %v23104_v5 = vpop.f32.mrf.mxu1  ;;  %7782 = vmatprep.subr.bf16.mxu1 %v19433_v21 }
 0x610   : > { %7742 = vmatpush1.bf16.msra.mxu0 %v19332_v3  ;;  %v19463_v3 = vld [vmem:[#allocation17 + $0x604] ss:$16 sps:$4 sm:$0xff]   ;;  %v6432_v12 = vadd.f32 %v23092_v8, %v23082_v26  ;;  %v6438_v26 = vadd.f32 %v23104_v5, %v23089_v62 }
 0x611   : > { %v6395_v36 = vpop.f32.mrf.mxu0  ;;  %6746 = vmatmul.mubr.bf16.gmra.mxu1 %v23069_v11  ;;  %v23107_v47 = vpop.f32.mrf.mxu1  ;;  %7743 = vmatprep.subr.bf16.mxu0 %v19337_v10  ;;  %v19349_v11 = vld [vmem:[#allocation17 + $0x5e4] ss:$16 sps:$4 sm:$0xff]  }
 0x612   : > { %7783 = vmatpush1.bf16.msra.mxu1 %v19431_v51  ;;  %v6434_v36 = vadd.f32 %v23098_v28, %v23085_v59  ;;  %v19473_v59 = vld [vmem:[#allocation17 + $0x7c0] ss:$16 sps:$4 sm:$0xff]   ;;  %v19475_v28 = vld [vmem:[#allocation17 + $0x7c4] ss:$16 sps:$4 sm:$0xff]  }
 0x613   : > { %v23109_v56 = vpop.f32.mrf.mxu1  ;;  %7784 = vmatprep.subr.bf16.mxu1 %v19439_v35  ;;  %v19481_v51 = vld [vmem:[#allocation17 + $0x7a4] ss:$16 sps:$4 sm:$0xff]  }
 0x614   : > { %7744 = vmatpush1.bf16.msra.mxu0 %v19335_v16  ;;  %v6444_v43 = vadd.f32 %v23109_v56, %v23100_v9 }
 0x615   : > { %v6445_v13 = vpop.f32.mrf.mxu1  ;;  %7745 = vmatprep.subr.bf16.mxu0 %v19340_v50 }
 0x616   : > { %7785 = vmatpush1.bf16.msra.mxu1 %v19437_v39  ;;  %v19469_v13 = vld [vmem:[#allocation17 + $0x7e4] ss:$16 sps:$4 sm:$0xff]  }
 0x617   : > { %v6446_v4 = vpop.f32.mrf.mxu1  ;;  %7786 = vmatprep.subr.bf16.mxu1 %v19445_v30 }
 0x618   : > { %7746 = vmatpush1.bf16.msra.mxu0 %v19338_v37  ;;  %v19467_v37 = vld [vmem:[#allocation17 + $0x7e0] ss:$16 sps:$4 sm:$0xff]  }
 0x619   : > { %7747 = vmatprep.subr.bf16.mxu0 %v19343_v20 }
 0x61a   : > { %7787 = vmatpush1.bf16.msra.mxu1 %v19443_v40 }
 0x61b   : > { %7788 = vmatprep.subr.bf16.mxu1 %v19451_v17  ;;  %v19491_v17 = vld [vmem:[#allocation17 + $0x760] ss:$16 sps:$4 sm:$0xff]  }
 0x61c   : > { %7748 = vmatpush1.bf16.msra.mxu0 %v19341_v38  ;;  %v6436_v38 = vadd.f32 %v23102_v41, %v23087_v48 }
 0x61d   : > { %7749 = vmatprep.subr.bf16.mxu0 %v19346_v55 }
 0x61e   : > { %7789 = vmatpush1.bf16.msra.mxu1 %v19449_v42 }
 0x61f   : > { %7790 = vmatprep.subr.bf16.mxu1 %v19457_v18 }
 0x620   : > { %7750 = vmatpush1.bf16.msra.mxu0 %v19344_v7 }
 0x621   : > { %7751 = vmatprep.subr.bf16.mxu0 %v19349_v11 }
 0x622   : > { %7791 = vmatpush1.bf16.msra.mxu1 %v19455_v24 }
 0x623   : > { %7792 = vmatprep.subr.bf16.mxu1 %v19463_v3 }
 0x624   : > { %7752 = vmatpush2.bf16.msra.mxu0 %v19347_v54 }
 0x625   : > { %7753 = vmatprep.subr.bf16.mxu0 %v19352_v34 }
 0x626   : > { %7793 = vmatpush1.bf16.msra.mxu1 %v19461_v15 }
 0x627   : > { %7794 = vmatprep.subr.bf16.mxu1 %v19469_v13 }
 0x628   : > { %7754 = vmatpush2.bf16.msra.mxu0 %v19350_v1  ;;  %v6442_v1 = vadd.f32 %v23107_v47, %v23096_v14 }
 0x629   : > { %7755 = vmatprep.subr.bf16.mxu0 %v19355_v57 }
 0x62a   : > { %7795 = vmatpush2.bf16.msra.mxu1 %v19467_v37 }
 0x62b   : > { %7796 = vmatprep.subr.bf16.mxu1 %v19475_v28  ;;  %v19371_v28 = vld [vmem:[#allocation17 + $0x4e8] ss:$16 sps:$4 sm:$0xff]  }
 0x62c   : > { %7756 = vmatpush2.bf16.msra.mxu0 %v19353_v22 }
 0x62d   : > { %7757 = vmatprep.subr.bf16.mxu0 %v19358_v52  ;;  %v19479_v52 = vld [vmem:[#allocation17 + $0x7a0] ss:$16 sps:$4 sm:$0xff]  }
 0x62e   : > { %7797 = vmatpush2.bf16.msra.mxu1 %v19473_v59 }
 0x62f   : > { %7798 = vmatprep.subr.bf16.mxu1 %v19481_v51 }
 0x630   : > { %7758 = vmatpush2.bf16.msra.mxu0 %v19356_v32 }
 0x631   : > { %7759 = vmatprep.subr.bf16.mxu0 %v19361_v29 }
 0x632   : > { %7799 = vmatpush2.bf16.msra.mxu1 %v19479_v52  ;;  %v19374_v52 = vld [vmem:[#allocation17 + $0x4c8] ss:$16 sps:$4 sm:$0xff]  }
 0x634   : > { %7760 = vmatpush2.bf16.msra.mxu0 %v19359_v60  ;;  %v19485_v60 = vld [vmem:[#allocation17 + $0x780] ss:$16 sps:$4 sm:$0xff]  }
 0x635   : > { %7761 = vmatprep.subr.bf16.mxu0 %v19364_v33 }
 0x638   : > { %7762 = vmatpush2.bf16.msra.mxu0 %v19362_v19  ;;  %v19487_v19 = vld [vmem:[#allocation17 + $0x784] ss:$16 sps:$4 sm:$0xff]  }
 0x639   : > { %7763 = vmatprep.subr.bf16.mxu0 %v19367_v2  ;;  %v19493_v2 = vld [vmem:[#allocation17 + $0x764] ss:$16 sps:$4 sm:$0xff]   ;;  %7800 = vmatprep.subr.bf16.mxu1 %v19487_v19  ;;  %v19397_v19 = vld [vmem:[#allocation17 + $0x5ec] ss:$16 sps:$4 sm:$0xff]  }
 0x63a   : > { %7801 = vmatpush2.bf16.msra.mxu1 %v19485_v60  ;;  %v19388_v60 = vld [vmem:[#allocation17 + $0x44c] ss:$16 sps:$4 sm:$0xff]  }
 0x63b   : > { %7802 = vmatprep.subr.bf16.mxu1 %v19493_v2 }
 0x63c   : > { %7764 = vmatpush2.bf16.msra.mxu0 %v19365_v61  ;;  %v19499_v61 = vld [vmem:[#allocation17 + $0x744] ss:$16 sps:$4 sm:$0xff]  }
 0x63d   : > { %7765 = vmatprep.subr.bf16.mxu0 %v19370_v31 }
 0x63e   : > { %7803 = vmatpush2.bf16.msra.mxu1 %v19491_v17  ;;  %v19400_v17 = vld [vmem:[#allocation17 + $0x5cc] ss:$16 sps:$4 sm:$0xff]  }
 0x63f   : > { %7804 = vmatprep.subr.bf16.mxu1 %v19499_v61 }
 0x640   : > { %7766 = vmatpush2.bf16.msra.mxu0 %v19368_v27 }
 0x641   : > { %7821 = vmatprep.subr.bf16.mxu0 %v19373_v23 }
 0x643   : > { %v6482_v58 = vpop.f32.mrf.mxu0 }
 0x644   : > { %v6483_v50 = vadd.f32 %v6482_v58, %v6432_v12 }
 0x645   : > { %v6484_v10 = vpop.f32.mrf.mxu0 }
 0x646   : > { %v6485_v55 = vadd.f32 %v6484_v10, %v6434_v36  ;;  %v19497_v10 = vld [vmem:[#allocation17 + $0x740] ss:$16 sps:$4 sm:$0xff]  }
 0x647   : > { %v6486_v16 = vpop.f32.mrf.mxu0  ;;  %7805 = vmatpush2.bf16.msra.mxu1 %v19497_v10  ;;  %v19401_v10 = vld [vmem:[#allocation17 + $0x5a8] ss:$16 sps:$4 sm:$0xff]  }
 0x648   : > { %v6487_v8 = vadd.f32 %v6486_v16, %v6436_v38  ;;  %v19505_v16 = vld [vmem:[#allocation17 + $0x724] ss:$16 sps:$4 sm:$0xff]   ;;  %v19503_v38 = vld [vmem:[#allocation17 + $0x720] ss:$16 sps:$4 sm:$0xff]  }
 0x649   : > { %v6488_v20 = vpop.f32.mrf.mxu0  ;;  %v6533_v4 = vpop.f32.mrf.mxu1  ;;  %7806 = vmatprep.subr.bf16.mxu1 %v19505_v16 }
 0x64a   : > { %v6534_v7 = vadd.f32 %v6533_v4, %v6483_v50  ;;  %v6489_v57 = vadd.f32 %v6488_v20, %v6438_v26 }
 0x64b   : > { %v6492_v11 = vpop.f32.mrf.mxu0  ;;  %v6535_v54 = vpop.f32.mrf.mxu1  ;;  %7807 = vmatpush2.bf16.msra.mxu1 %v19503_v38 }
 0x64c   : > { %v6536_v34 = vadd.f32 %v6535_v54, %v6485_v55  ;;  %v6493_v22 = vadd.f32 %v6492_v11, %v6442_v1 }
 0x64d   : > { %v6494_v45 = vpop.f32.mrf.mxu0  ;;  %v6537_v46 = vpop.f32.mrf.mxu1 }
 0x64e   : > { %v6538_v48 = vadd.f32 %v6537_v46, %v6487_v8  ;;  %v6495_v29 = vadd.f32 %v6494_v45, %v6444_v43  ;;  %v19517_v43 = vld [vmem:[#allocation17 + $0x6ec] ss:$16 sps:$4 sm:$0xff]  }
 0x64f   : > { %v6496_v41 = vpop.f32.mrf.mxu0  ;;  %v6539_v44 = vpop.f32.mrf.mxu1 }
 0x650   : > { %v6540_v62 = vadd.f32 %v6539_v44, %v6489_v57  ;;  %v23123_v5 = vpack.c.bf16 %v6538_v48, %v6534_v7  ;;  %v19511_v7 = vld [vmem:[#allocation17 + $0x704] ss:$16 sps:$4 sm:$0xff]   ;;  %v19376_v48 = vld [vmem:[#allocation17 + $0x4cc] ss:$16 sps:$4 sm:$0xff]   ;;  %v19509_v41 = vld [vmem:[#allocation17 + $0x700] ss:$16 sps:$4 sm:$0xff]  }
 0x651   : > { %v6497_v21 = vpop.f32.mrf.mxu0  ;;  %v6543_v32 = vpop.f32.mrf.mxu1  ;;  %7808 = vmatprep.subr.bf16.mxu1 %v19511_v7 }
 0x652   : > { %v6544_v39 = vadd.f32 %v6543_v32, %v6493_v22  ;;  %v23125_v14 = vpack.c.bf16 %v6540_v62, %v6536_v34  ;;  %v7044_v40 = vshrl.u32 %v23123_v5, 16  ;;  %v7046_v30 = vshll.u32 %v23123_v5, 16  ;;  %v19379_v21 = vld [vmem:[#allocation17 + $0x4ac] ss:$16 sps:$4 sm:$0xff]   ;;  %7809 = vmatpush2.bf16.msra.mxu1 %v19509_v41  ;;  %v19377_v32 = vld [vmem:[#allocation17 + $0x4a8] ss:$16 sps:$4 sm:$0xff]  }
 0x653   : > { %v6545_v47 = vpop.f32.mrf.mxu1  ;;  %7864 = vmatprep.subr.bf16.mxu1 %v19517_v43  ;;  %v19428_v41 = vld [vmem:[#allocation17 + $0xc0] ss:$16 sps:$4 sm:$0xff]   ;;  %v19436_v43 = vld [vmem:[#allocation17 + $0xa4] ss:$16 sps:$4 sm:$0xff]  }
 0x654   : > { %6762 = vst [vmem:[#allocation3 + $0x28] sm:$0xf] %v6544_v39  ;;  %v6546_v35 = vadd.f32 %v6545_v47, %v6495_v29  ;;  %v7056_v9 = vshrl.u32 %v23125_v14, 16  ;;  %v7058_v56 = vshll.u32 %v23125_v14, 16  ;;  %v9821_v18 = vrot.slane %v7044_v40, 1 }
 0x655   : > { %v6547_v33 = vpop.f32.mrf.mxu1  ;;  %v9822_v27 = vrot.slane %v7046_v30, 2  ;;  %v7048_v20 = vrot.slane %v7046_v30, 1  ;;  %v19382_v29 = vld [vmem:[#allocation17 + $0x48c] ss:$16 sps:$4 sm:$0xff]   ;;  %v19380_v39 = vld [vmem:[#allocation17 + $0x488] ss:$16 sps:$4 sm:$0xff]  }
 0x656   : > { %6763 = vst [vmem:[#allocation3 + $0x48] sm:$0xf] %v6546_v35  ;;  %v9830_v31 = vrot.slane %v7056_v9, 1  ;;  %v9831_v24 = vrot.slane %v7058_v56, 2  ;;  %v7060_v50 = vrot.slane %v7058_v56, 1 }
 0x657   : > { %v6548_v42 = vpop.f32.mrf.mxu1  ;;  %v9823_v15 = vor.u32 %v9822_v27, %v9821_v18  ;;  %v7049_v45 = vor.u32 %v7048_v20, %v7044_v40  ;;  %v19385_v47 = vld [vmem:[#allocation17 + $0x46c] ss:$16 sps:$4 sm:$0xff]   ;;  %v19383_v35 = vld [vmem:[#allocation17 + $0x468] ss:$16 sps:$4 sm:$0xff]  }
 0x658   : > { %v9832_v58 = vor.u32 %v9831_v24, %v9830_v31  ;;  %v7061_v8 = vor.u32 %v7060_v50, %v7056_v9  ;;  %v19386_v33 = vld [vmem:[#allocation17 + $0x448] ss:$16 sps:$4 sm:$0xff]   ;;  %v19391_v9 = vld [vmem:[#allocation17 + $0x42c] ss:$16 sps:$4 sm:$0xff]  }
 0x659   : > { %v19389_v56 = vld [vmem:[#allocation17 + $0x428] ss:$16 sps:$4 sm:$0xff]   ;;  %v19394_v40 = vld [vmem:[#allocation17 + $0x40c] ss:$16 sps:$4 sm:$0xff]  }
 0x65a   : > { %v19392_v30 = vld [vmem:[#allocation17 + $0x408] ss:$16 sps:$4 sm:$0xff]   ;;  %v19403_v18 = vld [vmem:[#allocation17 + $0x5ac] ss:$16 sps:$4 sm:$0xff]  }
 0x65b   : > { %v6774_v23 = vld [vmem:[#allocation3 + $0x28] sm:$0xf]  ;;  %v19395_v42 = vld [vmem:[#allocation17 + $0x5e8] ss:$16 sps:$4 sm:$0xff]  }
 0x65c   : > { %v23131_v3 = vpack.c.bf16 %v6774_v23, %v6774_v23  ;;  %v19398_v24 = vld [vmem:[#allocation17 + $0x5c8] ss:$16 sps:$4 sm:$0xff]  }
 0x65d   : > { %v6775_v12 = vld [vmem:[#allocation3 + $0x48] sm:$0xf]  ;;  %v19404_v20 = vld [vmem:[#allocation17 + $0x588] ss:$16 sps:$4 sm:$0xff]  }
 0x65e   : > { %v23133_v36 = vpack.c.bf16 %v6775_v12, %v6775_v12  ;;  %v7051_v37 = vshll.u32 %v23131_v3, 16  ;;  %v9824_v13 = vshrl.u32 %v23131_v3, 16  ;;  %v19406_v12 = vld [vmem:[#allocation17 + $0x58c] ss:$16 sps:$4 sm:$0xff]  }
 0x660   : > { %v7063_v4 = vshll.u32 %v23133_v36, 16  ;;  %v7053_v55 = vrot.slane %v7051_v37, 1  ;;  %v9833_v11 = vshrl.u32 %v23133_v36, 16  ;;  %v9826_v54 = vrot.slane %v9824_v13, 1 }
 0x661   : > { %v9827_v26 = vrot.slane %v7051_v37, 2 }
 0x662   : > { %v7065_v34 = vrot.slane %v7063_v4, 1  ;;  %v9836_v59 = vrot.slane %v7063_v4, 2  ;;  %v9835_v46 = vrot.slane %v9833_v11, 1  ;;  %v23141_v44 = vsel %vm1098_vm3, %v7049_v45, %v7053_v55  ;;  %v19409_v4 = vld [vmem:[#allocation17 + $0x56c] ss:$16 sps:$4 sm:$0xff]  }
 0x663   : > { %v9828_v1 = vor.u32 %v9827_v26, %v9826_v54  ;;  %v19407_v11 = vld [vmem:[#allocation17 + $0x568] ss:$16 sps:$4 sm:$0xff]   ;;  %v19412_v54 = vld [vmem:[#allocation17 + $0x54c] ss:$16 sps:$4 sm:$0xff]  }
 0x664   : > { %v7066_v57 = vsel %vm1098_vm3, %v7061_v8, %v7065_v34  ;;  %v9837_v22 = vor.u32 %v9836_v59, %v9835_v46  ;;  %v19410_v34 = vld [vmem:[#allocation17 + $0x548] ss:$16 sps:$4 sm:$0xff]   ;;  %v19415_v59 = vld [vmem:[#allocation17 + $0x52c] ss:$16 sps:$4 sm:$0xff]  }
 0x665   : > { %7767 = vmatprep.mubr.bf16.mxu0 %v7066_v57  ;;  %v23144_v62 = vsel %vm2890_vm4, %v9823_v15, %v9828_v1  ;;  %v19418_v45 = vld [vmem:[#allocation17 + $0x50c] ss:$16 sps:$4 sm:$0xff]   ;;  %v19416_v46 = vld [vmem:[#allocation17 + $0x508] ss:$16 sps:$4 sm:$0xff]   ;;  %v19424_v1 = vld [vmem:[#allocation17 + $0xe4] ss:$16 sps:$4 sm:$0xff]  }
 0x666   : > { %7768 = vmatmul.mubr.bf16.vlgmr.msra.gmra.mxu0 %v23141_v44  ;;  %v23148_v51 = vsel %vm2890_vm4, %v9832_v58, %v9837_v22  ;;  %v19434_v22 = vld [vmem:[#allocation17 + $0xa0] ss:$16 sps:$4 sm:$0xff]  }
 0x667   : > { %7822 = vmatpush1.bf16.msra.mxu0 %v19371_v28  ;;  %7853 = vmatprep.mubr.bf16.mxu0 %v7066_v57  ;;  %v19413_v28 = vld [vmem:[#allocation17 + $0x528] ss:$16 sps:$4 sm:$0xff]   ;;  %v19422_v57 = vld [vmem:[#allocation17 + $0xe0] ss:$16 sps:$4 sm:$0xff]  }
 0x668   : > { %7823 = vmatprep.subr.bf16.mxu0 %v19376_v48  ;;  %v19430_v48 = vld [vmem:[#allocation17 + $0xc4] ss:$16 sps:$4 sm:$0xff]  }
 0x66b   : > { %7824 = vmatpush1.bf16.msra.mxu0 %v19374_v52  ;;  %v19442_v52 = vld [vmem:[#allocation17 + $0x84] ss:$16 sps:$4 sm:$0xff]  }
 0x66c   : > { %7825 = vmatprep.subr.bf16.mxu0 %v19379_v21  ;;  %v19440_v21 = vld [vmem:[#allocation17 + $0x80] ss:$16 sps:$4 sm:$0xff]  }
 0x66f   : > { %7826 = vmatpush1.bf16.msra.mxu0 %v19377_v32  ;;  %v19448_v32 = vld [vmem:[#allocation17 + $0x64] ss:$16 sps:$4 sm:$0xff]  }
 0x670   : > { %7827 = vmatprep.subr.bf16.mxu0 %v19382_v29  ;;  %v19446_v29 = vld [vmem:[#allocation17 + $0x60] ss:$16 sps:$4 sm:$0xff]  }
 0x673   : > { %7828 = vmatpush1.bf16.msra.mxu0 %v19380_v39  ;;  %v19454_v39 = vld [vmem:[#allocation17 + $0x44] ss:$16 sps:$4 sm:$0xff]  }
 0x674   : > { %7829 = vmatprep.subr.bf16.mxu0 %v19385_v47  ;;  %v19460_v47 = vld [vmem:[#allocation17 + $0x24] ss:$16 sps:$4 sm:$0xff]  }
 0x677   : > { %7830 = vmatpush1.bf16.msra.mxu0 %v19383_v35  ;;  %v19458_v35 = vld [vmem:[#allocation17 + $0x20] ss:$16 sps:$4 sm:$0xff]  }
 0x678   : > { %7831 = vmatprep.subr.bf16.mxu0 %v19388_v60  ;;  %v19466_v60 = vld [vmem:[#allocation17 + $0x4] ss:$16 sps:$4 sm:$0xff]  }
 0x67b   : > { %7832 = vmatpush1.bf16.msra.mxu0 %v19386_v33  ;;  %v19464_v33 = vld [vmem:[#allocation17] ss:$16 sps:$4 sm:$0xff]  }
 0x67c   : > { %7833 = vmatprep.subr.bf16.mxu0 %v19391_v9  ;;  %v19472_v9 = vld [vmem:[#allocation17 + $0x1e4] ss:$16 sps:$4 sm:$0xff]  }
 0x67f   : > { %7834 = vmatpush1.bf16.msra.mxu0 %v19389_v56 }
 0x680   : > { %7835 = vmatprep.subr.bf16.mxu0 %v19394_v40  ;;  %v19470_v40 = vld [vmem:[#allocation17 + $0x1e0] ss:$16 sps:$4 sm:$0xff]  }
 0x683   : > { %v23150_v2 = vpop.f32.mrf.mxu0  ;;  %7836 = vmatpush1.bf16.msra.mxu0 %v19392_v30  ;;  %v19478_v30 = vld [vmem:[#allocation17 + $0x1c4] ss:$16 sps:$4 sm:$0xff]  }
 0x684   : > { %7837 = vmatprep.subr.bf16.mxu0 %v19397_v19 }
 0x685   : > { %v23152_v61 = vpop.f32.mrf.mxu0 }
 0x687   : > { %v23154_v31 = vpop.f32.mrf.mxu0  ;;  %7838 = vmatpush2.bf16.msra.mxu0 %v19395_v42 }
 0x688   : > { %7839 = vmatprep.subr.bf16.mxu0 %v19400_v17 }
 0x689   : > { %v23156_v27 = vpop.f32.mrf.mxu0  ;;  %v23158_v23 = vpop.f32.mrf.mxu1 }
 0x68a   : > { %v6636_v42 = vadd.f32 %v23158_v23, %v23150_v2  ;;  %v19482_v2 = vld [vmem:[#allocation17 + $0x1a0] ss:$16 sps:$4 sm:$0xff]  }
 0x68b   : > { %v23160_v58 = vpop.f32.mrf.mxu0  ;;  %7840 = vmatpush2.bf16.msra.mxu0 %v19398_v24  ;;  %v23162_v15 = vpop.f32.mrf.mxu1  ;;  %v19476_v24 = vld [vmem:[#allocation17 + $0x1c0] ss:$16 sps:$4 sm:$0xff]  }
 0x68c   : > { %7841 = vmatprep.subr.bf16.mxu0 %v19403_v18  ;;  %v6638_v18 = vadd.f32 %v23162_v15, %v23152_v61  ;;  %v19490_v61 = vld [vmem:[#allocation17 + $0x184] ss:$16 sps:$4 sm:$0xff]  }
 0x68d   : > { %v23164_v16 = vpop.f32.mrf.mxu0  ;;  %v23166_v50 = vpop.f32.mrf.mxu1 }
 0x68f   : > { %v6598_v37 = vpop.f32.mrf.mxu0  ;;  %7842 = vmatpush2.bf16.msra.mxu0 %v19401_v10  ;;  %v23168_v13 = vpop.f32.mrf.mxu1 }
 0x690   : > { %7843 = vmatprep.subr.bf16.mxu0 %v19406_v12  ;;  %v19484_v12 = vld [vmem:[#allocation17 + $0x1a4] ss:$16 sps:$4 sm:$0xff]   ;;  %v6642_v23 = vadd.f32 %v23168_v13, %v23156_v27 }
 0x691   : > { %v6599_v38 = vpop.f32.mrf.mxu0  ;;  %v23170_v55 = vpop.f32.mrf.mxu1  ;;  %v19496_v13 = vld [vmem:[#allocation17 + $0x164] ss:$16 sps:$4 sm:$0xff]  }
 0x693   : > { %7844 = vmatpush2.bf16.msra.mxu0 %v19404_v20  ;;  %v23172_v7 = vpop.f32.mrf.mxu1 }
 0x694   : > { %7845 = vmatprep.subr.bf16.mxu0 %v19409_v4  ;;  %v6640_v4 = vadd.f32 %v23166_v50, %v23154_v31 }
 0x695   : > { %v6649_v26 = vpop.f32.mrf.mxu1 }
 0x697   : > { %7846 = vmatpush2.bf16.msra.mxu0 %v19407_v11  ;;  %v6650_v8 = vpop.f32.mrf.mxu1 }
 0x698   : > { %7847 = vmatprep.subr.bf16.mxu0 %v19412_v54 }
 0x69b   : > { %7848 = vmatpush2.bf16.msra.mxu0 %v19410_v34 }
 0x69c   : > { %7849 = vmatprep.subr.bf16.mxu0 %v19415_v59 }
 0x69f   : > { %7850 = vmatpush2.bf16.msra.mxu0 %v19413_v28  ;;  %v6646_v28 = vadd.f32 %v23170_v55, %v23160_v58 }
 0x6a0   : > { %7851 = vmatprep.subr.bf16.mxu0 %v19418_v45 }
 0x6a3   : > { %7852 = vmatpush2.bf16.msra.mxu0 %v19416_v46 }
 0x6a4   : > { %8547 = vmatprep.subr.bf16.mxu0 %v19424_v1  ;;  %v19488_v1 = vld [vmem:[#allocation17 + $0x180] ss:$16 sps:$4 sm:$0xff]  }
 0x6a6   : > { %7854 = vmatmul.mubr.bf16.vlgmr.msra.gmra.mxu0 %v23141_v44  ;;  %v19452_v44 = vld [vmem:[#allocation17 + $0x40] ss:$16 sps:$4 sm:$0xff]  }
 0x6a7   : > { %8548 = vmatpush1.bf16.msra.mxu0 %v19422_v57  ;;  %8579 = vmatprep.mubr.bf16.mxu0 %v23125_v14  ;;  %v6648_v57 = vadd.f32 %v23172_v7, %v23164_v16  ;;  %v19502_v7 = vld [vmem:[#allocation17 + $0x144] ss:$16 sps:$4 sm:$0xff]  }
 0x6a8   : > { %8549 = vmatprep.subr.bf16.mxu0 %v19430_v48 }
 0x6ab   : > { %8550 = vmatpush1.bf16.msra.mxu0 %v19428_v41 }
 0x6ac   : > { %8551 = vmatprep.subr.bf16.mxu0 %v19436_v43 }
 0x6af   : > { %8552 = vmatpush1.bf16.msra.mxu0 %v19434_v22 }
 0x6b0   : > { %8553 = vmatprep.subr.bf16.mxu0 %v19442_v52 }
 0x6b3   : > { %8554 = vmatpush1.bf16.msra.mxu0 %v19440_v21 }
 0x6b4   : > { %8555 = vmatprep.subr.bf16.mxu0 %v19448_v32  ;;  %v19494_v32 = vld [vmem:[#allocation17 + $0x160] ss:$16 sps:$4 sm:$0xff]  }
 0x6b7   : > { %8556 = vmatpush1.bf16.msra.mxu0 %v19446_v29 }
 0x6b8   : > { %8557 = vmatprep.subr.bf16.mxu0 %v19454_v39 }
 0x6bb   : > { %8558 = vmatpush1.bf16.msra.mxu0 %v19452_v44 }
 0x6bc   : > { %8559 = vmatprep.subr.bf16.mxu0 %v19460_v47 }
 0x6bf   : > { %8560 = vmatpush1.bf16.msra.mxu0 %v19458_v35 }
 0x6c0   : > { %8561 = vmatprep.subr.bf16.mxu0 %v19466_v60 }
 0x6c3   : > { %v6686_v56 = vpop.f32.mrf.mxu0  ;;  %8562 = vmatpush1.bf16.msra.mxu0 %v19464_v33 }
 0x6c4   : > { %8563 = vmatprep.subr.bf16.mxu0 %v19472_v9  ;;  %v6687_v10 = vadd.f32 %v6686_v56, %v6636_v42  ;;  %v19500_v9 = vld [vmem:[#allocation17 + $0x140] ss:$16 sps:$4 sm:$0xff]  }
 0x6c5   : > { %v6688_v19 = vpop.f32.mrf.mxu0 }
 0x6c6   : > { %v6689_v38 = vadd.f32 %v6688_v19, %v6638_v18  ;;  %v19508_v19 = vld [vmem:[#allocation17 + $0x124] ss:$16 sps:$4 sm:$0xff]  }
 0x6c7   : > { %v6690_v17 = vpop.f32.mrf.mxu0  ;;  %8564 = vmatpush2.bf16.msra.mxu0 %v19470_v40 }
 0x6c8   : > { %8565 = vmatprep.subr.bf16.mxu0 %v19478_v30  ;;  %v6691_v8 = vadd.f32 %v6690_v17, %v6640_v4 }
 0x6c9   : > { %v6692_v37 = vpop.f32.mrf.mxu0  ;;  %v6737_v20 = vpop.f32.mrf.mxu1 }
 0x6ca   : > { %v6738_v11 = vadd.f32 %v6737_v20, %v6687_v10  ;;  %v6693_v45 = vadd.f32 %v6692_v37, %v6642_v23  ;;  %v19514_v10 = vld [vmem:[#allocation17 + $0x104] ss:$16 sps:$4 sm:$0xff]   ;;  %v19520_v23 = vld [vmem:[#allocation17 + $0xec] ss:$16 sps:$4 sm:$0xff]  }
 0x6cb   : > { %v6696_v54 = vpop.f32.mrf.mxu0  ;;  %8566 = vmatpush2.bf16.msra.mxu0 %v19476_v24  ;;  %v6739_v26 = vpop.f32.mrf.mxu1  ;;  %v19506_v24 = vld [vmem:[#allocation17 + $0x120] ss:$16 sps:$4 sm:$0xff]  }
 0x6cc   : > { %v6740_v34 = vadd.f32 %v6739_v26, %v6689_v38  ;;  %8567 = vmatprep.subr.bf16.mxu0 %v19484_v12  ;;  %v6697_v48 = vadd.f32 %v6696_v54, %v6646_v28  ;;  %v19512_v54 = vld [vmem:[#allocation17 + $0x100] ss:$16 sps:$4 sm:$0xff]  }
 0x6cd   : > { %v6698_v15 = vpop.f32.mrf.mxu0  ;;  %v6741_v59 = vpop.f32.mrf.mxu1 }
 0x6ce   : > { %v6742_v31 = vadd.f32 %v6741_v59, %v6691_v8  ;;  %v6699_v52 = vadd.f32 %v6698_v15, %v6648_v57 }
 0x6cf   : > { %v6700_v50 = vpop.f32.mrf.mxu0  ;;  %8568 = vmatpush2.bf16.msra.mxu0 %v19482_v2  ;;  %v6743_v46 = vpop.f32.mrf.mxu1 }
 0x6d0   : > { %v6744_v27 = vadd.f32 %v6743_v46, %v6693_v45  ;;  %8569 = vmatprep.subr.bf16.mxu0 %v19490_v61  ;;  %v23188_v41 = vpack.c.bf16 %v6742_v31, %v6738_v11  ;;  %v19515_v45 = vld [vmem:[#allocation17 + $0x6e8] ss:$16 sps:$4 sm:$0xff]  }
 0x6d1   : > { %v6701_v43 = vpop.f32.mrf.mxu0  ;;  %v6747_v22 = vpop.f32.mrf.mxu1  ;;  %v19518_v31 = vld [vmem:[#allocation17 + $0xe8] ss:$16 sps:$4 sm:$0xff]  }
 0x6d2   : > { %v6748_v21 = vadd.f32 %v6747_v22, %v6697_v48  ;;  %v23190_v58 = vpack.c.bf16 %v6744_v27, %v6740_v34  ;;  %v7068_v29 = vshrl.u32 %v23188_v41, 16  ;;  %v7070_v39 = vshll.u32 %v23188_v41, 16  ;;  %v19523_v27 = vld [vmem:[#allocation17 + $0x6cc] ss:$16 sps:$4 sm:$0xff]  }
 0x6d3   : > { %8570 = vmatpush2.bf16.msra.mxu0 %v19488_v1  ;;  %v6749_v55 = vpop.f32.mrf.mxu1 }
 0x6d4   : > { %6764 = vst [vmem:[#allocation3 + $0x10] sm:$0xf] %v6748_v21  ;;  %v6750_v16 = vadd.f32 %v6749_v55, %v6699_v52  ;;  %8571 = vmatprep.subr.bf16.mxu0 %v19496_v13  ;;  %v7080_v44 = vshrl.u32 %v23190_v58, 16  ;;  %v7082_v47 = vshll.u32 %v23190_v58, 16  ;;  %v9839_v40 = vrot.slane %v7068_v29, 1 }
 0x6d5   : > { %v6751_v35 = vpop.f32.mrf.mxu1  ;;  %v9840_v30 = vrot.slane %v7070_v39, 2  ;;  %v7072_v26 = vrot.slane %v7070_v39, 1  ;;  %v19526_v13 = vld [vmem:[#allocation17 + $0xcc] ss:$16 sps:$4 sm:$0xff]   ;;  %v19521_v52 = vld [vmem:[#allocation17 + $0x6c8] ss:$16 sps:$4 sm:$0xff]  }
 0x6d6   : > { %6765 = vst [vmem:[#allocation3 + $0x40] sm:$0xf] %v6750_v16  ;;  %v9848_v60 = vrot.slane %v7080_v44, 1  ;;  %v9849_v56 = vrot.slane %v7082_v47, 2  ;;  %v7084_v4 = vrot.slane %v7082_v47, 1 }
 0x6d7   : > { %8572 = vmatpush2.bf16.msra.mxu0 %v19494_v32  ;;  %v6752_v33 = vpop.f32.mrf.mxu1  ;;  %v9841_v17 = vor.u32 %v9840_v30, %v9839_v40  ;;  %v7073_v50 = vor.u32 %v7072_v26, %v7068_v29  ;;  %v19524_v21 = vld [vmem:[#allocation17 + $0xc8] ss:$16 sps:$4 sm:$0xff]   ;;  %v19529_v29 = vld [vmem:[#allocation17 + $0x6ac] ss:$16 sps:$4 sm:$0xff]  }
 0x6d8   : > { %8573 = vmatprep.subr.bf16.mxu0 %v19502_v7  ;;  %v9850_v42 = vor.u32 %v9849_v56, %v9848_v60  ;;  %v7085_v61 = vor.u32 %v7084_v4, %v7080_v44  ;;  %v19532_v39 = vld [vmem:[#allocation17 + $0xac] ss:$16 sps:$4 sm:$0xff]   ;;  %v19527_v16 = vld [vmem:[#allocation17 + $0x6a8] ss:$16 sps:$4 sm:$0xff]  }
 0x6d9   : > { %v19530_v7 = vld [vmem:[#allocation17 + $0xa8] ss:$16 sps:$4 sm:$0xff]   ;;  %v19535_v44 = vld [vmem:[#allocation17 + $0x68c] ss:$16 sps:$4 sm:$0xff]  }
 0x6da   : > { %v19538_v47 = vld [vmem:[#allocation17 + $0x8c] ss:$16 sps:$4 sm:$0xff]   ;;  %v19533_v35 = vld [vmem:[#allocation17 + $0x688] ss:$16 sps:$4 sm:$0xff]  }
 0x6db   : > { %8574 = vmatpush2.bf16.msra.mxu0 %v19500_v9  ;;  %v6776_v18 = vld [vmem:[#allocation3 + $0x10] sm:$0xf]  ;;  %v19541_v33 = vld [vmem:[#allocation17 + $0x66c] ss:$16 sps:$4 sm:$0xff]  }
 0x6dc   : > { %8575 = vmatprep.subr.bf16.mxu0 %v19508_v19  ;;  %v23196_v12 = vpack.c.bf16 %v6776_v18, %v6776_v18  ;;  %v19536_v60 = vld [vmem:[#allocation17 + $0x88] ss:$16 sps:$4 sm:$0xff]   ;;  %v19544_v9 = vld [vmem:[#allocation17 + $0x6c] ss:$16 sps:$4 sm:$0xff]  }
 0x6dd   : > { %v6777_v37 = vld [vmem:[#allocation3 + $0x40] sm:$0xf]  ;;  %v19547_v30 = vld [vmem:[#allocation17 + $0x64c] ss:$16 sps:$4 sm:$0xff]  }
 0x6de   : > { %v23198_v20 = vpack.c.bf16 %v6777_v37, %v6777_v37  ;;  %v7075_v38 = vshll.u32 %v23196_v12, 16  ;;  %v9842_v11 = vshrl.u32 %v23196_v12, 16  ;;  %v19539_v56 = vld [vmem:[#allocation17 + $0x668] ss:$16 sps:$4 sm:$0xff]   ;;  %v19550_v19 = vld [vmem:[#allocation17 + $0x4c] ss:$16 sps:$4 sm:$0xff]  }
 0x6df   : > { %8576 = vmatpush2.bf16.msra.mxu0 %v19506_v24  ;;  %v19542_v40 = vld [vmem:[#allocation17 + $0x68] ss:$16 sps:$4 sm:$0xff]   ;;  %v19553_v24 = vld [vmem:[#allocation17 + $0x62c] ss:$16 sps:$4 sm:$0xff]  }
 0x6e0   : > { %8577 = vmatprep.subr.bf16.mxu0 %v19514_v10  ;;  %v7087_v2 = vshll.u32 %v23198_v20, 16  ;;  %v7077_v8 = vrot.slane %v7075_v38, 1  ;;  %v9851_v34 = vshrl.u32 %v23198_v20, 16  ;;  %v9844_v28 = vrot.slane %v9842_v11, 1  ;;  %v19556_v18 = vld [vmem:[#allocation17 + $0x2c] ss:$16 sps:$4 sm:$0xff]  }
 0x6e1   : > { %v9845_v1 = vrot.slane %v7075_v38, 2  ;;  %v19551_v10 = vld [vmem:[#allocation17 + $0x628] ss:$16 sps:$4 sm:$0xff]   ;;  %v19559_v4 = vld [vmem:[#allocation17 + $0x60c] ss:$16 sps:$4 sm:$0xff]  }
 0x6e2   : > { %v7089_v15 = vrot.slane %v7087_v2, 1  ;;  %v9854_v59 = vrot.slane %v7087_v2, 2  ;;  %v9853_v46 = vrot.slane %v9851_v34, 1  ;;  %v23206_v48 = vsel %vm1098_vm3, %v7073_v50, %v7077_v8  ;;  %v19554_v37 = vld [vmem:[#allocation17 + $0x28] ss:$16 sps:$4 sm:$0xff]  }
 0x6e3   : > { %8578 = vmatpush2.bf16.msra.mxu0 %v19512_v54  ;;  %v9846_v22 = vor.u32 %v9845_v1, %v9844_v28  ;;  %v19562_v38 = vld [vmem:[#allocation17 + $0xc] ss:$16 sps:$4 sm:$0xff]   ;;  %v19557_v11 = vld [vmem:[#allocation17 + $0x608] ss:$16 sps:$4 sm:$0xff]  }
 0x6e4   : > { %v7090_v57 = vsel %vm1098_vm3, %v7085_v61, %v7089_v15  ;;  %8633 = vmatprep.subr.bf16.mxu0 %v19520_v23  ;;  %v9855_v43 = vor.u32 %v9854_v59, %v9853_v46  ;;  %v19560_v54 = vld [vmem:[#allocation17 + $0x8] ss:$16 sps:$4 sm:$0xff]   ;;  %v19565_v26 = vld [vmem:[#allocation17 + $0x7ec] ss:$16 sps:$4 sm:$0xff]  }
 0x6e5   : > { %7810 = vmatprep.mubr.bf16.mxu1 %v7090_v57  ;;  %v23214_v32 = vsel %vm2890_vm4, %v9841_v17, %v9846_v22  ;;  %v19548_v17 = vld [vmem:[#allocation17 + $0x48] ss:$16 sps:$4 sm:$0xff]   ;;  %v19568_v2 = vld [vmem:[#allocation17 + $0x1ec] ss:$16 sps:$4 sm:$0xff]  }
 0x6e6   : > { %8580 = vmatmul.mubr.bf16.vlgmr.msra.gmra.mxu0 %v23123_v5  ;;  %7811 = vmatmul.mubr.bf16.vlgmr.msra.gmra.mxu1 %v23206_v48  ;;  %v23211_v55 = vsel %vm2890_vm4, %v9850_v42, %v9855_v43  ;;  %v19545_v42 = vld [vmem:[#allocation17 + $0x648] ss:$16 sps:$4 sm:$0xff]   ;;  %v19571_v34 = vld [vmem:[#allocation17 + $0x7cc] ss:$16 sps:$4 sm:$0xff]  }
 0x6e7   : > { %7865 = vmatpush1.bf16.msra.mxu1 %v19515_v45  ;;  %8634 = vmatpush1.bf16.msra.mxu0 %v19518_v31  ;;  %v19563_v23 = vld [vmem:[#allocation17 + $0x7e8] ss:$16 sps:$4 sm:$0xff]   ;;  %v19574_v61 = vld [vmem:[#allocation17 + $0x1cc] ss:$16 sps:$4 sm:$0xff]  }
 0x6e8   : > { %8665 = vmatprep.mubr.bf16.mxu0 %v23125_v14  ;;  %7896 = vmatprep.mubr.bf16.mxu1 %v7090_v57  ;;  %v19566_v8 = vld [vmem:[#allocation17 + $0x1e8] ss:$16 sps:$4 sm:$0xff]   ;;  %v19577_v28 = vld [vmem:[#allocation17 + $0x7ac] ss:$16 sps:$4 sm:$0xff]  }
 0x6e9   : > { %7866 = vmatprep.subr.bf16.mxu1 %v19523_v27  ;;  %8635 = vmatprep.subr.bf16.mxu0 %v19526_v13  ;;  %v19569_v15 = vld [vmem:[#allocation17 + $0x7c8] ss:$16 sps:$4 sm:$0xff]   ;;  %v19580_v45 = vld [vmem:[#allocation17 + $0x1ac] ss:$16 sps:$4 sm:$0xff]  }
 0x6ea   : > { %v19572_v59 = vld [vmem:[#allocation17 + $0x1c8] ss:$16 sps:$4 sm:$0xff]   ;;  %v19583_v46 = vld [vmem:[#allocation17 + $0x78c] ss:$16 sps:$4 sm:$0xff]  }
 0x6eb   : > { %7867 = vmatpush1.bf16.msra.mxu1 %v19521_v52  ;;  %8636 = vmatpush1.bf16.msra.mxu0 %v19524_v21  ;;  %v19575_v31 = vld [vmem:[#allocation17 + $0x7a8] ss:$16 sps:$4 sm:$0xff]   ;;  %v19586_v1 = vld [vmem:[#allocation17 + $0x18c] ss:$16 sps:$4 sm:$0xff]  }
 0x6ec   : > { %7868 = vmatprep.subr.bf16.mxu1 %v19529_v29  ;;  %8637 = vmatprep.subr.bf16.mxu0 %v19532_v39  ;;  %v19578_v50 = vld [vmem:[#allocation17 + $0x1a8] ss:$16 sps:$4 sm:$0xff]   ;;  %v19589_v13 = vld [vmem:[#allocation17 + $0x76c] ss:$16 sps:$4 sm:$0xff]  }
 0x6ed   : > { %v19581_v57 = vld [vmem:[#allocation17 + $0x788] ss:$16 sps:$4 sm:$0xff]   ;;  %v19592_v43 = vld [vmem:[#allocation17 + $0x16c] ss:$16 sps:$4 sm:$0xff]  }
 0x6ee   : > { %v19584_v27 = vld [vmem:[#allocation17 + $0x188] ss:$16 sps:$4 sm:$0xff]   ;;  %v19595_v21 = vld [vmem:[#allocation17 + $0x74c] ss:$16 sps:$4 sm:$0xff]  }
 0x6ef   : > { %7869 = vmatpush1.bf16.msra.mxu1 %v19527_v16  ;;  %8638 = vmatpush1.bf16.msra.mxu0 %v19530_v7  ;;  %v19587_v22 = vld [vmem:[#allocation17 + $0x768] ss:$16 sps:$4 sm:$0xff]   ;;  %v19598_v29 = vld [vmem:[#allocation17 + $0x14c] ss:$16 sps:$4 sm:$0xff]  }
 0x6f0   : > { %7870 = vmatprep.subr.bf16.mxu1 %v19535_v44  ;;  %8639 = vmatprep.subr.bf16.mxu0 %v19538_v47  ;;  %v19590_v52 = vld [vmem:[#allocation17 + $0x168] ss:$16 sps:$4 sm:$0xff]   ;;  %v19601_v7 = vld [vmem:[#allocation17 + $0x72c] ss:$16 sps:$4 sm:$0xff]  }
 0x6f1   : > { %v19593_v39 = vld [vmem:[#allocation17 + $0x748] ss:$16 sps:$4 sm:$0xff]   ;;  %v19604_v44 = vld [vmem:[#allocation17 + $0x12c] ss:$16 sps:$4 sm:$0xff]  }
 0x6f2   : > { %v19596_v16 = vld [vmem:[#allocation17 + $0x148] ss:$16 sps:$4 sm:$0xff]  }
 0x6f3   : > { %7871 = vmatpush1.bf16.msra.mxu1 %v19533_v35  ;;  %8640 = vmatpush1.bf16.msra.mxu0 %v19536_v60  ;;  %v19599_v47 = vld [vmem:[#allocation17 + $0x728] ss:$16 sps:$4 sm:$0xff]   ;;  %v19607_v60 = vld [vmem:[#allocation17 + $0x70c] ss:$16 sps:$4 sm:$0xff]  }
 0x6f4   : > { %7872 = vmatprep.subr.bf16.mxu1 %v19541_v33  ;;  %8641 = vmatprep.subr.bf16.mxu0 %v19544_v9  ;;  %v19602_v35 = vld [vmem:[#allocation17 + $0x128] ss:$16 sps:$4 sm:$0xff]   ;;  %v19610_v33 = vld [vmem:[#allocation17 + $0x10c] ss:$16 sps:$4 sm:$0xff]  }
 0x6f5   : > { %v19605_v9 = vld [vmem:[#allocation17 + $0x708] ss:$16 sps:$4 sm:$0xff]  }
 0x6f7   : > { %7873 = vmatpush1.bf16.msra.mxu1 %v19539_v56  ;;  %8642 = vmatpush1.bf16.msra.mxu0 %v19542_v40  ;;  %v19608_v56 = vld [vmem:[#allocation17 + $0x108] ss:$16 sps:$4 sm:$0xff]   ;;  %v19613_v40 = vld [vmem:[#allocation17 + $0x2e4] ss:$16 sps:$4 sm:$0xff]  }
 0x6f8   : > { %7874 = vmatprep.subr.bf16.mxu1 %v19547_v30  ;;  %8643 = vmatprep.subr.bf16.mxu0 %v19550_v19  ;;  %v19616_v30 = vld [vmem:[#allocation17 + $0x8e4] ss:$16 sps:$4 sm:$0xff]   ;;  %v19611_v19 = vld [vmem:[#allocation17 + $0x2e0] ss:$16 sps:$4 sm:$0xff]  }
 0x6fb   : > { %7875 = vmatpush1.bf16.msra.mxu1 %v19545_v42  ;;  %8644 = vmatpush1.bf16.msra.mxu0 %v19548_v17  ;;  %v8860_v42 = vrot.slane %v23133_v36, 1  ;;  %v19614_v17 = vld [vmem:[#allocation17 + $0x8e0] ss:$16 sps:$4 sm:$0xff]  }
 0x6fc   : > { %7876 = vmatprep.subr.bf16.mxu1 %v19553_v24  ;;  %8645 = vmatprep.subr.bf16.mxu0 %v19556_v18  ;;  %v8859_v24 = vrot.slane %v23125_v14, 1  ;;  %v19619_v18 = vld [vmem:[#allocation17 + $0x2c4] ss:$16 sps:$4 sm:$0xff]  }
 0x6ff   : > { %7877 = vmatpush1.bf16.msra.mxu1 %v19551_v10  ;;  %8646 = vmatpush1.bf16.msra.mxu0 %v19554_v37  ;;  %v19622_v10 = vld [vmem:[#allocation17 + $0x8c4] ss:$16 sps:$4 sm:$0xff]   ;;  %v23223_v37 = vsel %vm2253_vm5, %v8859_v24, %v8860_v42  ;;  %v19677_v42 = vld [vmem:[#allocation17 + $0x380] ss:$16 sps:$4 sm:$0xff]  }
 0x700   : > { %7878 = vmatprep.subr.bf16.mxu1 %v19559_v4  ;;  %8647 = vmatprep.subr.bf16.mxu0 %v19562_v38  ;;  %v19617_v4 = vld [vmem:[#allocation17 + $0x2c0] ss:$16 sps:$4 sm:$0xff]   ;;  %v19685_v24 = vld [vmem:[#allocation17 + $0x364] ss:$16 sps:$4 sm:$0xff]  }
 0x701   : > { %v19620_v38 = vld [vmem:[#allocation17 + $0x8c0] ss:$16 sps:$4 sm:$0xff]  }
 0x703   : > { %7879 = vmatpush1.bf16.msra.mxu1 %v19557_v11  ;;  %8648 = vmatpush1.bf16.msra.mxu0 %v19560_v54  ;;  %v19625_v11 = vld [vmem:[#allocation17 + $0x2a4] ss:$16 sps:$4 sm:$0xff]  }
 0x704   : > { %7880 = vmatprep.subr.bf16.mxu1 %v19565_v26  ;;  %8649 = vmatprep.subr.bf16.mxu0 %v19568_v2  ;;  %v19628_v54 = vld [vmem:[#allocation17 + $0x8a4] ss:$16 sps:$4 sm:$0xff]   ;;  %v19623_v26 = vld [vmem:[#allocation17 + $0x2a0] ss:$16 sps:$4 sm:$0xff]  }
 0x705   : > { %v19631_v2 = vld [vmem:[#allocation17 + $0x284] ss:$16 sps:$4 sm:$0xff]  }
 0x707   : > { %7881 = vmatpush2.bf16.msra.mxu1 %v19563_v23  ;;  %8650 = vmatpush2.bf16.msra.mxu0 %v19566_v8  ;;  %v19634_v23 = vld [vmem:[#allocation17 + $0x884] ss:$16 sps:$4 sm:$0xff]   ;;  %v19629_v8 = vld [vmem:[#allocation17 + $0x280] ss:$16 sps:$4 sm:$0xff]  }
 0x708   : > { %7882 = vmatprep.subr.bf16.mxu1 %v19571_v34  ;;  %8651 = vmatprep.subr.bf16.mxu0 %v19574_v61  ;;  %v19632_v34 = vld [vmem:[#allocation17 + $0x880] ss:$16 sps:$4 sm:$0xff]   ;;  %v19637_v61 = vld [vmem:[#allocation17 + $0x264] ss:$16 sps:$4 sm:$0xff]  }
 0x70b   : > { %7883 = vmatpush2.bf16.msra.mxu1 %v19569_v15  ;;  %8652 = vmatpush2.bf16.msra.mxu0 %v19572_v59  ;;  %v19640_v15 = vld [vmem:[#allocation17 + $0x864] ss:$16 sps:$4 sm:$0xff]   ;;  %v19635_v59 = vld [vmem:[#allocation17 + $0x260] ss:$16 sps:$4 sm:$0xff]  }
 0x70c   : > { %7884 = vmatprep.subr.bf16.mxu1 %v19577_v28  ;;  %8653 = vmatprep.subr.bf16.mxu0 %v19580_v45  ;;  %v19638_v28 = vld [vmem:[#allocation17 + $0x860] ss:$16 sps:$4 sm:$0xff]   ;;  %v19643_v45 = vld [vmem:[#allocation17 + $0x244] ss:$16 sps:$4 sm:$0xff]  }
 0x70f   : > { %7885 = vmatpush2.bf16.msra.mxu1 %v19575_v31  ;;  %8654 = vmatpush2.bf16.msra.mxu0 %v19578_v50  ;;  %v19646_v31 = vld [vmem:[#allocation17 + $0x844] ss:$16 sps:$4 sm:$0xff]   ;;  %v19641_v50 = vld [vmem:[#allocation17 + $0x240] ss:$16 sps:$4 sm:$0xff]  }
 0x710   : > { %7886 = vmatprep.subr.bf16.mxu1 %v19583_v46  ;;  %8655 = vmatprep.subr.bf16.mxu0 %v19586_v1  ;;  %v19644_v46 = vld [vmem:[#allocation17 + $0x840] ss:$16 sps:$4 sm:$0xff]   ;;  %v19649_v1 = vld [vmem:[#allocation17 + $0x224] ss:$16 sps:$4 sm:$0xff]  }
 0x713   : > { %7887 = vmatpush2.bf16.msra.mxu1 %v19581_v57  ;;  %8656 = vmatpush2.bf16.msra.mxu0 %v19584_v27  ;;  %v19652_v57 = vld [vmem:[#allocation17 + $0x824] ss:$16 sps:$4 sm:$0xff]   ;;  %v19647_v27 = vld [vmem:[#allocation17 + $0x220] ss:$16 sps:$4 sm:$0xff]  }
 0x714   : > { %7888 = vmatprep.subr.bf16.mxu1 %v19589_v13  ;;  %8657 = vmatprep.subr.bf16.mxu0 %v19592_v43  ;;  %v19650_v13 = vld [vmem:[#allocation17 + $0x820] ss:$16 sps:$4 sm:$0xff]   ;;  %v19655_v43 = vld [vmem:[#allocation17 + $0x204] ss:$16 sps:$4 sm:$0xff]  }
 0x717   : > { %7889 = vmatpush2.bf16.msra.mxu1 %v19587_v22  ;;  %8658 = vmatpush2.bf16.msra.mxu0 %v19590_v52  ;;  %v19658_v22 = vld [vmem:[#allocation17 + $0x804] ss:$16 sps:$4 sm:$0xff]   ;;  %v19653_v52 = vld [vmem:[#allocation17 + $0x200] ss:$16 sps:$4 sm:$0xff]  }
 0x718   : > { %7890 = vmatprep.subr.bf16.mxu1 %v19595_v21  ;;  %8659 = vmatprep.subr.bf16.mxu0 %v19598_v29  ;;  %v19656_v21 = vld [vmem:[#allocation17 + $0x800] ss:$16 sps:$4 sm:$0xff]   ;;  %v19661_v29 = vld [vmem:[#allocation17 + $0x3e4] ss:$16 sps:$4 sm:$0xff]  }
 0x71b   : > { %7891 = vmatpush2.bf16.msra.mxu1 %v19593_v39  ;;  %8660 = vmatpush2.bf16.msra.mxu0 %v19596_v16  ;;  %v19664_v39 = vld [vmem:[#allocation17 + $0x9e4] ss:$16 sps:$4 sm:$0xff]   ;;  %v19659_v16 = vld [vmem:[#allocation17 + $0x3e0] ss:$16 sps:$4 sm:$0xff]  }
 0x71c   : > { %7892 = vmatprep.subr.bf16.mxu1 %v19601_v7  ;;  %8661 = vmatprep.subr.bf16.mxu0 %v19604_v44  ;;  %v19662_v7 = vld [vmem:[#allocation17 + $0x9e0] ss:$16 sps:$4 sm:$0xff]   ;;  %v19667_v44 = vld [vmem:[#allocation17 + $0x3c4] ss:$16 sps:$4 sm:$0xff]  }
 0x71f   : > { %7893 = vmatpush2.bf16.msra.mxu1 %v19599_v47  ;;  %8662 = vmatpush2.bf16.msra.mxu0 %v19602_v35  ;;  %v19670_v47 = vld [vmem:[#allocation17 + $0x9c4] ss:$16 sps:$4 sm:$0xff]   ;;  %v19665_v35 = vld [vmem:[#allocation17 + $0x3c0] ss:$16 sps:$4 sm:$0xff]  }
 0x720   : > { %7894 = vmatprep.subr.bf16.mxu1 %v19607_v60  ;;  %8663 = vmatprep.subr.bf16.mxu0 %v19610_v33  ;;  %v19668_v60 = vld [vmem:[#allocation17 + $0x9c0] ss:$16 sps:$4 sm:$0xff]   ;;  %v19673_v33 = vld [vmem:[#allocation17 + $0x3a4] ss:$16 sps:$4 sm:$0xff]  }
 0x723   : > { %7895 = vmatpush2.bf16.msra.mxu1 %v19605_v9  ;;  %8664 = vmatpush2.bf16.msra.mxu0 %v19608_v56  ;;  %v19676_v9 = vld [vmem:[#allocation17 + $0x9a4] ss:$16 sps:$4 sm:$0xff]   ;;  %v19671_v56 = vld [vmem:[#allocation17 + $0x3a0] ss:$16 sps:$4 sm:$0xff]  }
 0x724   : > { %8590 = vmatprep.subr.bf16.mxu1 %v19613_v40  ;;  %9512 = vmatprep.subr.bf16.mxu0 %v19616_v30  ;;  %v19674_v40 = vld [vmem:[#allocation17 + $0x9a0] ss:$16 sps:$4 sm:$0xff]   ;;  %v19679_v30 = vld [vmem:[#allocation17 + $0x384] ss:$16 sps:$4 sm:$0xff]  }
 0x726   : > { %7897 = vmatmul.mubr.bf16.vlgmr.msra.gmra.mxu1 %v23206_v48  ;;  %8666 = vmatmul.mubr.bf16.vlgmr.msra.gmra.mxu0 %v23123_v5  ;;  %v19626_v48 = vld [vmem:[#allocation17 + $0x8a0] ss:$16 sps:$4 sm:$0xff]  }
 0x727   : > { %8591 = vmatpush1.bf16.msra.mxu1 %v19611_v19  ;;  %8622 = vmatprep.mubr.bf16.mxu1 %v23190_v58  ;;  %v19682_v19 = vld [vmem:[#allocation17 + $0x984] ss:$16 sps:$4 sm:$0xff]  }
 0x728   : > { %9513 = vmatpush1.bf16.msra.mxu0 %v19614_v17  ;;  %9544 = vmatprep.mubr.bf16.mxu0 %v23223_v37  ;;  %v19680_v17 = vld [vmem:[#allocation17 + $0x980] ss:$16 sps:$4 sm:$0xff]  }
 0x729   : > { %8592 = vmatprep.subr.bf16.mxu1 %v19619_v18  ;;  %9514 = vmatprep.subr.bf16.mxu0 %v19622_v10  ;;  %v19688_v18 = vld [vmem:[#allocation17 + $0x964] ss:$16 sps:$4 sm:$0xff]   ;;  %v19683_v10 = vld [vmem:[#allocation17 + $0x360] ss:$16 sps:$4 sm:$0xff]  }
 0x72b   : > { %8593 = vmatpush1.bf16.msra.mxu1 %v19617_v4  ;;  %v19686_v4 = vld [vmem:[#allocation17 + $0x960] ss:$16 sps:$4 sm:$0xff]  }
 0x72c   : > { %9515 = vmatpush1.bf16.msra.mxu0 %v19620_v38  ;;  %8594 = vmatprep.subr.bf16.mxu1 %v19625_v11  ;;  %v19691_v38 = vld [vmem:[#allocation17 + $0x344] ss:$16 sps:$4 sm:$0xff]  }
 0x72d   : > { %9516 = vmatprep.subr.bf16.mxu0 %v19628_v54  ;;  %v19694_v11 = vld [vmem:[#allocation17 + $0x944] ss:$16 sps:$4 sm:$0xff]   ;;  %v19689_v54 = vld [vmem:[#allocation17 + $0x340] ss:$16 sps:$4 sm:$0xff]  }
 0x72f   : > { %8595 = vmatpush1.bf16.msra.mxu1 %v19623_v26  ;;  %v19692_v26 = vld [vmem:[#allocation17 + $0x940] ss:$16 sps:$4 sm:$0xff]  }
 0x730   : > { %9517 = vmatpush1.bf16.msra.mxu0 %v19626_v48  ;;  %8596 = vmatprep.subr.bf16.mxu1 %v19631_v2  ;;  %v19697_v48 = vld [vmem:[#allocation17 + $0x324] ss:$16 sps:$4 sm:$0xff]  }
 0x731   : > { %9518 = vmatprep.subr.bf16.mxu0 %v19634_v23  ;;  %v19700_v2 = vld [vmem:[#allocation17 + $0x924] ss:$16 sps:$4 sm:$0xff]   ;;  %v19695_v23 = vld [vmem:[#allocation17 + $0x320] ss:$16 sps:$4 sm:$0xff]  }
 0x733   : > { %8597 = vmatpush1.bf16.msra.mxu1 %v19629_v8  ;;  %v19698_v8 = vld [vmem:[#allocation17 + $0x920] ss:$16 sps:$4 sm:$0xff]  }
 0x734   : > { %9519 = vmatpush1.bf16.msra.mxu0 %v19632_v34  ;;  %8598 = vmatprep.subr.bf16.mxu1 %v19637_v61  ;;  %v19703_v34 = vld [vmem:[#allocation17 + $0x304] ss:$16 sps:$4 sm:$0xff]  }
 0x735   : > { %9520 = vmatprep.subr.bf16.mxu0 %v19640_v15  ;;  %v19706_v61 = vld [vmem:[#allocation17 + $0x904] ss:$16 sps:$4 sm:$0xff]   ;;  %v19701_v15 = vld [vmem:[#allocation17 + $0x300] ss:$16 sps:$4 sm:$0xff]  }
 0x737   : > { %8599 = vmatpush1.bf16.msra.mxu1 %v19635_v59  ;;  %v19704_v59 = vld [vmem:[#allocation17 + $0x900] ss:$16 sps:$4 sm:$0xff]  }
 0x738   : > { %9521 = vmatpush1.bf16.msra.mxu0 %v19638_v28  ;;  %8600 = vmatprep.subr.bf16.mxu1 %v19643_v45  ;;  %v19709_v28 = vld [vmem:[#allocation17 + $0x2ec] ss:$16 sps:$4 sm:$0xff]  }
 0x739   : > { %9522 = vmatprep.subr.bf16.mxu0 %v19646_v31  ;;  %v19712_v45 = vld [vmem:[#allocation17 + $0x8ec] ss:$16 sps:$4 sm:$0xff]   ;;  %v8857_v31 = vrot.slane %v23131_v3, 1 }
 0x73b   : > { %8601 = vmatpush1.bf16.msra.mxu1 %v19641_v50  ;;  %v19707_v50 = vld [vmem:[#allocation17 + $0x2e8] ss:$16 sps:$4 sm:$0xff]  }
 0x73c   : > { %9523 = vmatpush1.bf16.msra.mxu0 %v19644_v46  ;;  %8602 = vmatprep.subr.bf16.mxu1 %v19649_v1  ;;  %v8856_v46 = vrot.slane %v23123_v5, 1  ;;  %v19710_v1 = vld [vmem:[#allocation17 + $0x8e8] ss:$16 sps:$4 sm:$0xff]  }
 0x73d   : > { %9524 = vmatprep.subr.bf16.mxu0 %v19652_v57  ;;  %v19715_v57 = vld [vmem:[#allocation17 + $0x2cc] ss:$16 sps:$4 sm:$0xff]  }
 0x73f   : > { %8603 = vmatpush1.bf16.msra.mxu1 %v19647_v27  ;;  %v23230_v27 = vsel %vm2253_vm5, %v8856_v46, %v8857_v31  ;;  %v19778_v31 = vld [vmem:[#allocation17 + $0x98c] ss:$16 sps:$4 sm:$0xff]   ;;  %v19776_v46 = vld [vmem:[#allocation17 + $0x988] ss:$16 sps:$4 sm:$0xff]  }
 0x740   : > { %9525 = vmatpush1.bf16.msra.mxu0 %v19650_v13  ;;  %8604 = vmatprep.subr.bf16.mxu1 %v19655_v43  ;;  %v19718_v13 = vld [vmem:[#allocation17 + $0x8cc] ss:$16 sps:$4 sm:$0xff]   ;;  %v19713_v43 = vld [vmem:[#allocation17 + $0x2c8] ss:$16 sps:$4 sm:$0xff]  }
 0x741   : > { %9526 = vmatprep.subr.bf16.mxu0 %v19658_v22  ;;  %v19716_v22 = vld [vmem:[#allocation17 + $0x8c8] ss:$16 sps:$4 sm:$0xff]  }
 0x743   : > { %8605 = vmatpush1.bf16.msra.mxu1 %v19653_v52  ;;  %v19721_v52 = vld [vmem:[#allocation17 + $0x2ac] ss:$16 sps:$4 sm:$0xff]  }
 0x744   : > { %9527 = vmatpush1.bf16.msra.mxu0 %v19656_v21  ;;  %8606 = vmatprep.subr.bf16.mxu1 %v19661_v29  ;;  %v19724_v21 = vld [vmem:[#allocation17 + $0x8ac] ss:$16 sps:$4 sm:$0xff]   ;;  %v19719_v29 = vld [vmem:[#allocation17 + $0x2a8] ss:$16 sps:$4 sm:$0xff]  }
 0x745   : > { %9528 = vmatprep.subr.bf16.mxu0 %v19664_v39  ;;  %v19722_v39 = vld [vmem:[#allocation17 + $0x8a8] ss:$16 sps:$4 sm:$0xff]  }
 0x747   : > { %8607 = vmatpush2.bf16.msra.mxu1 %v19659_v16  ;;  %v19727_v16 = vld [vmem:[#allocation17 + $0x28c] ss:$16 sps:$4 sm:$0xff]  }
 0x748   : > { %9529 = vmatpush2.bf16.msra.mxu0 %v19662_v7  ;;  %8608 = vmatprep.subr.bf16.mxu1 %v19667_v44  ;;  %v19730_v7 = vld [vmem:[#allocation17 + $0x88c] ss:$16 sps:$4 sm:$0xff]   ;;  %v19725_v44 = vld [vmem:[#allocation17 + $0x288] ss:$16 sps:$4 sm:$0xff]  }
 0x749   : > { %9530 = vmatprep.subr.bf16.mxu0 %v19670_v47  ;;  %v19728_v47 = vld [vmem:[#allocation17 + $0x888] ss:$16 sps:$4 sm:$0xff]  }
 0x74b   : > { %8609 = vmatpush2.bf16.msra.mxu1 %v19665_v35  ;;  %v19733_v35 = vld [vmem:[#allocation17 + $0x26c] ss:$16 sps:$4 sm:$0xff]  }
 0x74c   : > { %9531 = vmatpush2.bf16.msra.mxu0 %v19668_v60  ;;  %8610 = vmatprep.subr.bf16.mxu1 %v19673_v33  ;;  %v19736_v60 = vld [vmem:[#allocation17 + $0x86c] ss:$16 sps:$4 sm:$0xff]   ;;  %v19734_v33 = vld [vmem:[#allocation17 + $0x868] ss:$16 sps:$4 sm:$0xff]  }
 0x74d   : > { %9532 = vmatprep.subr.bf16.mxu0 %v19676_v9  ;;  %v19739_v9 = vld [vmem:[#allocation17 + $0x24c] ss:$16 sps:$4 sm:$0xff]  }
 0x74f   : > { %8611 = vmatpush2.bf16.msra.mxu1 %v19671_v56  ;;  %v19742_v56 = vld [vmem:[#allocation17 + $0x84c] ss:$16 sps:$4 sm:$0xff]  }
 0x750   : > { %9533 = vmatpush2.bf16.msra.mxu0 %v19674_v40  ;;  %8612 = vmatprep.subr.bf16.mxu1 %v19679_v30  ;;  %v19737_v40 = vld [vmem:[#allocation17 + $0x248] ss:$16 sps:$4 sm:$0xff]  }
 0x751   : > { %9534 = vmatprep.subr.bf16.mxu0 %v19682_v19  ;;  %v19740_v30 = vld [vmem:[#allocation17 + $0x848] ss:$16 sps:$4 sm:$0xff]   ;;  %v19745_v19 = vld [vmem:[#allocation17 + $0x22c] ss:$16 sps:$4 sm:$0xff]  }
 0x753   : > { %8613 = vmatpush2.bf16.msra.mxu1 %v19677_v42  ;;  %v19748_v42 = vld [vmem:[#allocation17 + $0x82c] ss:$16 sps:$4 sm:$0xff]  }
 0x754   : > { %9535 = vmatpush2.bf16.msra.mxu0 %v19680_v17  ;;  %8614 = vmatprep.subr.bf16.mxu1 %v19685_v24  ;;  %v19743_v17 = vld [vmem:[#allocation17 + $0x228] ss:$16 sps:$4 sm:$0xff]  }
 0x755   : > { %9536 = vmatprep.subr.bf16.mxu0 %v19688_v18  ;;  %v19746_v24 = vld [vmem:[#allocation17 + $0x828] ss:$16 sps:$4 sm:$0xff]   ;;  %v19751_v18 = vld [vmem:[#allocation17 + $0x20c] ss:$16 sps:$4 sm:$0xff]  }
 0x757   : > { %8615 = vmatpush2.bf16.msra.mxu1 %v19683_v10  ;;  %v19754_v10 = vld [vmem:[#allocation17 + $0x80c] ss:$16 sps:$4 sm:$0xff]  }
 0x758   : > { %9537 = vmatpush2.bf16.msra.mxu0 %v19686_v4  ;;  %8616 = vmatprep.subr.bf16.mxu1 %v19691_v38  ;;  %v19749_v4 = vld [vmem:[#allocation17 + $0x208] ss:$16 sps:$4 sm:$0xff]  }
 0x759   : > { %9538 = vmatprep.subr.bf16.mxu0 %v19694_v11  ;;  %v19752_v38 = vld [vmem:[#allocation17 + $0x808] ss:$16 sps:$4 sm:$0xff]   ;;  %v19757_v11 = vld [vmem:[#allocation17 + $0x3ec] ss:$16 sps:$4 sm:$0xff]  }
 0x75b   : > { %8617 = vmatpush2.bf16.msra.mxu1 %v19689_v54  ;;  %v19760_v54 = vld [vmem:[#allocation17 + $0x9ec] ss:$16 sps:$4 sm:$0xff]  }
 0x75c   : > { %9539 = vmatpush2.bf16.msra.mxu0 %v19692_v26  ;;  %8618 = vmatprep.subr.bf16.mxu1 %v19697_v48  ;;  %v19755_v26 = vld [vmem:[#allocation17 + $0x3e8] ss:$16 sps:$4 sm:$0xff]  }
 0x75d   : > { %9540 = vmatprep.subr.bf16.mxu0 %v19700_v2  ;;  %v19758_v48 = vld [vmem:[#allocation17 + $0x9e8] ss:$16 sps:$4 sm:$0xff]   ;;  %v19763_v2 = vld [vmem:[#allocation17 + $0x3cc] ss:$16 sps:$4 sm:$0xff]  }
 0x75f   : > { %8619 = vmatpush2.bf16.msra.mxu1 %v19695_v23  ;;  %v19766_v23 = vld [vmem:[#allocation17 + $0x9cc] ss:$16 sps:$4 sm:$0xff]  }
 0x760   : > { %9541 = vmatpush2.bf16.msra.mxu0 %v19698_v8  ;;  %8620 = vmatprep.subr.bf16.mxu1 %v19703_v34  ;;  %v19761_v8 = vld [vmem:[#allocation17 + $0x3c8] ss:$16 sps:$4 sm:$0xff]  }
 0x761   : > { %9542 = vmatprep.subr.bf16.mxu0 %v19706_v61  ;;  %v19764_v34 = vld [vmem:[#allocation17 + $0x9c8] ss:$16 sps:$4 sm:$0xff]   ;;  %v19769_v61 = vld [vmem:[#allocation17 + $0x3ac] ss:$16 sps:$4 sm:$0xff]  }
 0x763   : > { %8621 = vmatpush2.bf16.msra.mxu1 %v19701_v15  ;;  %v19772_v15 = vld [vmem:[#allocation17 + $0x9ac] ss:$16 sps:$4 sm:$0xff]  }
 0x764   : > { %9543 = vmatpush2.bf16.msra.mxu0 %v19704_v59  ;;  %8676 = vmatprep.subr.bf16.mxu1 %v19709_v28  ;;  %v19767_v59 = vld [vmem:[#allocation17 + $0x3a8] ss:$16 sps:$4 sm:$0xff]  }
 0x765   : > { %9598 = vmatprep.subr.bf16.mxu0 %v19712_v45  ;;  %v19770_v28 = vld [vmem:[#allocation17 + $0x9a8] ss:$16 sps:$4 sm:$0xff]   ;;  %v19775_v45 = vld [vmem:[#allocation17 + $0x38c] ss:$16 sps:$4 sm:$0xff]  }
 0x766   : > { %8623 = vmatmul.mubr.bf16.vlgmr.msra.gmra.mxu1 %v23188_v41 }
 0x767   : > { %9545 = vmatmul.mubr.bf16.vlgmr.msra.gmra.mxu0 %v23230_v27  ;;  %8677 = vmatpush1.bf16.msra.mxu1 %v19707_v50  ;;  %v19773_v50 = vld [vmem:[#allocation17 + $0x388] ss:$16 sps:$4 sm:$0xff]  }
 0x768   : > { %8708 = vmatprep.mubr.bf16.mxu1 %v23190_v58  ;;  %9599 = vmatpush1.bf16.msra.mxu0 %v19710_v1  ;;  %v19781_v1 = vld [vmem:[#allocation17 + $0x36c] ss:$16 sps:$4 sm:$0xff]  }
 0x769   : > { %9630 = vmatprep.mubr.bf16.mxu0 %v23223_v37  ;;  %8678 = vmatprep.subr.bf16.mxu1 %v19715_v57  ;;  %v19731_v37 = vld [vmem:[#allocation17 + $0x268] ss:$16 sps:$4 sm:$0xff]   ;;  %v19784_v57 = vld [vmem:[#allocation17 + $0x96c] ss:$16 sps:$4 sm:$0xff]  }
 0x76a   : > { %9600 = vmatprep.subr.bf16.mxu0 %v19718_v13  ;;  %v19779_v13 = vld [vmem:[#allocation17 + $0x368] ss:$16 sps:$4 sm:$0xff]  }
 0x76b   : > { %8679 = vmatpush1.bf16.msra.mxu1 %v19713_v43  ;;  %v19782_v43 = vld [vmem:[#allocation17 + $0x968] ss:$16 sps:$4 sm:$0xff]  }
 0x76c   : > { %9601 = vmatpush1.bf16.msra.mxu0 %v19716_v22  ;;  %8680 = vmatprep.subr.bf16.mxu1 %v19721_v52  ;;  %v19787_v22 = vld [vmem:[#allocation17 + $0x34c] ss:$16 sps:$4 sm:$0xff]  }
 0x76d   : > { %9602 = vmatprep.subr.bf16.mxu0 %v19724_v21  ;;  %v19790_v52 = vld [vmem:[#allocation17 + $0x94c] ss:$16 sps:$4 sm:$0xff]   ;;  %v19785_v21 = vld [vmem:[#allocation17 + $0x348] ss:$16 sps:$4 sm:$0xff]  }
 0x76f   : > { %8681 = vmatpush1.bf16.msra.mxu1 %v19719_v29  ;;  %v19788_v29 = vld [vmem:[#allocation17 + $0x948] ss:$16 sps:$4 sm:$0xff]  }
 0x770   : > { %9603 = vmatpush1.bf16.msra.mxu0 %v19722_v39  ;;  %8682 = vmatprep.subr.bf16.mxu1 %v19727_v16  ;;  %v19793_v39 = vld [vmem:[#allocation17 + $0x32c] ss:$16 sps:$4 sm:$0xff]  }
 0x771   : > { %9604 = vmatprep.subr.bf16.mxu0 %v19730_v7  ;;  %v19796_v16 = vld [vmem:[#allocation17 + $0x92c] ss:$16 sps:$4 sm:$0xff]   ;;  %v19791_v7 = vld [vmem:[#allocation17 + $0x328] ss:$16 sps:$4 sm:$0xff]  }
 0x773   : > { %8683 = vmatpush1.bf16.msra.mxu1 %v19725_v44  ;;  %v19794_v44 = vld [vmem:[#allocation17 + $0x928] ss:$16 sps:$4 sm:$0xff]  }
 0x774   : > { %9605 = vmatpush1.bf16.msra.mxu0 %v19728_v47  ;;  %8684 = vmatprep.subr.bf16.mxu1 %v19733_v35  ;;  %v19799_v47 = vld [vmem:[#allocation17 + $0x30c] ss:$16 sps:$4 sm:$0xff]  }
 0x775   : > { %9606 = vmatprep.subr.bf16.mxu0 %v19736_v60  ;;  %v19802_v35 = vld [vmem:[#allocation17 + $0x90c] ss:$16 sps:$4 sm:$0xff]   ;;  %v19797_v60 = vld [vmem:[#allocation17 + $0x308] ss:$16 sps:$4 sm:$0xff]  }
 0x777   : > { %8685 = vmatpush1.bf16.msra.mxu1 %v19731_v37  ;;  %v19800_v37 = vld [vmem:[#allocation17 + $0x908] ss:$16 sps:$4 sm:$0xff]  }
 0x778   : > { %9607 = vmatpush1.bf16.msra.mxu0 %v19734_v33  ;;  %8686 = vmatprep.subr.bf16.mxu1 %v19739_v9  ;;  %v19805_v33 = vld [vmem:[#allocation17 + $0xae4] ss:$16 sps:$4 sm:$0xff]  }
 0x779   : > { %9608 = vmatprep.subr.bf16.mxu0 %v19742_v56  ;;  %v19808_v9 = vld [vmem:[#allocation17 + $0xce4] ss:$16 sps:$4 sm:$0xff]   ;;  %v19803_v56 = vld [vmem:[#allocation17 + $0xae0] ss:$16 sps:$4 sm:$0xff]  }
 0x77b   : > { %8687 = vmatpush1.bf16.msra.mxu1 %v19737_v40  ;;  %v8866_v40 = vrot.slane %v23198_v20, 1 }
 0x77c   : > { %9609 = vmatpush1.bf16.msra.mxu0 %v19740_v30  ;;  %8688 = vmatprep.subr.bf16.mxu1 %v19745_v19  ;;  %v19806_v30 = vld [vmem:[#allocation17 + $0xce0] ss:$16 sps:$4 sm:$0xff]   ;;  %v8865_v19 = vrot.slane %v23190_v58, 1 }
 0x77d   : > { %9610 = vmatprep.subr.bf16.mxu0 %v19748_v42  ;;  %v19811_v42 = vld [vmem:[#allocation17 + $0xac4] ss:$16 sps:$4 sm:$0xff]  }
 0x77f   : > { %8689 = vmatpush1.bf16.msra.mxu1 %v19743_v17  ;;  %v19814_v17 = vld [vmem:[#allocation17 + $0xcc4] ss:$16 sps:$4 sm:$0xff]  }
 0x780   : > { %9611 = vmatpush1.bf16.msra.mxu0 %v19746_v24  ;;  %8690 = vmatprep.subr.bf16.mxu1 %v19751_v18  ;;  %v23240_v24 = vsel %vm2253_vm5, %v8865_v19, %v8866_v40  ;;  %v19809_v18 = vld [vmem:[#allocation17 + $0xac0] ss:$16 sps:$4 sm:$0xff]  }
 0x781   : > { %9612 = vmatprep.subr.bf16.mxu0 %v19754_v10  ;;  %v19812_v10 = vld [vmem:[#allocation17 + $0xcc0] ss:$16 sps:$4 sm:$0xff]  }
 0x782   : > { %v19866_v19 = vld [vmem:[#allocation17 + $0xda0] ss:$16 sps:$4 sm:$0xff]  }
 0x783   : > { %8691 = vmatpush1.bf16.msra.mxu1 %v19749_v4  ;;  %v19817_v4 = vld [vmem:[#allocation17 + $0xaa4] ss:$16 sps:$4 sm:$0xff]  }
 0x784   : > { %9613 = vmatpush1.bf16.msra.mxu0 %v19752_v38  ;;  %8692 = vmatprep.subr.bf16.mxu1 %v19757_v11  ;;  %v19820_v38 = vld [vmem:[#allocation17 + $0xca4] ss:$16 sps:$4 sm:$0xff]   ;;  %v19815_v11 = vld [vmem:[#allocation17 + $0xaa0] ss:$16 sps:$4 sm:$0xff]  }
 0x785   : > { %9614 = vmatprep.subr.bf16.mxu0 %v19760_v54  ;;  %v19823_v54 = vld [vmem:[#allocation17 + $0xa84] ss:$16 sps:$4 sm:$0xff]  }
 0x787   : > { %8693 = vmatpush2.bf16.msra.mxu1 %v19755_v26  ;;  %v19826_v26 = vld [vmem:[#allocation17 + $0xc84] ss:$16 sps:$4 sm:$0xff]  }
 0x788   : > { %9615 = vmatpush2.bf16.msra.mxu0 %v19758_v48  ;;  %8694 = vmatprep.subr.bf16.mxu1 %v19763_v2  ;;  %v19821_v48 = vld [vmem:[#allocation17 + $0xa80] ss:$16 sps:$4 sm:$0xff]  }
 0x789   : > { %9616 = vmatprep.subr.bf16.mxu0 %v19766_v23  ;;  %v19824_v2 = vld [vmem:[#allocation17 + $0xc80] ss:$16 sps:$4 sm:$0xff]   ;;  %v19829_v23 = vld [vmem:[#allocation17 + $0xa64] ss:$16 sps:$4 sm:$0xff]  }
 0x78b   : > { %8695 = vmatpush2.bf16.msra.mxu1 %v19761_v8  ;;  %v19832_v8 = vld [vmem:[#allocation17 + $0xc64] ss:$16 sps:$4 sm:$0xff]  }
 0x78c   : > { %9617 = vmatpush2.bf16.msra.mxu0 %v19764_v34  ;;  %8696 = vmatprep.subr.bf16.mxu1 %v19769_v61  ;;  %v19827_v34 = vld [vmem:[#allocation17 + $0xa60] ss:$16 sps:$4 sm:$0xff]  }
 0x78d   : > { %9618 = vmatprep.subr.bf16.mxu0 %v19772_v15  ;;  %v19830_v61 = vld [vmem:[#allocation17 + $0xc60] ss:$16 sps:$4 sm:$0xff]   ;;  %v19835_v15 = vld [vmem:[#allocation17 + $0xa44] ss:$16 sps:$4 sm:$0xff]  }
 0x78f   : > { %8697 = vmatpush2.bf16.msra.mxu1 %v19767_v59  ;;  %v19838_v59 = vld [vmem:[#allocation17 + $0xc44] ss:$16 sps:$4 sm:$0xff]  }
 0x790   : > { %9619 = vmatpush2.bf16.msra.mxu0 %v19770_v28  ;;  %8698 = vmatprep.subr.bf16.mxu1 %v19775_v45  ;;  %v19833_v28 = vld [vmem:[#allocation17 + $0xa40] ss:$16 sps:$4 sm:$0xff]  }
 0x791   : > { %9620 = vmatprep.subr.bf16.mxu0 %v19778_v31  ;;  %v19836_v45 = vld [vmem:[#allocation17 + $0xc40] ss:$16 sps:$4 sm:$0xff]   ;;  %v19841_v31 = vld [vmem:[#allocation17 + $0xa24] ss:$16 sps:$4 sm:$0xff]  }
 0x793   : > { %8699 = vmatpush2.bf16.msra.mxu1 %v19773_v50  ;;  %v19844_v50 = vld [vmem:[#allocation17 + $0xc24] ss:$16 sps:$4 sm:$0xff]  }
 0x794   : > { %9621 = vmatpush2.bf16.msra.mxu0 %v19776_v46  ;;  %8700 = vmatprep.subr.bf16.mxu1 %v19781_v1  ;;  %v19839_v46 = vld [vmem:[#allocation17 + $0xa20] ss:$16 sps:$4 sm:$0xff]   ;;  %v23244_v1 = vpop.f32.mrf.mxu0 }
 0x795   : > { %9622 = vmatprep.subr.bf16.mxu0 %v19784_v57  ;;  %v19842_v57 = vld [vmem:[#allocation17 + $0xc20] ss:$16 sps:$4 sm:$0xff]  }
 0x797   : > { %8701 = vmatpush2.bf16.msra.mxu1 %v19779_v13  ;;  %v19847_v13 = vld [vmem:[#allocation17 + $0xa04] ss:$16 sps:$4 sm:$0xff]  }
 0x798   : > { %9623 = vmatpush2.bf16.msra.mxu0 %v19782_v43  ;;  %8702 = vmatprep.subr.bf16.mxu1 %v19787_v22  ;;  %v19850_v43 = vld [vmem:[#allocation17 + $0xc04] ss:$16 sps:$4 sm:$0xff]   ;;  %v19845_v22 = vld [vmem:[#allocation17 + $0xa00] ss:$16 sps:$4 sm:$0xff]  }
 0x799   : > { %9624 = vmatprep.subr.bf16.mxu0 %v19790_v52  ;;  %v23246_v52 = vpop.f32.mrf.mxu0 }
 0x79b   : > { %8703 = vmatpush2.bf16.msra.mxu1 %v19785_v21  ;;  %v19848_v21 = vld [vmem:[#allocation17 + $0xc00] ss:$16 sps:$4 sm:$0xff]  }
 0x79c   : > { %9625 = vmatpush2.bf16.msra.mxu0 %v19788_v29  ;;  %8704 = vmatprep.subr.bf16.mxu1 %v19793_v39  ;;  %v19853_v29 = vld [vmem:[#allocation17 + $0xbe4] ss:$16 sps:$4 sm:$0xff]  }
 0x79d   : > { %9626 = vmatprep.subr.bf16.mxu0 %v19796_v16  ;;  %v19856_v39 = vld [vmem:[#allocation17 + $0xde4] ss:$16 sps:$4 sm:$0xff]   ;;  %v19851_v16 = vld [vmem:[#allocation17 + $0xbe0] ss:$16 sps:$4 sm:$0xff]  }
 0x79f   : > { %8705 = vmatpush2.bf16.msra.mxu1 %v19791_v7  ;;  %v23248_v7 = vpop.f32.mrf.mxu0 }
 0x7a0   : > { %9627 = vmatpush2.bf16.msra.mxu0 %v19794_v44  ;;  %8706 = vmatprep.subr.bf16.mxu1 %v19799_v47  ;;  %v19854_v44 = vld [vmem:[#allocation17 + $0xde0] ss:$16 sps:$4 sm:$0xff]   ;;  %v19859_v47 = vld [vmem:[#allocation17 + $0xbc4] ss:$16 sps:$4 sm:$0xff]  }
 0x7a1   : > { %9628 = vmatprep.subr.bf16.mxu0 %v19802_v35  ;;  %v19862_v35 = vld [vmem:[#allocation17 + $0xdc4] ss:$16 sps:$4 sm:$0xff]  }
 0x7a3   : > { %8707 = vmatpush2.bf16.msra.mxu1 %v19797_v60  ;;  %v19857_v60 = vld [vmem:[#allocation17 + $0xbc0] ss:$16 sps:$4 sm:$0xff]  }
 0x7a4   : > { %9629 = vmatpush2.bf16.msra.mxu0 %v19800_v37  ;;  %9555 = vmatprep.subr.bf16.mxu1 %v19805_v33  ;;  %v23250_v37 = vpop.f32.mrf.mxu0  ;;  %v19860_v33 = vld [vmem:[#allocation17 + $0xdc0] ss:$16 sps:$4 sm:$0xff]  }
 0x7a5   : > { %10501 = vmatprep.subr.bf16.mxu0 %v19808_v9  ;;  %v19865_v9 = vld [vmem:[#allocation17 + $0xba4] ss:$16 sps:$4 sm:$0xff]  }
 0x7a6   : > { %8709 = vmatmul.mubr.bf16.vlgmr.msra.gmra.mxu1 %v23188_v41  ;;  %v23252_v40 = vpop.f32.mrf.mxu0 }
 0x7a7   : > { %9631 = vmatmul.mubr.bf16.vlgmr.msra.gmra.mxu0 %v23230_v27  ;;  %9556 = vmatpush1.bf16.msra.mxu1 %v19803_v56  ;;  %v19818_v27 = vld [vmem:[#allocation17 + $0xca0] ss:$16 sps:$4 sm:$0xff]   ;;  %v19868_v56 = vld [vmem:[#allocation17 + $0xda4] ss:$16 sps:$4 sm:$0xff]  }
 0x7a8   : > { %9587 = vmatprep.mubr.bf16.mxu1 %v23240_v24  ;;  %10502 = vmatpush1.bf16.msra.mxu0 %v19806_v30  ;;  %v19863_v30 = vld [vmem:[#allocation17 + $0xba0] ss:$16 sps:$4 sm:$0xff]  }
 0x7a9   : > { %10533 = vmatprep.mubr.bf16.mxu0 %v23148_v51  ;;  %9557 = vmatprep.subr.bf16.mxu1 %v19811_v42  ;;  %v19871_v42 = vld [vmem:[#allocation17 + $0xb84] ss:$16 sps:$4 sm:$0xff]  }
 0x7aa   : > { %10503 = vmatprep.subr.bf16.mxu0 %v19814_v17  ;;  %v19874_v17 = vld [vmem:[#allocation17 + $0xd84] ss:$16 sps:$4 sm:$0xff]  }
 0x7ab   : > { %9558 = vmatpush1.bf16.msra.mxu1 %v19809_v18  ;;  %v23254_v18 = vpop.f32.mrf.mxu0 }
 0x7ac   : > { %10504 = vmatpush1.bf16.msra.mxu0 %v19812_v10  ;;  %9559 = vmatprep.subr.bf16.mxu1 %v19817_v4  ;;  %v19869_v10 = vld [vmem:[#allocation17 + $0xb80] ss:$16 sps:$4 sm:$0xff]  }
 0x7ad   : > { %10505 = vmatprep.subr.bf16.mxu0 %v19820_v38  ;;  %v19872_v4 = vld [vmem:[#allocation17 + $0xd80] ss:$16 sps:$4 sm:$0xff]   ;;  %v19877_v38 = vld [vmem:[#allocation17 + $0xb64] ss:$16 sps:$4 sm:$0xff]  }
 0x7af   : > { %9560 = vmatpush1.bf16.msra.mxu1 %v19815_v11  ;;  %v19880_v11 = vld [vmem:[#allocation17 + $0xd64] ss:$16 sps:$4 sm:$0xff]  }
 0x7b0   : > { %10506 = vmatpush1.bf16.msra.mxu0 %v19818_v27  ;;  %9561 = vmatprep.subr.bf16.mxu1 %v19823_v54  ;;  %v23256_v27 = vpop.f32.mrf.mxu0  ;;  %v19875_v54 = vld [vmem:[#allocation17 + $0xb60] ss:$16 sps:$4 sm:$0xff]  }
 0x7b1   : > { %10507 = vmatprep.subr.bf16.mxu0 %v19826_v26  ;;  %v19878_v26 = vld [vmem:[#allocation17 + $0xd60] ss:$16 sps:$4 sm:$0xff]  }
 0x7b3   : > { %9562 = vmatpush1.bf16.msra.mxu1 %v19821_v48  ;;  %v19883_v48 = vld [vmem:[#allocation17 + $0xb44] ss:$16 sps:$4 sm:$0xff]  }
 0x7b4   : > { %10508 = vmatpush1.bf16.msra.mxu0 %v19824_v2  ;;  %9563 = vmatprep.subr.bf16.mxu1 %v19829_v23  ;;  %v19886_v2 = vld [vmem:[#allocation17 + $0xd44] ss:$16 sps:$4 sm:$0xff]   ;;  %v23258_v23 = vpop.f32.mrf.mxu0 }
 0x7b5   : > { %10509 = vmatprep.subr.bf16.mxu0 %v19832_v8  ;;  %v19881_v8 = vld [vmem:[#allocation17 + $0xb40] ss:$16 sps:$4 sm:$0xff]  }
 0x7b7   : > { %9564 = vmatpush1.bf16.msra.mxu1 %v19827_v34  ;;  %v23260_v34 = vpop.f32.mrf.mxu0 }
 0x7b8   : > { %10510 = vmatpush1.bf16.msra.mxu0 %v19830_v61  ;;  %9565 = vmatprep.subr.bf16.mxu1 %v19835_v15  ;;  %v23262_v61 = vpop.f32.mrf.mxu1  ;;  %v19884_v15 = vld [vmem:[#allocation17 + $0xd40] ss:$16 sps:$4 sm:$0xff]  }
 0x7b9   : > { %10511 = vmatprep.subr.bf16.mxu0 %v19838_v59  ;;  %v19889_v59 = vld [vmem:[#allocation17 + $0xb24] ss:$16 sps:$4 sm:$0xff]  }
 0x7bb   : > { %9566 = vmatpush1.bf16.msra.mxu1 %v19833_v28  ;;  %v19892_v28 = vld [vmem:[#allocation17 + $0xd24] ss:$16 sps:$4 sm:$0xff]  }
 0x7bc   : > { %10512 = vmatpush1.bf16.msra.mxu0 %v19836_v45  ;;  %9567 = vmatprep.subr.bf16.mxu1 %v19841_v31  ;;  %v19887_v45 = vld [vmem:[#allocation17 + $0xb20] ss:$16 sps:$4 sm:$0xff]   ;;  %v23264_v31 = vpop.f32.mrf.mxu0 }
 0x7bd   : > { %10513 = vmatprep.subr.bf16.mxu0 %v19844_v50  ;;  %v23266_v50 = vpop.f32.mrf.mxu1 }
 0x7bf   : > { %9568 = vmatpush1.bf16.msra.mxu1 %v19839_v46  ;;  %v19890_v46 = vld [vmem:[#allocation17 + $0xd20] ss:$16 sps:$4 sm:$0xff]  }
 0x7c0   : > { %10514 = vmatpush1.bf16.msra.mxu0 %v19842_v57  ;;  %9569 = vmatprep.subr.bf16.mxu1 %v19847_v13  ;;  %v19895_v57 = vld [vmem:[#allocation17 + $0xb04] ss:$16 sps:$4 sm:$0xff]  }
 0x7c1   : > { %10515 = vmatprep.subr.bf16.mxu0 %v19850_v43  ;;  %v19898_v13 = vld [vmem:[#allocation17 + $0xd04] ss:$16 sps:$4 sm:$0xff]   ;;  %v19893_v43 = vld [vmem:[#allocation17 + $0xb00] ss:$16 sps:$4 sm:$0xff]  }
 0x7c3   : > { %9570 = vmatpush1.bf16.msra.mxu1 %v19845_v22  ;;  %v23268_v22 = vpop.f32.mrf.mxu0 }
 0x7c4   : > { %10516 = vmatpush1.bf16.msra.mxu0 %v19848_v21  ;;  %9571 = vmatprep.subr.bf16.mxu1 %v19853_v29  ;;  %v23270_v21 = vpop.f32.mrf.mxu1  ;;  %v19896_v29 = vld [vmem:[#allocation17 + $0xd00] ss:$16 sps:$4 sm:$0xff]  }
 0x7c5   : > { %10517 = vmatprep.subr.bf16.mxu0 %v19856_v39  ;;  %v19901_v39 = vld [vmem:[#allocation17 + $0xaec] ss:$16 sps:$4 sm:$0xff]  }
 0x7c7   : > { %9572 = vmatpush2.bf16.msra.mxu1 %v19851_v16  ;;  %v8863_v16 = vrot.slane %v23196_v12, 1 }
 0x7c8   : > { %10518 = vmatpush2.bf16.msra.mxu0 %v19854_v44  ;;  %9573 = vmatprep.subr.bf16.mxu1 %v19859_v47  ;;  %v19904_v44 = vld [vmem:[#allocation17 + $0xcec] ss:$16 sps:$4 sm:$0xff]   ;;  %v8862_v47 = vrot.slane %v23188_v41, 1 }
 0x7c9   : > { %10519 = vmatprep.subr.bf16.mxu0 %v19862_v35  ;;  %v19899_v35 = vld [vmem:[#allocation17 + $0xae8] ss:$16 sps:$4 sm:$0xff]  }
 0x7cb   : > { %9574 = vmatpush2.bf16.msra.mxu1 %v19857_v60  ;;  %v23274_v60 = vpop.f32.mrf.mxu0 }
 0x7cc   : > { %10520 = vmatpush2.bf16.msra.mxu0 %v19860_v33  ;;  %9575 = vmatprep.subr.bf16.mxu1 %v19865_v9  ;;  %v23276_v33 = vpop.f32.mrf.mxu1  ;;  %v19902_v9 = vld [vmem:[#allocation17 + $0xce8] ss:$16 sps:$4 sm:$0xff]  }
 0x7cd   : > { %10521 = vmatprep.subr.bf16.mxu0 %v19868_v56  ;;  %v23279_v56 = vsel %vm2253_vm5, %v8862_v47, %v8863_v16  ;;  %v19925_v16 = vld [vmem:[#allocation17 + $0xa6c] ss:$16 sps:$4 sm:$0xff]   ;;  %v19923_v47 = vld [vmem:[#allocation17 + $0xa68] ss:$16 sps:$4 sm:$0xff]  }
 0x7cf   : > { %9576 = vmatpush2.bf16.msra.mxu1 %v19863_v30  ;;  %v19907_v30 = vld [vmem:[#allocation17 + $0xacc] ss:$16 sps:$4 sm:$0xff]  }
 0x7d0   : > { %10522 = vmatpush2.bf16.msra.mxu0 %v19866_v19  ;;  %9577 = vmatprep.subr.bf16.mxu1 %v19871_v42 }
 0x7d1   : > { %10523 = vmatprep.subr.bf16.mxu0 %v19874_v17  ;;  %v19910_v17 = vld [vmem:[#allocation17 + $0xccc] ss:$16 sps:$4 sm:$0xff]  }
 0x7d3   : > { %9578 = vmatpush2.bf16.msra.mxu1 %v19869_v10 }
 0x7d4   : > { %10524 = vmatpush2.bf16.msra.mxu0 %v19872_v4  ;;  %9579 = vmatprep.subr.bf16.mxu1 %v19877_v38  ;;  %v19905_v4 = vld [vmem:[#allocation17 + $0xac8] ss:$16 sps:$4 sm:$0xff]  }
 0x7d5   : > { %10525 = vmatprep.subr.bf16.mxu0 %v19880_v11 }
 0x7d7   : > { %9580 = vmatpush2.bf16.msra.mxu1 %v19875_v54  ;;  %v19908_v54 = vld [vmem:[#allocation17 + $0xcc8] ss:$16 sps:$4 sm:$0xff]  }
 0x7d8   : > { %10526 = vmatpush2.bf16.msra.mxu0 %v19878_v26  ;;  %9581 = vmatprep.subr.bf16.mxu1 %v19883_v48  ;;  %v19913_v26 = vld [vmem:[#allocation17 + $0xaac] ss:$16 sps:$4 sm:$0xff]  }
 0x7d9   : > { %10527 = vmatprep.subr.bf16.mxu0 %v19886_v2 }
 0x7db   : > { %9582 = vmatpush2.bf16.msra.mxu1 %v19881_v8  ;;  %v19916_v8 = vld [vmem:[#allocation17 + $0xcac] ss:$16 sps:$4 sm:$0xff]  }
 0x7dc   : > { %10528 = vmatpush2.bf16.msra.mxu0 %v19884_v15  ;;  %9583 = vmatprep.subr.bf16.mxu1 %v19889_v59 }
 0x7dd   : > { %10529 = vmatprep.subr.bf16.mxu0 %v19892_v28  ;;  %v19911_v28 = vld [vmem:[#allocation17 + $0xaa8] ss:$16 sps:$4 sm:$0xff]  }
 0x7df   : > { %9584 = vmatpush2.bf16.msra.mxu1 %v19887_v45 }
 0x7e0   : > { %10530 = vmatpush2.bf16.msra.mxu0 %v19890_v46  ;;  %9585 = vmatprep.subr.bf16.mxu1 %v19895_v57  ;;  %v19914_v46 = vld [vmem:[#allocation17 + $0xca8] ss:$16 sps:$4 sm:$0xff]   ;;  %v19919_v57 = vld [vmem:[#allocation17 + $0xa8c] ss:$16 sps:$4 sm:$0xff]  }
 0x7e1   : > { %10531 = vmatprep.subr.bf16.mxu0 %v19898_v13 }
 0x7e3   : > { %9586 = vmatpush2.bf16.msra.mxu1 %v19893_v43 }
 0x7e4   : > { %10532 = vmatpush2.bf16.msra.mxu0 %v19896_v29  ;;  %9641 = vmatprep.subr.bf16.mxu1 %v19901_v39  ;;  %v19917_v39 = vld [vmem:[#allocation17 + $0xa88] ss:$16 sps:$4 sm:$0xff]  }
 0x7e5   : > { %10587 = vmatprep.subr.bf16.mxu0 %v19904_v44  ;;  %v19928_v44 = vld [vmem:[#allocation17 + $0xc6c] ss:$16 sps:$4 sm:$0xff]  }
 0x7e6   : > { %v7898_v19 = vpop.f32.mrf.mxu1  ;;  %v8667_v42 = vpop.f32.mrf.mxu0  ;;  %9588 = vmatmul.mubr.bf16.vlgmr.msra.gmra.mxu1 %v23279_v56 }
 0x7e7   : > { %v7899_v10 = vadd.f32 %v7898_v19, %v23252_v40  ;;  %10534 = vmatmul.mubr.bf16.vlgmr.msra.gmra.mxu0 %v23144_v62  ;;  %9642 = vmatpush1.bf16.msra.mxu1 %v19899_v35  ;;  %v19926_v35 = vld [vmem:[#allocation17 + $0xc68] ss:$16 sps:$4 sm:$0xff]  }
 0x7e8   : > { %9673 = vmatprep.mubr.bf16.mxu1 %v23240_v24  ;;  %10588 = vmatpush1.bf16.msra.mxu0 %v19902_v9  ;;  %v7900_v38 = vpop.f32.mrf.mxu1  ;;  %v8669_v11 = vpop.f32.mrf.mxu0  ;;  %v19931_v9 = vld [vmem:[#allocation17 + $0xa4c] ss:$16 sps:$4 sm:$0xff]   ;;  %v19932_v19 = vld [vmem:[#allocation17 + $0xc48] ss:$16 sps:$4 sm:$0xff]  }
 0x7e9   : > { %v23285_v48 = vadd.f32 %v8667_v42, %v7899_v10  ;;  %10619 = vmatprep.mubr.bf16.mxu0 %v23148_v51  ;;  %v7901_v2 = vadd.f32 %v7900_v38, %v23254_v18  ;;  %9643 = vmatprep.subr.bf16.mxu1 %v19907_v30  ;;  %v19922_v18 = vld [vmem:[#allocation17 + $0xc8c] ss:$16 sps:$4 sm:$0xff]   ;;  %v19929_v30 = vld [vmem:[#allocation17 + $0xa48] ss:$16 sps:$4 sm:$0xff]  }
 0x7ea   : > { %v7902_v40 = vpop.f32.mrf.mxu1  ;;  %v8671_v15 = vpop.f32.mrf.mxu0  ;;  %10589 = vmatprep.subr.bf16.mxu0 %v19910_v17  ;;  %v19937_v42 = vld [vmem:[#allocation17 + $0xa2c] ss:$16 sps:$4 sm:$0xff]   ;;  %v19935_v10 = vld [vmem:[#allocation17 + $0xa28] ss:$16 sps:$4 sm:$0xff]  }
 0x7eb   : > { %v23289_v59 = vadd.f32 %v8669_v11, %v7901_v2  ;;  %v7903_v24 = vadd.f32 %v7902_v40, %v23256_v27  ;;  %9644 = vmatpush1.bf16.msra.mxu1 %v19905_v4  ;;  %v19920_v27 = vld [vmem:[#allocation17 + $0xc88] ss:$16 sps:$4 sm:$0xff]   ;;  %v19940_v17 = vld [vmem:[#allocation17 + $0xc2c] ss:$16 sps:$4 sm:$0xff]  }
 0x7ec   : > { %10590 = vmatpush1.bf16.msra.mxu0 %v19908_v54  ;;  %v7904_v45 = vpop.f32.mrf.mxu1  ;;  %9645 = vmatprep.subr.bf16.mxu1 %v19913_v26  ;;  %v8673_v43 = vpop.f32.mrf.mxu0  ;;  %v19938_v4 = vld [vmem:[#allocation17 + $0xc28] ss:$16 sps:$4 sm:$0xff]   ;;  %v19943_v38 = vld [vmem:[#allocation17 + $0xa0c] ss:$16 sps:$4 sm:$0xff]  }
 0x7ed   : > { %v23292_v13 = vadd.f32 %v8671_v15, %v7903_v24  ;;  %v7905_v51 = vadd.f32 %v7904_v45, %v23258_v23  ;;  %10591 = vmatprep.subr.bf16.mxu0 %v19916_v8  ;;  %v19934_v23 = vld [vmem:[#allocation17 + $0xc4c] ss:$16 sps:$4 sm:$0xff]   ;;  %v19941_v54 = vld [vmem:[#allocation17 + $0xa08] ss:$16 sps:$4 sm:$0xff]  }
 0x7ee   : > { %v19946_v11 = vld [vmem:[#allocation17 + $0xc0c] ss:$16 sps:$4 sm:$0xff]   ;;  %v19944_v26 = vld [vmem:[#allocation17 + $0xc08] ss:$16 sps:$4 sm:$0xff]  }
 0x7ef   : > { %v23295_v29 = vadd.f32 %v8673_v43, %v7905_v51  ;;  %9646 = vmatpush1.bf16.msra.mxu1 %v19911_v28  ;;  %v19949_v2 = vld [vmem:[#allocation17 + $0xbec] ss:$16 sps:$4 sm:$0xff]   ;;  %v19947_v40 = vld [vmem:[#allocation17 + $0xbe8] ss:$16 sps:$4 sm:$0xff]  }
 0x7f0   : > { %10592 = vmatpush1.bf16.msra.mxu0 %v19914_v46  ;;  %9647 = vmatprep.subr.bf16.mxu1 %v19919_v57  ;;  %v19952_v8 = vld [vmem:[#allocation17 + $0xdec] ss:$16 sps:$4 sm:$0xff]   ;;  %v19950_v15 = vld [vmem:[#allocation17 + $0xde8] ss:$16 sps:$4 sm:$0xff]  }
 0x7f1   : > { %10593 = vmatprep.subr.bf16.mxu0 %v19922_v18  ;;  %v19955_v24 = vld [vmem:[#allocation17 + $0xbcc] ss:$16 sps:$4 sm:$0xff]   ;;  %v19953_v45 = vld [vmem:[#allocation17 + $0xbc8] ss:$16 sps:$4 sm:$0xff]  }
 0x7f2   : > { %v19958_v28 = vld [vmem:[#allocation17 + $0xdcc] ss:$16 sps:$4 sm:$0xff]   ;;  %v19956_v46 = vld [vmem:[#allocation17 + $0xdc8] ss:$16 sps:$4 sm:$0xff]  }
 0x7f3   : > { %9648 = vmatpush1.bf16.msra.mxu1 %v19917_v39  ;;  %v19961_v57 = vld [vmem:[#allocation17 + $0xbac] ss:$16 sps:$4 sm:$0xff]   ;;  %v19959_v18 = vld [vmem:[#allocation17 + $0xba8] ss:$16 sps:$4 sm:$0xff]  }
 0x7f4   : > { %10594 = vmatpush1.bf16.msra.mxu0 %v19920_v27  ;;  %9649 = vmatprep.subr.bf16.mxu1 %v19925_v16  ;;  %v19964_v51 = vld [vmem:[#allocation17 + $0xdac] ss:$16 sps:$4 sm:$0xff]   ;;  %v19962_v43 = vld [vmem:[#allocation17 + $0xda8] ss:$16 sps:$4 sm:$0xff]  }
 0x7f5   : > { %10595 = vmatprep.subr.bf16.mxu0 %v19928_v44  ;;  %v19967_v39 = vld [vmem:[#allocation17 + $0xb8c] ss:$16 sps:$4 sm:$0xff]   ;;  %v19965_v16 = vld [vmem:[#allocation17 + $0xb88] ss:$16 sps:$4 sm:$0xff]  }
 0x7f6   : > { %v19970_v27 = vld [vmem:[#allocation17 + $0xd8c] ss:$16 sps:$4 sm:$0xff]   ;;  %v19968_v44 = vld [vmem:[#allocation17 + $0xd88] ss:$16 sps:$4 sm:$0xff]  }
 0x7f7   : > { %9650 = vmatpush1.bf16.msra.mxu1 %v19923_v47  ;;  %v19973_v47 = vld [vmem:[#allocation17 + $0xb6c] ss:$16 sps:$4 sm:$0xff]  }
 0x7f8   : > { %10596 = vmatpush1.bf16.msra.mxu0 %v19926_v35  ;;  %9651 = vmatprep.subr.bf16.mxu1 %v19931_v9  ;;  %v19976_v35 = vld [vmem:[#allocation17 + $0xd6c] ss:$16 sps:$4 sm:$0xff]   ;;  %v19971_v9 = vld [vmem:[#allocation17 + $0xb68] ss:$16 sps:$4 sm:$0xff]  }
 0x7f9   : > { %10597 = vmatprep.subr.bf16.mxu0 %v19934_v23  ;;  %v19974_v23 = vld [vmem:[#allocation17 + $0xd68] ss:$16 sps:$4 sm:$0xff]  }
 0x7fb   : > { %9652 = vmatpush1.bf16.msra.mxu1 %v19929_v30  ;;  %v19979_v30 = vld [vmem:[#allocation17 + $0xb4c] ss:$16 sps:$4 sm:$0xff]  }
 0x7fc   : > { %10598 = vmatpush1.bf16.msra.mxu0 %v19932_v19  ;;  %9653 = vmatprep.subr.bf16.mxu1 %v19937_v42  ;;  %v19982_v19 = vld [vmem:[#allocation17 + $0xd4c] ss:$16 sps:$4 sm:$0xff]   ;;  %v19977_v42 = vld [vmem:[#allocation17 + $0xb48] ss:$16 sps:$4 sm:$0xff]  }
 0x7fd   : > { %10599 = vmatprep.subr.bf16.mxu0 %v19940_v17  ;;  %v19980_v17 = vld [vmem:[#allocation17 + $0xd48] ss:$16 sps:$4 sm:$0xff]  }
 0x7ff   : > { %9654 = vmatpush1.bf16.msra.mxu1 %v19935_v10  ;;  %v19985_v10 = vld [vmem:[#allocation17 + $0xb2c] ss:$16 sps:$4 sm:$0xff]  }
 0x800   : > { %10600 = vmatpush1.bf16.msra.mxu0 %v19938_v4  ;;  %9655 = vmatprep.subr.bf16.mxu1 %v19943_v38  ;;  %v19988_v4 = vld [vmem:[#allocation17 + $0xd2c] ss:$16 sps:$4 sm:$0xff]   ;;  %v19983_v38 = vld [vmem:[#allocation17 + $0xb28] ss:$16 sps:$4 sm:$0xff]  }
 0x801   : > { %10601 = vmatprep.subr.bf16.mxu0 %v19946_v11  ;;  %v19986_v11 = vld [vmem:[#allocation17 + $0xd28] ss:$16 sps:$4 sm:$0xff]  }
 0x803   : > { %9656 = vmatpush1.bf16.msra.mxu1 %v19941_v54  ;;  %v19991_v54 = vld [vmem:[#allocation17 + $0xb0c] ss:$16 sps:$4 sm:$0xff]  }
 0x804   : > { %10602 = vmatpush1.bf16.msra.mxu0 %v19944_v26  ;;  %9657 = vmatprep.subr.bf16.mxu1 %v19949_v2  ;;  %v19994_v26 = vld [vmem:[#allocation17 + $0xd0c] ss:$16 sps:$4 sm:$0xff]   ;;  %v19989_v2 = vld [vmem:[#allocation17 + $0xb08] ss:$16 sps:$4 sm:$0xff]  }
 0x805   : > { %10603 = vmatprep.subr.bf16.mxu0 %v19952_v8  ;;  %v19992_v8 = vld [vmem:[#allocation17 + $0xd08] ss:$16 sps:$4 sm:$0xff]  }
 0x807   : > { %9658 = vmatpush2.bf16.msra.mxu1 %v19947_v40  ;;  %v19997_v40 = vld [vmem:[#allocation17 + $0xee4] ss:$16 sps:$4 sm:$0xff]  }
 0x808   : > { %10604 = vmatpush2.bf16.msra.mxu0 %v19950_v15  ;;  %9659 = vmatprep.subr.bf16.mxu1 %v19955_v24  ;;  %v20000_v15 = vld [vmem:[#allocation17 + $0x10e4] ss:$16 sps:$4 sm:$0xff]   ;;  %v19995_v24 = vld [vmem:[#allocation17 + $0xee0] ss:$16 sps:$4 sm:$0xff]  }
 0x809   : > { %10605 = vmatprep.subr.bf16.mxu0 %v19958_v28  ;;  %v19998_v28 = vld [vmem:[#allocation17 + $0x10e0] ss:$16 sps:$4 sm:$0xff]  }
 0x80b   : > { %9660 = vmatpush2.bf16.msra.mxu1 %v19953_v45  ;;  %v10814_v45 = vrot.slane %v23133_v36, 2  ;;  %v20012_v36 = vld [vmem:[#allocation17 + $0x10a4] ss:$16 sps:$4 sm:$0xff]  }
 0x80c   : > { %10606 = vmatpush2.bf16.msra.mxu0 %v19956_v46  ;;  %9661 = vmatprep.subr.bf16.mxu1 %v19961_v57  ;;  %v20003_v46 = vld [vmem:[#allocation17 + $0xec4] ss:$16 sps:$4 sm:$0xff]   ;;  %v10813_v57 = vrot.slane %v23125_v14, 2  ;;  %v20007_v14 = vld [vmem:[#allocation17 + $0xea0] ss:$16 sps:$4 sm:$0xff]  }
 0x80d   : > { %10607 = vmatprep.subr.bf16.mxu0 %v19964_v51  ;;  %v20006_v51 = vld [vmem:[#allocation17 + $0x10c4] ss:$16 sps:$4 sm:$0xff]  }
 0x80f   : > { %9662 = vmatpush2.bf16.msra.mxu1 %v19959_v18  ;;  %v20001_v18 = vld [vmem:[#allocation17 + $0xec0] ss:$16 sps:$4 sm:$0xff]  }
 0x810   : > { %10608 = vmatpush2.bf16.msra.mxu0 %v19962_v43  ;;  %9663 = vmatprep.subr.bf16.mxu1 %v19967_v39  ;;  %v23303_v43 = vsel %vm3535_vm6, %v10813_v57, %v10814_v45  ;;  %v20004_v39 = vld [vmem:[#allocation17 + $0x10c0] ss:$16 sps:$4 sm:$0xff]   ;;  %v20054_v57 = vld [vmem:[#allocation17 + $0x11c4] ss:$16 sps:$4 sm:$0xff]  }
 0x811   : > { %10609 = vmatprep.subr.bf16.mxu0 %v19970_v27  ;;  %v20009_v27 = vld [vmem:[#allocation17 + $0xea4] ss:$16 sps:$4 sm:$0xff]   ;;  %v20046_v45 = vld [vmem:[#allocation17 + $0x11e0] ss:$16 sps:$4 sm:$0xff]  }
 0x813   : > { %9664 = vmatpush2.bf16.msra.mxu1 %v19965_v16  ;;  %v20018_v16 = vld [vmem:[#allocation17 + $0x1084] ss:$16 sps:$4 sm:$0xff]  }
 0x814   : > { %10610 = vmatpush2.bf16.msra.mxu0 %v19968_v44  ;;  %9665 = vmatprep.subr.bf16.mxu1 %v19973_v47  ;;  %v20013_v44 = vld [vmem:[#allocation17 + $0xe80] ss:$16 sps:$4 sm:$0xff]  }
 0x815   : > { %10611 = vmatprep.subr.bf16.mxu0 %v19976_v35  ;;  %v20016_v47 = vld [vmem:[#allocation17 + $0x1080] ss:$16 sps:$4 sm:$0xff]   ;;  %v20021_v35 = vld [vmem:[#allocation17 + $0xe64] ss:$16 sps:$4 sm:$0xff]  }
 0x817   : > { %9666 = vmatpush2.bf16.msra.mxu1 %v19971_v9  ;;  %v20024_v9 = vld [vmem:[#allocation17 + $0x1064] ss:$16 sps:$4 sm:$0xff]  }
 0x818   : > { %10612 = vmatpush2.bf16.msra.mxu0 %v19974_v23  ;;  %9667 = vmatprep.subr.bf16.mxu1 %v19979_v30  ;;  %v20019_v23 = vld [vmem:[#allocation17 + $0xe60] ss:$16 sps:$4 sm:$0xff]  }
 0x819   : > { %10613 = vmatprep.subr.bf16.mxu0 %v19982_v19  ;;  %v20022_v30 = vld [vmem:[#allocation17 + $0x1060] ss:$16 sps:$4 sm:$0xff]   ;;  %v20027_v19 = vld [vmem:[#allocation17 + $0xe44] ss:$16 sps:$4 sm:$0xff]  }
 0x81b   : > { %9668 = vmatpush2.bf16.msra.mxu1 %v19977_v42  ;;  %v20030_v42 = vld [vmem:[#allocation17 + $0x1044] ss:$16 sps:$4 sm:$0xff]  }
 0x81c   : > { %10614 = vmatpush2.bf16.msra.mxu0 %v19980_v17  ;;  %9669 = vmatprep.subr.bf16.mxu1 %v19985_v10  ;;  %v20025_v17 = vld [vmem:[#allocation17 + $0xe40] ss:$16 sps:$4 sm:$0xff]  }
 0x81d   : > { %10615 = vmatprep.subr.bf16.mxu0 %v19988_v4  ;;  %v20028_v10 = vld [vmem:[#allocation17 + $0x1040] ss:$16 sps:$4 sm:$0xff]   ;;  %v20033_v4 = vld [vmem:[#allocation17 + $0xe24] ss:$16 sps:$4 sm:$0xff]  }
 0x81f   : > { %9670 = vmatpush2.bf16.msra.mxu1 %v19983_v38  ;;  %v20036_v38 = vld [vmem:[#allocation17 + $0x1024] ss:$16 sps:$4 sm:$0xff]  }
 0x820   : > { %10616 = vmatpush2.bf16.msra.mxu0 %v19986_v11  ;;  %9671 = vmatprep.subr.bf16.mxu1 %v19991_v54  ;;  %v20031_v11 = vld [vmem:[#allocation17 + $0xe20] ss:$16 sps:$4 sm:$0xff]  }
 0x821   : > { %10617 = vmatprep.subr.bf16.mxu0 %v19994_v26  ;;  %v20034_v54 = vld [vmem:[#allocation17 + $0x1020] ss:$16 sps:$4 sm:$0xff]   ;;  %v20039_v26 = vld [vmem:[#allocation17 + $0xe04] ss:$16 sps:$4 sm:$0xff]  }
 0x823   : > { %9672 = vmatpush2.bf16.msra.mxu1 %v19989_v2  ;;  %v20042_v2 = vld [vmem:[#allocation17 + $0x1004] ss:$16 sps:$4 sm:$0xff]  }
 0x824   : > { %10618 = vmatpush2.bf16.msra.mxu0 %v19992_v8  ;;  %10544 = vmatprep.subr.bf16.mxu1 %v19997_v40  ;;  %v20037_v8 = vld [vmem:[#allocation17 + $0xe00] ss:$16 sps:$4 sm:$0xff]  }
 0x825   : > { %11466 = vmatprep.subr.bf16.mxu0 %v20000_v15  ;;  %v20040_v40 = vld [vmem:[#allocation17 + $0x1000] ss:$16 sps:$4 sm:$0xff]   ;;  %v20045_v15 = vld [vmem:[#allocation17 + $0xfe4] ss:$16 sps:$4 sm:$0xff]  }
 0x826   : > { %9674 = vmatmul.mubr.bf16.vlgmr.msra.gmra.mxu1 %v23279_v56  ;;  %v20015_v56 = vld [vmem:[#allocation17 + $0xe84] ss:$16 sps:$4 sm:$0xff]  }
 0x827   : > { %10620 = vmatmul.mubr.bf16.vlgmr.msra.gmra.mxu0 %v23144_v62  ;;  %10545 = vmatpush1.bf16.msra.mxu1 %v19995_v24  ;;  %v20010_v62 = vld [vmem:[#allocation17 + $0x10a0] ss:$16 sps:$4 sm:$0xff]   ;;  %v20048_v24 = vld [vmem:[#allocation17 + $0x11e4] ss:$16 sps:$4 sm:$0xff]  }
 0x828   : > { %10576 = vmatprep.mubr.bf16.mxu1 %v23211_v55  ;;  %11467 = vmatpush1.bf16.msra.mxu0 %v19998_v28  ;;  %v20043_v28 = vld [vmem:[#allocation17 + $0xfe0] ss:$16 sps:$4 sm:$0xff]  }
 0x829   : > { %11498 = vmatprep.mubr.bf16.mxu0 %v23303_v43  ;;  %10546 = vmatprep.subr.bf16.mxu1 %v20003_v46  ;;  %v20051_v46 = vld [vmem:[#allocation17 + $0xfc4] ss:$16 sps:$4 sm:$0xff]  }
 0x82a   : > { %11468 = vmatprep.subr.bf16.mxu0 %v20006_v51  ;;  %v20049_v51 = vld [vmem:[#allocation17 + $0xfc0] ss:$16 sps:$4 sm:$0xff]  }
 0x82b   : > { %10547 = vmatpush1.bf16.msra.mxu1 %v20001_v18  ;;  %v20052_v18 = vld [vmem:[#allocation17 + $0x11c0] ss:$16 sps:$4 sm:$0xff]  }
 0x82c   : > { %11469 = vmatpush1.bf16.msra.mxu0 %v20004_v39  ;;  %10548 = vmatprep.subr.bf16.mxu1 %v20009_v27  ;;  %v20057_v39 = vld [vmem:[#allocation17 + $0xfa4] ss:$16 sps:$4 sm:$0xff]  }
 0x82d   : > { %11470 = vmatprep.subr.bf16.mxu0 %v20012_v36  ;;  %v20060_v27 = vld [vmem:[#allocation17 + $0x11a4] ss:$16 sps:$4 sm:$0xff]   ;;  %v20055_v36 = vld [vmem:[#allocation17 + $0xfa0] ss:$16 sps:$4 sm:$0xff]  }
 0x82f   : > { %10549 = vmatpush1.bf16.msra.mxu1 %v20007_v14  ;;  %v20058_v14 = vld [vmem:[#allocation17 + $0x11a0] ss:$16 sps:$4 sm:$0xff]  }
 0x830   : > { %11471 = vmatpush1.bf16.msra.mxu0 %v20010_v62  ;;  %10550 = vmatprep.subr.bf16.mxu1 %v20015_v56  ;;  %v20063_v62 = vld [vmem:[#allocation17 + $0xf84] ss:$16 sps:$4 sm:$0xff]  }
 0x831   : > { %11472 = vmatprep.subr.bf16.mxu0 %v20018_v16  ;;  %v20066_v56 = vld [vmem:[#allocation17 + $0x1184] ss:$16 sps:$4 sm:$0xff]   ;;  %v20061_v16 = vld [vmem:[#allocation17 + $0xf80] ss:$16 sps:$4 sm:$0xff]  }
 0x833   : > { %10551 = vmatpush1.bf16.msra.mxu1 %v20013_v44  ;;  %v20064_v44 = vld [vmem:[#allocation17 + $0x1180] ss:$16 sps:$4 sm:$0xff]  }
 0x834   : > { %11473 = vmatpush1.bf16.msra.mxu0 %v20016_v47  ;;  %10552 = vmatprep.subr.bf16.mxu1 %v20021_v35  ;;  %v20069_v47 = vld [vmem:[#allocation17 + $0xf64] ss:$16 sps:$4 sm:$0xff]  }
 0x835   : > { %11474 = vmatprep.subr.bf16.mxu0 %v20024_v9  ;;  %v20072_v35 = vld [vmem:[#allocation17 + $0x1164] ss:$16 sps:$4 sm:$0xff]   ;;  %v20067_v9 = vld [vmem:[#allocation17 + $0xf60] ss:$16 sps:$4 sm:$0xff]  }
 0x837   : > { %10553 = vmatpush1.bf16.msra.mxu1 %v20019_v23  ;;  %v20070_v23 = vld [vmem:[#allocation17 + $0x1160] ss:$16 sps:$4 sm:$0xff]  }
 0x838   : > { %11475 = vmatpush1.bf16.msra.mxu0 %v20022_v30  ;;  %10554 = vmatprep.subr.bf16.mxu1 %v20027_v19  ;;  %v20075_v30 = vld [vmem:[#allocation17 + $0xf44] ss:$16 sps:$4 sm:$0xff]  }
 0x839   : > { %11476 = vmatprep.subr.bf16.mxu0 %v20030_v42  ;;  %v20078_v19 = vld [vmem:[#allocation17 + $0x1144] ss:$16 sps:$4 sm:$0xff]   ;;  %v20073_v42 = vld [vmem:[#allocation17 + $0xf40] ss:$16 sps:$4 sm:$0xff]  }
 0x83b   : > { %10555 = vmatpush1.bf16.msra.mxu1 %v20025_v17  ;;  %v23306_v17 = vpop.f32.mrf.mxu1 }
 0x83c   : > { %11477 = vmatpush1.bf16.msra.mxu0 %v20028_v10  ;;  %10556 = vmatprep.subr.bf16.mxu1 %v20033_v4  ;;  %v20076_v10 = vld [vmem:[#allocation17 + $0x1140] ss:$16 sps:$4 sm:$0xff]   ;;  %v20081_v4 = vld [vmem:[#allocation17 + $0xf24] ss:$16 sps:$4 sm:$0xff]  }
 0x83d   : > { %11478 = vmatprep.subr.bf16.mxu0 %v20036_v38  ;;  %v20084_v38 = vld [vmem:[#allocation17 + $0x1124] ss:$16 sps:$4 sm:$0xff]  }
 0x83f   : > { %10557 = vmatpush1.bf16.msra.mxu1 %v20031_v11  ;;  %v20079_v11 = vld [vmem:[#allocation17 + $0xf20] ss:$16 sps:$4 sm:$0xff]  }
 0x840   : > { %11479 = vmatpush1.bf16.msra.mxu0 %v20034_v54  ;;  %10558 = vmatprep.subr.bf16.mxu1 %v20039_v26  ;;  %v23308_v54 = vpop.f32.mrf.mxu1  ;;  %v20082_v26 = vld [vmem:[#allocation17 + $0x1120] ss:$16 sps:$4 sm:$0xff]  }
 0x841   : > { %11480 = vmatprep.subr.bf16.mxu0 %v20042_v2  ;;  %v20087_v2 = vld [vmem:[#allocation17 + $0xf04] ss:$16 sps:$4 sm:$0xff]  }
 0x843   : > { %10559 = vmatpush1.bf16.msra.mxu1 %v20037_v8  ;;  %v20090_v8 = vld [vmem:[#allocation17 + $0x1104] ss:$16 sps:$4 sm:$0xff]  }
 0x844   : > { %11481 = vmatpush1.bf16.msra.mxu0 %v20040_v40  ;;  %10560 = vmatprep.subr.bf16.mxu1 %v20045_v15  ;;  %v20085_v40 = vld [vmem:[#allocation17 + $0xf00] ss:$16 sps:$4 sm:$0xff]   ;;  %v23310_v15 = vpop.f32.mrf.mxu1 }
 0x845   : > { %11482 = vmatprep.subr.bf16.mxu0 %v20048_v24  ;;  %v20088_v24 = vld [vmem:[#allocation17 + $0x1100] ss:$16 sps:$4 sm:$0xff]  }
 0x847   : > { %10561 = vmatpush2.bf16.msra.mxu1 %v20043_v28  ;;  %v20093_v28 = vld [vmem:[#allocation17 + $0xeec] ss:$16 sps:$4 sm:$0xff]  }
 0x848   : > { %11483 = vmatpush2.bf16.msra.mxu0 %v20046_v45  ;;  %10562 = vmatprep.subr.bf16.mxu1 %v20051_v46  ;;  %v20096_v45 = vld [vmem:[#allocation17 + $0x10ec] ss:$16 sps:$4 sm:$0xff]   ;;  %v10811_v46 = vrot.slane %v23131_v3, 2 }
 0x849   : > { %11484 = vmatprep.subr.bf16.mxu0 %v20054_v57  ;;  %v20091_v57 = vld [vmem:[#allocation17 + $0xee8] ss:$16 sps:$4 sm:$0xff]  }
 0x84b   : > { %10563 = vmatpush2.bf16.msra.mxu1 %v20049_v51  ;;  %v23313_v51 = vpop.f32.mrf.mxu1 }
 0x84c   : > { %11485 = vmatpush2.bf16.msra.mxu0 %v20052_v18  ;;  %10564 = vmatprep.subr.bf16.mxu1 %v20057_v39  ;;  %v10810_v18 = vrot.slane %v23123_v5, 2  ;;  %v20094_v39 = vld [vmem:[#allocation17 + $0x10e8] ss:$16 sps:$4 sm:$0xff]  }
 0x84d   : > { %11486 = vmatprep.subr.bf16.mxu0 %v20060_v27  ;;  %v20099_v27 = vld [vmem:[#allocation17 + $0xecc] ss:$16 sps:$4 sm:$0xff]  }
 0x84f   : > { %10565 = vmatpush2.bf16.msra.mxu1 %v20055_v36 }
 0x850   : > { %11487 = vmatpush2.bf16.msra.mxu0 %v20058_v14  ;;  %10566 = vmatprep.subr.bf16.mxu1 %v20063_v62  ;;  %v23318_v14 = vsel %vm3535_vm6, %v10810_v18, %v10811_v46  ;;  %v20102_v62 = vld [vmem:[#allocation17 + $0x10cc] ss:$16 sps:$4 sm:$0xff]   ;;  %v20133_v18 = vld [vmem:[#allocation17 + $0xe08] ss:$16 sps:$4 sm:$0xff]  }
 0x851   : > { %11488 = vmatprep.subr.bf16.mxu0 %v20066_v56  ;;  %v20097_v56 = vld [vmem:[#allocation17 + $0xec8] ss:$16 sps:$4 sm:$0xff]   ;;  %v20135_v46 = vld [vmem:[#allocation17 + $0xe0c] ss:$16 sps:$4 sm:$0xff]  }
 0x853   : > { %10567 = vmatpush2.bf16.msra.mxu1 %v20061_v16  ;;  %v20100_v16 = vld [vmem:[#allocation17 + $0x10c8] ss:$16 sps:$4 sm:$0xff]  }
 0x854   : > { %11489 = vmatpush2.bf16.msra.mxu0 %v20064_v44  ;;  %10568 = vmatprep.subr.bf16.mxu1 %v20069_v47  ;;  %v20105_v44 = vld [vmem:[#allocation17 + $0xeac] ss:$16 sps:$4 sm:$0xff]  }
 0x855   : > { %11490 = vmatprep.subr.bf16.mxu0 %v20072_v35  ;;  %v20108_v35 = vld [vmem:[#allocation17 + $0x10ac] ss:$16 sps:$4 sm:$0xff]  }
 0x857   : > { %10569 = vmatpush2.bf16.msra.mxu1 %v20067_v9 }
 0x858   : > { %11491 = vmatpush2.bf16.msra.mxu0 %v20070_v23  ;;  %10570 = vmatprep.subr.bf16.mxu1 %v20075_v30  ;;  %v20103_v23 = vld [vmem:[#allocation17 + $0xea8] ss:$16 sps:$4 sm:$0xff]  }
 0x859   : > { %11492 = vmatprep.subr.bf16.mxu0 %v20078_v19  ;;  %v20106_v30 = vld [vmem:[#allocation17 + $0x10a8] ss:$16 sps:$4 sm:$0xff]   ;;  %v20111_v19 = vld [vmem:[#allocation17 + $0xe8c] ss:$16 sps:$4 sm:$0xff]  }
 0x85b   : > { %10571 = vmatpush2.bf16.msra.mxu1 %v20073_v42 }
 0x85c   : > { %11493 = vmatpush2.bf16.msra.mxu0 %v20076_v10  ;;  %10572 = vmatprep.subr.bf16.mxu1 %v20081_v4  ;;  %v20112_v10 = vld [vmem:[#allocation17 + $0x1088] ss:$16 sps:$4 sm:$0xff]   ;;  %v20117_v4 = vld [vmem:[#allocation17 + $0xe6c] ss:$16 sps:$4 sm:$0xff]  }
 0x85d   : > { %11494 = vmatprep.subr.bf16.mxu0 %v20084_v38  ;;  %v20115_v38 = vld [vmem:[#allocation17 + $0xe68] ss:$16 sps:$4 sm:$0xff]  }
 0x85f   : > { %10573 = vmatpush2.bf16.msra.mxu1 %v20079_v11  ;;  %v20118_v11 = vld [vmem:[#allocation17 + $0x1068] ss:$16 sps:$4 sm:$0xff]  }
 0x860   : > { %11495 = vmatpush2.bf16.msra.mxu0 %v20082_v26  ;;  %10574 = vmatprep.subr.bf16.mxu1 %v20087_v2  ;;  %v20123_v26 = vld [vmem:[#allocation17 + $0xe4c] ss:$16 sps:$4 sm:$0xff]  }
 0x861   : > { %11496 = vmatprep.subr.bf16.mxu0 %v20090_v8  ;;  %v20126_v2 = vld [vmem:[#allocation17 + $0x104c] ss:$16 sps:$4 sm:$0xff]   ;;  %v20124_v8 = vld [vmem:[#allocation17 + $0x1048] ss:$16 sps:$4 sm:$0xff]  }
 0x863   : > { %10575 = vmatpush2.bf16.msra.mxu1 %v20085_v40  ;;  %v20129_v40 = vld [vmem:[#allocation17 + $0xe2c] ss:$16 sps:$4 sm:$0xff]  }
 0x864   : > { %11497 = vmatpush2.bf16.msra.mxu0 %v20088_v24  ;;  %10630 = vmatprep.subr.bf16.mxu1 %v20093_v28  ;;  %v20132_v24 = vld [vmem:[#allocation17 + $0x102c] ss:$16 sps:$4 sm:$0xff]   ;;  %v20127_v28 = vld [vmem:[#allocation17 + $0xe28] ss:$16 sps:$4 sm:$0xff]  }
 0x865   : > { %11552 = vmatprep.subr.bf16.mxu0 %v20096_v45  ;;  %v20130_v45 = vld [vmem:[#allocation17 + $0x1028] ss:$16 sps:$4 sm:$0xff]  }
 0x866   : > { %v8710_v36 = vpop.f32.mrf.mxu1  ;;  %10577 = vmatmul.mubr.bf16.vlgmr.msra.gmra.mxu1 %v23214_v32 }
 0x867   : > { %v23321_v3 = vadd.f32 %v8710_v36, %v23285_v48  ;;  %11499 = vmatmul.mubr.bf16.vlgmr.msra.gmra.mxu0 %v23318_v14  ;;  %10631 = vmatpush1.bf16.msra.mxu1 %v20091_v57  ;;  %v20138_v57 = vld [vmem:[#allocation17 + $0x100c] ss:$16 sps:$4 sm:$0xff]  }
 0x868   : > { %10662 = vmatprep.mubr.bf16.mxu1 %v23211_v55  ;;  %11553 = vmatpush1.bf16.msra.mxu0 %v20094_v39  ;;  %v8712_v5 = vpop.f32.mrf.mxu1  ;;  %v20136_v39 = vld [vmem:[#allocation17 + $0x1008] ss:$16 sps:$4 sm:$0xff]   ;;  %v20144_v36 = vld [vmem:[#allocation17 + $0x11ec] ss:$16 sps:$4 sm:$0xff]  }
 0x869   : > { %11584 = vmatprep.mubr.bf16.mxu0 %v23303_v43  ;;  %v23327_v47 = vadd.f32 %v8712_v5, %v23289_v59  ;;  %10632 = vmatprep.subr.bf16.mxu1 %v20099_v27  ;;  %v20114_v59 = vld [vmem:[#allocation17 + $0x108c] ss:$16 sps:$4 sm:$0xff]   ;;  %v20109_v43 = vld [vmem:[#allocation17 + $0xe88] ss:$16 sps:$4 sm:$0xff]  }
 0x86a   : > { %v8714_v9 = vpop.f32.mrf.mxu1  ;;  %11554 = vmatprep.subr.bf16.mxu0 %v20102_v62  ;;  %v20141_v27 = vld [vmem:[#allocation17 + $0xfec] ss:$16 sps:$4 sm:$0xff]   ;;  %v20139_v62 = vld [vmem:[#allocation17 + $0xfe8] ss:$16 sps:$4 sm:$0xff]  }
 0x86b   : > { %v23330_v48 = vadd.f32 %v8714_v9, %v23292_v13  ;;  %10633 = vmatpush1.bf16.msra.mxu1 %v20097_v56  ;;  %v20120_v13 = vld [vmem:[#allocation17 + $0x106c] ss:$16 sps:$4 sm:$0xff]   ;;  %v20142_v56 = vld [vmem:[#allocation17 + $0x11e8] ss:$16 sps:$4 sm:$0xff]  }
 0x86c   : > { %11555 = vmatpush1.bf16.msra.mxu0 %v20100_v16  ;;  %v8716_v55 = vpop.f32.mrf.mxu1  ;;  %10634 = vmatprep.subr.bf16.mxu1 %v20105_v44  ;;  %v20147_v5 = vld [vmem:[#allocation17 + $0xfcc] ss:$16 sps:$4 sm:$0xff]   ;;  %v20145_v44 = vld [vmem:[#allocation17 + $0xfc8] ss:$16 sps:$4 sm:$0xff]  }
 0x86d   : > { %v23333_v42 = vadd.f32 %v8716_v55, %v23295_v29  ;;  %11556 = vmatprep.subr.bf16.mxu0 %v20108_v35  ;;  %v20121_v29 = vld [vmem:[#allocation17 + $0xe48] ss:$16 sps:$4 sm:$0xff]   ;;  %v20150_v16 = vld [vmem:[#allocation17 + $0x11cc] ss:$16 sps:$4 sm:$0xff]  }
 0x86e   : > { %v20148_v35 = vld [vmem:[#allocation17 + $0x11c8] ss:$16 sps:$4 sm:$0xff]   ;;  %v20153_v9 = vld [vmem:[#allocation17 + $0xfac] ss:$16 sps:$4 sm:$0xff]  }
 0x86f   : > { %10635 = vmatpush1.bf16.msra.mxu1 %v20103_v23  ;;  %v20156_v23 = vld [vmem:[#allocation17 + $0x11ac] ss:$16 sps:$4 sm:$0xff]   ;;  %v20151_v55 = vld [vmem:[#allocation17 + $0xfa8] ss:$16 sps:$4 sm:$0xff]  }
 0x870   : > { %11557 = vmatpush1.bf16.msra.mxu0 %v20106_v30  ;;  %10636 = vmatprep.subr.bf16.mxu1 %v20111_v19  ;;  %v20154_v30 = vld [vmem:[#allocation17 + $0x11a8] ss:$16 sps:$4 sm:$0xff]   ;;  %v20159_v19 = vld [vmem:[#allocation17 + $0xf8c] ss:$16 sps:$4 sm:$0xff]  }
 0x871   : > { %11558 = vmatprep.subr.bf16.mxu0 %v20114_v59  ;;  %v20162_v59 = vld [vmem:[#allocation17 + $0x118c] ss:$16 sps:$4 sm:$0xff]  }
 0x873   : > { %10637 = vmatpush1.bf16.msra.mxu1 %v20109_v43  ;;  %v20157_v43 = vld [vmem:[#allocation17 + $0xf88] ss:$16 sps:$4 sm:$0xff]  }
 0x874   : > { %11559 = vmatpush1.bf16.msra.mxu0 %v20112_v10  ;;  %10638 = vmatprep.subr.bf16.mxu1 %v20117_v4  ;;  %v20160_v10 = vld [vmem:[#allocation17 + $0x1188] ss:$16 sps:$4 sm:$0xff]   ;;  %v20165_v4 = vld [vmem:[#allocation17 + $0xf6c] ss:$16 sps:$4 sm:$0xff]  }
 0x875   : > { %11560 = vmatprep.subr.bf16.mxu0 %v20120_v13  ;;  %v20168_v13 = vld [vmem:[#allocation17 + $0x116c] ss:$16 sps:$4 sm:$0xff]  }
 0x877   : > { %10639 = vmatpush1.bf16.msra.mxu1 %v20115_v38  ;;  %v20163_v38 = vld [vmem:[#allocation17 + $0xf68] ss:$16 sps:$4 sm:$0xff]  }
 0x878   : > { %11561 = vmatpush1.bf16.msra.mxu0 %v20118_v11  ;;  %10640 = vmatprep.subr.bf16.mxu1 %v20123_v26  ;;  %v20166_v11 = vld [vmem:[#allocation17 + $0x1168] ss:$16 sps:$4 sm:$0xff]   ;;  %v20171_v26 = vld [vmem:[#allocation17 + $0xf4c] ss:$16 sps:$4 sm:$0xff]  }
 0x879   : > { %11562 = vmatprep.subr.bf16.mxu0 %v20126_v2  ;;  %v20174_v2 = vld [vmem:[#allocation17 + $0x114c] ss:$16 sps:$4 sm:$0xff]  }
 0x87b   : > { %10641 = vmatpush1.bf16.msra.mxu1 %v20121_v29  ;;  %v20169_v29 = vld [vmem:[#allocation17 + $0xf48] ss:$16 sps:$4 sm:$0xff]  }
 0x87c   : > { %11563 = vmatpush1.bf16.msra.mxu0 %v20124_v8  ;;  %10642 = vmatprep.subr.bf16.mxu1 %v20129_v40  ;;  %v20172_v8 = vld [vmem:[#allocation17 + $0x1148] ss:$16 sps:$4 sm:$0xff]   ;;  %v20177_v40 = vld [vmem:[#allocation17 + $0xf2c] ss:$16 sps:$4 sm:$0xff]  }
 0x87d   : > { %11564 = vmatprep.subr.bf16.mxu0 %v20132_v24  ;;  %v20180_v24 = vld [vmem:[#allocation17 + $0x112c] ss:$16 sps:$4 sm:$0xff]  }
 0x87f   : > { %10643 = vmatpush1.bf16.msra.mxu1 %v20127_v28  ;;  %v20175_v28 = vld [vmem:[#allocation17 + $0xf28] ss:$16 sps:$4 sm:$0xff]  }
 0x880   : > { %11565 = vmatpush1.bf16.msra.mxu0 %v20130_v45  ;;  %10644 = vmatprep.subr.bf16.mxu1 %v20135_v46  ;;  %v20178_v45 = vld [vmem:[#allocation17 + $0x1128] ss:$16 sps:$4 sm:$0xff]   ;;  %v20183_v46 = vld [vmem:[#allocation17 + $0xf0c] ss:$16 sps:$4 sm:$0xff]  }
 0x881   : > { %11566 = vmatprep.subr.bf16.mxu0 %v20138_v57  ;;  %v20186_v57 = vld [vmem:[#allocation17 + $0x110c] ss:$16 sps:$4 sm:$0xff]  }
 0x883   : > { %10645 = vmatpush1.bf16.msra.mxu1 %v20133_v18  ;;  %v20181_v18 = vld [vmem:[#allocation17 + $0xf08] ss:$16 sps:$4 sm:$0xff]  }
 0x884   : > { %11567 = vmatpush1.bf16.msra.mxu0 %v20136_v39  ;;  %10646 = vmatprep.subr.bf16.mxu1 %v20141_v27  ;;  %v20184_v39 = vld [vmem:[#allocation17 + $0x1108] ss:$16 sps:$4 sm:$0xff]   ;;  %v20189_v27 = vld [vmem:[#allocation17 + $0x12e4] ss:$16 sps:$4 sm:$0xff]  }
 0x885   : > { %11568 = vmatprep.subr.bf16.mxu0 %v20144_v36  ;;  %v20187_v36 = vld [vmem:[#allocation17 + $0x12e0] ss:$16 sps:$4 sm:$0xff]  }
 0x887   : > { %10647 = vmatpush2.bf16.msra.mxu1 %v20139_v62  ;;  %v10820_v62 = vrot.slane %v23198_v20, 2  ;;  %v20193_v20 = vld [vmem:[#allocation17 + $0x12a0] ss:$16 sps:$4 sm:$0xff]  }
 0x888   : > { %11569 = vmatpush2.bf16.msra.mxu0 %v20142_v56  ;;  %10648 = vmatprep.subr.bf16.mxu1 %v20147_v5  ;;  %v20192_v56 = vld [vmem:[#allocation17 + $0x12c4] ss:$16 sps:$4 sm:$0xff]   ;;  %v10819_v5 = vrot.slane %v23190_v58, 2  ;;  %v20196_v58 = vld [vmem:[#allocation17 + $0x1280] ss:$16 sps:$4 sm:$0xff]  }
 0x889   : > { %11570 = vmatprep.subr.bf16.mxu0 %v20150_v16 }
 0x88a   : > { %v23340_v16 = vsel %vm3535_vm6, %v10819_v5, %v10820_v62  ;;  %v20234_v62 = vld [vmem:[#allocation17 + $0x1304] ss:$16 sps:$4 sm:$0xff]   ;;  %v20232_v5 = vld [vmem:[#allocation17 + $0x1300] ss:$16 sps:$4 sm:$0xff]  }
 0x88b   : > { %10649 = vmatpush2.bf16.msra.mxu1 %v20145_v44  ;;  %v20190_v44 = vld [vmem:[#allocation17 + $0x12c0] ss:$16 sps:$4 sm:$0xff]  }
 0x88c   : > { %11571 = vmatpush2.bf16.msra.mxu0 %v20148_v35  ;;  %10650 = vmatprep.subr.bf16.mxu1 %v20153_v9  ;;  %v20195_v35 = vld [vmem:[#allocation17 + $0x12a4] ss:$16 sps:$4 sm:$0xff]  }
 0x88d   : > { %11572 = vmatprep.subr.bf16.mxu0 %v20156_v23  ;;  %v20198_v9 = vld [vmem:[#allocation17 + $0x1284] ss:$16 sps:$4 sm:$0xff]  }
 0x88e   : > { %v20204_v23 = vld [vmem:[#allocation17 + $0x1244] ss:$16 sps:$4 sm:$0xff]  }
 0x88f   : > { %10651 = vmatpush2.bf16.msra.mxu1 %v20151_v55  ;;  %v20202_v55 = vld [vmem:[#allocation17 + $0x1240] ss:$16 sps:$4 sm:$0xff]  }
 0x890   : > { %11573 = vmatpush2.bf16.msra.mxu0 %v20154_v30  ;;  %10652 = vmatprep.subr.bf16.mxu1 %v20159_v19  ;;  %v20207_v30 = vld [vmem:[#allocation17 + $0x1224] ss:$16 sps:$4 sm:$0xff]   ;;  %v20205_v19 = vld [vmem:[#allocation17 + $0x1220] ss:$16 sps:$4 sm:$0xff]  }
 0x891   : > { %11574 = vmatprep.subr.bf16.mxu0 %v20162_v59  ;;  %v20210_v59 = vld [vmem:[#allocation17 + $0x1204] ss:$16 sps:$4 sm:$0xff]  }
 0x893   : > { %10653 = vmatpush2.bf16.msra.mxu1 %v20157_v43  ;;  %v20208_v43 = vld [vmem:[#allocation17 + $0x1200] ss:$16 sps:$4 sm:$0xff]  }
 0x894   : > { %11575 = vmatpush2.bf16.msra.mxu0 %v20160_v10  ;;  %10654 = vmatprep.subr.bf16.mxu1 %v20165_v4  ;;  %v20213_v10 = vld [vmem:[#allocation17 + $0x13e4] ss:$16 sps:$4 sm:$0xff]   ;;  %v20211_v4 = vld [vmem:[#allocation17 + $0x13e0] ss:$16 sps:$4 sm:$0xff]  }
 0x895   : > { %11576 = vmatprep.subr.bf16.mxu0 %v20168_v13  ;;  %v20216_v13 = vld [vmem:[#allocation17 + $0x13c4] ss:$16 sps:$4 sm:$0xff]  }
 0x897   : > { %10655 = vmatpush2.bf16.msra.mxu1 %v20163_v38  ;;  %v20214_v38 = vld [vmem:[#allocation17 + $0x13c0] ss:$16 sps:$4 sm:$0xff]  }
 0x898   : > { %11577 = vmatpush2.bf16.msra.mxu0 %v20166_v11  ;;  %10656 = vmatprep.subr.bf16.mxu1 %v20171_v26  ;;  %v20219_v11 = vld [vmem:[#allocation17 + $0x13a4] ss:$16 sps:$4 sm:$0xff]   ;;  %v20217_v26 = vld [vmem:[#allocation17 + $0x13a0] ss:$16 sps:$4 sm:$0xff]  }
 0x899   : > { %11578 = vmatprep.subr.bf16.mxu0 %v20174_v2  ;;  %v20222_v2 = vld [vmem:[#allocation17 + $0x1384] ss:$16 sps:$4 sm:$0xff]  }
 0x89b   : > { %10657 = vmatpush2.bf16.msra.mxu1 %v20169_v29  ;;  %v20220_v29 = vld [vmem:[#allocation17 + $0x1380] ss:$16 sps:$4 sm:$0xff]  }
 0x89c   : > { %11579 = vmatpush2.bf16.msra.mxu0 %v20172_v8  ;;  %10658 = vmatprep.subr.bf16.mxu1 %v20177_v40  ;;  %v20225_v8 = vld [vmem:[#allocation17 + $0x1364] ss:$16 sps:$4 sm:$0xff]   ;;  %v23344_v40 = vpop.f32.mrf.mxu0 }
 0x89d   : > { %11580 = vmatprep.subr.bf16.mxu0 %v20180_v24  ;;  %v20223_v24 = vld [vmem:[#allocation17 + $0x1360] ss:$16 sps:$4 sm:$0xff]  }
 0x89f   : > { %10659 = vmatpush2.bf16.msra.mxu1 %v20175_v28  ;;  %v20228_v28 = vld [vmem:[#allocation17 + $0x1344] ss:$16 sps:$4 sm:$0xff]  }
 0x8a0   : > { %11581 = vmatpush2.bf16.msra.mxu0 %v20178_v45  ;;  %10660 = vmatprep.subr.bf16.mxu1 %v20183_v46  ;;  %v23346_v45 = vpop.f32.mrf.mxu0  ;;  %v20226_v46 = vld [vmem:[#allocation17 + $0x1340] ss:$16 sps:$4 sm:$0xff]  }
 0x8a1   : > { %11582 = vmatprep.subr.bf16.mxu0 %v20186_v57 }
 0x8a3   : > { %10661 = vmatpush2.bf16.msra.mxu1 %v20181_v18  ;;  %v20231_v18 = vld [vmem:[#allocation17 + $0x1324] ss:$16 sps:$4 sm:$0xff]  }
 0x8a4   : > { %11583 = vmatpush2.bf16.msra.mxu0 %v20184_v39  ;;  %11509 = vmatprep.subr.bf16.mxu1 %v20189_v27  ;;  %v23350_v39 = vpop.f32.mrf.mxu0  ;;  %v20229_v27 = vld [vmem:[#allocation17 + $0x1320] ss:$16 sps:$4 sm:$0xff]  }
 0x8a6   : > { %10663 = vmatmul.mubr.bf16.vlgmr.msra.gmra.mxu1 %v23214_v32  ;;  %v20201_v32 = vld [vmem:[#allocation17 + $0x1264] ss:$16 sps:$4 sm:$0xff]   ;;  %v23348_v57 = vpop.f32.mrf.mxu1 }
 0x8a7   : > { %11585 = vmatmul.mubr.bf16.vlgmr.msra.gmra.mxu0 %v23318_v14  ;;  %11510 = vmatpush1.bf16.msra.mxu1 %v20187_v36  ;;  %v20199_v14 = vld [vmem:[#allocation17 + $0x1260] ss:$16 sps:$4 sm:$0xff]  }
 0x8a8   : > { %11541 = vmatprep.mubr.bf16.mxu1 %v23340_v16  ;;  %11511 = vmatprep.subr.bf16.mxu1 %v20192_v56  ;;  %v23352_v36 = vpop.f32.mrf.mxu1  ;;  %v23354_v56 = vpop.f32.mrf.mxu0 }
 0x8a9   : > { %11755 = vmatprep.mubr.bf16.mxu0 %v23965_v53 }
 0x8ab   : > { %11512 = vmatpush1.bf16.msra.mxu1 %v20190_v44  ;;  %v9632_v44 = vpop.f32.mrf.mxu0 }
 0x8ac   : > { %11513 = vmatprep.subr.bf16.mxu1 %v20195_v35  ;;  %v23356_v35 = vpop.f32.mrf.mxu1 }
 0x8af   : > { %11514 = vmatpush1.bf16.msra.mxu1 %v20193_v20  ;;  %v20237_v20 = vld [vmem:[#allocation17 + $0x12ec] ss:$16 sps:$4 sm:$0xff]  }
 0x8b0   : > { %11515 = vmatprep.subr.bf16.mxu1 %v20198_v9  ;;  %v10817_v9 = vrot.slane %v23196_v12, 2  ;;  %v20238_v12 = vld [vmem:[#allocation17 + $0x12c8] ss:$16 sps:$4 sm:$0xff]  }
 0x8b3   : > { %11516 = vmatpush1.bf16.msra.mxu1 %v20196_v58  ;;  %v10816_v58 = vrot.slane %v23188_v41, 2  ;;  %v20243_v41 = vld [vmem:[#allocation17 + $0x12ac] ss:$16 sps:$4 sm:$0xff]  }
 0x8b4   : > { %11517 = vmatprep.subr.bf16.mxu1 %v20201_v32  ;;  %v20235_v32 = vld [vmem:[#allocation17 + $0x12e8] ss:$16 sps:$4 sm:$0xff]  }
 0x8b7   : > { %11518 = vmatpush1.bf16.msra.mxu1 %v20199_v14  ;;  %v9634_v14 = vpop.f32.mrf.mxu0 }
 0x8b8   : > { %11519 = vmatprep.subr.bf16.mxu1 %v20204_v23  ;;  %v23360_v23 = vpop.f32.mrf.mxu1 }
 0x8bb   : > { %11520 = vmatpush1.bf16.msra.mxu1 %v20202_v55  ;;  %v20240_v55 = vld [vmem:[#allocation17 + $0x12cc] ss:$16 sps:$4 sm:$0xff]  }
 0x8bc   : > { %11521 = vmatprep.subr.bf16.mxu1 %v20207_v30  ;;  %v23363_v30 = vsel %vm3535_vm6, %v10816_v58, %v10817_v9  ;;  %v20259_v9 = vld [vmem:[#allocation17 + $0x13e8] ss:$16 sps:$4 sm:$0xff]   ;;  %v20264_v58 = vld [vmem:[#allocation17 + $0x13cc] ss:$16 sps:$4 sm:$0xff]  }
 0x8bf   : > { %11522 = vmatpush1.bf16.msra.mxu1 %v20205_v19 }
 0x8c0   : > { %11523 = vmatprep.subr.bf16.mxu1 %v20210_v59 }
 0x8c3   : > { %11524 = vmatpush1.bf16.msra.mxu1 %v20208_v43  ;;  %v9636_v43 = vpop.f32.mrf.mxu0 }
 0x8c4   : > { %11525 = vmatprep.subr.bf16.mxu1 %v20213_v10 }
 0x8c7   : > { %11526 = vmatpush2.bf16.msra.mxu1 %v20211_v4 }
 0x8c8   : > { %11527 = vmatprep.subr.bf16.mxu1 %v20216_v13 }
 0x8cb   : > { %11528 = vmatpush2.bf16.msra.mxu1 %v20214_v38 }
 0x8cc   : > { %11529 = vmatprep.subr.bf16.mxu1 %v20219_v11 }
 0x8cf   : > { %11530 = vmatpush2.bf16.msra.mxu1 %v20217_v26 }
 0x8d0   : > { %11531 = vmatprep.subr.bf16.mxu1 %v20222_v2  ;;  %v20241_v2 = vld [vmem:[#allocation17 + $0x12a8] ss:$16 sps:$4 sm:$0xff]  }
 0x8d3   : > { %11532 = vmatpush2.bf16.msra.mxu1 %v20220_v29  ;;  %v9638_v29 = vpop.f32.mrf.mxu0 }
 0x8d4   : > { %11533 = vmatprep.subr.bf16.mxu1 %v20225_v8 }
 0x8d7   : > { %11534 = vmatpush2.bf16.msra.mxu1 %v20223_v24 }
 0x8d8   : > { %11535 = vmatprep.subr.bf16.mxu1 %v20228_v28 }
 0x8db   : > { %11536 = vmatpush2.bf16.msra.mxu1 %v20226_v46 }
 0x8dc   : > { %11537 = vmatprep.subr.bf16.mxu1 %v20231_v18  ;;  %v20249_v18 = vld [vmem:[#allocation17 + $0x126c] ss:$16 sps:$4 sm:$0xff]  }
 0x8df   : > { %11538 = vmatpush2.bf16.msra.mxu1 %v20229_v27  ;;  %v20252_v27 = vld [vmem:[#allocation17 + $0x124c] ss:$16 sps:$4 sm:$0xff]  }
 0x8e0   : > { %11539 = vmatprep.subr.bf16.mxu1 %v20234_v62  ;;  %v20250_v62 = vld [vmem:[#allocation17 + $0x1248] ss:$16 sps:$4 sm:$0xff]  }
 0x8e3   : > { %11540 = vmatpush2.bf16.msra.mxu1 %v20232_v5  ;;  %v20255_v5 = vld [vmem:[#allocation17 + $0x122c] ss:$16 sps:$4 sm:$0xff]  }
 0x8e4   : > { %11595 = vmatprep.subr.bf16.mxu1 %v20237_v20  ;;  %v20256_v20 = vld [vmem:[#allocation17 + $0x1208] ss:$16 sps:$4 sm:$0xff]  }
 0x8e6   : > { %v9675_v19 = vpop.f32.mrf.mxu1  ;;  %11542 = vmatmul.mubr.bf16.vlgmr.msra.gmra.mxu1 %v23363_v30 }
 0x8e7   : > { %v9676_v59 = vadd.f32 %v9675_v19, %v9632_v44  ;;  %11596 = vmatpush1.bf16.msra.mxu1 %v20235_v32  ;;  %11627 = vmatprep.mubr.bf16.mxu1 %v23340_v16  ;;  %v20246_v16 = vld [vmem:[#allocation17 + $0x128c] ss:$16 sps:$4 sm:$0xff]   ;;  %v20253_v44 = vld [vmem:[#allocation17 + $0x1228] ss:$16 sps:$4 sm:$0xff]  }
 0x8e8   : > { %v9677_v10 = vpop.f32.mrf.mxu1  ;;  %11597 = vmatprep.subr.bf16.mxu1 %v20240_v55  ;;  %v20262_v32 = vld [vmem:[#allocation17 + $0x13c8] ss:$16 sps:$4 sm:$0xff]   ;;  %v20270_v19 = vld [vmem:[#allocation17 + $0x138c] ss:$16 sps:$4 sm:$0xff]  }
 0x8e9   : > { %v23368_v4 = vadd.f32 %v9676_v59, %v23321_v3  ;;  %v9678_v13 = vadd.f32 %v9677_v10, %v9634_v14  ;;  %v20244_v3 = vld [vmem:[#allocation17 + $0x1288] ss:$16 sps:$4 sm:$0xff]   ;;  %v20267_v14 = vld [vmem:[#allocation17 + $0x13ac] ss:$16 sps:$4 sm:$0xff]  }
 0x8ea   : > { %v9679_v38 = vpop.f32.mrf.mxu1  ;;  %v20265_v55 = vld [vmem:[#allocation17 + $0x13a8] ss:$16 sps:$4 sm:$0xff]   ;;  %v20276_v10 = vld [vmem:[#allocation17 + $0x134c] ss:$16 sps:$4 sm:$0xff]  }
 0x8eb   : > { %v23371_v11 = vadd.f32 %v9678_v13, %v23327_v47  ;;  %v9680_v26 = vadd.f32 %v9679_v38, %v9636_v43  ;;  %11598 = vmatpush1.bf16.msra.mxu1 %v20238_v12  ;;  %v20247_v47 = vld [vmem:[#allocation17 + $0x1268] ss:$16 sps:$4 sm:$0xff]   ;;  %v20273_v12 = vld [vmem:[#allocation17 + $0x136c] ss:$16 sps:$4 sm:$0xff]  }
 0x8ec   : > { %v9681_v8 = vpop.f32.mrf.mxu1  ;;  %11599 = vmatprep.subr.bf16.mxu1 %v20243_v41  ;;  %v20268_v59 = vld [vmem:[#allocation17 + $0x1388] ss:$16 sps:$4 sm:$0xff]   ;;  %v20279_v13 = vld [vmem:[#allocation17 + $0x132c] ss:$16 sps:$4 sm:$0xff]  }
 0x8ed   : > { %v23374_v24 = vadd.f32 %v9680_v26, %v23330_v48  ;;  %v9682_v28 = vadd.f32 %v9681_v8, %v9638_v29  ;;  %v20258_v48 = vld [vmem:[#allocation17 + $0x120c] ss:$16 sps:$4 sm:$0xff]   ;;  %v20271_v43 = vld [vmem:[#allocation17 + $0x1368] ss:$16 sps:$4 sm:$0xff]   ;;  %v10535_v29 = vpop.f32.mrf.mxu0 }
 0x8ee   : > { %v20274_v41 = vld [vmem:[#allocation17 + $0x1348] ss:$16 sps:$4 sm:$0xff]   ;;  %v20282_v26 = vld [vmem:[#allocation17 + $0x130c] ss:$16 sps:$4 sm:$0xff]  }
 0x8ef   : > { %v23377_v46 = vadd.f32 %v9682_v28, %v23333_v42  ;;  %11600 = vmatpush1.bf16.msra.mxu1 %v20241_v2  ;;  %v20261_v42 = vld [vmem:[#allocation17 + $0x13ec] ss:$16 sps:$4 sm:$0xff]   ;;  %v20277_v38 = vld [vmem:[#allocation17 + $0x1328] ss:$16 sps:$4 sm:$0xff]   ;;  %v10537_v8 = vpop.f32.mrf.mxu0 }
 0x8f0   : > { %11601 = vmatprep.subr.bf16.mxu1 %v20246_v16  ;;  %v20280_v2 = vld [vmem:[#allocation17 + $0x1308] ss:$16 sps:$4 sm:$0xff]  }
 0x8f1   : > { %v10539_v28 = vpop.f32.mrf.mxu0 }
 0x8f3   : > { %11602 = vmatpush1.bf16.msra.mxu1 %v20244_v3 }
 0x8f4   : > { %11603 = vmatprep.subr.bf16.mxu1 %v20249_v18  ;;  %v10541_v18 = vpop.f32.mrf.mxu0 }
 0x8f7   : > { %11604 = vmatpush1.bf16.msra.mxu1 %v20247_v47  ;;  %v10621_v47 = vpop.f32.mrf.mxu0 }
 0x8f8   : > { %11605 = vmatprep.subr.bf16.mxu1 %v20252_v27 }
 0x8fb   : > { %11606 = vmatpush1.bf16.msra.mxu1 %v20250_v62  ;;  %v10623_v62 = vpop.f32.mrf.mxu0 }
 0x8fc   : > { %11607 = vmatprep.subr.bf16.mxu1 %v20255_v5 }
 0x8ff   : > { %11608 = vmatpush1.bf16.msra.mxu1 %v20253_v44 }
 0x900   : > { %11609 = vmatprep.subr.bf16.mxu1 %v20258_v48 }
 0x903   : > { %11610 = vmatpush1.bf16.msra.mxu1 %v20256_v20  ;;  %v10625_v20 = vpop.f32.mrf.mxu0 }
 0x904   : > { %11611 = vmatprep.subr.bf16.mxu1 %v20261_v42 }
 0x907   : > { %11612 = vmatpush2.bf16.msra.mxu1 %v20259_v9 }
 0x908   : > { %11613 = vmatprep.subr.bf16.mxu1 %v20264_v58 }
 0x90b   : > { %11614 = vmatpush2.bf16.msra.mxu1 %v20262_v32 }
 0x90c   : > { %11615 = vmatprep.subr.bf16.mxu1 %v20267_v14 }
 0x90f   : > { %11616 = vmatpush2.bf16.msra.mxu1 %v20265_v55  ;;  %v10627_v55 = vpop.f32.mrf.mxu0 }
 0x910   : > { %11617 = vmatprep.subr.bf16.mxu1 %v20270_v19 }
 0x913   : > { %11618 = vmatpush2.bf16.msra.mxu1 %v20268_v59 }
 0x914   : > { %11619 = vmatprep.subr.bf16.mxu1 %v20273_v12 }
 0x917   : > { %11620 = vmatpush2.bf16.msra.mxu1 %v20271_v43 }
 0x918   : > { %11621 = vmatprep.subr.bf16.mxu1 %v20276_v10  ;;  %v7813_v10 = vadd.f32 %v23262_v61, %v23244_v1  ;;  %v9592_v1 = vadd.f32 %v23352_v36, %v23346_v45  ;;  %v11646_v36 = vld [vmem:[#allocation18] sm:$0xf] }
 0x91b   : > { %11622 = vmatpush2.bf16.msra.mxu1 %v20274_v41 }
 0x91c   : > { %11623 = vmatprep.subr.bf16.mxu1 %v20279_v13  ;;  %v7819_v13 = vadd.f32 %v23276_v33, %v23250_v37 }
 0x91f   : > { %11624 = vmatpush2.bf16.msra.mxu1 %v20277_v38  ;;  %v9590_v38 = vadd.f32 %v23348_v57, %v23344_v40 }
 0x920   : > { %11625 = vmatprep.subr.bf16.mxu1 %v20282_v26 }
 0x923   : > { %11626 = vmatpush2.bf16.msra.mxu1 %v20280_v2 }
 0x926   : > { %11628 = vmatmul.mubr.bf16.vlgmr.msra.gmra.mxu1 %v23363_v30  ;;  %v10578_v16 = vpop.f32.mrf.mxu1 }
 0x927   : > { %11798 = vmatprep.mubr.bf16.mxu1 %v23965_v53  ;;  %v11500_v41 = vpop.f32.mrf.mxu0 }
 0x928   : > { %v10580_v3 = vpop.f32.mrf.mxu1 }
 0x929   : > { %v10581_v40 = vadd.f32 %v10580_v3, %v10537_v8  ;;  %v11655_v3 = vrot.slane %v11646_v36, %v22509_v63 }
 0x92a   : > { %v10582_v27 = vpop.f32.mrf.mxu1 }
 0x92b   : > { %v10583_v45 = vadd.f32 %v10582_v27, %v10539_v28 }
 0x92c   : > { %v10584_v5 = vpop.f32.mrf.mxu1 }
 0x966   : > { %v10664_v44 = vpop.f32.mrf.mxu1 }
 0x967   : > { %v10665_v48 = vadd.f32 %v10664_v44, %v10621_v47 }
 0x968   : > { %v10666_v42 = vpop.f32.mrf.mxu1 }
 0x969   : > { %v23382_v9 = vadd.f32 %v10665_v48, %v23368_v4  ;;  %v10667_v30 = vadd.f32 %v10666_v42, %v10623_v62  ;;  %v7815_v4 = vadd.f32 %v23266_v50, %v23246_v52  ;;  %v11502_v52 = vpop.f32.mrf.mxu0  ;;  %v10579_v50 = vadd.f32 %v10578_v16, %v10535_v29 }
 0x96a   : > { %v10668_v58 = vpop.f32.mrf.mxu1  ;;  %v10585_v16 = vadd.f32 %v10584_v5, %v10541_v18 }
 0x96b   : > { %v23385_v32 = vadd.f32 %v10667_v30, %v23371_v11  ;;  %v10669_v14 = vadd.f32 %v10668_v58, %v10625_v20  ;;  %v7817_v11 = vadd.f32 %v23270_v21, %v23248_v7  ;;  %v9594_v7 = vadd.f32 %v23356_v35, %v23350_v39  ;;  %v11504_v39 = vpop.f32.mrf.mxu0 }
 0x96c   : > { %v10670_v19 = vpop.f32.mrf.mxu1  ;;  %v8588_v21 = vadd.f32 %v23274_v60, %v7819_v13  ;;  %v11651_v60 = vrot.slane %v11646_v36, %v22503_v49 }
 0x96d   : > { %v23388_v59 = vadd.f32 %v10669_v14, %v23374_v24  ;;  %v10671_v12 = vadd.f32 %v10670_v19, %v10627_v55  ;;  %v8582_v24 = vadd.f32 %v23260_v34, %v7813_v10  ;;  %v8586_v26 = vadd.f32 %v23268_v22, %v7817_v11  ;;  %v11506_v28 = vpop.f32.mrf.mxu0 }
 0x96f   : > { %v23391_v43 = vadd.f32 %v10671_v12, %v23377_v46  ;;  %v8584_v46 = vadd.f32 %v23264_v31, %v7815_v4  ;;  %v8625_v61 = vadd.f32 %v23306_v17, %v8582_v24  ;;  %v8629_v34 = vadd.f32 %v23310_v15, %v8586_v26  ;;  %v11586_v12 = vpop.f32.mrf.mxu0 }
 0x970   : > { %v9596_v31 = vadd.f32 %v23360_v23, %v23354_v56  ;;  %v8631_v17 = vadd.f32 %v23313_v51, %v8588_v21  ;;  %v11659_v26 = vrot.slane %v11646_v36, %v22506_v0 }
 0x971   : > { %v8627_v37 = vadd.f32 %v23308_v54, %v8584_v46  ;;  %v9684_v33 = vadd.f32 %v9590_v38, %v8625_v61  ;;  %v9688_v29 = vadd.f32 %v9594_v7, %v8629_v34  ;;  %v11588_v10 = vpop.f32.mrf.mxu0 }
 0x972   : > { %v9689_v47 = vadd.f32 %v9596_v31, %v8631_v17 }
 0x973   : > { %v9685_v2 = vadd.f32 %v9592_v1, %v8627_v37  ;;  %v10673_v54 = vadd.f32 %v10579_v50, %v9684_v33  ;;  %v10677_v23 = vadd.f32 %v10583_v45, %v9688_v29  ;;  %v11663_v50 = vrot.slane %v11646_v36, %v22514_v25 }
 0x974   : > { %v10678_v51 = vadd.f32 %v10585_v16, %v9689_v47 }
 0x975   : > { %v10674_v56 = vadd.f32 %v10581_v40, %v9685_v2 }
 0x9a6   : > { %v11543_v22 = vpop.f32.mrf.mxu1 }
 0x9a7   : > { %v11544_v57 = vadd.f32 %v11543_v22, %v11500_v41  ;;  %v11590_v41 = vpop.f32.mrf.mxu0 }
 0x9a8   : > { %v11545_v35 = vpop.f32.mrf.mxu1 }
 0x9a9   : > { %v11546_v15 = vadd.f32 %v11545_v35, %v11502_v52  ;;  %v11638_v44 = vadd.f32 %v11544_v57, %v10673_v54  ;;  %v11592_v52 = vpop.f32.mrf.mxu0 }
 0x9aa   : > { %v11547_v62 = vpop.f32.mrf.mxu1 }
 0x9ab   : > { %v11548_v8 = vadd.f32 %v11547_v62, %v11504_v39  ;;  %v11639_v48 = vadd.f32 %v11546_v15, %v10674_v56  ;;  %v23419_v30 = vadd.f32 %v11651_v60, %v11638_v44 }
 0x9ac   : > { %v11549_v27 = vpop.f32.mrf.mxu1 }
 0x9ad   : > { %v11642_v20 = vadd.f32 %v11548_v8, %v10677_v23  ;;  %v11550_v42 = vadd.f32 %v11549_v27, %v11506_v28  ;;  %v11669_v58 = vadd.f32 %v11655_v3, %v11639_v48 }
 0x9af   : > { %v23421_v18 = vadd.f32 %v11651_v60, %v11642_v20  ;;  %v11643_v5 = vadd.f32 %v11550_v42, %v10678_v51 }
 0x9b1   : > { %v11673_v14 = vadd.f32 %v11655_v3, %v11643_v5  ;;  %v18905_v55 = vpack.i.bf16 %v23421_v18, %v23419_v30 }
 0x9b3   : > { %18906 = vrot.lane.b32.xlu0 %v18905_v55, %s21654_s7  ;;  %v18910_v19 = vpack.i.bf16 %v11673_v14, %v11669_v58 }
 0x9b5   : > { %18911 = vrot.lane.b32.xlu1 %v18910_v19, %s21654_s7  ;;  %v20287_v19 = vld [vmem:[#allocation23 + $0x74] ss:$8 sps:$4 sm:$0xff]  }
 0x9e6   : > { %v11629_v4 = vpop.f32.mrf.mxu1 }
 0x9e7   : > { %v11630_v11 = vadd.f32 %v11629_v4, %v11586_v12  ;;  %v20290_v12 = vld [vmem:[#allocation23 + $0x174] ss:$8 sps:$4 sm:$0xff]   ;;  %v20285_v4 = vld [vmem:[#allocation23 + $0x70] ss:$8 sps:$4 sm:$0xff]  }
 0x9e8   : > { %v11631_v13 = vpop.f32.mrf.mxu1 }
 0x9e9   : > { %v11632_v24 = vadd.f32 %v11631_v13, %v11588_v10  ;;  %v11640_v46 = vadd.f32 %v11630_v11, %v23382_v9  ;;  %v20284_v10 = vld [vmem:[#allocation21] sm:$0x3f]   ;;  %v20293_v11 = vld [vmem:[#allocation23 + $0x64] ss:$8 sps:$4 sm:$0xff]   ;;  %v20291_v13 = vld [vmem:[#allocation23 + $0x60] ss:$8 sps:$4 sm:$0xff]  }
 0x9ea   : > { %v11633_v38 = vpop.f32.mrf.mxu1 }
 0x9eb   : > { %v11634_v1 = vadd.f32 %v11633_v38, %v11590_v41  ;;  %v11641_v7 = vadd.f32 %v11632_v24, %v23385_v32  ;;  %v11670_v21 = vadd.f32 %v11659_v26, %v11640_v46  ;;  %v20288_v41 = vld [vmem:[#allocation23 + $0x170] ss:$8 sps:$4 sm:$0xff]   ;;  %v20296_v24 = vld [vmem:[#allocation23 + $0x164] ss:$8 sps:$4 sm:$0xff]   ;;  %v20299_v38 = vld [vmem:[#allocation23 + $0x54] ss:$8 sps:$4 sm:$0xff]  }
 0x9ec   : > { %v11635_v61 = vpop.f32.mrf.mxu1  ;;  %v20294_v46 = vld [vmem:[#allocation23 + $0x160] ss:$8 sps:$4 sm:$0xff]  }
 0x9ed   : > { %v11644_v37 = vadd.f32 %v11634_v1, %v23388_v59  ;;  %v11636_v34 = vadd.f32 %v11635_v61, %v11592_v52  ;;  %v11671_v33 = vadd.f32 %v11663_v50, %v11641_v7  ;;  %v20302_v1 = vld [vmem:[#allocation23 + $0x154] ss:$8 sps:$4 sm:$0xff]   ;;  %v20305_v52 = vld [vmem:[#allocation23 + $0x44] ss:$8 sps:$4 sm:$0xff]   ;;  %v20300_v61 = vld [vmem:[#allocation23 + $0x150] ss:$8 sps:$4 sm:$0xff]  }
 0x9ee   : > { %v20303_v7 = vld [vmem:[#allocation23 + $0x40] ss:$8 sps:$4 sm:$0xff]  }
 0x9ef   : > { %v11674_v31 = vadd.f32 %v11659_v26, %v11644_v37  ;;  %v11645_v22 = vadd.f32 %v11636_v34, %v23391_v43  ;;  %v20297_v26 = vld [vmem:[#allocation23 + $0x50] ss:$8 sps:$4 sm:$0xff]   ;;  %v20311_v37 = vld [vmem:[#allocation23 + $0x34] ss:$8 sps:$4 sm:$0xff]   ;;  %v20306_v34 = vld [vmem:[#allocation23 + $0x140] ss:$8 sps:$4 sm:$0xff]  }
 0x9f1   : > { %v11675_v40 = vadd.f32 %v11663_v50, %v11645_v22  ;;  %v18915_v45 = vpack.i.bf16 %v11674_v31, %v11670_v21  ;;  %v20308_v50 = vld [vmem:[#allocation23 + $0x144] ss:$8 sps:$4 sm:$0xff]  }
 0x9f2   : > { %v20317_v22 = vld [vmem:[#allocation23 + $0x24] ss:$8 sps:$4 sm:$0xff]  }
 0x9f3   : > { %18916 = vrot.lane.b32.xlu0 %v18915_v45, %s21654_s7  ;;  %v18920_v9 = vpack.i.bf16 %v11675_v40, %v11671_v33  ;;  %v20320_v45 = vld [vmem:[#allocation23 + $0x124] ss:$8 sps:$4 sm:$0xff]  }
 0x9f5   : > { %18921 = vrot.lane.b32.xlu1 %v18920_v9, %s21654_s7  ;;  %v20323_v9 = vld [vmem:[#allocation23 + $0x14] ss:$8 sps:$4 sm:$0xff]  }
 0xa25   : > { %v18907_v17 = vpop.permute.xlu0 %18906 }
 0xa26   : > { %v18909_v36 = vunpack.i.h.bf16 %v18907_v17  ;;  %v18908_v39 = vunpack.i.l.bf16 %v18907_v17  ;;  %v20321_v17 = vld [vmem:[#allocation23 + $0x10] ss:$8 sps:$4 sm:$0xff]  }
 0xa27   : > { %v18912_v57 = vpop.permute.xlu1 %18911 }
 0xa28   : > { %v18914_v32 = vunpack.i.h.bf16 %v18912_v57  ;;  %v18913_v2 = vunpack.i.l.bf16 %v18912_v57  ;;  %v20318_v57 = vld [vmem:[#allocation23 + $0x120] ss:$8 sps:$4 sm:$0xff]  }
 0xa2a   : > { %v11697_v59 = vsel %vm4247_vm7, %v18909_v36, %v18914_v32  ;;  %v11696_v43 = vsel %vm4247_vm7, %v18908_v39, %v18913_v2 }
 0xa2b   : > { %v11704_v16 = vmax.f32 %v23421_v18, %v11697_v59  ;;  %v11700_v15 = vmax.f32 %v23419_v30, %v11696_v43  ;;  %v20332_v59 = vld [vmem:[#allocation23 + $0x104] ss:$8 sps:$4 sm:$0xff]   ;;  %v20335_v43 = vld [vmem:[#allocation23 + $0xf4] ss:$8 sps:$4 sm:$0xff]  }
 0xa2d   : > { %v11708_v18 = vpack.c.bf16 %v11704_v16, %v11700_v15  ;;  %v20341_v16 = vld [vmem:[#allocation23 + $0xe4] ss:$8 sps:$4 sm:$0xff]   ;;  %v20336_v15 = vld [vmem:[#allocation23 + $0x1f0] ss:$8 sps:$4 sm:$0xff]  }
 0xa65   : > { %v18917_v35 = vpop.permute.xlu0 %18916 }
 0xa66   : > { %v18919_v29 = vunpack.i.h.bf16 %v18917_v35  ;;  %v18918_v54 = vunpack.i.l.bf16 %v18917_v35  ;;  %v20330_v35 = vld [vmem:[#allocation23 + $0x100] ss:$8 sps:$4 sm:$0xff]  }
 0xa67   : > { %v18922_v47 = vpop.permute.xlu1 %18921 }
 0xa68   : > { %v11694_v60 = vsel %vm4247_vm7, %v18913_v2, %v18918_v54  ;;  %v11695_v62 = vsel %vm4247_vm7, %v18914_v32, %v18919_v29  ;;  %v18924_v56 = vunpack.i.h.bf16 %v18922_v47  ;;  %v18923_v23 = vunpack.i.l.bf16 %v18922_v47  ;;  %v20326_v32 = vld [vmem:[#allocation23 + $0x114] ss:$8 sps:$4 sm:$0xff]   ;;  %v20329_v2 = vld [vmem:[#allocation23 + $0x4] ss:$8 sps:$4 sm:$0xff]   ;;  %v20339_v47 = vld [vmem:[#allocation23 + $0xe0] ss:$8 sps:$4 sm:$0xff]  }
 0xa69   : > { %v11701_v44 = vmax.f32 %v11669_v58, %v11694_v60  ;;  %v11705_v8 = vmax.f32 %v11673_v14, %v11695_v62  ;;  %v20283_v14 = vld [vmem:[#allocation20] sm:$0x3f]   ;;  %v20344_v60 = vld [vmem:[#allocation23 + $0x1e4] ss:$8 sps:$4 sm:$0xff]  }
 0xa6a   : > { %v11693_v28 = vsel %vm4247_vm7, %v18919_v29, %v18924_v56  ;;  %v11699_v3 = vsel %vm4247_vm7, %v18924_v56, %v18909_v36  ;;  %v11692_v27 = vsel %vm4247_vm7, %v18918_v54, %v18923_v23  ;;  %v11698_v51 = vsel %vm4247_vm7, %v18923_v23, %v18908_v39  ;;  %v20324_v36 = vld [vmem:[#allocation23 + $0x110] ss:$8 sps:$4 sm:$0xff]   ;;  %v20327_v39 = vld [vmem:[#allocation23] ss:$8 sps:$4 sm:$0xff]   ;;  %v20338_v54 = vld [vmem:[#allocation23 + $0x1f4] ss:$8 sps:$4 sm:$0xff]  }
 0xa6b   : > { %v11706_v48 = vmax.f32 %v11674_v31, %v11693_v28  ;;  %v11702_v20 = vmax.f32 %v11670_v21, %v11692_v27  ;;  %v11709_v42 = vpack.c.bf16 %v11705_v8, %v11701_v44  ;;  %v11703_v30 = vmax.f32 %v11671_v33, %v11698_v51  ;;  %v20309_v21 = vld [vmem:[#allocation23 + $0x30] ss:$8 sps:$4 sm:$0xff]   ;;  %v20314_v31 = vld [vmem:[#allocation23 + $0x134] ss:$8 sps:$4 sm:$0xff]   ;;  %v20342_v56 = vld [vmem:[#allocation23 + $0x1e0] ss:$8 sps:$4 sm:$0xff]  }
 0xa6c   : > { %v11707_v5 = vmax.f32 %v11675_v40, %v11699_v3  ;;  %v20312_v33 = vld [vmem:[#allocation23 + $0x130] ss:$8 sps:$4 sm:$0xff]   ;;  %v20315_v40 = vld [vmem:[#allocation23 + $0x20] ss:$8 sps:$4 sm:$0xff]   ;;  %v20347_v62 = vld [vmem:[#allocation23 + $0xd4] ss:$8 sps:$4 sm:$0xff]  }
 0xa6d   : > { %11737 = vmatprep.subr.bf16.mxu0 %v11709_v42  ;;  %v11710_v58 = vpack.c.bf16 %v11706_v48, %v11702_v20  ;;  %v20333_v29 = vld [vmem:[#allocation23 + $0xf0] ss:$8 sps:$4 sm:$0xff]   ;;  %v20350_v44 = vld [vmem:[#allocation23 + $0x1d4] ss:$8 sps:$4 sm:$0xff]   ;;  %v20351_v28 = vld [vmem:[#allocation23 + $0xc0] ss:$8 sps:$4 sm:$0xff]  }
 0xa6e   : > { %11738 = vmatpush1.bf16.msra.mxu0 %v11708_v18  ;;  %v11711_v55 = vpack.c.bf16 %v11707_v5, %v11703_v30  ;;  %v20345_v23 = vld [vmem:[#allocation23 + $0xd0] ss:$8 sps:$4 sm:$0xff]   ;;  %v20353_v3 = vld [vmem:[#allocation23 + $0xc4] ss:$8 sps:$4 sm:$0xff]   ;;  %v20354_v27 = vld [vmem:[#allocation23 + $0x1c0] ss:$8 sps:$4 sm:$0xff]  }
 0xa6f   : > { %11833 = vmatprep.subr.bf16.mxu0 %v11709_v42  ;;  %v20348_v8 = vld [vmem:[#allocation23 + $0x1d0] ss:$8 sps:$4 sm:$0xff]   ;;  %v20356_v51 = vld [vmem:[#allocation23 + $0x1c4] ss:$8 sps:$4 sm:$0xff]   ;;  %v20359_v20 = vld [vmem:[#allocation23 + $0xb4] ss:$8 sps:$4 sm:$0xff]  }
 0xa70   : > { %11780 = vmatprep.subr.bf16.mxu1 %v11711_v55  ;;  %v20357_v48 = vld [vmem:[#allocation23 + $0xb0] ss:$8 sps:$4 sm:$0xff]   ;;  %v20362_v30 = vld [vmem:[#allocation23 + $0x1b4] ss:$8 sps:$4 sm:$0xff]   ;;  %v20365_v5 = vld [vmem:[#allocation23 + $0xa4] ss:$8 sps:$4 sm:$0xff]  }
 0xa71   : > { %11781 = vmatpush1.bf16.msra.mxu1 %v11710_v58  ;;  %17843 = vmatmul.mubr.msk.bf16.vlgmr.msra.gmra.mxu0 %vm11719_vm8, %v20283_v14  ;;  %v20360_v42 = vld [vmem:[#allocation23 + $0x1b0] ss:$8 sps:$4 sm:$0xff]  }
 0xa72   : > { %11876 = vmatprep.subr.bf16.mxu1 %v11711_v55  ;;  %11834 = vmatpush1.bf16.msra.mxu0 %v11708_v18  ;;  %v20363_v18 = vld [vmem:[#allocation23 + $0xa0] ss:$8 sps:$4 sm:$0xff]   ;;  %v20369_v55 = vld [vmem:[#allocation23 + $0x90] ss:$8 sps:$4 sm:$0xff]  }
 0xa73   : > { %11851 = vmatprep.mubr.bf16.mxu0 %v23965_v53  ;;  %12301 = vmatprep.subr.bf16.mxu0 %v20287_v19  ;;  %v20371_v19 = vld [vmem:[#allocation23 + $0x94] ss:$8 sps:$4 sm:$0xff]  }
 0xa74   : > { %17844 = vmatmul.mubr.msk.bf16.vlgmr.msra.gmra.mxu1 %vm11719_vm8, %v20283_v14  ;;  %v20368_v14 = vld [vmem:[#allocation23 + $0x1a4] ss:$8 sps:$4 sm:$0xff]  }
 0xa75   : > { %11877 = vmatpush1.bf16.msra.mxu1 %v11710_v58  ;;  %11894 = vmatprep.mubr.bf16.mxu1 %v23965_v53  ;;  %v20366_v58 = vld [vmem:[#allocation23 + $0x1a0] ss:$8 sps:$4 sm:$0xff]  }
 0xa76   : > { %12344 = vmatprep.subr.bf16.mxu1 %v20290_v12  ;;  %v20374_v12 = vld [vmem:[#allocation23 + $0x194] ss:$8 sps:$4 sm:$0xff]  }
 0xa79   : > { %17846 = vmatmul.mubr.msk.bf16.vlgmr.msra.gmra.mxu0 %vm11719_vm8, %v20284_v10 }
 0xa7a   : > { %12302 = vmatpush1.bf16.msra.mxu0 %v20285_v4  ;;  %v20377_v4 = vld [vmem:[#allocation23 + $0x84] ss:$8 sps:$4 sm:$0xff]  }
 0xa7b   : > { %12303 = vmatprep.subr.bf16.mxu0 %v20293_v11  ;;  %v20375_v11 = vld [vmem:[#allocation23 + $0x80] ss:$8 sps:$4 sm:$0xff]  }
 0xa7c   : > { %17847 = vmatmul.mubr.msk.bf16.vlgmr.msra.gmra.mxu1 %vm11719_vm8, %v20284_v10  ;;  %v20372_v10 = vld [vmem:[#allocation23 + $0x190] ss:$8 sps:$4 sm:$0xff]  }
 0xa7d   : > { %12345 = vmatpush1.bf16.msra.mxu1 %v20288_v41  ;;  %v20378_v41 = vld [vmem:[#allocation23 + $0x180] ss:$8 sps:$4 sm:$0xff]  }
 0xa7e   : > { %12304 = vmatpush1.bf16.msra.mxu0 %v20291_v13  ;;  %12346 = vmatprep.subr.bf16.mxu1 %v20296_v24  ;;  %v20380_v13 = vld [vmem:[#allocation23 + $0x184] ss:$8 sps:$4 sm:$0xff]  }
 0xa7f   : > { %12305 = vmatprep.subr.bf16.mxu0 %v20299_v38  ;;  %v20383_v24 = vld [vmem:[#allocation24 + $0x2e4] ss:$16 sps:$4 sm:$0xff]   ;;  %v20386_v38 = vld [vmem:[#allocation24 + $0x2ec] ss:$16 sps:$4 sm:$0xff]  }
 0xa81   : > { %12347 = vmatpush1.bf16.msra.mxu1 %v20294_v46 }
 0xa82   : > { %12306 = vmatpush1.bf16.msra.mxu0 %v20297_v26  ;;  %12348 = vmatprep.subr.bf16.mxu1 %v20302_v1 }
 0xa83   : > { %12307 = vmatprep.subr.bf16.mxu0 %v20305_v52 }
 0xa85   : > { %12349 = vmatpush1.bf16.msra.mxu1 %v20300_v61 }
 0xa86   : > { %12308 = vmatpush1.bf16.msra.mxu0 %v20303_v7  ;;  %12350 = vmatprep.subr.bf16.mxu1 %v20308_v50 }
 0xa87   : > { %12309 = vmatprep.subr.bf16.mxu0 %v20311_v37 }
 0xa89   : > { %12351 = vmatpush1.bf16.msra.mxu1 %v20306_v34 }
 0xa8a   : > { %12310 = vmatpush1.bf16.msra.mxu0 %v20309_v21  ;;  %12352 = vmatprep.subr.bf16.mxu1 %v20314_v31 }
 0xa8b   : > { %12311 = vmatprep.subr.bf16.mxu0 %v20317_v22 }
 0xa8d   : > { %12353 = vmatpush1.bf16.msra.mxu1 %v20312_v33 }
 0xa8e   : > { %12312 = vmatpush1.bf16.msra.mxu0 %v20315_v40  ;;  %12354 = vmatprep.subr.bf16.mxu1 %v20320_v45 }
 0xa8f   : > { %12313 = vmatprep.subr.bf16.mxu0 %v20323_v9 }
 0xa91   : > { %12355 = vmatpush1.bf16.msra.mxu1 %v20318_v57 }
 0xa92   : > { %12314 = vmatpush1.bf16.msra.mxu0 %v20321_v17  ;;  %12356 = vmatprep.subr.bf16.mxu1 %v20326_v32 }
 0xa93   : > { %12315 = vmatprep.subr.bf16.mxu0 %v20329_v2 }
 0xa95   : > { %12357 = vmatpush1.bf16.msra.mxu1 %v20324_v36 }
 0xa96   : > { %12316 = vmatpush1.bf16.msra.mxu0 %v20327_v39  ;;  %12358 = vmatprep.subr.bf16.mxu1 %v20332_v59  ;;  %v20381_v59 = vld [vmem:[#allocation24 + $0x2e0] ss:$16 sps:$4 sm:$0xff]  }
 0xa97   : > { %12317 = vmatprep.subr.bf16.mxu0 %v20335_v43 }
 0xa99   : > { %12359 = vmatpush1.bf16.msra.mxu1 %v20330_v35 }
 0xa9a   : > { %12318 = vmatpush2.bf16.msra.mxu0 %v20333_v29  ;;  %12360 = vmatprep.subr.bf16.mxu1 %v20338_v54  ;;  %v20389_v54 = vld [vmem:[#allocation24 + $0x2c4] ss:$16 sps:$4 sm:$0xff]  }
 0xa9b   : > { %12319 = vmatprep.subr.bf16.mxu0 %v20341_v16 }
 0xa9d   : > { %12361 = vmatpush2.bf16.msra.mxu1 %v20336_v15 }
 0xa9e   : > { %12320 = vmatpush2.bf16.msra.mxu0 %v20339_v47  ;;  %12362 = vmatprep.subr.bf16.mxu1 %v20344_v60  ;;  %v20384_v47 = vld [vmem:[#allocation24 + $0x2e8] ss:$16 sps:$4 sm:$0xff]  }
 0xa9f   : > { %12321 = vmatprep.subr.bf16.mxu0 %v20347_v62  ;;  %v20387_v62 = vld [vmem:[#allocation24 + $0x2c0] ss:$16 sps:$4 sm:$0xff]  }
 0xaa1   : > { %12363 = vmatpush2.bf16.msra.mxu1 %v20342_v56  ;;  %v20392_v56 = vld [vmem:[#allocation24 + $0x2cc] ss:$16 sps:$4 sm:$0xff]  }
 0xaa2   : > { %12322 = vmatpush2.bf16.msra.mxu0 %v20345_v23  ;;  %12364 = vmatprep.subr.bf16.mxu1 %v20350_v44  ;;  %v20395_v23 = vld [vmem:[#allocation24 + $0x2a4] ss:$16 sps:$4 sm:$0xff]   ;;  %v20390_v44 = vld [vmem:[#allocation24 + $0x2c8] ss:$16 sps:$4 sm:$0xff]  }
 0xaa3   : > { %12323 = vmatprep.subr.bf16.mxu0 %v20353_v3  ;;  %v20401_v3 = vld [vmem:[#allocation24 + $0x284] ss:$16 sps:$4 sm:$0xff]  }
 0xaa5   : > { %12365 = vmatpush2.bf16.msra.mxu1 %v20348_v8  ;;  %v20393_v8 = vld [vmem:[#allocation24 + $0x2a0] ss:$16 sps:$4 sm:$0xff]  }
 0xaa6   : > { %12324 = vmatpush2.bf16.msra.mxu0 %v20351_v28  ;;  %12366 = vmatprep.subr.bf16.mxu1 %v20356_v51  ;;  %v20398_v28 = vld [vmem:[#allocation24 + $0x2ac] ss:$16 sps:$4 sm:$0xff]   ;;  %v20399_v51 = vld [vmem:[#allocation24 + $0x280] ss:$16 sps:$4 sm:$0xff]  }
 0xaa7   : > { %12325 = vmatprep.subr.bf16.mxu0 %v20359_v20  ;;  %v20407_v20 = vld [vmem:[#allocation24 + $0x264] ss:$16 sps:$4 sm:$0xff]  }
 0xaa9   : > { %12367 = vmatpush2.bf16.msra.mxu1 %v20354_v27  ;;  %v20396_v27 = vld [vmem:[#allocation24 + $0x2a8] ss:$16 sps:$4 sm:$0xff]  }
 0xaaa   : > { %12326 = vmatpush2.bf16.msra.mxu0 %v20357_v48  ;;  %12368 = vmatprep.subr.bf16.mxu1 %v20362_v30  ;;  %v20404_v48 = vld [vmem:[#allocation24 + $0x28c] ss:$16 sps:$4 sm:$0xff]   ;;  %v20405_v30 = vld [vmem:[#allocation24 + $0x260] ss:$16 sps:$4 sm:$0xff]  }
 0xaab   : > { %12327 = vmatprep.subr.bf16.mxu0 %v20365_v5  ;;  %v20413_v5 = vld [vmem:[#allocation24 + $0x244] ss:$16 sps:$4 sm:$0xff]  }
 0xaad   : > { %12369 = vmatpush2.bf16.msra.mxu1 %v20360_v42  ;;  %v20402_v42 = vld [vmem:[#allocation24 + $0x288] ss:$16 sps:$4 sm:$0xff]  }
 0xaae   : > { %12328 = vmatpush2.bf16.msra.mxu0 %v20363_v18  ;;  %12370 = vmatprep.subr.bf16.mxu1 %v20368_v14  ;;  %v20410_v18 = vld [vmem:[#allocation24 + $0x26c] ss:$16 sps:$4 sm:$0xff]   ;;  %v20411_v14 = vld [vmem:[#allocation24 + $0x240] ss:$16 sps:$4 sm:$0xff]  }
 0xaaf   : > { %12329 = vmatprep.subr.bf16.mxu0 %v20371_v19  ;;  %v20419_v19 = vld [vmem:[#allocation24 + $0x224] ss:$16 sps:$4 sm:$0xff]  }
 0xab1   : > { %12371 = vmatpush2.bf16.msra.mxu1 %v20366_v58  ;;  %v20408_v58 = vld [vmem:[#allocation24 + $0x268] ss:$16 sps:$4 sm:$0xff]  }
 0xab2   : > { %12330 = vmatpush2.bf16.msra.mxu0 %v20369_v55  ;;  %12372 = vmatprep.subr.bf16.mxu1 %v20374_v12  ;;  %v20416_v55 = vld [vmem:[#allocation24 + $0x24c] ss:$16 sps:$4 sm:$0xff]   ;;  %v20414_v12 = vld [vmem:[#allocation24 + $0x248] ss:$16 sps:$4 sm:$0xff]  }
 0xab3   : > { %12331 = vmatprep.subr.bf16.mxu0 %v20377_v4  ;;  %v20422_v4 = vld [vmem:[#allocation24 + $0x22c] ss:$16 sps:$4 sm:$0xff]  }
 0xab5   : > { %12373 = vmatpush2.bf16.msra.mxu1 %v20372_v10  ;;  %v20417_v10 = vld [vmem:[#allocation24 + $0x220] ss:$16 sps:$4 sm:$0xff]  }
 0xab6   : > { %12332 = vmatpush2.bf16.msra.mxu0 %v20375_v11  ;;  %12374 = vmatprep.subr.bf16.mxu1 %v20380_v13  ;;  %v20425_v11 = vld [vmem:[#allocation24 + $0x204] ss:$16 sps:$4 sm:$0xff]   ;;  %v20423_v13 = vld [vmem:[#allocation24 + $0x200] ss:$16 sps:$4 sm:$0xff]  }
 0xab7   : > { %12864 = vmatprep.subr.bf16.mxu0 %v20383_v24  ;;  %v20428_v24 = vld [vmem:[#allocation24 + $0x20c] ss:$16 sps:$4 sm:$0xff]  }
 0xab9   : > { %12375 = vmatpush2.bf16.msra.mxu1 %v20378_v41  ;;  %v20420_v41 = vld [vmem:[#allocation24 + $0x228] ss:$16 sps:$4 sm:$0xff]  }
 0xaba   : > { %12905 = vmatprep.subr.bf16.mxu1 %v20386_v38  ;;  %v20431_v38 = vld [vmem:[#allocation24 + $0x3e4] ss:$16 sps:$4 sm:$0xff]  }
 0xb31   : > { %v11757_v46 = vpop.f32.mrf.mxu0 }
 0xb33   : > { %v11759_v26 = vpop.f32.mrf.mxu0 }
 0xb34   : > { %v11800_v1 = vpop.f32.mrf.mxu1 }
 0xb35   : > { %v11761_v52 = vpop.f32.mrf.mxu0 }
 0xb36   : > { %v11802_v61 = vpop.f32.mrf.mxu1 }
 0xb37   : > { %v11763_v7 = vpop.f32.mrf.mxu0 }
 0xb38   : > { %v11804_v50 = vpop.f32.mrf.mxu1 }
 0xb39   : > { %v11853_v37 = vpop.f32.mrf.mxu0 }
 0xb3a   : > { %v11806_v34 = vpop.f32.mrf.mxu1  ;;  %v11905_v32 = vmax.f32 %v11757_v46, %v11853_v37  ;;  %v20426_v46 = vld [vmem:[#allocation24 + $0x208] ss:$16 sps:$4 sm:$0xff]  }
 0xb3b   : > { %v11855_v21 = vpop.f32.mrf.mxu0  ;;  %v20438_v37 = vld [vmem:[#allocation24 + $0x3c8] ss:$16 sps:$4 sm:$0xff]  }
 0xb3c   : > { %v11896_v31 = vpop.f32.mrf.mxu1  ;;  %v11906_v9 = vmax.f32 %v11759_v26, %v11855_v21  ;;  %v20429_v26 = vld [vmem:[#allocation24 + $0x3e0] ss:$16 sps:$4 sm:$0xff]   ;;  %v20443_v21 = vld [vmem:[#allocation24 + $0x3a4] ss:$16 sps:$4 sm:$0xff]  }
 0xb3d   : > { %v11857_v22 = vpop.f32.mrf.mxu0  ;;  %v11907_v16 = vmax.f32 %v11800_v1, %v11896_v31  ;;  %v20434_v1 = vld [vmem:[#allocation24 + $0x3ec] ss:$16 sps:$4 sm:$0xff]   ;;  %v20444_v31 = vld [vmem:[#allocation24 + $0x3a8] ss:$16 sps:$4 sm:$0xff]  }
 0xb3e   : > { %v11898_v33 = vpop.f32.mrf.mxu1  ;;  %v11909_v40 = vmax.f32 %v11761_v52, %v11857_v22  ;;  %v20437_v52 = vld [vmem:[#allocation24 + $0x3c4] ss:$16 sps:$4 sm:$0xff]   ;;  %v20446_v22 = vld [vmem:[#allocation24 + $0x3ac] ss:$16 sps:$4 sm:$0xff]  }
 0xb3f   : > { %v11859_v45 = vpop.f32.mrf.mxu0  ;;  %v11908_v35 = vmax.f32 %v11802_v61, %v11898_v33  ;;  %v20432_v61 = vld [vmem:[#allocation24 + $0x3e8] ss:$16 sps:$4 sm:$0xff]   ;;  %v20447_v33 = vld [vmem:[#allocation24 + $0x380] ss:$16 sps:$4 sm:$0xff]  }
 0xb40   : > { %v11910_v57 = vmax.f32 %v11763_v7, %v11859_v45  ;;  %v11900_v17 = vpop.f32.mrf.mxu1  ;;  %v11913_v43 = vpack.c.bf16 %v11909_v40, %v11905_v32  ;;  %v20435_v7 = vld [vmem:[#allocation24 + $0x3c0] ss:$16 sps:$4 sm:$0xff]   ;;  %v20449_v40 = vld [vmem:[#allocation24 + $0x384] ss:$16 sps:$4 sm:$0xff]   ;;  %v20450_v45 = vld [vmem:[#allocation24 + $0x388] ss:$16 sps:$4 sm:$0xff]  }
 0xb41   : > { %v11911_v36 = vmax.f32 %v11804_v50, %v11900_v17  ;;  %v20440_v50 = vld [vmem:[#allocation24 + $0x3cc] ss:$16 sps:$4 sm:$0xff]   ;;  %v20453_v17 = vld [vmem:[#allocation24 + $0x360] ss:$16 sps:$4 sm:$0xff]  }
 0xb42   : > { %v11914_v2 = vpack.c.bf16 %v11910_v57, %v11906_v9  ;;  %v11902_v39 = vpop.f32.mrf.mxu1  ;;  %v20452_v9 = vld [vmem:[#allocation24 + $0x38c] ss:$16 sps:$4 sm:$0xff]   ;;  %v20455_v57 = vld [vmem:[#allocation24 + $0x364] ss:$16 sps:$4 sm:$0xff]  }
 0xb43   : > { %v11912_v29 = vmax.f32 %v11806_v34, %v11902_v39  ;;  %v11915_v60 = vpack.c.bf16 %v11911_v36, %v11907_v16  ;;  %v20441_v34 = vld [vmem:[#allocation24 + $0x3a0] ss:$16 sps:$4 sm:$0xff]   ;;  %v20458_v32 = vld [vmem:[#allocation24 + $0x36c] ss:$16 sps:$4 sm:$0xff]   ;;  %v20461_v36 = vld [vmem:[#allocation24 + $0x344] ss:$16 sps:$4 sm:$0xff]  }
 0xb44   : > { %12333 = vmatprep.mubr.bf16.mxu0 %v11914_v2  ;;  %v20456_v2 = vld [vmem:[#allocation24 + $0x368] ss:$16 sps:$4 sm:$0xff]   ;;  %v20464_v39 = vld [vmem:[#allocation24 + $0x34c] ss:$16 sps:$4 sm:$0xff]  }
 0xb45   : > { %v11916_v15 = vpack.c.bf16 %v11912_v29, %v11908_v35  ;;  %12334 = vmatmul.mubr.bf16.vlgmr.msra.gmra.mxu0 %v11913_v43  ;;  %v20462_v43 = vld [vmem:[#allocation24 + $0x348] ss:$16 sps:$4 sm:$0xff]   ;;  %v20467_v35 = vld [vmem:[#allocation24 + $0x324] ss:$16 sps:$4 sm:$0xff]   ;;  %v20470_v29 = vld [vmem:[#allocation24 + $0x32c] ss:$16 sps:$4 sm:$0xff]  }
 0xb46   : > { %12865 = vmatpush1.bf16.msra.mxu0 %v20381_v59  ;;  %v20459_v59 = vld [vmem:[#allocation24 + $0x340] ss:$16 sps:$4 sm:$0xff]   ;;  %v20468_v16 = vld [vmem:[#allocation24 + $0x328] ss:$16 sps:$4 sm:$0xff]  }
 0xb47   : > { %12376 = vmatprep.mubr.bf16.mxu1 %v11916_v15  ;;  %12866 = vmatprep.subr.bf16.mxu0 %v20389_v54  ;;  %v20465_v54 = vld [vmem:[#allocation24 + $0x320] ss:$16 sps:$4 sm:$0xff]   ;;  %v20473_v15 = vld [vmem:[#allocation24 + $0x304] ss:$16 sps:$4 sm:$0xff]  }
 0xb48   : > { %12377 = vmatmul.mubr.bf16.vlgmr.msra.gmra.mxu1 %v11915_v60  ;;  %v20471_v60 = vld [vmem:[#allocation24 + $0x300] ss:$16 sps:$4 sm:$0xff]  }
 0xb49   : > { %12906 = vmatpush1.bf16.msra.mxu1 %v20384_v47  ;;  %v20476_v47 = vld [vmem:[#allocation24 + $0x30c] ss:$16 sps:$4 sm:$0xff]  }
 0xb4a   : > { %12907 = vmatprep.subr.bf16.mxu1 %v20392_v56  ;;  %12867 = vmatpush1.bf16.msra.mxu0 %v20387_v62  ;;  %v20474_v62 = vld [vmem:[#allocation24 + $0x308] ss:$16 sps:$4 sm:$0xff]   ;;  %v20479_v56 = vld [vmem:[#allocation24 + $0xe4] ss:$16 sps:$4 sm:$0xff]  }
 0xb4b   : > { %12868 = vmatprep.subr.bf16.mxu0 %v20395_v23  ;;  %v20482_v23 = vld [vmem:[#allocation24 + $0xec] ss:$16 sps:$4 sm:$0xff]  }
 0xb4d   : > { %12908 = vmatpush1.bf16.msra.mxu1 %v20390_v44 }
 0xb4e   : > { %12909 = vmatprep.subr.bf16.mxu1 %v20398_v28  ;;  %12869 = vmatpush1.bf16.msra.mxu0 %v20393_v8 }
 0xb4f   : > { %12870 = vmatprep.subr.bf16.mxu0 %v20401_v3 }
 0xb51   : > { %12910 = vmatpush1.bf16.msra.mxu1 %v20396_v27 }
 0xb52   : > { %12911 = vmatprep.subr.bf16.mxu1 %v20404_v48  ;;  %12871 = vmatpush1.bf16.msra.mxu0 %v20399_v51 }
 0xb53   : > { %12872 = vmatprep.subr.bf16.mxu0 %v20407_v20 }
 0xb55   : > { %12912 = vmatpush1.bf16.msra.mxu1 %v20402_v42 }
 0xb56   : > { %12913 = vmatprep.subr.bf16.mxu1 %v20410_v18  ;;  %12873 = vmatpush1.bf16.msra.mxu0 %v20405_v30 }
 0xb57   : > { %12874 = vmatprep.subr.bf16.mxu0 %v20413_v5 }
 0xb59   : > { %12914 = vmatpush1.bf16.msra.mxu1 %v20408_v58 }
 0xb5a   : > { %12915 = vmatprep.subr.bf16.mxu1 %v20416_v55  ;;  %12875 = vmatpush1.bf16.msra.mxu0 %v20411_v14 }
 0xb5b   : > { %12876 = vmatprep.subr.bf16.mxu0 %v20419_v19 }
 0xb5d   : > { %12916 = vmatpush1.bf16.msra.mxu1 %v20414_v12 }
 0xb5e   : > { %12917 = vmatprep.subr.bf16.mxu1 %v20422_v4  ;;  %12877 = vmatpush1.bf16.msra.mxu0 %v20417_v10 }
 0xb5f   : > { %12878 = vmatprep.subr.bf16.mxu0 %v20425_v11 }
 0xb61   : > { %12918 = vmatpush1.bf16.msra.mxu1 %v20420_v41 }
 0xb62   : > { %12919 = vmatprep.subr.bf16.mxu1 %v20428_v24  ;;  %12879 = vmatpush1.bf16.msra.mxu0 %v20423_v13 }
 0xb63   : > { %12880 = vmatprep.subr.bf16.mxu0 %v20431_v38 }
 0xb65   : > { %12920 = vmatpush1.bf16.msra.mxu1 %v20426_v46 }
 0xb66   : > { %12921 = vmatprep.subr.bf16.mxu1 %v20434_v1  ;;  %12881 = vmatpush2.bf16.msra.mxu0 %v20429_v26 }
 0xb67   : > { %12882 = vmatprep.subr.bf16.mxu0 %v20437_v52  ;;  %v20477_v52 = vld [vmem:[#allocation24 + $0xe0] ss:$16 sps:$4 sm:$0xff]  }
 0xb69   : > { %12922 = vmatpush2.bf16.msra.mxu1 %v20432_v61  ;;  %v20480_v61 = vld [vmem:[#allocation24 + $0xe8] ss:$16 sps:$4 sm:$0xff]  }
 0xb6a   : > { %12923 = vmatprep.subr.bf16.mxu1 %v20440_v50  ;;  %12883 = vmatpush2.bf16.msra.mxu0 %v20435_v7 }
 0xb6b   : > { %12884 = vmatprep.subr.bf16.mxu0 %v20443_v21  ;;  %v20488_v21 = vld [vmem:[#allocation24 + $0xcc] ss:$16 sps:$4 sm:$0xff]  }
 0xb6d   : > { %12924 = vmatpush2.bf16.msra.mxu1 %v20438_v37 }
 0xb6e   : > { %12925 = vmatprep.subr.bf16.mxu1 %v20446_v22  ;;  %12885 = vmatpush2.bf16.msra.mxu0 %v20441_v34  ;;  %v20485_v34 = vld [vmem:[#allocation24 + $0xc4] ss:$16 sps:$4 sm:$0xff]   ;;  %v20483_v22 = vld [vmem:[#allocation24 + $0xc0] ss:$16 sps:$4 sm:$0xff]  }
 0xb6f   : > { %12886 = vmatprep.subr.bf16.mxu0 %v20449_v40  ;;  %v20491_v40 = vld [vmem:[#allocation24 + $0xa4] ss:$16 sps:$4 sm:$0xff]  }
 0xb71   : > { %12926 = vmatpush2.bf16.msra.mxu1 %v20444_v31 }
 0xb72   : > { %12927 = vmatprep.subr.bf16.mxu1 %v20452_v9  ;;  %12887 = vmatpush2.bf16.msra.mxu0 %v20447_v33  ;;  %v20486_v33 = vld [vmem:[#allocation24 + $0xc8] ss:$16 sps:$4 sm:$0xff]   ;;  %v20489_v9 = vld [vmem:[#allocation24 + $0xa0] ss:$16 sps:$4 sm:$0xff]  }
 0xb73   : > { %12888 = vmatprep.subr.bf16.mxu0 %v20455_v57  ;;  %v20492_v57 = vld [vmem:[#allocation24 + $0xa8] ss:$16 sps:$4 sm:$0xff]  }
 0xb75   : > { %12928 = vmatpush2.bf16.msra.mxu1 %v20450_v45  ;;  %v20494_v45 = vld [vmem:[#allocation24 + $0xac] ss:$16 sps:$4 sm:$0xff]  }
 0xb76   : > { %12929 = vmatprep.subr.bf16.mxu1 %v20458_v32  ;;  %12889 = vmatpush2.bf16.msra.mxu0 %v20453_v17  ;;  %v20497_v17 = vld [vmem:[#allocation24 + $0x84] ss:$16 sps:$4 sm:$0xff]   ;;  %v20500_v32 = vld [vmem:[#allocation24 + $0x8c] ss:$16 sps:$4 sm:$0xff]  }
 0xb77   : > { %12890 = vmatprep.subr.bf16.mxu0 %v20461_v36  ;;  %v20498_v36 = vld [vmem:[#allocation24 + $0x88] ss:$16 sps:$4 sm:$0xff]  }
 0xb79   : > { %12930 = vmatpush2.bf16.msra.mxu1 %v20456_v2  ;;  %v20495_v2 = vld [vmem:[#allocation24 + $0x80] ss:$16 sps:$4 sm:$0xff]  }
 0xb7a   : > { %12931 = vmatprep.subr.bf16.mxu1 %v20464_v39  ;;  %12891 = vmatpush2.bf16.msra.mxu0 %v20459_v59  ;;  %v20503_v39 = vld [vmem:[#allocation24 + $0x64] ss:$16 sps:$4 sm:$0xff]   ;;  %v20506_v59 = vld [vmem:[#allocation24 + $0x6c] ss:$16 sps:$4 sm:$0xff]  }
 0xb7b   : > { %12892 = vmatprep.subr.bf16.mxu0 %v20467_v35  ;;  %v20504_v35 = vld [vmem:[#allocation24 + $0x68] ss:$16 sps:$4 sm:$0xff]  }
 0xb7d   : > { %12932 = vmatpush2.bf16.msra.mxu1 %v20462_v43  ;;  %v20501_v43 = vld [vmem:[#allocation24 + $0x60] ss:$16 sps:$4 sm:$0xff]  }
 0xb7e   : > { %12933 = vmatprep.subr.bf16.mxu1 %v20470_v29  ;;  %12893 = vmatpush2.bf16.msra.mxu0 %v20465_v54  ;;  %v20509_v29 = vld [vmem:[#allocation24 + $0x44] ss:$16 sps:$4 sm:$0xff]   ;;  %v20512_v54 = vld [vmem:[#allocation24 + $0x4c] ss:$16 sps:$4 sm:$0xff]  }
 0xb7f   : > { %12894 = vmatprep.subr.bf16.mxu0 %v20473_v15  ;;  %v20510_v15 = vld [vmem:[#allocation24 + $0x48] ss:$16 sps:$4 sm:$0xff]  }
 0xb81   : > { %12934 = vmatpush2.bf16.msra.mxu1 %v20468_v16  ;;  %v20507_v16 = vld [vmem:[#allocation24 + $0x40] ss:$16 sps:$4 sm:$0xff]  }
 0xb82   : > { %12935 = vmatprep.subr.bf16.mxu1 %v20476_v47  ;;  %12895 = vmatpush2.bf16.msra.mxu0 %v20471_v60  ;;  %v20515_v47 = vld [vmem:[#allocation24 + $0x24] ss:$16 sps:$4 sm:$0xff]   ;;  %v20518_v60 = vld [vmem:[#allocation24 + $0x2c] ss:$16 sps:$4 sm:$0xff]  }
 0xb83   : > { %13266 = vmatprep.subr.bf16.mxu0 %v20479_v56  ;;  %v20516_v56 = vld [vmem:[#allocation24 + $0x28] ss:$16 sps:$4 sm:$0xff]  }
 0xb85   : > { %12936 = vmatpush2.bf16.msra.mxu1 %v20474_v62  ;;  %v20513_v62 = vld [vmem:[#allocation24 + $0x20] ss:$16 sps:$4 sm:$0xff]  }
 0xb86   : > { %13307 = vmatprep.subr.bf16.mxu1 %v20482_v23  ;;  %v20521_v23 = vld [vmem:[#allocation24 + $0x4] ss:$16 sps:$4 sm:$0xff]  }
 0xc05   : > { %v12335_v44 = vpop.f32.mrf.mxu0 }
 0xc07   : > { %v12337_v8 = vpop.f32.mrf.mxu0 }
 0xc08   : > { %v12378_v28 = vpop.f32.mrf.mxu1 }
 0xc09   : > { %v23459_v3 = vadd.f32 %v12378_v28, %v12335_v44  ;;  %v12339_v27 = vpop.f32.mrf.mxu0  ;;  %v20524_v44 = vld [vmem:[#allocation24 + $0xc] ss:$16 sps:$4 sm:$0xff]   ;;  %v20522_v28 = vld [vmem:[#allocation24 + $0x8] ss:$16 sps:$4 sm:$0xff]  }
 0xc0a   : > { %v12380_v51 = vpop.f32.mrf.mxu1 }
 0xc0b   : > { %v12381_v48 = vadd.f32 %v12380_v51, %v12337_v8  ;;  %v12341_v30 = vpop.f32.mrf.mxu0  ;;  %v20519_v8 = vld [vmem:[#allocation24] ss:$16 sps:$4 sm:$0xff]   ;;  %v20530_v51 = vld [vmem:[#allocation24 + $0x1ec] ss:$16 sps:$4 sm:$0xff]  }
 0xc0c   : > { %v12382_v20 = vpop.f32.mrf.mxu1 }
 0xc0d   : > { %v12383_v42 = vadd.f32 %v12382_v20, %v12339_v27  ;;  %v12396_v31 = vpack.c.bf16 %v12381_v48, %v12381_v48  ;;  %v20527_v27 = vld [vmem:[#allocation24 + $0x1e4] ss:$16 sps:$4 sm:$0xff]   ;;  %v20528_v20 = vld [vmem:[#allocation24 + $0x1e8] ss:$16 sps:$4 sm:$0xff]  }
 0xc0e   : > { %v12384_v18 = vpop.f32.mrf.mxu1 }
 0xc0f   : > { %12389 = vst [vmem:[#allocation4 + $0x10] sm:$0xf] %v12383_v42  ;;  %v12385_v5 = vadd.f32 %v12384_v18, %v12341_v30  ;;  %v20533_v42 = vld [vmem:[#allocation24 + $0x1c4] ss:$16 sps:$4 sm:$0xff]   ;;  %v20536_v30 = vld [vmem:[#allocation24 + $0x1cc] ss:$16 sps:$4 sm:$0xff]  }
 0xc10   : > { %v20531_v18 = vld [vmem:[#allocation24 + $0x1c0] ss:$16 sps:$4 sm:$0xff]  }
 0xc11   : > { %12390 = vst [vmem:[#allocation4 + $0x18] sm:$0xf] %v12385_v5  ;;  %v20534_v5 = vld [vmem:[#allocation24 + $0x1c8] ss:$16 sps:$4 sm:$0xff]  }
 0xc16   : > { %v12393_v58 = vld [vmem:[#allocation4 + $0x10] sm:$0xf] }
 0xc17   : > { %v23462_v14 = vpack.c.bf16 %v12393_v58, %v23459_v3  ;;  %v20539_v58 = vld [vmem:[#allocation24 + $0x1a4] ss:$16 sps:$4 sm:$0xff]  }
 0xc18   : > { %v12394_v55 = vld [vmem:[#allocation4 + $0x18] sm:$0xf] }
 0xc19   : > { %v23464_v19 = vpack.c.bf16 %v12394_v55, %v12381_v48  ;;  %v12531_v12 = vshll.u32 %v23462_v14, 16  ;;  %v12529_v10 = vshrl.u32 %v23462_v14, 16  ;;  %v20525_v48 = vld [vmem:[#allocation24 + $0x1e0] ss:$16 sps:$4 sm:$0xff]   ;;  %v20542_v55 = vld [vmem:[#allocation24 + $0x1ac] ss:$16 sps:$4 sm:$0xff]  }
 0xc1b   : > { %v12536_v4 = vshrl.u32 %v23464_v19, 16  ;;  %v12538_v11 = vshll.u32 %v23464_v19, 16  ;;  %v12533_v41 = vrot.slane %v12531_v12, 1  ;;  %v13890_v46 = vrot.slane %v12529_v10, 1 }
 0xc1c   : > { %v13891_v26 = vrot.slane %v12531_v12, 2  ;;  %v20537_v12 = vld [vmem:[#allocation24 + $0x1a0] ss:$16 sps:$4 sm:$0xff]  }
 0xc1d   : > { %v12540_v13 = vrot.slane %v12538_v11, 1  ;;  %v13893_v24 = vrot.slane %v12536_v4, 1  ;;  %v13894_v38 = vrot.slane %v12538_v11, 2  ;;  %v12534_v50 = vor.u32 %v12533_v41, %v12529_v10  ;;  %v20540_v10 = vld [vmem:[#allocation24 + $0x1a8] ss:$16 sps:$4 sm:$0xff]  }
 0xc1e   : > { %v23472_v37 = vor.u32 %v13891_v26, %v13890_v46  ;;  %v20548_v11 = vld [vmem:[#allocation24 + $0x18c] ss:$16 sps:$4 sm:$0xff]   ;;  %v20543_v41 = vld [vmem:[#allocation24 + $0x180] ss:$16 sps:$4 sm:$0xff]   ;;  %v20552_v26 = vld [vmem:[#allocation24 + $0x168] ss:$16 sps:$4 sm:$0xff]  }
 0xc1f   : > { %v12541_v1 = vor.u32 %v12540_v13, %v12536_v4  ;;  %v23470_v7 = vor.u32 %v13894_v38, %v13893_v24  ;;  %v20545_v4 = vld [vmem:[#allocation24 + $0x184] ss:$16 sps:$4 sm:$0xff]   ;;  %v20546_v13 = vld [vmem:[#allocation24 + $0x188] ss:$16 sps:$4 sm:$0xff]   ;;  %v20554_v38 = vld [vmem:[#allocation24 + $0x16c] ss:$16 sps:$4 sm:$0xff]  }
 0xc20   : > { %v20551_v24 = vld [vmem:[#allocation24 + $0x164] ss:$16 sps:$4 sm:$0xff]   ;;  %v20549_v46 = vld [vmem:[#allocation24 + $0x160] ss:$16 sps:$4 sm:$0xff]  }
 0xc21   : > { %12896 = vmatprep.mubr.bf16.mxu0 %v12541_v1  ;;  %12937 = vmatprep.mubr.bf16.mxu1 %v12541_v1  ;;  %v20557_v1 = vld [vmem:[#allocation24 + $0x144] ss:$16 sps:$4 sm:$0xff]  }
 0xc22   : > { %12897 = vmatmul.mubr.bf16.vlgmr.msra.gmra.mxu0 %v12534_v50  ;;  %12938 = vmatmul.mubr.bf16.vlgmr.msra.gmra.mxu1 %v12534_v50  ;;  %v20558_v50 = vld [vmem:[#allocation24 + $0x148] ss:$16 sps:$4 sm:$0xff]  }
 0xc23   : > { %13267 = vmatpush1.bf16.msra.mxu0 %v20477_v52  ;;  %13308 = vmatpush1.bf16.msra.mxu1 %v20480_v61  ;;  %v20560_v52 = vld [vmem:[#allocation24 + $0x14c] ss:$16 sps:$4 sm:$0xff]   ;;  %v20555_v61 = vld [vmem:[#allocation24 + $0x140] ss:$16 sps:$4 sm:$0xff]  }
 0xc24   : > { %13298 = vmatprep.mubr.bf16.mxu0 %v12396_v31  ;;  %13339 = vmatprep.mubr.bf16.mxu1 %v12396_v31  ;;  %v20561_v31 = vld [vmem:[#allocation24 + $0x120] ss:$16 sps:$4 sm:$0xff]  }
 0xc25   : > { %13268 = vmatprep.subr.bf16.mxu0 %v20485_v34  ;;  %13309 = vmatprep.subr.bf16.mxu1 %v20488_v21  ;;  %v20563_v34 = vld [vmem:[#allocation24 + $0x124] ss:$16 sps:$4 sm:$0xff]   ;;  %v20566_v21 = vld [vmem:[#allocation24 + $0x12c] ss:$16 sps:$4 sm:$0xff]  }
 0xc27   : > { %13269 = vmatpush1.bf16.msra.mxu0 %v20483_v22  ;;  %13310 = vmatpush1.bf16.msra.mxu1 %v20486_v33  ;;  %v20564_v22 = vld [vmem:[#allocation24 + $0x128] ss:$16 sps:$4 sm:$0xff]   ;;  %v20569_v33 = vld [vmem:[#allocation24 + $0x104] ss:$16 sps:$4 sm:$0xff]  }
 0xc28   : > { %13270 = vmatprep.subr.bf16.mxu0 %v20491_v40  ;;  %13311 = vmatprep.subr.bf16.mxu1 %v20494_v45  ;;  %v20572_v40 = vld [vmem:[#allocation24 + $0x10c] ss:$16 sps:$4 sm:$0xff]   ;;  %v20567_v45 = vld [vmem:[#allocation24 + $0x100] ss:$16 sps:$4 sm:$0xff]  }
 0xc2b   : > { %13271 = vmatpush1.bf16.msra.mxu0 %v20489_v9  ;;  %13312 = vmatpush1.bf16.msra.mxu1 %v20492_v57  ;;  %v20570_v9 = vld [vmem:[#allocation24 + $0x108] ss:$16 sps:$4 sm:$0xff]   ;;  %v20575_v57 = vld [vmem:[#allocation24 + $0x4e4] ss:$16 sps:$4 sm:$0xff]  }
 0xc2c   : > { %13272 = vmatprep.subr.bf16.mxu0 %v20497_v17  ;;  %13313 = vmatprep.subr.bf16.mxu1 %v20500_v32  ;;  %v20578_v17 = vld [vmem:[#allocation24 + $0x4ec] ss:$16 sps:$4 sm:$0xff]   ;;  %v20573_v32 = vld [vmem:[#allocation24 + $0x4e0] ss:$16 sps:$4 sm:$0xff]  }
 0xc2f   : > { %13273 = vmatpush1.bf16.msra.mxu0 %v20495_v2  ;;  %13314 = vmatpush1.bf16.msra.mxu1 %v20498_v36  ;;  %v12395_v2 = vpack.c.bf16 %v23459_v3, %v23459_v3  ;;  %v20576_v36 = vld [vmem:[#allocation24 + $0x4e8] ss:$16 sps:$4 sm:$0xff]   ;;  %v20585_v3 = vld [vmem:[#allocation24 + $0x4a0] ss:$16 sps:$4 sm:$0xff]  }
 0xc30   : > { %13274 = vmatprep.subr.bf16.mxu0 %v20503_v39  ;;  %13315 = vmatprep.subr.bf16.mxu1 %v20506_v59  ;;  %v13416_v39 = vrot.slane %v23464_v19, 1  ;;  %v20581_v59 = vld [vmem:[#allocation24 + $0x4c4] ss:$16 sps:$4 sm:$0xff]  }
 0xc33   : > { %13275 = vmatpush1.bf16.msra.mxu0 %v20501_v43  ;;  %13316 = vmatpush1.bf16.msra.mxu1 %v20504_v35  ;;  %v20584_v43 = vld [vmem:[#allocation24 + $0x4cc] ss:$16 sps:$4 sm:$0xff]   ;;  %v20579_v35 = vld [vmem:[#allocation24 + $0x4c0] ss:$16 sps:$4 sm:$0xff]  }
 0xc34   : > { %13276 = vmatprep.subr.bf16.mxu0 %v20509_v29  ;;  %13317 = vmatprep.subr.bf16.mxu1 %v20512_v54  ;;  %v20582_v29 = vld [vmem:[#allocation24 + $0x4c8] ss:$16 sps:$4 sm:$0xff]   ;;  %v20587_v54 = vld [vmem:[#allocation24 + $0x4a4] ss:$16 sps:$4 sm:$0xff]  }
 0xc37   : > { %13277 = vmatpush1.bf16.msra.mxu0 %v20507_v16  ;;  %13318 = vmatpush1.bf16.msra.mxu1 %v20510_v15  ;;  %v20590_v16 = vld [vmem:[#allocation24 + $0x4ac] ss:$16 sps:$4 sm:$0xff]   ;;  %v20588_v15 = vld [vmem:[#allocation24 + $0x4a8] ss:$16 sps:$4 sm:$0xff]  }
 0xc38   : > { %13278 = vmatprep.subr.bf16.mxu0 %v20515_v47  ;;  %13319 = vmatprep.subr.bf16.mxu1 %v20518_v60  ;;  %v20593_v47 = vld [vmem:[#allocation24 + $0x484] ss:$16 sps:$4 sm:$0xff]   ;;  %v20596_v60 = vld [vmem:[#allocation24 + $0x48c] ss:$16 sps:$4 sm:$0xff]  }
 0xc3b   : > { %13279 = vmatpush1.bf16.msra.mxu0 %v20513_v62  ;;  %13320 = vmatpush1.bf16.msra.mxu1 %v20516_v56  ;;  %v20591_v62 = vld [vmem:[#allocation24 + $0x480] ss:$16 sps:$4 sm:$0xff]   ;;  %v20594_v56 = vld [vmem:[#allocation24 + $0x488] ss:$16 sps:$4 sm:$0xff]  }
 0xc3c   : > { %13280 = vmatprep.subr.bf16.mxu0 %v20521_v23  ;;  %13321 = vmatprep.subr.bf16.mxu1 %v20524_v44  ;;  %v20599_v23 = vld [vmem:[#allocation24 + $0x464] ss:$16 sps:$4 sm:$0xff]   ;;  %v20602_v44 = vld [vmem:[#allocation24 + $0x46c] ss:$16 sps:$4 sm:$0xff]  }
 0xc3f   : > { %13281 = vmatpush1.bf16.msra.mxu0 %v20519_v8  ;;  %13322 = vmatpush1.bf16.msra.mxu1 %v20522_v28  ;;  %v20597_v8 = vld [vmem:[#allocation24 + $0x460] ss:$16 sps:$4 sm:$0xff]   ;;  %v20600_v28 = vld [vmem:[#allocation24 + $0x468] ss:$16 sps:$4 sm:$0xff]  }
 0xc40   : > { %13282 = vmatprep.subr.bf16.mxu0 %v20527_v27  ;;  %13323 = vmatprep.subr.bf16.mxu1 %v20530_v51  ;;  %v20605_v27 = vld [vmem:[#allocation24 + $0x444] ss:$16 sps:$4 sm:$0xff]   ;;  %v20608_v51 = vld [vmem:[#allocation24 + $0x44c] ss:$16 sps:$4 sm:$0xff]  }
 0xc43   : > { %13283 = vmatpush2.bf16.msra.mxu0 %v20525_v48  ;;  %13324 = vmatpush2.bf16.msra.mxu1 %v20528_v20  ;;  %v20603_v48 = vld [vmem:[#allocation24 + $0x440] ss:$16 sps:$4 sm:$0xff]   ;;  %v20606_v20 = vld [vmem:[#allocation24 + $0x448] ss:$16 sps:$4 sm:$0xff]  }
 0xc44   : > { %13284 = vmatprep.subr.bf16.mxu0 %v20533_v42  ;;  %13325 = vmatprep.subr.bf16.mxu1 %v20536_v30  ;;  %v20611_v42 = vld [vmem:[#allocation24 + $0x424] ss:$16 sps:$4 sm:$0xff]   ;;  %v20614_v30 = vld [vmem:[#allocation24 + $0x42c] ss:$16 sps:$4 sm:$0xff]  }
 0xc47   : > { %13285 = vmatpush2.bf16.msra.mxu0 %v20531_v18  ;;  %13326 = vmatpush2.bf16.msra.mxu1 %v20534_v5  ;;  %v20609_v18 = vld [vmem:[#allocation24 + $0x420] ss:$16 sps:$4 sm:$0xff]   ;;  %v20612_v5 = vld [vmem:[#allocation24 + $0x428] ss:$16 sps:$4 sm:$0xff]  }
 0xc48   : > { %13286 = vmatprep.subr.bf16.mxu0 %v20539_v58  ;;  %13327 = vmatprep.subr.bf16.mxu1 %v20542_v55  ;;  %v20617_v58 = vld [vmem:[#allocation24 + $0x404] ss:$16 sps:$4 sm:$0xff]   ;;  %v20620_v55 = vld [vmem:[#allocation24 + $0x40c] ss:$16 sps:$4 sm:$0xff]  }
 0xc4b   : > { %13287 = vmatpush2.bf16.msra.mxu0 %v20537_v12  ;;  %13328 = vmatpush2.bf16.msra.mxu1 %v20540_v10  ;;  %v20615_v12 = vld [vmem:[#allocation24 + $0x400] ss:$16 sps:$4 sm:$0xff]   ;;  %v20618_v10 = vld [vmem:[#allocation24 + $0x408] ss:$16 sps:$4 sm:$0xff]  }
 0xc4c   : > { %13288 = vmatprep.subr.bf16.mxu0 %v20545_v4  ;;  %13329 = vmatprep.subr.bf16.mxu1 %v20548_v11  ;;  %v20623_v4 = vld [vmem:[#allocation24 + $0x5e4] ss:$16 sps:$4 sm:$0xff]   ;;  %v20626_v11 = vld [vmem:[#allocation24 + $0x5ec] ss:$16 sps:$4 sm:$0xff]  }
 0xc4f   : > { %13289 = vmatpush2.bf16.msra.mxu0 %v20543_v41  ;;  %13330 = vmatpush2.bf16.msra.mxu1 %v20546_v13  ;;  %v20621_v41 = vld [vmem:[#allocation24 + $0x5e0] ss:$16 sps:$4 sm:$0xff]   ;;  %v20624_v13 = vld [vmem:[#allocation24 + $0x5e8] ss:$16 sps:$4 sm:$0xff]  }
 0xc50   : > { %13290 = vmatprep.subr.bf16.mxu0 %v20551_v24  ;;  %13331 = vmatprep.subr.bf16.mxu1 %v20554_v38  ;;  %v20629_v24 = vld [vmem:[#allocation24 + $0x5c4] ss:$16 sps:$4 sm:$0xff]   ;;  %v20632_v38 = vld [vmem:[#allocation24 + $0x5cc] ss:$16 sps:$4 sm:$0xff]  }
 0xc53   : > { %13291 = vmatpush2.bf16.msra.mxu0 %v20549_v46  ;;  %13332 = vmatpush2.bf16.msra.mxu1 %v20552_v26  ;;  %v20627_v46 = vld [vmem:[#allocation24 + $0x5c0] ss:$16 sps:$4 sm:$0xff]   ;;  %v20630_v26 = vld [vmem:[#allocation24 + $0x5c8] ss:$16 sps:$4 sm:$0xff]  }
 0xc54   : > { %13292 = vmatprep.subr.bf16.mxu0 %v20557_v1  ;;  %13333 = vmatprep.subr.bf16.mxu1 %v20560_v52  ;;  %v20635_v1 = vld [vmem:[#allocation24 + $0x5a4] ss:$16 sps:$4 sm:$0xff]   ;;  %v20638_v52 = vld [vmem:[#allocation24 + $0x5ac] ss:$16 sps:$4 sm:$0xff]  }
 0xc57   : > { %13293 = vmatpush2.bf16.msra.mxu0 %v20555_v61  ;;  %13334 = vmatpush2.bf16.msra.mxu1 %v20558_v50  ;;  %v20633_v61 = vld [vmem:[#allocation24 + $0x5a0] ss:$16 sps:$4 sm:$0xff]   ;;  %v20636_v50 = vld [vmem:[#allocation24 + $0x5a8] ss:$16 sps:$4 sm:$0xff]  }
 0xc58   : > { %13294 = vmatprep.subr.bf16.mxu0 %v20563_v34  ;;  %13335 = vmatprep.subr.bf16.mxu1 %v20566_v21  ;;  %v20641_v34 = vld [vmem:[#allocation24 + $0x584] ss:$16 sps:$4 sm:$0xff]   ;;  %v20644_v21 = vld [vmem:[#allocation24 + $0x58c] ss:$16 sps:$4 sm:$0xff]  }
 0xc5b   : > { %13295 = vmatpush2.bf16.msra.mxu0 %v20561_v31  ;;  %13336 = vmatpush2.bf16.msra.mxu1 %v20564_v22  ;;  %v20639_v31 = vld [vmem:[#allocation24 + $0x580] ss:$16 sps:$4 sm:$0xff]   ;;  %v20642_v22 = vld [vmem:[#allocation24 + $0x588] ss:$16 sps:$4 sm:$0xff]  }
 0xc5c   : > { %13296 = vmatprep.subr.bf16.mxu0 %v20569_v33  ;;  %13337 = vmatprep.subr.bf16.mxu1 %v20572_v40  ;;  %v20647_v33 = vld [vmem:[#allocation24 + $0x564] ss:$16 sps:$4 sm:$0xff]   ;;  %v20650_v40 = vld [vmem:[#allocation24 + $0x56c] ss:$16 sps:$4 sm:$0xff]  }
 0xc5f   : > { %13297 = vmatpush2.bf16.msra.mxu0 %v20567_v45  ;;  %13338 = vmatpush2.bf16.msra.mxu1 %v20570_v9  ;;  %v20645_v45 = vld [vmem:[#allocation24 + $0x560] ss:$16 sps:$4 sm:$0xff]   ;;  %v20648_v9 = vld [vmem:[#allocation24 + $0x568] ss:$16 sps:$4 sm:$0xff]  }
 0xc60   : > { %13739 = vmatprep.subr.bf16.mxu0 %v20575_v57  ;;  %13780 = vmatprep.subr.bf16.mxu1 %v20578_v17  ;;  %v20653_v57 = vld [vmem:[#allocation24 + $0x544] ss:$16 sps:$4 sm:$0xff]   ;;  %v20656_v17 = vld [vmem:[#allocation24 + $0x54c] ss:$16 sps:$4 sm:$0xff]  }
 0xc62   : > { %13299 = vmatmul.mubr.bf16.vlgmr.msra.gmra.mxu0 %v12395_v2  ;;  %13340 = vmatmul.mubr.bf16.vlgmr.msra.gmra.mxu1 %v12395_v2  ;;  %v20654_v2 = vld [vmem:[#allocation24 + $0x548] ss:$16 sps:$4 sm:$0xff]  }
 0xc63   : > { %13740 = vmatpush1.bf16.msra.mxu0 %v20573_v32  ;;  %13771 = vmatprep.mubr.bf16.mxu0 %v13416_v39  ;;  %v20651_v32 = vld [vmem:[#allocation24 + $0x540] ss:$16 sps:$4 sm:$0xff]  }
 0xc64   : > { %13781 = vmatpush1.bf16.msra.mxu1 %v20576_v36  ;;  %13812 = vmatprep.mubr.bf16.mxu1 %v13416_v39  ;;  %v20659_v36 = vld [vmem:[#allocation24 + $0x524] ss:$16 sps:$4 sm:$0xff]   ;;  %v20662_v39 = vld [vmem:[#allocation24 + $0x52c] ss:$16 sps:$4 sm:$0xff]  }
 0xc65   : > { %13741 = vmatprep.subr.bf16.mxu0 %v20581_v59  ;;  %13782 = vmatprep.subr.bf16.mxu1 %v20584_v43  ;;  %v20657_v59 = vld [vmem:[#allocation24 + $0x520] ss:$16 sps:$4 sm:$0xff]   ;;  %v20660_v43 = vld [vmem:[#allocation24 + $0x528] ss:$16 sps:$4 sm:$0xff]  }
 0xc67   : > { %13742 = vmatpush1.bf16.msra.mxu0 %v20579_v35  ;;  %v20665_v35 = vld [vmem:[#allocation24 + $0x504] ss:$16 sps:$4 sm:$0xff]  }
 0xc68   : > { %13783 = vmatpush1.bf16.msra.mxu1 %v20582_v29  ;;  %13743 = vmatprep.subr.bf16.mxu0 %v20587_v54  ;;  %v20668_v29 = vld [vmem:[#allocation24 + $0x50c] ss:$16 sps:$4 sm:$0xff]   ;;  %v20663_v54 = vld [vmem:[#allocation24 + $0x500] ss:$16 sps:$4 sm:$0xff]  }
 0xc69   : > { %13784 = vmatprep.subr.bf16.mxu1 %v20590_v16  ;;  %v20666_v16 = vld [vmem:[#allocation24 + $0x508] ss:$16 sps:$4 sm:$0xff]  }
 0xc6b   : > { %13744 = vmatpush1.bf16.msra.mxu0 %v20585_v3  ;;  %v20671_v3 = vld [vmem:[#allocation24 + $0x6e4] ss:$16 sps:$4 sm:$0xff]  }
 0xc6c   : > { %13785 = vmatpush1.bf16.msra.mxu1 %v20588_v15  ;;  %13745 = vmatprep.subr.bf16.mxu0 %v20593_v47  ;;  %v20674_v15 = vld [vmem:[#allocation24 + $0x6ec] ss:$16 sps:$4 sm:$0xff]   ;;  %v20669_v47 = vld [vmem:[#allocation24 + $0x6e0] ss:$16 sps:$4 sm:$0xff]  }
 0xc6d   : > { %13786 = vmatprep.subr.bf16.mxu1 %v20596_v60  ;;  %v13415_v60 = vrot.slane %v23462_v14, 1 }
 0xc6f   : > { %13746 = vmatpush1.bf16.msra.mxu0 %v20591_v62  ;;  %v20672_v62 = vld [vmem:[#allocation24 + $0x6e8] ss:$16 sps:$4 sm:$0xff]  }
 0xc70   : > { %13787 = vmatpush1.bf16.msra.mxu1 %v20594_v56  ;;  %13747 = vmatprep.subr.bf16.mxu0 %v20599_v23  ;;  %v20677_v56 = vld [vmem:[#allocation24 + $0x6c4] ss:$16 sps:$4 sm:$0xff]   ;;  %v20680_v23 = vld [vmem:[#allocation24 + $0x6cc] ss:$16 sps:$4 sm:$0xff]  }
 0xc71   : > { %13788 = vmatprep.subr.bf16.mxu1 %v20602_v44  ;;  %v20675_v44 = vld [vmem:[#allocation24 + $0x6c0] ss:$16 sps:$4 sm:$0xff]  }
 0xc73   : > { %13748 = vmatpush1.bf16.msra.mxu0 %v20597_v8  ;;  %v20678_v8 = vld [vmem:[#allocation24 + $0x6c8] ss:$16 sps:$4 sm:$0xff]  }
 0xc74   : > { %13789 = vmatpush1.bf16.msra.mxu1 %v20600_v28  ;;  %13749 = vmatprep.subr.bf16.mxu0 %v20605_v27  ;;  %v20683_v28 = vld [vmem:[#allocation24 + $0x6a4] ss:$16 sps:$4 sm:$0xff]   ;;  %v20686_v27 = vld [vmem:[#allocation24 + $0x6ac] ss:$16 sps:$4 sm:$0xff]  }
 0xc75   : > { %13790 = vmatprep.subr.bf16.mxu1 %v20608_v51  ;;  %v20681_v51 = vld [vmem:[#allocation24 + $0x6a0] ss:$16 sps:$4 sm:$0xff]  }
 0xc77   : > { %13750 = vmatpush1.bf16.msra.mxu0 %v20603_v48  ;;  %v20684_v48 = vld [vmem:[#allocation24 + $0x6a8] ss:$16 sps:$4 sm:$0xff]  }
 0xc78   : > { %13791 = vmatpush1.bf16.msra.mxu1 %v20606_v20  ;;  %13751 = vmatprep.subr.bf16.mxu0 %v20611_v42  ;;  %v20689_v20 = vld [vmem:[#allocation24 + $0x684] ss:$16 sps:$4 sm:$0xff]   ;;  %v20692_v42 = vld [vmem:[#allocation24 + $0x68c] ss:$16 sps:$4 sm:$0xff]  }
 0xc79   : > { %13792 = vmatprep.subr.bf16.mxu1 %v20614_v30  ;;  %v20687_v30 = vld [vmem:[#allocation24 + $0x680] ss:$16 sps:$4 sm:$0xff]  }
 0xc7b   : > { %13752 = vmatpush1.bf16.msra.mxu0 %v20609_v18  ;;  %v20690_v18 = vld [vmem:[#allocation24 + $0x688] ss:$16 sps:$4 sm:$0xff]  }
 0xc7c   : > { %13793 = vmatpush1.bf16.msra.mxu1 %v20612_v5  ;;  %13753 = vmatprep.subr.bf16.mxu0 %v20617_v58  ;;  %v20695_v5 = vld [vmem:[#allocation24 + $0x664] ss:$16 sps:$4 sm:$0xff]   ;;  %v20698_v58 = vld [vmem:[#allocation24 + $0x66c] ss:$16 sps:$4 sm:$0xff]  }
 0xc7d   : > { %13794 = vmatprep.subr.bf16.mxu1 %v20620_v55  ;;  %v20696_v55 = vld [vmem:[#allocation24 + $0x668] ss:$16 sps:$4 sm:$0xff]  }
 0xc7f   : > { %13754 = vmatpush1.bf16.msra.mxu0 %v20615_v12  ;;  %v20701_v12 = vld [vmem:[#allocation24 + $0x644] ss:$16 sps:$4 sm:$0xff]  }
 0xc80   : > { %13795 = vmatpush1.bf16.msra.mxu1 %v20618_v10  ;;  %13755 = vmatprep.subr.bf16.mxu0 %v20623_v4  ;;  %v20704_v10 = vld [vmem:[#allocation24 + $0x64c] ss:$16 sps:$4 sm:$0xff]   ;;  %v20699_v4 = vld [vmem:[#allocation24 + $0x640] ss:$16 sps:$4 sm:$0xff]  }
 0xc81   : > { %13796 = vmatprep.subr.bf16.mxu1 %v20626_v11  ;;  %v20702_v11 = vld [vmem:[#allocation24 + $0x648] ss:$16 sps:$4 sm:$0xff]  }
 0xc83   : > { %13756 = vmatpush2.bf16.msra.mxu0 %v20621_v41  ;;  %v20707_v41 = vld [vmem:[#allocation24 + $0x624] ss:$16 sps:$4 sm:$0xff]  }
 0xc84   : > { %13797 = vmatpush2.bf16.msra.mxu1 %v20624_v13  ;;  %13757 = vmatprep.subr.bf16.mxu0 %v20629_v24  ;;  %v20710_v13 = vld [vmem:[#allocation24 + $0x62c] ss:$16 sps:$4 sm:$0xff]   ;;  %v20705_v24 = vld [vmem:[#allocation24 + $0x620] ss:$16 sps:$4 sm:$0xff]  }
 0xc85   : > { %13798 = vmatprep.subr.bf16.mxu1 %v20632_v38  ;;  %v20708_v38 = vld [vmem:[#allocation24 + $0x628] ss:$16 sps:$4 sm:$0xff]  }
 0xc87   : > { %13758 = vmatpush2.bf16.msra.mxu0 %v20627_v46  ;;  %v20713_v46 = vld [vmem:[#allocation24 + $0x604] ss:$16 sps:$4 sm:$0xff]  }
 0xc88   : > { %13799 = vmatpush2.bf16.msra.mxu1 %v20630_v26  ;;  %13759 = vmatprep.subr.bf16.mxu0 %v20635_v1  ;;  %v20716_v26 = vld [vmem:[#allocation24 + $0x60c] ss:$16 sps:$4 sm:$0xff]   ;;  %v20711_v1 = vld [vmem:[#allocation24 + $0x600] ss:$16 sps:$4 sm:$0xff]  }
 0xc89   : > { %13800 = vmatprep.subr.bf16.mxu1 %v20638_v52  ;;  %v20714_v52 = vld [vmem:[#allocation24 + $0x608] ss:$16 sps:$4 sm:$0xff]  }
 0xc8b   : > { %13760 = vmatpush2.bf16.msra.mxu0 %v20633_v61  ;;  %v20719_v61 = vld [vmem:[#allocation24 + $0x7e4] ss:$16 sps:$4 sm:$0xff]  }
 0xc8c   : > { %13801 = vmatpush2.bf16.msra.mxu1 %v20636_v50  ;;  %13761 = vmatprep.subr.bf16.mxu0 %v20641_v34  ;;  %v20722_v50 = vld [vmem:[#allocation24 + $0x7ec] ss:$16 sps:$4 sm:$0xff]   ;;  %v20717_v34 = vld [vmem:[#allocation24 + $0x7e0] ss:$16 sps:$4 sm:$0xff]  }
 0xc8d   : > { %13802 = vmatprep.subr.bf16.mxu1 %v20644_v21  ;;  %v20720_v21 = vld [vmem:[#allocation24 + $0x7e8] ss:$16 sps:$4 sm:$0xff]  }
 0xc8f   : > { %13762 = vmatpush2.bf16.msra.mxu0 %v20639_v31  ;;  %v20725_v31 = vld [vmem:[#allocation24 + $0x7c4] ss:$16 sps:$4 sm:$0xff]  }
 0xc90   : > { %13803 = vmatpush2.bf16.msra.mxu1 %v20642_v22  ;;  %13763 = vmatprep.subr.bf16.mxu0 %v20647_v33  ;;  %v20728_v22 = vld [vmem:[#allocation24 + $0x7cc] ss:$16 sps:$4 sm:$0xff]   ;;  %v20723_v33 = vld [vmem:[#allocation24 + $0x7c0] ss:$16 sps:$4 sm:$0xff]  }
 0xc91   : > { %13804 = vmatprep.subr.bf16.mxu1 %v20650_v40  ;;  %v20726_v40 = vld [vmem:[#allocation24 + $0x7c8] ss:$16 sps:$4 sm:$0xff]  }
 0xc93   : > { %13764 = vmatpush2.bf16.msra.mxu0 %v20645_v45  ;;  %v20731_v45 = vld [vmem:[#allocation24 + $0x7a4] ss:$16 sps:$4 sm:$0xff]  }
 0xc94   : > { %13805 = vmatpush2.bf16.msra.mxu1 %v20648_v9  ;;  %13765 = vmatprep.subr.bf16.mxu0 %v20653_v57  ;;  %v20734_v9 = vld [vmem:[#allocation24 + $0x7ac] ss:$16 sps:$4 sm:$0xff]   ;;  %v20729_v57 = vld [vmem:[#allocation24 + $0x7a0] ss:$16 sps:$4 sm:$0xff]  }
 0xc95   : > { %13806 = vmatprep.subr.bf16.mxu1 %v20656_v17  ;;  %v20732_v17 = vld [vmem:[#allocation24 + $0x7a8] ss:$16 sps:$4 sm:$0xff]  }
 0xc97   : > { %13766 = vmatpush2.bf16.msra.mxu0 %v20651_v32  ;;  %v20737_v32 = vld [vmem:[#allocation24 + $0x784] ss:$16 sps:$4 sm:$0xff]  }
 0xc98   : > { %13807 = vmatpush2.bf16.msra.mxu1 %v20654_v2  ;;  %13767 = vmatprep.subr.bf16.mxu0 %v20659_v36  ;;  %v20740_v2 = vld [vmem:[#allocation24 + $0x78c] ss:$16 sps:$4 sm:$0xff]   ;;  %v20735_v36 = vld [vmem:[#allocation24 + $0x780] ss:$16 sps:$4 sm:$0xff]  }
 0xc99   : > { %13808 = vmatprep.subr.bf16.mxu1 %v20662_v39  ;;  %v20738_v39 = vld [vmem:[#allocation24 + $0x788] ss:$16 sps:$4 sm:$0xff]  }
 0xc9b   : > { %13768 = vmatpush2.bf16.msra.mxu0 %v20657_v59  ;;  %v20743_v59 = vld [vmem:[#allocation24 + $0x764] ss:$16 sps:$4 sm:$0xff]  }
 0xc9c   : > { %13809 = vmatpush2.bf16.msra.mxu1 %v20660_v43  ;;  %13769 = vmatprep.subr.bf16.mxu0 %v20665_v35  ;;  %v20746_v43 = vld [vmem:[#allocation24 + $0x76c] ss:$16 sps:$4 sm:$0xff]   ;;  %v20741_v35 = vld [vmem:[#allocation24 + $0x760] ss:$16 sps:$4 sm:$0xff]  }
 0xc9d   : > { %13810 = vmatprep.subr.bf16.mxu1 %v20668_v29  ;;  %v20744_v29 = vld [vmem:[#allocation24 + $0x768] ss:$16 sps:$4 sm:$0xff]  }
 0xc9f   : > { %13770 = vmatpush2.bf16.msra.mxu0 %v20663_v54  ;;  %v20749_v54 = vld [vmem:[#allocation24 + $0x744] ss:$16 sps:$4 sm:$0xff]  }
 0xca0   : > { %13811 = vmatpush2.bf16.msra.mxu1 %v20666_v16  ;;  %14218 = vmatprep.subr.bf16.mxu0 %v20671_v3  ;;  %v20752_v16 = vld [vmem:[#allocation24 + $0x74c] ss:$16 sps:$4 sm:$0xff]   ;;  %v20747_v3 = vld [vmem:[#allocation24 + $0x740] ss:$16 sps:$4 sm:$0xff]  }
 0xca1   : > { %14259 = vmatprep.subr.bf16.mxu1 %v20674_v15  ;;  %v20750_v15 = vld [vmem:[#allocation24 + $0x748] ss:$16 sps:$4 sm:$0xff]  }
 0xca2   : > { %13772 = vmatmul.mubr.bf16.vlgmr.msra.gmra.mxu0 %v13415_v60 }
 0xca3   : > { %13813 = vmatmul.mubr.bf16.vlgmr.msra.gmra.mxu1 %v13415_v60  ;;  %14219 = vmatpush1.bf16.msra.mxu0 %v20669_v47  ;;  %v20755_v47 = vld [vmem:[#allocation24 + $0x724] ss:$16 sps:$4 sm:$0xff]   ;;  %v20758_v60 = vld [vmem:[#allocation24 + $0x72c] ss:$16 sps:$4 sm:$0xff]  }
 0xca4   : > { %14250 = vmatprep.mubr.bf16.mxu0 %v23470_v7  ;;  %14260 = vmatpush1.bf16.msra.mxu1 %v20672_v62  ;;  %v20753_v62 = vld [vmem:[#allocation24 + $0x720] ss:$16 sps:$4 sm:$0xff]  }
 0xca5   : > { %14291 = vmatprep.mubr.bf16.mxu1 %v23470_v7  ;;  %14220 = vmatprep.subr.bf16.mxu0 %v20677_v56  ;;  %v20693_v7 = vld [vmem:[#allocation24 + $0x660] ss:$16 sps:$4 sm:$0xff]   ;;  %v20756_v56 = vld [vmem:[#allocation24 + $0x728] ss:$16 sps:$4 sm:$0xff]  }
 0xca6   : > { %14261 = vmatprep.subr.bf16.mxu1 %v20680_v23  ;;  %v20761_v23 = vld [vmem:[#allocation24 + $0x704] ss:$16 sps:$4 sm:$0xff]  }
 0xca7   : > { %14221 = vmatpush1.bf16.msra.mxu0 %v20675_v44  ;;  %v20764_v44 = vld [vmem:[#allocation24 + $0x70c] ss:$16 sps:$4 sm:$0xff]  }
 0xca8   : > { %14262 = vmatpush1.bf16.msra.mxu1 %v20678_v8  ;;  %14222 = vmatprep.subr.bf16.mxu0 %v20683_v28  ;;  %v20759_v8 = vld [vmem:[#allocation24 + $0x700] ss:$16 sps:$4 sm:$0xff]   ;;  %v20762_v28 = vld [vmem:[#allocation24 + $0x708] ss:$16 sps:$4 sm:$0xff]  }
 0xca9   : > { %14263 = vmatprep.subr.bf16.mxu1 %v20686_v27  ;;  %v20767_v27 = vld [vmem:[#allocation24 + $0x8e4] ss:$16 sps:$4 sm:$0xff]  }
 0xcab   : > { %14223 = vmatpush1.bf16.msra.mxu0 %v20681_v51  ;;  %v20770_v51 = vld [vmem:[#allocation24 + $0x8ec] ss:$16 sps:$4 sm:$0xff]  }
 0xcac   : > { %14264 = vmatpush1.bf16.msra.mxu1 %v20684_v48  ;;  %14224 = vmatprep.subr.bf16.mxu0 %v20689_v20  ;;  %v20765_v48 = vld [vmem:[#allocation24 + $0x8e0] ss:$16 sps:$4 sm:$0xff]   ;;  %v20768_v20 = vld [vmem:[#allocation24 + $0x8e8] ss:$16 sps:$4 sm:$0xff]  }
 0xcad   : > { %14265 = vmatprep.subr.bf16.mxu1 %v20692_v42  ;;  %v20773_v42 = vld [vmem:[#allocation24 + $0x8c4] ss:$16 sps:$4 sm:$0xff]  }
 0xcaf   : > { %14225 = vmatpush1.bf16.msra.mxu0 %v20687_v30 }
 0xcb0   : > { %14266 = vmatpush1.bf16.msra.mxu1 %v20690_v18  ;;  %14226 = vmatprep.subr.bf16.mxu0 %v20695_v5  ;;  %v14370_v5 = vrot.slane %v23464_v19, 2  ;;  %v20777_v19 = vld [vmem:[#allocation24 + $0x8a0] ss:$16 sps:$4 sm:$0xff]  }
 0xcb1   : > { %14267 = vmatprep.subr.bf16.mxu1 %v20698_v58  ;;  %v20776_v58 = vld [vmem:[#allocation24 + $0x8cc] ss:$16 sps:$4 sm:$0xff]  }
 0xcb3   : > { %14227 = vmatpush1.bf16.msra.mxu0 %v20693_v7  ;;  %v20771_v7 = vld [vmem:[#allocation24 + $0x8c0] ss:$16 sps:$4 sm:$0xff]  }
 0xcb4   : > { %14268 = vmatpush1.bf16.msra.mxu1 %v20696_v55  ;;  %14228 = vmatprep.subr.bf16.mxu0 %v20701_v12 }
 0xcb5   : > { %14269 = vmatprep.subr.bf16.mxu1 %v20704_v10  ;;  %v20774_v10 = vld [vmem:[#allocation24 + $0x8c8] ss:$16 sps:$4 sm:$0xff]  }
 0xcb7   : > { %14229 = vmatpush1.bf16.msra.mxu0 %v20699_v4  ;;  %v20779_v4 = vld [vmem:[#allocation24 + $0x8a4] ss:$16 sps:$4 sm:$0xff]  }
 0xcb8   : > { %14270 = vmatpush1.bf16.msra.mxu1 %v20702_v11  ;;  %14230 = vmatprep.subr.bf16.mxu0 %v20707_v41  ;;  %v20782_v11 = vld [vmem:[#allocation24 + $0x8ac] ss:$16 sps:$4 sm:$0xff]  }
 0xcb9   : > { %14271 = vmatprep.subr.bf16.mxu1 %v20710_v13 }
 0xcbb   : > { %14231 = vmatpush1.bf16.msra.mxu0 %v20705_v24 }
 0xcbc   : > { %14272 = vmatpush1.bf16.msra.mxu1 %v20708_v38  ;;  %14232 = vmatprep.subr.bf16.mxu0 %v20713_v46  ;;  %v20780_v38 = vld [vmem:[#allocation24 + $0x8a8] ss:$16 sps:$4 sm:$0xff]   ;;  %v20785_v46 = vld [vmem:[#allocation24 + $0x884] ss:$16 sps:$4 sm:$0xff]  }
 0xcbd   : > { %14273 = vmatprep.subr.bf16.mxu1 %v20716_v26  ;;  %v20788_v26 = vld [vmem:[#allocation24 + $0x88c] ss:$16 sps:$4 sm:$0xff]  }
 0xcbf   : > { %14233 = vmatpush1.bf16.msra.mxu0 %v20711_v1  ;;  %v20783_v1 = vld [vmem:[#allocation24 + $0x880] ss:$16 sps:$4 sm:$0xff]  }
 0xcc0   : > { %14274 = vmatpush1.bf16.msra.mxu1 %v20714_v52  ;;  %14234 = vmatprep.subr.bf16.mxu0 %v20719_v61  ;;  %v20786_v52 = vld [vmem:[#allocation24 + $0x888] ss:$16 sps:$4 sm:$0xff]   ;;  %v20791_v61 = vld [vmem:[#allocation24 + $0x864] ss:$16 sps:$4 sm:$0xff]  }
 0xcc1   : > { %14275 = vmatprep.subr.bf16.mxu1 %v20722_v50  ;;  %v20794_v50 = vld [vmem:[#allocation24 + $0x86c] ss:$16 sps:$4 sm:$0xff]  }
 0xcc3   : > { %14235 = vmatpush2.bf16.msra.mxu0 %v20717_v34  ;;  %v20789_v34 = vld [vmem:[#allocation24 + $0x860] ss:$16 sps:$4 sm:$0xff]  }
 0xcc4   : > { %14276 = vmatpush2.bf16.msra.mxu1 %v20720_v21  ;;  %14236 = vmatprep.subr.bf16.mxu0 %v20725_v31  ;;  %v20792_v21 = vld [vmem:[#allocation24 + $0x868] ss:$16 sps:$4 sm:$0xff]   ;;  %v20797_v31 = vld [vmem:[#allocation24 + $0x844] ss:$16 sps:$4 sm:$0xff]  }
 0xcc5   : > { %14277 = vmatprep.subr.bf16.mxu1 %v20728_v22  ;;  %v20800_v22 = vld [vmem:[#allocation24 + $0x84c] ss:$16 sps:$4 sm:$0xff]  }
 0xcc7   : > { %14237 = vmatpush2.bf16.msra.mxu0 %v20723_v33  ;;  %v20795_v33 = vld [vmem:[#allocation24 + $0x840] ss:$16 sps:$4 sm:$0xff]  }
 0xcc8   : > { %14278 = vmatpush2.bf16.msra.mxu1 %v20726_v40  ;;  %14238 = vmatprep.subr.bf16.mxu0 %v20731_v45  ;;  %v20798_v40 = vld [vmem:[#allocation24 + $0x848] ss:$16 sps:$4 sm:$0xff]   ;;  %v20803_v45 = vld [vmem:[#allocation24 + $0x824] ss:$16 sps:$4 sm:$0xff]  }
 0xcc9   : > { %14279 = vmatprep.subr.bf16.mxu1 %v20734_v9  ;;  %v20806_v9 = vld [vmem:[#allocation24 + $0x82c] ss:$16 sps:$4 sm:$0xff]  }
 0xccb   : > { %14239 = vmatpush2.bf16.msra.mxu0 %v20729_v57  ;;  %v20801_v57 = vld [vmem:[#allocation24 + $0x820] ss:$16 sps:$4 sm:$0xff]  }
 0xccc   : > { %14280 = vmatpush2.bf16.msra.mxu1 %v20732_v17  ;;  %14240 = vmatprep.subr.bf16.mxu0 %v20737_v32  ;;  %v20804_v17 = vld [vmem:[#allocation24 + $0x828] ss:$16 sps:$4 sm:$0xff]   ;;  %v20809_v32 = vld [vmem:[#allocation24 + $0x804] ss:$16 sps:$4 sm:$0xff]  }
 0xccd   : > { %14281 = vmatprep.subr.bf16.mxu1 %v20740_v2  ;;  %v20812_v2 = vld [vmem:[#allocation24 + $0x80c] ss:$16 sps:$4 sm:$0xff]  }
 0xccf   : > { %14241 = vmatpush2.bf16.msra.mxu0 %v20735_v36  ;;  %v20807_v36 = vld [vmem:[#allocation24 + $0x800] ss:$16 sps:$4 sm:$0xff]  }
 0xcd0   : > { %14282 = vmatpush2.bf16.msra.mxu1 %v20738_v39  ;;  %14242 = vmatprep.subr.bf16.mxu0 %v20743_v59  ;;  %v20810_v39 = vld [vmem:[#allocation24 + $0x808] ss:$16 sps:$4 sm:$0xff]   ;;  %v20815_v59 = vld [vmem:[#allocation24 + $0x9e4] ss:$16 sps:$4 sm:$0xff]  }
 0xcd1   : > { %14283 = vmatprep.subr.bf16.mxu1 %v20746_v43  ;;  %v20818_v43 = vld [vmem:[#allocation24 + $0x9ec] ss:$16 sps:$4 sm:$0xff]  }
 0xcd3   : > { %14243 = vmatpush2.bf16.msra.mxu0 %v20741_v35  ;;  %v20813_v35 = vld [vmem:[#allocation24 + $0x9e0] ss:$16 sps:$4 sm:$0xff]  }
 0xcd4   : > { %14284 = vmatpush2.bf16.msra.mxu1 %v20744_v29  ;;  %14244 = vmatprep.subr.bf16.mxu0 %v20749_v54  ;;  %v20816_v29 = vld [vmem:[#allocation24 + $0x9e8] ss:$16 sps:$4 sm:$0xff]   ;;  %v20821_v54 = vld [vmem:[#allocation24 + $0x9c4] ss:$16 sps:$4 sm:$0xff]  }
 0xcd5   : > { %14285 = vmatprep.subr.bf16.mxu1 %v20752_v16  ;;  %v20824_v16 = vld [vmem:[#allocation24 + $0x9cc] ss:$16 sps:$4 sm:$0xff]  }
 0xcd7   : > { %14245 = vmatpush2.bf16.msra.mxu0 %v20747_v3  ;;  %v20819_v3 = vld [vmem:[#allocation24 + $0x9c0] ss:$16 sps:$4 sm:$0xff]  }
 0xcd8   : > { %14286 = vmatpush2.bf16.msra.mxu1 %v20750_v15  ;;  %14246 = vmatprep.subr.bf16.mxu0 %v20755_v47  ;;  %v20822_v15 = vld [vmem:[#allocation24 + $0x9c8] ss:$16 sps:$4 sm:$0xff]   ;;  %v20827_v47 = vld [vmem:[#allocation24 + $0x9a4] ss:$16 sps:$4 sm:$0xff]  }
 0xcd9   : > { %14287 = vmatprep.subr.bf16.mxu1 %v20758_v60  ;;  %v20830_v60 = vld [vmem:[#allocation24 + $0x9ac] ss:$16 sps:$4 sm:$0xff]  }
 0xcdb   : > { %14247 = vmatpush2.bf16.msra.mxu0 %v20753_v62  ;;  %v20825_v62 = vld [vmem:[#allocation24 + $0x9a0] ss:$16 sps:$4 sm:$0xff]  }
 0xcdc   : > { %14288 = vmatpush2.bf16.msra.mxu1 %v20756_v56  ;;  %14248 = vmatprep.subr.bf16.mxu0 %v20761_v23  ;;  %v20828_v56 = vld [vmem:[#allocation24 + $0x9a8] ss:$16 sps:$4 sm:$0xff]   ;;  %v20833_v23 = vld [vmem:[#allocation24 + $0x984] ss:$16 sps:$4 sm:$0xff]  }
 0xcdd   : > { %14289 = vmatprep.subr.bf16.mxu1 %v20764_v44  ;;  %v20836_v44 = vld [vmem:[#allocation24 + $0x98c] ss:$16 sps:$4 sm:$0xff]  }
 0xcdf   : > { %14249 = vmatpush2.bf16.msra.mxu0 %v20759_v8  ;;  %v20831_v8 = vld [vmem:[#allocation24 + $0x980] ss:$16 sps:$4 sm:$0xff]  }
 0xce0   : > { %14290 = vmatpush2.bf16.msra.mxu1 %v20762_v28  ;;  %14693 = vmatprep.subr.bf16.mxu0 %v20767_v27  ;;  %v20834_v28 = vld [vmem:[#allocation24 + $0x988] ss:$16 sps:$4 sm:$0xff]   ;;  %v20839_v27 = vld [vmem:[#allocation24 + $0x964] ss:$16 sps:$4 sm:$0xff]  }
 0xce1   : > { %14734 = vmatprep.subr.bf16.mxu1 %v20770_v51  ;;  %v20842_v51 = vld [vmem:[#allocation24 + $0x96c] ss:$16 sps:$4 sm:$0xff]  }
 0xce2   : > { %14251 = vmatmul.mubr.bf16.vlgmr.msra.gmra.mxu0 %v23472_v37  ;;  %v23481_v30 = vpop.f32.mrf.mxu0  ;;  %v23483_v18 = vpop.f32.mrf.mxu1 }
 0xce3   : > { %14292 = vmatmul.mubr.bf16.vlgmr.msra.gmra.mxu1 %v23472_v37  ;;  %14694 = vmatpush1.bf16.msra.mxu0 %v20765_v48  ;;  %v20837_v48 = vld [vmem:[#allocation24 + $0x960] ss:$16 sps:$4 sm:$0xff]  }
 0xce4   : > { %14725 = vmatprep.mubr.bf16.mxu0 %v14370_v5  ;;  %14735 = vmatpush1.bf16.msra.mxu1 %v20768_v20  ;;  %v23487_v55 = vpop.f32.mrf.mxu0  ;;  %v23489_v12 = vpop.f32.mrf.mxu1  ;;  %v20840_v20 = vld [vmem:[#allocation24 + $0x968] ss:$16 sps:$4 sm:$0xff]  }
 0xce5   : > { %14766 = vmatprep.mubr.bf16.mxu1 %v14370_v5  ;;  %14695 = vmatprep.subr.bf16.mxu0 %v20773_v42  ;;  %v20845_v42 = vld [vmem:[#allocation24 + $0x944] ss:$16 sps:$4 sm:$0xff]   ;;  %v20848_v5 = vld [vmem:[#allocation24 + $0x94c] ss:$16 sps:$4 sm:$0xff]  }
 0xce6   : > { %14736 = vmatprep.subr.bf16.mxu1 %v20776_v58  ;;  %v12902_v41 = vpop.f32.mrf.mxu0  ;;  %v12943_v13 = vpop.f32.mrf.mxu1  ;;  %v20843_v58 = vld [vmem:[#allocation24 + $0x940] ss:$16 sps:$4 sm:$0xff]  }
 0xce7   : > { %14696 = vmatpush1.bf16.msra.mxu0 %v20771_v7  ;;  %v20846_v7 = vld [vmem:[#allocation24 + $0x948] ss:$16 sps:$4 sm:$0xff]   ;;  %v20857_v13 = vld [vmem:[#allocation24 + $0x904] ss:$16 sps:$4 sm:$0xff]  }
 0xce8   : > { %14737 = vmatpush1.bf16.msra.mxu1 %v20774_v10  ;;  %v12903_v37 = vpop.f32.mrf.mxu0  ;;  %v12944_v24 = vpop.f32.mrf.mxu1  ;;  %14697 = vmatprep.subr.bf16.mxu0 %v20779_v4  ;;  %v20851_v10 = vld [vmem:[#allocation24 + $0x924] ss:$16 sps:$4 sm:$0xff]   ;;  %v20854_v4 = vld [vmem:[#allocation24 + $0x92c] ss:$16 sps:$4 sm:$0xff]   ;;  %v20852_v41 = vld [vmem:[#allocation24 + $0x928] ss:$16 sps:$4 sm:$0xff]  }
 0xce9   : > { %14738 = vmatprep.subr.bf16.mxu1 %v20782_v11  ;;  %v20849_v11 = vld [vmem:[#allocation24 + $0x920] ss:$16 sps:$4 sm:$0xff]   ;;  %v20858_v24 = vld [vmem:[#allocation24 + $0x908] ss:$16 sps:$4 sm:$0xff]  }
 0xcea   : > { %v20855_v37 = vld [vmem:[#allocation24 + $0x900] ss:$16 sps:$4 sm:$0xff]  }
 0xceb   : > { %14698 = vmatpush1.bf16.msra.mxu0 %v20777_v19  ;;  %v20860_v19 = vld [vmem:[#allocation24 + $0x90c] ss:$16 sps:$4 sm:$0xff]  }
 0xcec   : > { %14739 = vmatpush1.bf16.msra.mxu1 %v20780_v38  ;;  %14699 = vmatprep.subr.bf16.mxu0 %v20785_v46  ;;  %v14369_v38 = vrot.slane %v23462_v14, 2 }
 0xced   : > { %14740 = vmatprep.subr.bf16.mxu1 %v20788_v26 }
 0xcef   : > { %14700 = vmatpush1.bf16.msra.mxu0 %v20783_v1 }
 0xcf0   : > { %14741 = vmatpush1.bf16.msra.mxu1 %v20786_v52  ;;  %14701 = vmatprep.subr.bf16.mxu0 %v20791_v61 }
 0xcf1   : > { %14742 = vmatprep.subr.bf16.mxu1 %v20794_v50 }
 0xcf3   : > { %14702 = vmatpush1.bf16.msra.mxu0 %v20789_v34 }
 0xcf4   : > { %14743 = vmatpush1.bf16.msra.mxu1 %v20792_v21  ;;  %14703 = vmatprep.subr.bf16.mxu0 %v20797_v31 }
 0xcf5   : > { %14744 = vmatprep.subr.bf16.mxu1 %v20800_v22 }
 0xcf7   : > { %14704 = vmatpush1.bf16.msra.mxu0 %v20795_v33 }
 0xcf8   : > { %14745 = vmatpush1.bf16.msra.mxu1 %v20798_v40  ;;  %14705 = vmatprep.subr.bf16.mxu0 %v20803_v45 }
 0xcf9   : > { %14746 = vmatprep.subr.bf16.mxu1 %v20806_v9 }
 0xcfb   : > { %14706 = vmatpush1.bf16.msra.mxu0 %v20801_v57 }
 0xcfc   : > { %14747 = vmatpush1.bf16.msra.mxu1 %v20804_v17  ;;  %14707 = vmatprep.subr.bf16.mxu0 %v20809_v32 }
 0xcfd   : > { %14748 = vmatprep.subr.bf16.mxu1 %v20812_v2 }
 0xcff   : > { %14708 = vmatpush1.bf16.msra.mxu0 %v20807_v36 }
 0xd00   : > { %14749 = vmatpush1.bf16.msra.mxu1 %v20810_v39  ;;  %14709 = vmatprep.subr.bf16.mxu0 %v20815_v59 }
 0xd01   : > { %14750 = vmatprep.subr.bf16.mxu1 %v20818_v43 }
 0xd03   : > { %14710 = vmatpush2.bf16.msra.mxu0 %v20813_v35 }
 0xd04   : > { %14751 = vmatpush2.bf16.msra.mxu1 %v20816_v29  ;;  %14711 = vmatprep.subr.bf16.mxu0 %v20821_v54 }
 0xd05   : > { %14752 = vmatprep.subr.bf16.mxu1 %v20824_v16 }
 0xd07   : > { %14712 = vmatpush2.bf16.msra.mxu0 %v20819_v3 }
 0xd08   : > { %14753 = vmatpush2.bf16.msra.mxu1 %v20822_v15  ;;  %14713 = vmatprep.subr.bf16.mxu0 %v20827_v47 }
 0xd09   : > { %14754 = vmatprep.subr.bf16.mxu1 %v20830_v60  ;;  %v14779_v60 = vld [vmem:[#allocation26] sm:$0xf] }
 0xd0b   : > { %14714 = vmatpush2.bf16.msra.mxu0 %v20825_v62 }
 0xd0c   : > { %14755 = vmatpush2.bf16.msra.mxu1 %v20828_v56  ;;  %14715 = vmatprep.subr.bf16.mxu0 %v20833_v23 }
 0xd0d   : > { %14756 = vmatprep.subr.bf16.mxu1 %v20836_v44  ;;  %v14784_v44 = vrot.slane %v14779_v60, %v22503_v49 }
 0xd0f   : > { %14716 = vmatpush2.bf16.msra.mxu0 %v20831_v8 }
 0xd10   : > { %14757 = vmatpush2.bf16.msra.mxu1 %v20834_v28  ;;  %14717 = vmatprep.subr.bf16.mxu0 %v20839_v27  ;;  %v14788_v28 = vrot.slane %v14779_v60, %v22509_v63 }
 0xd11   : > { %14758 = vmatprep.subr.bf16.mxu1 %v20842_v51 }
 0xd13   : > { %14718 = vmatpush2.bf16.msra.mxu0 %v20837_v48  ;;  %v14792_v48 = vrot.slane %v14779_v60, %v22506_v0 }
 0xd14   : > { %14759 = vmatpush2.bf16.msra.mxu1 %v20840_v20  ;;  %14719 = vmatprep.subr.bf16.mxu0 %v20845_v42  ;;  %v14796_v42 = vrot.slane %v14779_v60, %v22514_v25  ;;  %v20882_v60 = vld [vmem:[#allocation30 + $0x140] ss:$8 sps:$4 sm:$0xff]  }
 0xd15   : > { %14760 = vmatprep.subr.bf16.mxu1 %v20848_v5 }
 0xd17   : > { %14720 = vmatpush2.bf16.msra.mxu0 %v20843_v58 }
 0xd18   : > { %14761 = vmatpush2.bf16.msra.mxu1 %v20846_v7  ;;  %14721 = vmatprep.subr.bf16.mxu0 %v20851_v10 }
 0xd19   : > { %14762 = vmatprep.subr.bf16.mxu1 %v20854_v4 }
 0xd1b   : > { %14722 = vmatpush2.bf16.msra.mxu0 %v20849_v11 }
 0xd1c   : > { %14763 = vmatpush2.bf16.msra.mxu1 %v20852_v41  ;;  %14723 = vmatprep.subr.bf16.mxu0 %v20857_v13 }
 0xd1d   : > { %14764 = vmatprep.subr.bf16.mxu1 %v20860_v19 }
 0xd1f   : > { %14724 = vmatpush2.bf16.msra.mxu0 %v20855_v37 }
 0xd20   : > { %14765 = vmatpush2.bf16.msra.mxu1 %v20858_v24 }
 0xd22   : > { %v13300_v46 = vpop.f32.mrf.mxu0  ;;  %v13341_v26 = vpop.f32.mrf.mxu1  ;;  %14726 = vmatmul.mubr.bf16.vlgmr.msra.gmra.mxu0 %v14369_v38 }
 0xd23   : > { %v13301_v1 = vadd.f32 %v13300_v46, %v23481_v30  ;;  %v13342_v52 = vadd.f32 %v13341_v26, %v23483_v18  ;;  %14767 = vmatmul.mubr.bf16.vlgmr.msra.gmra.mxu1 %v14369_v38  ;;  %14875 = vmatprep.mubr.bf16.mxu0 %v23965_v53 }
 0xd24   : > { %v13302_v61 = vpop.f32.mrf.mxu0  ;;  %v13343_v50 = vpop.f32.mrf.mxu1  ;;  %14916 = vmatprep.mubr.bf16.mxu1 %v23965_v53 }
 0xd25   : > { %v13303_v34 = vadd.f32 %v13302_v61, %v23487_v55  ;;  %v13344_v21 = vadd.f32 %v13343_v50, %v23489_v12 }
 0xd26   : > { %v13304_v31 = vpop.f32.mrf.mxu0  ;;  %v13345_v14 = vpop.f32.mrf.mxu1 }
 0xd28   : > { %v13305_v22 = vpop.f32.mrf.mxu0  ;;  %v13346_v33 = vpop.f32.mrf.mxu1 }
 0xd62   : > { %v13773_v40 = vpop.f32.mrf.mxu0 }
 0xd63   : > { %v13821_v45 = vadd.f32 %v13773_v40, %v13301_v1  ;;  %v13814_v30 = vpop.f32.mrf.mxu1 }
 0xd64   : > { %v13823_v9 = vadd.f32 %v13814_v30, %v13342_v52  ;;  %v13775_v18 = vpop.f32.mrf.mxu0 }
 0xd65   : > { %v13822_v57 = vadd.f32 %v13775_v18, %v13303_v34  ;;  %v13816_v17 = vpop.f32.mrf.mxu1 }
 0xd66   : > { %v13824_v32 = vadd.f32 %v13816_v17, %v13344_v21  ;;  %v13777_v2 = vpop.f32.mrf.mxu0 }
 0xd67   : > { %v13818_v36 = vpop.f32.mrf.mxu1  ;;  %v20866_v2 = vld [vmem:[#allocation30 + $0x174] ss:$8 sps:$4 sm:$0xff]  }
 0xd68   : > { %v13778_v39 = vpop.f32.mrf.mxu0  ;;  %v14925_v36 = vld [vmem:[#allocation29] sm:$0x3] }
 0xd69   : > { %v13819_v59 = vpop.f32.mrf.mxu1  ;;  %v20861_v39 = vld [vmem:[#allocation30 + $0x70] ss:$8 sps:$4 sm:$0xff]  }
 0xd6a   : > { %v20864_v59 = vld [vmem:[#allocation30 + $0x170] ss:$8 sps:$4 sm:$0xff]  }
 0xda2   : > { %v14252_v43 = vpop.f32.mrf.mxu0 }
 0xda3   : > { %v14300_v55 = vadd.f32 %v14252_v43, %v13821_v45  ;;  %v14293_v35 = vpop.f32.mrf.mxu1  ;;  %v20869_v43 = vld [vmem:[#allocation30 + $0x64] ss:$8 sps:$4 sm:$0xff]  }
 0xda4   : > { %v14302_v12 = vadd.f32 %v14293_v35, %v13823_v9  ;;  %v14254_v29 = vpop.f32.mrf.mxu0  ;;  %v20867_v35 = vld [vmem:[#allocation30 + $0x60] ss:$8 sps:$4 sm:$0xff]  }
 0xda5   : > { %v14295_v54 = vpop.f32.mrf.mxu1  ;;  %v14301_v56 = vadd.f32 %v14254_v29, %v13822_v57  ;;  %v20875_v29 = vld [vmem:[#allocation30 + $0x54] ss:$8 sps:$4 sm:$0xff]  }
 0xda6   : > { %v14256_v16 = vpop.f32.mrf.mxu0  ;;  %v14303_v27 = vadd.f32 %v14295_v54, %v13824_v32  ;;  %v14825_v32 = vld [vmem:[#allocation27] sm:$0x3] }
 0xda7   : > { %v14297_v3 = vpop.f32.mrf.mxu1  ;;  %v20878_v54 = vld [vmem:[#allocation30 + $0x154] ss:$8 sps:$4 sm:$0xff]   ;;  %v20876_v16 = vld [vmem:[#allocation30 + $0x150] ss:$8 sps:$4 sm:$0xff]  }
 0xda8   : > { %v14257_v15 = vpop.f32.mrf.mxu0  ;;  %v20881_v3 = vld [vmem:[#allocation30 + $0x44] ss:$8 sps:$4 sm:$0xff]  }
 0xda9   : > { %v14298_v47 = vpop.f32.mrf.mxu1  ;;  %v20884_v15 = vld [vmem:[#allocation30 + $0x144] ss:$8 sps:$4 sm:$0xff]  }
 0xdaa   : > { %v20879_v47 = vld [vmem:[#allocation30 + $0x40] ss:$8 sps:$4 sm:$0xff]  }
 0xde2   : > { %v14727_v62 = vpop.f32.mrf.mxu0 }
 0xde3   : > { %v14775_v23 = vadd.f32 %v14727_v62, %v14300_v55  ;;  %v14768_v8 = vpop.f32.mrf.mxu1  ;;  %v20872_v55 = vld [vmem:[#allocation30 + $0x164] ss:$8 sps:$4 sm:$0xff]   ;;  %v20887_v62 = vld [vmem:[#allocation30 + $0x34] ss:$8 sps:$4 sm:$0xff]  }
 0xde4   : > { %v14777_v51 = vadd.f32 %v14768_v8, %v14302_v12  ;;  %v14729_v20 = vpop.f32.mrf.mxu0  ;;  %v20870_v12 = vld [vmem:[#allocation30 + $0x160] ss:$8 sps:$4 sm:$0xff]   ;;  %v20893_v8 = vld [vmem:[#allocation30 + $0x24] ss:$8 sps:$4 sm:$0xff]  }
 0xde5   : > { %v14776_v5 = vadd.f32 %v14729_v20, %v14301_v56  ;;  %v14770_v58 = vpop.f32.mrf.mxu1  ;;  %v14801_v4 = vadd.f32 %v14784_v44, %v14775_v23  ;;  %v20890_v56 = vld [vmem:[#allocation30 + $0x134] ss:$8 sps:$4 sm:$0xff]   ;;  %v20885_v23 = vld [vmem:[#allocation30 + $0x30] ss:$8 sps:$4 sm:$0xff]  }
 0xde6   : > { %v14778_v7 = vadd.f32 %v14770_v58, %v14303_v27  ;;  %v14731_v10 = vpop.f32.mrf.mxu0  ;;  %v14803_v13 = vadd.f32 %v14792_v48, %v14777_v51  ;;  %v20888_v44 = vld [vmem:[#allocation30 + $0x130] ss:$8 sps:$4 sm:$0xff]   ;;  %v20891_v27 = vld [vmem:[#allocation30 + $0x20] ss:$8 sps:$4 sm:$0xff]   ;;  %v20899_v48 = vld [vmem:[#allocation30 + $0x14] ss:$8 sps:$4 sm:$0xff]  }
 0xde7   : > { %v14802_v11 = vadd.f32 %v14788_v28, %v14776_v5  ;;  %v14772_v41 = vpop.f32.mrf.mxu1  ;;  %v20896_v28 = vld [vmem:[#allocation30 + $0x124] ss:$8 sps:$4 sm:$0xff]   ;;  %v20894_v51 = vld [vmem:[#allocation30 + $0x120] ss:$8 sps:$4 sm:$0xff]   ;;  %v20902_v20 = vld [vmem:[#allocation30 + $0x114] ss:$8 sps:$4 sm:$0xff]  }
 0xde8   : > { %v14804_v19 = vadd.f32 %v14796_v42, %v14778_v7  ;;  %v14732_v37 = vpop.f32.mrf.mxu0  ;;  %v20897_v42 = vld [vmem:[#allocation30 + $0x10] ss:$8 sps:$4 sm:$0xff]   ;;  %v20905_v58 = vld [vmem:[#allocation30 + $0x4] ss:$8 sps:$4 sm:$0xff]   ;;  %v20903_v10 = vld [vmem:[#allocation30] ss:$8 sps:$4 sm:$0xff]  }
 0xde9   : > { %v14773_v24 = vpop.f32.mrf.mxu1  ;;  %v18925_v38 = vpack.i.bf16 %v14802_v11, %v14801_v4  ;;  %v20900_v5 = vld [vmem:[#allocation30 + $0x110] ss:$8 sps:$4 sm:$0xff]   ;;  %v20908_v7 = vld [vmem:[#allocation30 + $0x104] ss:$8 sps:$4 sm:$0xff]   ;;  %v20914_v41 = vld [vmem:[#allocation30 + $0x1f4] ss:$8 sps:$4 sm:$0xff]  }
 0xdea   : > { %v18930_v46 = vpack.i.bf16 %v14804_v19, %v14803_v13  ;;  %v20917_v37 = vld [vmem:[#allocation30 + $0xe4] ss:$8 sps:$4 sm:$0xff]  }
 0xdeb   : > { %18926 = vrot.lane.b32.xlu0 %v18925_v38, %s21654_s7  ;;  %v20920_v24 = vld [vmem:[#allocation30 + $0x1e4] ss:$8 sps:$4 sm:$0xff]   ;;  %v20915_v38 = vld [vmem:[#allocation30 + $0xe0] ss:$8 sps:$4 sm:$0xff]  }
 0xdec   : > { %18931 = vrot.lane.b32.xlu1 %v18930_v46, %s21654_s7  ;;  %v20918_v46 = vld [vmem:[#allocation30 + $0x1e0] ss:$8 sps:$4 sm:$0xff]   ;;  %s893_s7 = scalar_lea.vmem [#allocation36], %s22044_s12 }
 0xded   : > { %s16320_s20 = sshll.u32 %s893_s7, 4  ;;  %s23738_s20 = int_to_ptr.vmem [resolvable:$true] %s16320_s20 }
 0xdee   : > { %s21521_s10 = scalar_lea.vmem %s23738_s20, 16  ;;  %p21528_p1 = scmp.lt.s32.totalorder %s23738_s20, %s21526_s2 }
 0xdef   : > { %p21522_p10 = scmp.ne.s32.totalorder %s23738_s20, %s21521_s10  ;;  %p21529_p3 = scmp.lt.s32.totalorder %s21527_s30, %s21521_s10 }
 0xdf1   : > { %p21523_p12 = pnand %p21522_p10, %p23969_p11  ;;  %p21530_p5 = por %p21529_p3, %p21528_p1 }
 0xdf3   : > { %p21524_p6 = pneg %p21523_p12 }
 0xdf5   : > { %p21531_p8 = pnand %p21530_p5, %p21524_p6 }
 0xe5d   : > { %v18927_v0 = vpop.permute.xlu0 %18926 }
 0xe5e   : > { %v18932_v26 = vpop.permute.xlu1 %18931  ;;  %v18929_v25 = vunpack.i.h.bf16 %v18927_v0  ;;  %v18928_v1 = vunpack.i.l.bf16 %v18927_v0  ;;  %v20923_v0 = vld [vmem:[#allocation30 + $0xd4] ss:$8 sps:$4 sm:$0xff]  }
 0xe5f   : > { %v18934_v52 = vunpack.i.h.bf16 %v18932_v26  ;;  %v18933_v61 = vunpack.i.l.bf16 %v18932_v26  ;;  %v20926_v26 = vld [vmem:[#allocation30 + $0x1d4] ss:$8 sps:$4 sm:$0xff]  }
 0xe60   : > { %v14815_v50 = vsel %vm4247_vm7, %v18928_v1, %v18929_v25 }
 0xe61   : > { %v14813_v34 = vsel %vm4247_vm7, %v18933_v61, %v18934_v52  ;;  %v14814_v21 = vsel %vm4247_vm7, %v18929_v25, %v18933_v61  ;;  %v14816_v31 = vsel %vm4247_vm7, %v18934_v52, %v18928_v1  ;;  %v14817_v14 = vmax.f32 %v14801_v4, %v14815_v50  ;;  %v20906_v4 = vld [vmem:[#allocation30 + $0x100] ss:$8 sps:$4 sm:$0xff]   ;;  %v20921_v25 = vld [vmem:[#allocation30 + $0xd0] ss:$8 sps:$4 sm:$0xff]   ;;  %v20929_v52 = vld [vmem:[#allocation30 + $0xc4] ss:$8 sps:$4 sm:$0xff]  }
 0xe62   : > { %v14818_v22 = vmax.f32 %v14802_v11, %v14814_v21  ;;  %v14820_v33 = vmax.f32 %v14804_v19, %v14816_v31  ;;  %v14819_v40 = vmax.f32 %v14803_v13, %v14813_v34  ;;  %v20911_v11 = vld [vmem:[#allocation30 + $0xf4] ss:$8 sps:$4 sm:$0xff]   ;;  %v20909_v13 = vld [vmem:[#allocation30 + $0xf0] ss:$8 sps:$4 sm:$0xff]   ;;  %v20932_v61 = vld [vmem:[#allocation30 + $0x1c4] ss:$8 sps:$4 sm:$0xff]  }
 0xe63   : > { %v14821_v45 = vpack.c.bf16 %v14817_v14, %v14817_v14  ;;  %v20912_v19 = vld [vmem:[#allocation30 + $0x1f0] ss:$8 sps:$4 sm:$0xff]   ;;  %v20927_v50 = vld [vmem:[#allocation30 + $0xc0] ss:$8 sps:$4 sm:$0xff]   ;;  %v20935_v31 = vld [vmem:[#allocation30 + $0xb4] ss:$8 sps:$4 sm:$0xff]  }
 0xe64   : > { %v14822_v30 = vpack.c.bf16 %v14818_v22, %v14818_v22  ;;  %v14824_v9 = vpack.c.bf16 %v14820_v33, %v14820_v33  ;;  %v14823_v18 = vpack.c.bf16 %v14819_v40, %v14819_v40  ;;  %v20924_v1 = vld [vmem:[#allocation30 + $0x1d0] ss:$8 sps:$4 sm:$0xff]   ;;  %v20930_v34 = vld [vmem:[#allocation30 + $0x1c0] ss:$8 sps:$4 sm:$0xff]   ;;  %v20938_v22 = vld [vmem:[#allocation30 + $0x1b4] ss:$8 sps:$4 sm:$0xff]  }
 0xe65   : > { %v14832_v57 = vsel %vm14830_vm9, %v14821_v45, 0  ;;  %v20933_v21 = vld [vmem:[#allocation30 + $0xb0] ss:$8 sps:$4 sm:$0xff]   ;;  %v20939_v33 = vld [vmem:[#allocation30 + $0xa0] ss:$8 sps:$4 sm:$0xff]  }
 0xe66   : > { %18232 = vmatprep.subr.msk.bf16.mxu0 %vm14830_vm9, %v14822_v30  ;;  %18234 = vmatprep.subr.msk.bf16.mxu1 %vm14830_vm9, %v14824_v9  ;;  %v14838_v17 = vsel %vm14830_vm9, %v14823_v18, 0  ;;  %v20936_v14 = vld [vmem:[#allocation30 + $0x1b0] ss:$8 sps:$4 sm:$0xff]   ;;  %v20941_v40 = vld [vmem:[#allocation30 + $0xa4] ss:$8 sps:$4 sm:$0xff]  }
 0xe67   : > { %14858 = vmatpush1.bf16.msra.mxu0 %v14832_v57  ;;  %14899 = vmatpush1.bf16.msra.mxu1 %v14838_v17  ;;  %v20942_v45 = vld [vmem:[#allocation30 + $0x1a0] ss:$8 sps:$4 sm:$0xff]   ;;  %v20950_v18 = vld [vmem:[#allocation30 + $0x194] ss:$8 sps:$4 sm:$0xff]  }
 0xe68   : > { %18236 = vmatprep.subr.msk.bf16.mxu0 %vm14830_vm9, %v14822_v30  ;;  %18238 = vmatprep.subr.msk.bf16.mxu1 %vm14830_vm9, %v14824_v9  ;;  %v20944_v30 = vld [vmem:[#allocation30 + $0x1a4] ss:$8 sps:$4 sm:$0xff]   ;;  %v20947_v9 = vld [vmem:[#allocation30 + $0x94] ss:$8 sps:$4 sm:$0xff]  }
 0xe6a   : > { %18233 = vmatmul.mubr.msk.bf16.vlgmr.msra.gmra.mxu0 %vm14826_vm10, %v14825_v32  ;;  %18235 = vmatmul.mubr.msk.bf16.vlgmr.msra.gmra.mxu1 %vm14826_vm10, %v14825_v32  ;;  %v20953_v32 = vld [vmem:[#allocation30 + $0x84] ss:$8 sps:$4 sm:$0xff]  }
 0xe6b   : > { %14944 = vmatpush1.bf16.msra.mxu0 %v14832_v57  ;;  %14985 = vmatpush1.bf16.msra.mxu1 %v14838_v17  ;;  %v20945_v57 = vld [vmem:[#allocation30 + $0x90] ss:$8 sps:$4 sm:$0xff]  }
 0xe6c   : > { %14961 = vmatprep.mubr.bf16.mxu0 %v23965_v53  ;;  %15002 = vmatprep.mubr.bf16.mxu1 %v23965_v53  ;;  %v20873_v53 = vld [vmem:[#allocation30 + $0x50] ss:$8 sps:$4 sm:$0xff]  }
 0xe6d   : > { %15403 = vmatprep.subr.bf16.mxu0 %v20863_v6  ;;  %15444 = vmatprep.subr.bf16.mxu1 %v20866_v2  ;;  %v20948_v17 = vld [vmem:[#allocation30 + $0x190] ss:$8 sps:$4 sm:$0xff]   ;;  %v20956_v6 = vld [vmem:[#allocation30 + $0x184] ss:$8 sps:$4 sm:$0xff]   ;;  %v20951_v2 = vld [vmem:[#allocation30 + $0x80] ss:$8 sps:$4 sm:$0xff]  }
 0xe72   : > { %18237 = vmatmul.mubr.msk.bf16.vlgmr.msra.gmra.mxu0 %vm14826_vm10, %v14925_v36  ;;  %18239 = vmatmul.mubr.msk.bf16.vlgmr.msra.gmra.mxu1 %vm14826_vm10, %v14925_v36  ;;  %v20954_v36 = vld [vmem:[#allocation30 + $0x180] ss:$8 sps:$4 sm:$0xff]  }
 0xe73   : > { %15404 = vmatpush1.bf16.msra.mxu0 %v20861_v39  ;;  %15445 = vmatpush1.bf16.msra.mxu1 %v20864_v59  ;;  %v20957_v39 = vld [vmem:[%s23966_s16 + $0xf8] sm:$0xff]  }
 0xe74   : > { %15405 = vmatprep.subr.bf16.mxu0 %v20869_v43  ;;  %15446 = vmatprep.subr.bf16.mxu1 %v20872_v55  ;;  %v20958_v59 = vld [vmem:[%s23966_s16 + $0x78] sm:$0xff]  }
 0xe77   : > { %15406 = vmatpush1.bf16.msra.mxu0 %v20867_v35  ;;  %15447 = vmatpush1.bf16.msra.mxu1 %v20870_v12 }
 0xe78   : > { %15407 = vmatprep.subr.bf16.mxu0 %v20875_v29  ;;  %15448 = vmatprep.subr.bf16.mxu1 %v20878_v54 }
 0xe7b   : > { %15408 = vmatpush1.bf16.msra.mxu0 %v20873_v53  ;;  %15449 = vmatpush1.bf16.msra.mxu1 %v20876_v16 }
 0xe7c   : > { %15409 = vmatprep.subr.bf16.mxu0 %v20881_v3  ;;  %15450 = vmatprep.subr.bf16.mxu1 %v20884_v15 }
 0xe7f   : > { %15410 = vmatpush1.bf16.msra.mxu0 %v20879_v47  ;;  %15451 = vmatpush1.bf16.msra.mxu1 %v20882_v60 }
 0xe80   : > { %15411 = vmatprep.subr.bf16.mxu0 %v20887_v62  ;;  %15452 = vmatprep.subr.bf16.mxu1 %v20890_v56 }
 0xe83   : > { %15412 = vmatpush1.bf16.msra.mxu0 %v20885_v23  ;;  %15453 = vmatpush1.bf16.msra.mxu1 %v20888_v44 }
 0xe84   : > { %15413 = vmatprep.subr.bf16.mxu0 %v20893_v8  ;;  %15454 = vmatprep.subr.bf16.mxu1 %v20896_v28 }
 0xe87   : > { %15414 = vmatpush1.bf16.msra.mxu0 %v20891_v27  ;;  %15455 = vmatpush1.bf16.msra.mxu1 %v20894_v51 }
 0xe88   : > { %15415 = vmatprep.subr.bf16.mxu0 %v20899_v48  ;;  %15456 = vmatprep.subr.bf16.mxu1 %v20902_v20  ;;  %v20959_v48 = vld [vmem:[%s23966_s16 + $0xb8] sm:$0xff]  }
 0xe89   : > { %v20960_v20 = vld [vmem:[%s23966_s16 + $0x38] sm:$0xff]  }
 0xe8b   : > { %15416 = vmatpush1.bf16.msra.mxu0 %v20897_v42  ;;  %15457 = vmatpush1.bf16.msra.mxu1 %v20900_v5 }
 0xe8c   : > { %15417 = vmatprep.subr.bf16.mxu0 %v20905_v58  ;;  %15458 = vmatprep.subr.bf16.mxu1 %v20908_v7 }
 0xe8f   : > { %15418 = vmatpush1.bf16.msra.mxu0 %v20903_v10  ;;  %15459 = vmatpush1.bf16.msra.mxu1 %v20906_v4  ;;  %v20961_v10 = vld [vmem:[%s23966_s16 + $0xf0] sm:$0xff]  }
 0xe90   : > { %15419 = vmatprep.subr.bf16.mxu0 %v20911_v11  ;;  %15460 = vmatprep.subr.bf16.mxu1 %v20914_v41  ;;  %v20962_v4 = vld [vmem:[%s23966_s16 + $0x70] sm:$0xff]  }
 0xe91   : > { %v20963_v11 = vld [vmem:[%s23966_s16 + $0xb0] sm:$0xff]  }
 0xe92   : > { %v20964_v41 = vld [vmem:[%s23966_s16 + $0x30] sm:$0xff]  }
 0xe93   : > { %15420 = vmatpush2.bf16.msra.mxu0 %v20909_v13  ;;  %15461 = vmatpush2.bf16.msra.mxu1 %v20912_v19  ;;  %v20965_v13 = vld [vmem:[%s23966_s16 + $0xe8] sm:$0xff]  }
 0xe94   : > { %15421 = vmatprep.subr.bf16.mxu0 %v20917_v37  ;;  %15462 = vmatprep.subr.bf16.mxu1 %v20920_v24  ;;  %v20966_v19 = vld [vmem:[%s23966_s16 + $0x68] sm:$0xff]  }
 0xe95   : > { %v20967_v37 = vld [vmem:[%s23966_s16 + $0xa8] sm:$0xff]  }
 0xe96   : > { %v20968_v24 = vld [vmem:[%s23966_s16 + $0x28] sm:$0xff]  }
 0xe97   : > { %15422 = vmatpush2.bf16.msra.mxu0 %v20915_v38  ;;  %15463 = vmatpush2.bf16.msra.mxu1 %v20918_v46  ;;  %v20969_v38 = vld [vmem:[%s23966_s16 + $0xe0] sm:$0xff]  }
 0xe98   : > { %15423 = vmatprep.subr.bf16.mxu0 %v20923_v0  ;;  %15464 = vmatprep.subr.bf16.mxu1 %v20926_v26  ;;  %v20970_v46 = vld [vmem:[%s23966_s16 + $0x60] sm:$0xff]  }
 0xe99   : > { %v20971_v0 = vld [vmem:[%s23966_s16 + $0xa0] sm:$0xff]  }
 0xe9a   : > { %v20972_v26 = vld [vmem:[%s23966_s16 + $0x20] sm:$0xff]  }
 0xe9b   : > { %15424 = vmatpush2.bf16.msra.mxu0 %v20921_v25  ;;  %15465 = vmatpush2.bf16.msra.mxu1 %v20924_v1  ;;  %v20973_v25 = vld [vmem:[%s23966_s16 + $0xd8] sm:$0xff]  }
 0xe9c   : > { %15425 = vmatprep.subr.bf16.mxu0 %v20929_v52  ;;  %15466 = vmatprep.subr.bf16.mxu1 %v20932_v61  ;;  %v20974_v1 = vld [vmem:[%s23966_s16 + $0x58] sm:$0xff]  }
 0xe9d   : > { %v20975_v52 = vld [vmem:[%s23966_s16 + $0x98] sm:$0xff]  }
 0xe9e   : > { %v20976_v61 = vld [vmem:[%s23966_s16 + $0x18] sm:$0xff]  }
 0xe9f   : > { %15426 = vmatpush2.bf16.msra.mxu0 %v20927_v50  ;;  %15467 = vmatpush2.bf16.msra.mxu1 %v20930_v34  ;;  %v20977_v50 = vld [vmem:[%s23966_s16 + $0xd0] sm:$0xff]  }
 0xea0   : > { %15427 = vmatprep.subr.bf16.mxu0 %v20935_v31  ;;  %15468 = vmatprep.subr.bf16.mxu1 %v20938_v22  ;;  %v20978_v34 = vld [vmem:[%s23966_s16 + $0x50] sm:$0xff]   ;;  %v20982_v22 = vld [vmem:[%s23966_s16 + $0x48] sm:$0xff]  }
 0xea1   : > { %v20980_v31 = vld [vmem:[%s23966_s16 + $0x10] sm:$0xff]  }
 0xea3   : > { %15428 = vmatpush2.bf16.msra.mxu0 %v20933_v21  ;;  %15469 = vmatpush2.bf16.msra.mxu1 %v20936_v14  ;;  %v20979_v21 = vld [vmem:[%s23966_s16 + $0x90] sm:$0xff]   ;;  %v20981_v14 = vld [vmem:[%s23966_s16 + $0xc8] sm:$0xff]  }
 0xea4   : > { %15429 = vmatprep.subr.bf16.mxu0 %v20941_v40  ;;  %15470 = vmatprep.subr.bf16.mxu1 %v20944_v30  ;;  %v20984_v40 = vld [vmem:[%s23966_s16 + $0x8] sm:$0xff]   ;;  %v20986_v30 = vld [vmem:[%s23966_s16 + $0x40] sm:$0xff]  }
 0xea7   : > { %15430 = vmatpush2.bf16.msra.mxu0 %v20939_v33  ;;  %15471 = vmatpush2.bf16.msra.mxu1 %v20942_v45  ;;  %v20983_v33 = vld [vmem:[%s23966_s16 + $0x88] sm:$0xff]   ;;  %v20985_v45 = vld [vmem:[%s23966_s16 + $0xc0] sm:$0xff]  }
 0xea8   : > { %15431 = vmatprep.subr.bf16.mxu0 %v20947_v9  ;;  %15472 = vmatprep.subr.bf16.mxu1 %v20950_v18  ;;  %v20987_v9 = vld [vmem:[%s23966_s16 + $0x80] sm:$0xff]  }
 0xea9   : > { %v20988_v18 = vld [vmem:[%s23966_s16] sm:$0xff]  }
 0xeab   : > { %15432 = vmatpush2.bf16.msra.mxu0 %v20945_v57  ;;  %15473 = vmatpush2.bf16.msra.mxu1 %v20948_v17  ;;  %v20989_v57 = vld [vmem:[%s23966_s16 + $0x178] sm:$0xff]  }
 0xeac   : > { %15433 = vmatprep.subr.bf16.mxu0 %v20953_v32  ;;  %15474 = vmatprep.subr.bf16.mxu1 %v20956_v6  ;;  %v20990_v17 = vld [vmem:[%s23966_s16 + $0x1f8] sm:$0xff]  }
 0xeaf   : > { %15434 = vmatpush2.bf16.msra.mxu0 %v20951_v2  ;;  %15475 = vmatpush2.bf16.msra.mxu1 %v20954_v36 }
 0xeb0   : > { %18472 = vmatprep.subr.bf16.mxu0 %v20957_v39  ;;  %18494 = vmatprep.subr.bf16.mxu1 %v20958_v59 }
 0xf2a   : > { %v14877_v43 = vpop.f32.mrf.mxu0  ;;  %v14918_v55 = vpop.f32.mrf.mxu1 }
 0xf2c   : > { %v14879_v35 = vpop.f32.mrf.mxu0  ;;  %v14920_v12 = vpop.f32.mrf.mxu1 }
 0xf2e   : > { %v14881_v29 = vpop.f32.mrf.mxu0  ;;  %v14922_v54 = vpop.f32.mrf.mxu1 }
 0xf30   : > { %v14882_v53 = vpop.f32.mrf.mxu0  ;;  %v14923_v16 = vpop.f32.mrf.mxu1 }
 0xf32   : > { %v14963_v3 = vpop.f32.mrf.mxu0  ;;  %v15004_v15 = vpop.f32.mrf.mxu1 }
 0xf33   : > { %v15011_v47 = vmax.f32 %v14877_v43, %v14963_v3  ;;  %v15013_v60 = vmax.f32 %v14918_v55, %v15004_v15 }
 0xf34   : > { %v14965_v62 = vpop.f32.mrf.mxu0  ;;  %v15006_v56 = vpop.f32.mrf.mxu1 }
 0xf35   : > { %v15012_v23 = vmax.f32 %v14879_v35, %v14965_v62  ;;  %v15014_v44 = vmax.f32 %v14920_v12, %v15006_v56  ;;  %v15015_v42 = vpack.c.bf16 %v15011_v47, %v15011_v47  ;;  %v15017_v5 = vpack.c.bf16 %v15013_v60, %v15013_v60 }
 0xf36   : > { %v14967_v8 = vpop.f32.mrf.mxu0  ;;  %v15008_v28 = vpop.f32.mrf.mxu1 }
 0xf37   : > { %v15016_v27 = vpack.c.bf16 %v15012_v23, %v15012_v23  ;;  %v15018_v51 = vpack.c.bf16 %v15014_v44, %v15014_v44 }
 0xf38   : > { %v14968_v58 = vpop.f32.mrf.mxu0  ;;  %v15009_v7 = vpop.f32.mrf.mxu1 }
 0xf39   : > { %15435 = vmatprep.mubr.bf16.mxu0 %v15016_v27  ;;  %15476 = vmatprep.mubr.bf16.mxu1 %v15018_v51  ;;  %v20991_v51 = vld [vmem:[%s23966_s16 + $0x138] sm:$0xff]   ;;  %v20995_v58 = vld [vmem:[%s23966_s16 + $0x130] sm:$0xff]  }
 0xf3a   : > { %15436 = vmatmul.mubr.bf16.vlgmr.msra.gmra.mxu0 %v15015_v42  ;;  %15477 = vmatmul.mubr.bf16.vlgmr.msra.gmra.mxu1 %v15017_v5  ;;  %v20996_v7 = vld [vmem:[%s23966_s16 + $0x1b0] sm:$0xff]  }
 0xf3b   : > { %18473 = vmatpush3.bf16.msra.mxu0 %v20959_v48  ;;  %18495 = vmatpush3.bf16.msra.mxu1 %v20960_v20  ;;  %v20992_v48 = vld [vmem:[%s23966_s16 + $0x1b8] sm:$0xff]   ;;  %v20993_v20 = vld [vmem:[%s23966_s16 + $0x170] sm:$0xff]  }
 0xf3c   : > { %18474 = vmatprep.subr.bf16.mxu0 %v20961_v10  ;;  %18496 = vmatprep.subr.bf16.mxu1 %v20962_v4  ;;  %v20997_v10 = vld [vmem:[%s23966_s16 + $0x168] sm:$0xff]  }
 0xf3d   : > { %v20998_v4 = vld [vmem:[%s23966_s16 + $0x1e8] sm:$0xff]  }
 0xf3f   : > { %18475 = vmatpush3.bf16.msra.mxu0 %v20963_v11  ;;  %18497 = vmatpush3.bf16.msra.mxu1 %v20964_v41  ;;  %v20999_v11 = vld [vmem:[%s23966_s16 + $0x128] sm:$0xff]  }
 0xf40   : > { %18476 = vmatprep.subr.bf16.mxu0 %v20965_v13  ;;  %18498 = vmatprep.subr.bf16.mxu1 %v20966_v19  ;;  %v21000_v41 = vld [vmem:[%s23966_s16 + $0x1a8] sm:$0xff]   ;;  %v21001_v13 = vld [vmem:[%s23966_s16 + $0x160] sm:$0xff]  }
 0xf41   : > { %v21002_v19 = vld [vmem:[%s23966_s16 + $0x1e0] sm:$0xff]  }
 0xf43   : > { %18477 = vmatpush3.bf16.msra.mxu0 %v20967_v37  ;;  %18499 = vmatpush3.bf16.msra.mxu1 %v20968_v24  ;;  %v21003_v37 = vld [vmem:[%s23966_s16 + $0x120] sm:$0xff]  }
 0xf44   : > { %18478 = vmatprep.subr.bf16.mxu0 %v20969_v38  ;;  %18500 = vmatprep.subr.bf16.mxu1 %v20970_v46  ;;  %v21004_v24 = vld [vmem:[%s23966_s16 + $0x1a0] sm:$0xff]   ;;  %v21005_v38 = vld [vmem:[%s23966_s16 + $0x158] sm:$0xff]  }
 0xf45   : > { %v21006_v46 = vld [vmem:[%s23966_s16 + $0x1d8] sm:$0xff]  }
 0xf47   : > { %18479 = vmatpush3.bf16.msra.mxu0 %v20971_v0  ;;  %18501 = vmatpush3.bf16.msra.mxu1 %v20972_v26  ;;  %v21007_v0 = vld [vmem:[%s23966_s16 + $0x118] sm:$0xff]  }
 0xf48   : > { %18480 = vmatprep.subr.bf16.mxu0 %v20973_v25  ;;  %18502 = vmatprep.subr.bf16.mxu1 %v20974_v1  ;;  %v21008_v26 = vld [vmem:[%s23966_s16 + $0x198] sm:$0xff]   ;;  %v21009_v25 = vld [vmem:[%s23966_s16 + $0x150] sm:$0xff]  }
 0xf49   : > { %v21010_v1 = vld [vmem:[%s23966_s16 + $0x1d0] sm:$0xff]  }
 0xf4b   : > { %18481 = vmatpush3.bf16.msra.mxu0 %v20975_v52  ;;  %18503 = vmatpush3.bf16.msra.mxu1 %v20976_v61  ;;  %v21011_v52 = vld [vmem:[%s23966_s16 + $0x110] sm:$0xff]  }
 0xf4c   : > { %18482 = vmatprep.subr.bf16.mxu0 %v20977_v50  ;;  %18504 = vmatprep.subr.bf16.mxu1 %v20978_v34  ;;  %v21012_v61 = vld [vmem:[%s23966_s16 + $0x190] sm:$0xff]   ;;  %v21013_v50 = vld [vmem:[%s23966_s16 + $0x148] sm:$0xff]  }
 0xf4d   : > { %v21014_v34 = vld [vmem:[%s23966_s16 + $0x1c8] sm:$0xff]  }
 0xf4f   : > { %18483 = vmatpush3.bf16.msra.mxu0 %v20979_v21  ;;  %18505 = vmatpush3.bf16.msra.mxu1 %v20980_v31  ;;  %v21015_v21 = vld [vmem:[%s23966_s16 + $0x108] sm:$0xff]  }
 0xf50   : > { %18484 = vmatprep.subr.bf16.mxu0 %v20981_v14  ;;  %18506 = vmatprep.subr.bf16.mxu1 %v20982_v22  ;;  %v21016_v31 = vld [vmem:[%s23966_s16 + $0x188] sm:$0xff]   ;;  %v21017_v14 = vld [vmem:[%s23966_s16 + $0x140] sm:$0xff]  }
 0xf51   : > { %v21018_v22 = vld [vmem:[%s23966_s16 + $0x1c0] sm:$0xff]  }
 0xf53   : > { %18485 = vmatpush3.bf16.msra.mxu0 %v20983_v33  ;;  %18507 = vmatpush3.bf16.msra.mxu1 %v20984_v40  ;;  %v21019_v33 = vld [vmem:[%s23966_s16 + $0x100] sm:$0xff]  }
 0xf54   : > { %18486 = vmatprep.subr.bf16.mxu0 %v20985_v45  ;;  %18508 = vmatprep.subr.bf16.mxu1 %v20986_v30  ;;  %v21020_v40 = vld [vmem:[%s23966_s16 + $0x180] sm:$0xff]  }
 0xf57   : > { %18487 = vmatpush3.bf16.msra.mxu0 %v20987_v9  ;;  %18509 = vmatpush3.bf16.msra.mxu1 %v20988_v18 }
 0xf58   : > { %18516 = vmatprep.subr.bf16.mxu0 %v20989_v57  ;;  %18538 = vmatprep.subr.bf16.mxu1 %v20990_v17  ;;  %v23967_v57 = vmov 0.0   ;;  %v21021_v17 = vld [vmem:[#allocation33 + $0x18] sm:$0xff]  }
 0xffa   : > { %v15437_v32 = vpop.f32.mrf.mxu0  ;;  %v15478_v6 = vpop.f32.mrf.mxu1 }
 0xffb   : > { %v15479_v39 = vadd.f32 %v15478_v6, %v15437_v32  ;;  %v21022_v32 = vld [vmem:[#allocation33 + $0x10] sm:$0xff]   ;;  %v21023_v6 = vld [vmem:[#allocation33 + $0x8] sm:$0xff]  }
 0xffc   : > { %v15439_v2 = vpop.f32.mrf.mxu0  ;;  %v15480_v36 = vpop.f32.mrf.mxu1 }
 0xffd   : > { %v15481_v59 = vadd.f32 %v15480_v36, %v15439_v2 }
 0xffe   : > { %v15441_v43 = vpop.f32.mrf.mxu0  ;;  %v15482_v55 = vpop.f32.mrf.mxu1 }
 0xfff   : > { %v15487_v35 = vcombine.low %v15479_v39, %v15481_v59 }
0x1000   : > { %v15442_v12 = vpop.f32.mrf.mxu0  ;;  %v15483_v29 = vpop.f32.mrf.mxu1 }
0x1001   : > { %15489 = vst [vmem:[#allocation5] sm:$0xff] %v15487_v35 }
0x1008   : > { %v15537_v54 = vld [vmem:[#allocation5 + $0x1] ss:$4 sm:$0x3]  ;;  %v15490_v53 = vld [vmem:[#allocation5] ss:$4 sm:$0x3] }
0x1009   : > { %v15542_v16 = vrot.slane %v15537_v54, %v22503_v49  ;;  %v15546_v3 = vrot.slane %v15537_v54, %v22509_v63  ;;  %v15495_v15 = vrot.slane %v15490_v53, %v22503_v49  ;;  %v15499_v47 = vrot.slane %v15490_v53, %v22509_v63  ;;  %v23624_v60 = vld [vmem:[#allocation5 + $0x2] ss:$4 sm:$0x3]  ;;  %v23626_v62 = vld [vmem:[#allocation5 + $0x3] ss:$4 sm:$0x3] }
0x100a   : > { %v15866_v56 = vrot.slane %v23624_v60, %v22509_v63  ;;  %v16051_v23 = vrot.slane %v23626_v62, %v22509_v63  ;;  %v20994_v63 = vld [vmem:[%s23966_s16 + $0x1f0] sm:$0xff]   ;;  %v15862_v45 = vrot.slane %v23624_v60, %v22503_v49  ;;  %v16047_v30 = vrot.slane %v23626_v62, %v22503_v49 }
0x100b   : > { %v15549_v44 = vpack.c.bf16 %v15542_v16, %v15542_v16  ;;  %v15550_v8 = vpack.c.bf16 %v15546_v3, %v15546_v3  ;;  %v15502_v28 = vpack.c.bf16 %v15495_v15, %v15495_v15  ;;  %v15503_v27 = vpack.c.bf16 %v15499_v47, %v15499_v47  ;;  %v21024_v49 = vld [vmem:[#allocation33] sm:$0xff]  }
0x100c   : > { %v15870_v42 = vpack.c.bf16 %v15866_v56, %v15866_v56  ;;  %v16055_v5 = vpack.c.bf16 %v16051_v23, %v16051_v23  ;;  %v15869_v9 = vpack.c.bf16 %v15862_v45, %v15862_v45  ;;  %v16054_v18 = vpack.c.bf16 %v16047_v30, %v16047_v30 }
0x100d   : > { %15712 = vmatprep.mubr.bf16.mxu0 %v15550_v8  ;;  %15848 = vmatprep.mubr.bf16.mxu1 %v15503_v27  ;;  %v16226_v8 = vld [vmem:[#allocation32] sm:$0x1] }
0x100e   : > { %15713 = vmatmul.mubr.bf16.vlgmr.msra.gmra.mxu0 %v15549_v44  ;;  %15849 = vmatmul.mubr.bf16.vlgmr.msra.gmra.mxu1 %v15502_v28 }
0x100f   : > { %18517 = vmatpush3.bf16.msra.mxu0 %v20991_v51  ;;  %18539 = vmatpush3.bf16.msra.mxu1 %v20992_v48 }
0x1010   : > { %16032 = vmatprep.mubr.bf16.mxu0 %v15870_v42  ;;  %16217 = vmatprep.mubr.bf16.mxu1 %v16055_v5 }
0x1011   : > { %18518 = vmatprep.subr.bf16.mxu0 %v20993_v20  ;;  %18540 = vmatprep.subr.bf16.mxu1 %v20994_v63  ;;  %v16237_v63 = vld [vmem:[#allocation35] sm:$0x1] }
0x1013   : > { %18519 = vmatpush3.bf16.msra.mxu0 %v20995_v58  ;;  %18541 = vmatpush3.bf16.msra.mxu1 %v20996_v7 }
0x1014   : > { %18520 = vmatprep.subr.bf16.mxu0 %v20997_v10  ;;  %18542 = vmatprep.subr.bf16.mxu1 %v20998_v4 }
0x1017   : > { %18521 = vmatpush3.bf16.msra.mxu0 %v20999_v11  ;;  %18543 = vmatpush3.bf16.msra.mxu1 %v21000_v41 }
0x1018   : > { %18522 = vmatprep.subr.bf16.mxu0 %v21001_v13  ;;  %18544 = vmatprep.subr.bf16.mxu1 %v21002_v19 }
0x101b   : > { %18523 = vmatpush3.bf16.msra.mxu0 %v21003_v37  ;;  %18545 = vmatpush3.bf16.msra.mxu1 %v21004_v24 }
0x101c   : > { %18524 = vmatprep.subr.bf16.mxu0 %v21005_v38  ;;  %18546 = vmatprep.subr.bf16.mxu1 %v21006_v46 }
0x101f   : > { %18525 = vmatpush3.bf16.msra.mxu0 %v21007_v0  ;;  %18547 = vmatpush3.bf16.msra.mxu1 %v21008_v26 }
0x1020   : > { %18526 = vmatprep.subr.bf16.mxu0 %v21009_v25  ;;  %18548 = vmatprep.subr.bf16.mxu1 %v21010_v1 }
0x1023   : > { %18527 = vmatpush3.bf16.msra.mxu0 %v21011_v52  ;;  %18549 = vmatpush3.bf16.msra.mxu1 %v21012_v61 }
0x1024   : > { %18528 = vmatprep.subr.bf16.mxu0 %v21013_v50  ;;  %18550 = vmatprep.subr.bf16.mxu1 %v21014_v34 }
0x1027   : > { %18529 = vmatpush3.bf16.msra.mxu0 %v21015_v21  ;;  %18551 = vmatpush3.bf16.msra.mxu1 %v21016_v31 }
0x1028   : > { %18530 = vmatprep.subr.bf16.mxu0 %v21017_v14  ;;  %18552 = vmatprep.subr.bf16.mxu1 %v21018_v22 }
0x102b   : > { %18531 = vmatpush3.bf16.msra.mxu0 %v21019_v33  ;;  %18553 = vmatpush3.bf16.msra.mxu1 %v21020_v40 }
0x102c   : > { %18565 = vmatprep.subr.bf16.mxu0 %v23967_v57 }
0x102e   : > { %16033 = vmatmul.mubr.bf16.vlgmr.msra.gmra.mxu0 %v15869_v9  ;;  %16218 = vmatmul.mubr.bf16.vlgmr.msra.gmra.mxu1 %v16054_v18 }
0x102f   : > { %18566 = vmatpush3.bf16.msra.mxu0 %v21021_v17  ;;  %18573 = vmatprep.mubr.msk.bf16.mxu0 %vm21655_vm11, %v23967_v57 }
0x1030   : > { %18567 = vmatprep.subr.bf16.mxu0 %v23967_v57 }
0x1033   : > { %18568 = vmatpush3.bf16.msra.mxu0 %v21022_v32 }
0x1034   : > { %18569 = vmatprep.subr.bf16.mxu0 %v23967_v57 }
0x1037   : > { %18570 = vmatpush3.bf16.msra.mxu0 %v21023_v6 }
0x1038   : > { %18571 = vmatprep.subr.bf16.mxu0 %v23967_v57 }
0x103b   : > { %18572 = vmatpush3.bf16.msra.mxu0 %v21024_v49 }
0x10ce   : > { %v18488_v2 = vpop.f32.mrf.mxu0  ;;  %v18510_v36 = vpop.f32.mrf.mxu1 }
0x10d0   : > { %v18489_v39 = vpop.f32.mrf.mxu0  ;;  %v18511_v59 = vpop.f32.mrf.mxu1 }
0x10d1   : > { %v18490_v29 = vadd.f32 %v18489_v39, %v18488_v2  ;;  %v18512_v54 = vadd.f32 %v18511_v59, %v18510_v36 }
0x10d2   : > { %v18491_v43 = vpop.f32.mrf.mxu0  ;;  %v18513_v55 = vpop.f32.mrf.mxu1 }
0x10d3   : > { %v15851_v47 = vadd.f32 %v18512_v54, %v18490_v29 }
0x10d4   : > { %v18492_v35 = vpop.f32.mrf.mxu0  ;;  %v18514_v12 = vpop.f32.mrf.mxu1 }
0x10ee   : > { %v18532_v53 = vpop.f32.mrf.mxu0  ;;  %v18554_v16 = vpop.f32.mrf.mxu1 }
0x10f0   : > { %v18533_v3 = vpop.f32.mrf.mxu0  ;;  %v18555_v15 = vpop.f32.mrf.mxu1 }
0x10f1   : > { %v18534_v60 = vadd.f32 %v18533_v3, %v18532_v53  ;;  %v18556_v44 = vadd.f32 %v18555_v15, %v18554_v16 }
0x10f2   : > { %v18535_v62 = vpop.f32.mrf.mxu0  ;;  %v18557_v56 = vpop.f32.mrf.mxu1 }
0x10f3   : > { %v16040_v23 = vadd.f32 %v18534_v60, %v15851_v47 }
0x10f4   : > { %v18536_v28 = vpop.f32.mrf.mxu0  ;;  %v18558_v27 = vpop.f32.mrf.mxu1 }
0x10f5   : > { %v16225_v51 = vadd.f32 %v18556_v44, %v16040_v23 }
0x10f7   : > { %v16227_v48 = vadd.f32 %v16226_v8, %v16225_v51 }
0x10f9   : > { %v16228_v20 = vpack.c.bf16 %v16227_v48, %v16227_v48 }
0x10fb   : > { %18574 = vmatmul.mubr.msk.bf16.vlgmr.msra.gmra.mxu0 %vm16262_vm12, %v16228_v20 }
0x11bb   : > { %v16300_v42 = vpop.f32.mrf.mxu0 }
0x11bc   : > { %v16301_v5 = vadd.f32 %v16300_v42, %v16237_v63 }
0x11bd   : > { %v18575_v58 = vpop.f32.mrf.mxu0 }
0x11be   : > { %16306 = vst [vmem:[%s893_s7] sm:$0x1] %v16301_v5 }
0x11bf   : > { %v16303_v7 = vpop.f32.mrf.mxu0 }
0x11c0   : > { %21534 = shalt.err (!%p21531_p8)
}
0x11c1   : > { %s21535_s21 = scalar_lea.hbm %s23736_s26, 16  ;;  %s21539_s8 = scalar_lea.hbm %s23968_s25, 32 }
0x11c2   : > { %p21536_p7 = scmp.ne.s32.totalorder %s23736_s26, %s21535_s21  ;;  %p21540_p0 = scmp.lt.s32.totalorder %s23736_s26, %s23968_s25 }
0x11c3   : > { %p21541_p2 = scmp.lt.s32.totalorder %s21539_s8, %s21535_s21 }
0x11c4   : > { %p21537_p13 = pnand %p21536_p7, %p23969_p11 }
0x11c5   : > { %p21542_p9 = por %p21541_p2, %p21540_p0 }
0x11c6   : > { %p21538_p4 = pneg %p21537_p13 }
0x11c8   : > { %p21543_p10 = pnand %p21542_p9, %p21538_p4 }
0x11ca   : > { %21546 = shalt.err (!%p21543_p10)
}
0x11cb   : > { %18658 = dma.vmem_to_hbm [thread:$0]  (%p23969_p11), %s23738_s20, 16, %s23736_s26, %s16308_s11   ;;  %v18576_v10 = vpop.f32.mrf.mxu0 }
0x11cc PF: > { %s16332_s3 = sand.u32 1, %s21609_s1   ;;  %p23970_p12 = scmp.ne.s32.totalorder %s23870_s9, 0 }
0x11cd   : > { %p23971_p6 = scmp.ge.s32.totalorder %s21621_s24, 2  ;;  %s16333_s10 = scalar_lea.sflag [#allocation8], %s16332_s3 }
0x11cf   : > { %p18720_p1 = pnand %p23971_p6, %p23970_p12 }
0x11d1   : > { %p18721_p3 = pneg %p18720_p1 }
0x11d3   : > { %21604 = dma.done.wait (%p18721_p3), %s16333_s10, 16  }
0x11d4   : > { %21606 = vsyncadd (%p18721_p3), %s16333_s10, 4294967280  ;;  %p42_p5 = scmp.ge.s32.totalorder %s21975_s4, 4   ;;  %s23972_s1 = smov %s21613_s22 }
0x11d5   : > { %s23973_s22 = smov %s21617_s23  ;;  %s23974_s23 = smov %s21986_s29 }
0x11d6   : > { %s23975_s24 = smov %s21975_s4  ;;  %44 = sbr.rel (!%p42_p5) target bundleno = 30 (0x1e), region = 237 }
0x11db   :  { %16337 = vsyncpa [#allocation7], 1 }
0x11dc   :  { %16339 = vsyncpa [#allocation7 + $0x1], 1 }
0x11dd   :  { %16340 = vsyncpa [#allocation10], 1 }
0x11de   :  { %16341 = vsyncpa [#allocation13], 1 }
0x11df   :  { %16342 = vsyncpa [#allocation16], 1 }
0x11e0   :  { %16343 = vsyncpa [#allocation19], 1 }
0x11e1   :  { %16344 = vsyncpa [#allocation22], 1 }
0x11e2   :  { %16345 = vsyncpa [#allocation25], 1 }
0x11e3   :  { %16346 = vsyncpa [#allocation28], 1 }
0x11e4   :  { %16347 = vsyncpa [#allocation31], 1 }
0x11e5   :  { %16348 = vsyncpa [#allocation34], 1 }
0x11e6   :  { %16349 = vsyncpa [#allocation8], 1 }
0x11e7   :  { %16351 = vsyncpa [#allocation8 + $0x1], 1 }

</bundles_post_ra>
